<compile_context>
chip_gen: v7x
topology: tpu7x:2x2x1
jax: 0.10.0
libtpu: 0.0.40
codegen_flags: <defaults>
</compile_context>

<pallas_src>
import math
import functools

import jax
import jax.numpy as jnp
from jax.experimental import pallas as pl
from jax.experimental.pallas import tpu as pltpu

_VMEM_LIMIT = 64 * 1024 * 1024  # explicit scoped-VMEM budget (fits v5e/v6e/v7x)


# ----------------------------- tiling helpers ------------------------------

def _pick_tile(dim, target, align):
    """Largest divisor of `dim` that is a multiple of `align` and <= target.

    Falls back to the full dim (block == full array extent is always legal).
    """
    if dim <= target:
        return dim
    t = (target // align) * align
    while t >= align:
        if dim % t == 0:
            return t
        t -= align
    return dim


def _row_align(dtype):
    return 16 if dtype == jnp.bfloat16 else 8


# ------------------------------ linear kernels ------------------------------

def _linear_kernel(x_ref, w_ref, b_ref, o_ref, acc_ref, *, relu):
    k = pl.program_id(2)

    @pl.when(k == 0)
    def _():
        acc_ref[...] = jnp.zeros(acc_ref.shape, jnp.float32)

    acc_ref[...] += jnp.dot(x_ref[...], w_ref[...],
                            preferred_element_type=jnp.float32)

    @pl.when(k == pl.num_programs(2) - 1)
    def _():
        y = acc_ref[...] + b_ref[...].astype(jnp.float32)
        if relu:
            y = jnp.maximum(y, 0.0)
        o_ref[...] = y.astype(o_ref.dtype)


def linear(x2d, w, b, *, relu=False, weight_resident=False, out_dtype=None,
           tile_n=256, tile_m=512, tile_k=512):
    """x2d: [N, K] @ w: [K, M] + b: [M] -> [N, M] (optional fused ReLU).

    Rows (N) and output columns (M) are tiled lane-dense; K is tiled with an
    f32 VMEM accumulator.  weight_resident=True swaps the grid ordering so the
    full [K, tm] weight strip stays resident while row tiles are re-streamed
    (used for the vocab projection where the weight dominates HBM traffic).
    """
    N, K = x2d.shape
    K2, M = w.shape
    assert K == K2
    out_dtype = x2d.dtype if out_dtype is None else out_dtype

    tn = _pick_tile(N, tile_n, _row_align(x2d.dtype))
    tm = _pick_tile(M, tile_m, 128)
    tk = K if weight_resident else _pick_tile(K, tile_k, 128)
    gN, gM, gK = N // tn, M // tm, K // tk

    cost = pl.CostEstimate(
        flops=2 * N * M * K,
        transcendentals=0,
        bytes_accessed=int(x2d.size * x2d.dtype.itemsize
                           + w.size * w.dtype.itemsize
                           + b.size * b.dtype.itemsize
                           + N * M * jnp.dtype(out_dtype).itemsize))

    if weight_resident:
        # outer axis = output-column tile, inner = row tile -> weight strip read once
        grid = (gM, gN, gK)
        x_map = lambda j, i, k: (i, k)
        w_map = lambda j, i, k: (k, j)
        b_map = lambda j, i, k: (0, j)
        o_map = lambda j, i, k: (i, j)
    else:
        grid = (gN, gM, gK)
        x_map = lambda i, j, k: (i, k)
        w_map = lambda i, j, k: (k, j)
        b_map = lambda i, j, k: (0, j)
        o_map = lambda i, j, k: (i, j)

    return pl.pallas_call(
        functools.partial(_linear_kernel, relu=relu),
        out_shape=jax.ShapeDtypeStruct((N, M), out_dtype),
        grid=grid,
        in_specs=[
            pl.BlockSpec((tn, tk), x_map),
            pl.BlockSpec((tk, tm), w_map),
            pl.BlockSpec((1, tm), b_map),
        ],
        out_specs=pl.BlockSpec((tn, tm), o_map),
        scratch_shapes=[pltpu.VMEM((tn, tm), jnp.float32)],
        compiler_params=pltpu.CompilerParams(
            dimension_semantics=("parallel", "parallel", "arbitrary"),
            vmem_limit_bytes=_VMEM_LIMIT),
        cost_estimate=cost,
    )(x2d, w, b.reshape(1, M))


def _linear_res_ln_kernel(x_ref, w_ref, b_ref, r_ref, g_ref, bb_ref, o_ref, acc_ref):
    # y = LayerNorm(residual + (x @ w + b)) * gamma + beta   (all f32 math)
    k = pl.program_id(1)

    @pl.when(k == 0)
    def _():
        acc_ref[...] = jnp.zeros(acc_ref.shape, jnp.float32)

    acc_ref[...] += jnp.dot(x_ref[...], w_ref[...],
                            preferred_element_type=jnp.float32)

    @pl.when(k == pl.num_programs(1) - 1)
    def _():
        y = acc_ref[...] + b_ref[...].astype(jnp.float32) + r_ref[...].astype(jnp.float32)
        # single-pass statistics: mu = E[y], var = E[y^2] - mu^2
        mu = jnp.mean(y, axis=-1, keepdims=True)
        var = jnp.mean(y * y, axis=-1, keepdims=True) - mu * mu
        yn = (y - mu) * jax.lax.rsqrt(var + 1e-5)
        o_ref[...] = (yn * g_ref[...].astype(jnp.float32)
                      + bb_ref[...].astype(jnp.float32)).astype(o_ref.dtype)


def linear_residual_layernorm(x2d, w, b, residual2d, gamma, beta,
                              tile_n=256, tile_k=512):
    """Fused: LayerNorm(residual + x @ w + b).  Rows and K tiled, full feature dim."""
    N, K = x2d.shape
    K2, M = w.shape
    assert K == K2 and residual2d.shape == (N, M)
    tn = _pick_tile(N, tile_n, _row_align(x2d.dtype))
    tk = _pick_tile(K, tile_k, 128)
    grid = (N // tn, K // tk)

    cost = pl.CostEstimate(
        flops=2 * N * M * K + 10 * N * M,
        transcendentals=N,
        bytes_accessed=int(x2d.size * x2d.dtype.itemsize
                           + w.size * w.dtype.itemsize
                           + 2 * N * M * residual2d.dtype.itemsize))

    return pl.pallas_call(
        _linear_res_ln_kernel,
        out_shape=jax.ShapeDtypeStruct((N, M), x2d.dtype),
        grid=grid,
        in_specs=[
            pl.BlockSpec((tn, tk), lambda i, k: (i, k)),
            pl.BlockSpec((tk, M), lambda i, k: (k, 0)),
            pl.BlockSpec((1, M), lambda i, k: (0, 0)),
            pl.BlockSpec((tn, M), lambda i, k: (i, 0)),
            pl.BlockSpec((1, M), lambda i, k: (0, 0)),
            pl.BlockSpec((1, M), lambda i, k: (0, 0)),
        ],
        out_specs=pl.BlockSpec((tn, M), lambda i, k: (i, 0)),
        scratch_shapes=[pltpu.VMEM((tn, M), jnp.float32)],
        compiler_params=pltpu.CompilerParams(
            dimension_semantics=("parallel", "arbitrary"),
            vmem_limit_bytes=_VMEM_LIMIT),
        cost_estimate=cost,
    )(x2d, w, b.reshape(1, M), residual2d, gamma.reshape(1, M), beta.reshape(1, M))


# --------------------------- flash attention kernel -------------------------

def _mha_flash_kernel(q_ref, k_ref, v_ref, km_ref, o_ref, *rest,
                      scale, causal, return_attn):
    if return_attn:
        attn_ref, m_sc, l_sc, acc_sc = rest
    else:
        m_sc, l_sc, acc_sc = rest

    ki = pl.program_id(3)

    @pl.when(ki == 0)
    def _():
        m_sc[...] = jnp.full(m_sc.shape, -jnp.inf, jnp.float32)
        l_sc[...] = jnp.zeros(l_sc.shape, jnp.float32)
        acc_sc[...] = jnp.zeros(acc_sc.shape, jnp.float32)

    q = q_ref[0].astype(jnp.float32)    # [tq, Dh]  (one head, lane-aligned strip)
    k = k_ref[0].astype(jnp.float32)    # [tk, Dh]
    v = v_ref[0].astype(jnp.float32)    # [tk, Dh]
    tq, tk = q.shape[0], k.shape[0]

    # QK^T without materializing a transposed K (contract last dims).
    s = jax.lax.dot_general(q, k, (((1,), (1,)), ((), ())),
                            preferred_element_type=jnp.float32) * scale   # [tq, tk]

    # key padding mask [1, tk]; causal part built in-kernel from global indices.
    keep = km_ref[0] > 0
    if causal:
        row = pl.program_id(2) * tq + jax.lax.broadcasted_iota(jnp.int32, (tq, tk), 0)
        col = ki * tk + jax.lax.broadcasted_iota(jnp.int32, (tq, tk), 1)
        keep = keep & (row >= col)
    s = jnp.where(keep, s, -1e10)      # matches masked_fill(mask == 0, -1e10)

    # online softmax update
    m_prev = m_sc[...]
    m_new = jnp.maximum(m_prev, jnp.max(s, axis=-1, keepdims=True))
    alpha = jnp.exp(m_prev - m_new)
    p = jnp.exp(s - m_new)
    l_sc[...] = alpha * l_sc[...] + jnp.sum(p, axis=-1, keepdims=True)
    acc_sc[...] = alpha * acc_sc[...] + jnp.dot(p, v, preferred_element_type=jnp.float32)
    m_sc[...] = m_new

    @pl.when(ki == pl.num_programs(3) - 1)
    def _():
        o_ref[0] = (acc_sc[...] * pl.reciprocal(l_sc[...], approx=True)).astype(o_ref.dtype)
        if return_attn:
            # exact softmax normalization for the weights handed back to the caller
            attn_ref[0, 0] = (p / l_sc[...]).astype(attn_ref.dtype)


def masked_attention(q_arr, q_region, k_arr, k_region, v_arr, v_region, key_mask, *,
                     hid, n_heads, causal, return_attn):
    """q_arr/k_arr/v_arr may be the same fused activation; *_region selects the
    hid-wide Q/K/V column region.  key_mask: [B, 1, Tk] int32 (1 = keep)."""
    B, Tq = q_arr.shape[0], q_arr.shape[1]
    Tk = k_arr.shape[1]
    H = n_heads
    Dh = hid // H
    assert Dh * H == hid
    # TODO(synk): head_dim < 128 would need a packed-heads (multi-head-per-block)
    # fallback; this kernel keeps each head's strip as a lane-aligned BlockSpec window.
    assert Dh % 128 == 0, "Pallas attention kernel requires head_dim % 128 == 0"
    scale = 1.0 / math.sqrt(Dh)

    tq = _pick_tile(Tq, 256, _row_align(q_arr.dtype))
    tk = Tk if return_attn else _pick_tile(Tk, 512, 128)
    grid = (B, H, Tq // tq, Tk // tk)
    qb, kb, vb = q_region * H, k_region * H, v_region * H

    in_specs = [
        pl.BlockSpec((1, tq, Dh), lambda b, h, qi, ki: (b, qi, qb + h)),
        pl.BlockSpec((1, tk, Dh), lambda b, h, qi, ki: (b, ki, kb + h)),
        pl.BlockSpec((1, tk, Dh), lambda b, h, qi, ki: (b, ki, vb + h)),
        pl.BlockSpec((1, 1, tk), lambda b, h, qi, ki: (b, 0, ki)),
    ]
    o_spec = pl.BlockSpec((1, tq, Dh), lambda b, h, qi, ki: (b, qi, h))
    scratch = [pltpu.VMEM((tq, 1), jnp.float32),
               pltpu.VMEM((tq, 1), jnp.float32),
               pltpu.VMEM((tq, Dh), jnp.float32)]

    if return_attn:
        out_shape = (jax.ShapeDtypeStruct((B, Tq, hid), q_arr.dtype),
                     jax.ShapeDtypeStruct((B, H, Tq, Tk), jnp.float32))
        out_specs = (o_spec,
                     pl.BlockSpec((1, 1, tq, Tk), lambda b, h, qi, ki: (b, h, qi, 0)))
    else:
        out_shape = jax.ShapeDtypeStruct((B, Tq, hid), q_arr.dtype)
        out_specs = o_spec

    kernel = functools.partial(_mha_flash_kernel, scale=scale, causal=causal,
                               return_attn=return_attn)
    res = pl.pallas_call(
        kernel,
        out_shape=out_shape,
        grid=grid,
        in_specs=in_specs,
        out_specs=out_specs,
        scratch_shapes=scratch,
        compiler_params=pltpu.CompilerParams(
            dimension_semantics=("parallel", "parallel", "parallel", "arbitrary"),
            vmem_limit_bytes=_VMEM_LIMIT),
    )(q_arr, k_arr, v_arr, key_mask)
    if return_attn:
        return res[0], res[1]
    return res, None


# --------------------------- Transformer (glue) -----------------------------

def multi_head_self_attention(p, x, key_mask, *, n_heads, causal, return_attn=False):
    B, T, hid = x.shape
    # fused QKV projection (weights pre-concatenated at init); activation stays
    # [B, T, 3*hid] and the Q/K/V regions are picked via BlockSpec column windows.
    qkv = linear(x.reshape(B * T, hid), p['wqkv'], p['bqkv']).reshape(B, T, 3 * hid)
    return masked_attention(qkv, 0, qkv, 1, qkv, 2, key_mask, hid=hid,
                            n_heads=n_heads, causal=causal, return_attn=return_attn)


def multi_head_cross_attention(p, query, kv, key_mask, *, n_heads, return_attn=False):
    B, Tq, hid = query.shape
    Tk = kv.shape[1]
    q = linear(query.reshape(B * Tq, hid), p['wq'], p['bq']).reshape(B, Tq, hid)
    kvp = linear(kv.reshape(B * Tk, hid), p['wkv'], p['bkv']).reshape(B, Tk, 2 * hid)
    return masked_attention(q, 0, kvp, 0, kvp, 1, key_mask, hid=hid,
                            n_heads=n_heads, causal=False, return_attn=return_attn)


def encoder_layer(p, src, src_key_mask, n_heads):
    B, T, hid = src.shape
    attn_out, _ = multi_head_self_attention(p['self_attn'], src, src_key_mask,
                                            n_heads=n_heads, causal=False)
    src2d = linear_residual_layernorm(attn_out.reshape(B * T, hid),
                                      p['self_attn']['wo'], p['self_attn']['bo'],
                                      src.reshape(B * T, hid),
                                      p['ln1_g'], p['ln1_b'])
    h = linear(src2d, p['ff_w1'], p['ff_b1'], relu=True)
    src2d = linear_residual_layernorm(h, p['ff_w2'], p['ff_b2'],
                                      src2d, p['ln2_g'], p['ln2_b'])
    return src2d.reshape(B, T, hid)


def decoder_layer(p, trg, enc_src, trg_key_mask, src_key_mask, n_heads, need_attn):
    B, T, hid = trg.shape
    attn_out, _ = multi_head_self_attention(p['self_attn'], trg, trg_key_mask,
                                            n_heads=n_heads, causal=True)
    trg2d = linear_residual_layernorm(attn_out.reshape(B * T, hid),
                                      p['self_attn']['wo'], p['self_attn']['bo'],
                                      trg.reshape(B * T, hid),
                                      p['ln1_g'], p['ln1_b'])
    trg3d = trg2d.reshape(B, T, hid)

    cross_out, attention = multi_head_cross_attention(
        p['enc_attn'], trg3d, enc_src, src_key_mask,
        n_heads=n_heads, return_attn=need_attn)
    trg2d = linear_residual_layernorm(cross_out.reshape(B * T, hid),
                                      p['enc_attn']['wo'], p['enc_attn']['bo'],
                                      trg2d, p['ln2_g'], p['ln2_b'])

    h = linear(trg2d, p['ff_w1'], p['ff_b1'], relu=True)
    trg2d = linear_residual_layernorm(h, p['ff_w2'], p['ff_b2'],
                                      trg2d, p['ln3_g'], p['ln3_b'])
    return trg2d.reshape(B, T, hid), attention


def _embed(tok_emb, pos_emb, ids):
    # TODO(synk): data-dependent embedding gather stays in XLA (needs manual DMA in Pallas).
    hid = tok_emb.shape[1]
    T = ids.shape[1]
    x = tok_emb[ids].astype(jnp.float32) * jnp.float32(math.sqrt(hid))
    x = x + pos_emb[:T].astype(jnp.float32)[None]
    return x.astype(tok_emb.dtype)


def encoder_forward(p, src, src_key_mask, n_heads):
    x = _embed(p['tok_emb'], p['pos_emb'], src)
    for lp in p['layers']:
        x = encoder_layer(lp, x, src_key_mask, n_heads)
    return x


def decoder_forward(p, trg, enc_src, trg_key_mask, src_key_mask, n_heads):
    B, T = trg.shape
    hid = p['tok_emb'].shape[1]
    x = _embed(p['tok_emb'], p['pos_emb'], trg)
    n_layers = len(p['layers'])
    attention = None
    for li, lp in enumerate(p['layers']):
        need_attn = (li == n_layers - 1)   # only the returned attention is materialized
        x, attn_i = decoder_layer(lp, x, enc_src, trg_key_mask, src_key_mask,
                                  n_heads, need_attn)
        if need_attn:
            attention = attn_i
    # vocab projection: weight-resident grid ordering (big weight read once)
    out = linear(x.reshape(B * T, hid), p['fc_out_w'], p['fc_out_b'],
                 weight_resident=True, out_dtype=jnp.float32)
    return out.reshape(B, T, -1), attention


def seq2seq_forward(params, src, trg, *, src_pad_idx, trg_pad_idx, n_heads):
    # make_src_mask: (src != pad) over keys -> [B, 1, S]
    src_key_mask = (src != src_pad_idx).astype(jnp.int32)[:, None, :]
    # make_trg_mask: key padding mask; the lower-triangular causal part is built
    # inside the attention kernel with broadcasted_iota (causal=True).
    trg_key_mask = (trg != trg_pad_idx).astype(jnp.int32)[:, None, :]
    enc_src = encoder_forward(params['encoder'], src, src_key_mask, n_heads)
    output, attention = decoder_forward(params['decoder'], trg, enc_src,
                                        trg_key_mask, src_key_mask, n_heads)
    return output, attention


# ------------------------- deterministic parameters -------------------------

def init_params(key, input_dim, output_dim, hid_dim, n_layers, pf_dim, max_len,
                dtype=jnp.bfloat16):
    keys = iter(jax.random.split(key, 512))

    def dense(in_d, out_d):
        w = (jax.random.normal(next(keys), (in_d, out_d), jnp.float32) * 0.02).astype(dtype)
        return w, jnp.zeros((out_d,), dtype)

    def mha():
        wq, bq = dense(hid_dim, hid_dim)
        wk, bk = dense(hid_dim, hid_dim)
        wv, bv = dense(hid_dim, hid_dim)
        wo, bo = dense(hid_dim, hid_dim)
        # fused projection weights built ONCE at init (not per forward call)
        return dict(
            wqkv=jnp.concatenate([wq, wk, wv], axis=1),
            bqkv=jnp.concatenate([bq, bk, bv], axis=0),
            wq=wq, bq=bq,
            wkv=jnp.concatenate([wk, wv], axis=1),
            bkv=jnp.concatenate([bk, bv], axis=0),
            wo=wo, bo=bo)

    ones = lambda: jnp.ones((hid_dim,), dtype)
    zeros = lambda: jnp.zeros((hid_dim,), dtype)

    def enc_layer():
        w1, b1 = dense(hid_dim, pf_dim)
        w2, b2 = dense(pf_dim, hid_dim)
        return dict(self_attn=mha(),
                    ln1_g=ones(), ln1_b=zeros(), ln2_g=ones(), ln2_b=zeros(),
                    ff_w1=w1, ff_b1=b1, ff_w2=w2, ff_b2=b2)

    def dec_layer():
        w1, b1 = dense(hid_dim, pf_dim)
        w2, b2 = dense(pf_dim, hid_dim)
        return dict(self_attn=mha(), enc_attn=mha(),
                    ln1_g=ones(), ln1_b=zeros(), ln2_g=ones(), ln2_b=zeros(),
                    ln3_g=ones(), ln3_b=zeros(),
                    ff_w1=w1, ff_b1=b1, ff_w2=w2, ff_b2=b2)

    enc = dict(
        tok_emb=(jax.random.normal(next(keys), (input_dim, hid_dim), jnp.float32) * 0.02).astype(dtype),
        pos_emb=(jax.random.normal(next(keys), (max_len, hid_dim), jnp.float32) * 0.02).astype(dtype),
        layers=[enc_layer() for _ in range(n_layers)],
    )
    fc_w, fc_b = dense(hid_dim, output_dim)
    dec = dict(
        tok_emb=(jax.random.normal(next(keys), (output_dim, hid_dim), jnp.float32) * 0.02).astype(dtype),
        pos_emb=(jax.random.normal(next(keys), (max_len, hid_dim), jnp.float32) * 0.02).astype(dtype),
        layers=[dec_layer() for _ in range(n_layers)],
        fc_out_w=fc_w, fc_out_b=fc_b,
    )
    return dict(encoder=enc, decoder=dec)


# ----------------------------------- main -----------------------------------

if __name__ == "__main__":
    key = jax.random.PRNGKey(0)
    B, S_SRC, S_TRG = 2, 8, 8
    INPUT_DIM, OUTPUT_DIM = 100, 256
    # head_dim = 128 -> lane-aligned per-head BlockSpec windows, full MXU width
    HID, N_LAYERS, N_HEADS, PF_DIM = 256, 2, 2, 512
    SRC_PAD_IDX, TRG_PAD_IDX = 0, 0

    pkey, skey, tkey = jax.random.split(key, 3)
    params = init_params(pkey, INPUT_DIM, OUTPUT_DIM, HID, N_LAYERS, PF_DIM,
                         max_len=64, dtype=jnp.bfloat16)

    src = jax.random.randint(skey, (B, S_SRC), 1, INPUT_DIM, dtype=jnp.int32)
    trg = jax.random.randint(tkey, (B, S_TRG), 1, OUTPUT_DIM, dtype=jnp.int32)
    # add some padding positions so the masks are exercised
    src = src.at[:, -2:].set(SRC_PAD_IDX)
    trg = trg.at[:, -1:].set(TRG_PAD_IDX)

    fwd = jax.jit(functools.partial(seq2seq_forward,
                                    src_pad_idx=SRC_PAD_IDX,
                                    trg_pad_idx=TRG_PAD_IDX,
                                    n_heads=N_HEADS))
    output, attention = fwd(params, src, trg)
    jax.block_until_ready((output, attention))

    assert output.shape == (B, S_TRG, OUTPUT_DIM)
    assert attention.shape == (B, N_HEADS, S_TRG, S_SRC)
    assert bool(jnp.all(jnp.isfinite(output)))
    assert bool(jnp.all(jnp.isfinite(attention)))
    print("KERNEL_OK")
</pallas_src>

<mosaic_0001>
module attributes {stable_mosaic.version = 11 : i64} {
  func.func @_linear_kernel(%arg0: i32, %arg1: i32, %arg2: i32, %arg3: memref<16x256xbf16, #tpu.memory_space<vmem>>, %arg4: memref<256x384xbf16, #tpu.memory_space<vmem>>, %arg5: memref<1x384xbf16, #tpu.memory_space<vmem>>, %arg6: memref<16x384xbf16, #tpu.memory_space<vmem>>, %arg7: memref<16x384xf32, #tpu.memory_space<vmem>>) attributes {dimension_semantics = [#tpu.dimension_semantics<parallel>, #tpu.dimension_semantics<parallel>, #tpu.dimension_semantics<arbitrary>], iteration_bounds = array<i64: 1, 2, 1>, scalar_prefetch = 0 : i64, scratch_operands = 1 : i64, tpu.core_type = #tpu.core_type<tc>, window_params = [{transform_indices = @transform_0, window_bounds = array<i64: 16, 256>}, {transform_indices = @transform_1, window_bounds = array<i64: 256, 384>}, {transform_indices = @transform_2, window_bounds = array<i64: 1, 384>}, {transform_indices = @transform_3, window_bounds = array<i64: 16, 384>}]} {
    %c0_i32 = arith.constant 0 : i32
    %0 = arith.cmpi eq, %arg2, %c0_i32 : i32
    %1 = arith.extui %0 : i1 to i32
    %c0_i32_0 = arith.constant 0 : i32
    %2 = arith.cmpi ne, %1, %c0_i32_0 : i32
    scf.if %2 {
      %cst_10 = arith.constant 0.000000e+00 : f32
      %12 = vector.broadcast %cst_10 : f32 to vector<16x384xf32>
      %c0_11 = arith.constant 0 : index
      %c0_12 = arith.constant 0 : index
      %13 = vector.load %arg7[%c0_11, %c0_12] : memref<16x384xf32, #tpu.memory_space<vmem>>, vector<16x384xf32>
      tpu.vector_store %arg7[%c0_11, %c0_12], %12 {strides = array<i32>} : memref<16x384xf32, #tpu.memory_space<vmem>>, vector<16x384xf32>,
    } else {
    }
    %c0 = arith.constant 0 : index
    %c0_1 = arith.constant 0 : index
    %3 = vector.load %arg7[%c0, %c0_1] : memref<16x384xf32, #tpu.memory_space<vmem>>, vector<16x384xf32>
    %c0_2 = arith.constant 0 : index
    %c0_3 = arith.constant 0 : index
    %4 = vector.load %arg3[%c0_2, %c0_3] : memref<16x256xbf16, #tpu.memory_space<vmem>>, vector<16x256xbf16>
    %c0_4 = arith.constant 0 : index
    %c0_5 = arith.constant 0 : index
    %5 = vector.load %arg4[%c0_4, %c0_5] : memref<256x384xbf16, #tpu.memory_space<vmem>>, vector<256x384xbf16>
    %cst = arith.constant dense<0.000000e+00> : vector<16x384xf32>
    %6 = tpu.matmul %4, %5, %cst {dimension_numbers = #tpu.dot_dimension_numbers<[1], [0], [0], [1], [0, 0, 1, 1], [], []>} : vector<16x256xbf16>, vector<256x384xbf16>, vector<16x384xf32> -> vector<16x384xf32>
    %7 = arith.addf %3, %6 : vector<16x384xf32>
    %c0_6 = arith.constant 0 : index
    %c0_7 = arith.constant 0 : index
    %8 = vector.load %arg7[%c0_6, %c0_7] : memref<16x384xf32, #tpu.memory_space<vmem>>, vector<16x384xf32>
    tpu.vector_store %arg7[%c0_6, %c0_7], %7 {strides = array<i32>} : memref<16x384xf32, #tpu.memory_space<vmem>>, vector<16x384xf32>,
    %c0_i32_8 = arith.constant 0 : i32
    %9 = arith.cmpi eq, %arg2, %c0_i32_8 : i32
    %10 = arith.extui %9 : i1 to i32
    %c0_i32_9 = arith.constant 0 : i32
    %11 = arith.cmpi ne, %10, %c0_i32_9 : i32
    scf.if %11 {
      %c0_10 = arith.constant 0 : index
      %c0_11 = arith.constant 0 : index
      %12 = vector.load %arg7[%c0_10, %c0_11] : memref<16x384xf32, #tpu.memory_space<vmem>>, vector<16x384xf32>
      %c0_12 = arith.constant 0 : index
      %c0_13 = arith.constant 0 : index
      %13 = vector.load %arg5[%c0_12, %c0_13] : memref<1x384xbf16, #tpu.memory_space<vmem>>, vector<1x384xbf16>
      %14 = arith.extf %13 : vector<1x384xbf16> to vector<1x384xf32>
      %15 = vector.broadcast %14 : vector<1x384xf32> to vector<16x384xf32>
      %16 = arith.addf %12, %15 : vector<16x384xf32>
      %17 = arith.truncf %16 : vector<16x384xf32> to vector<16x384xbf16>
      %c0_14 = arith.constant 0 : index
      %c0_15 = arith.constant 0 : index
      %18 = vector.load %arg6[%c0_14, %c0_15] : memref<16x384xbf16, #tpu.memory_space<vmem>>, vector<16x384xbf16>
      tpu.vector_store %arg6[%c0_14, %c0_15], %17 {strides = array<i32>} : memref<16x384xbf16, #tpu.memory_space<vmem>>, vector<16x384xbf16>,
    } else {
    }
    return
  }
  func.func @transform_0(%arg0: i32, %arg1: i32, %arg2: i32) -> (i32, i32) {
    %c0_i32 = arith.constant 0 : i32
    return %arg0, %arg2 : i32, i32
  }
  func.func @transform_1(%arg0: i32, %arg1: i32, %arg2: i32) -> (i32, i32) {
    %c0_i32 = arith.constant 0 : i32
    return %arg2, %arg1 : i32, i32
  }
  func.func @transform_2(%arg0: i32, %arg1: i32, %arg2: i32) -> (i32, i32) {
    %c0_i32 = arith.constant 0 : i32
    %c0_i32_0 = arith.constant 0 : i32
    return %c0_i32, %arg1 : i32, i32
  }
  func.func @transform_3(%arg0: i32, %arg1: i32, %arg2: i32) -> (i32, i32) {
    %c0_i32 = arith.constant 0 : i32
    return %arg0, %arg1 : i32, i32
  }
}

module attributes {stable_mosaic.version = 11 : i64} {
  func.func @_mha_flash_kernel(%arg0: i32, %arg1: i32, %arg2: i32, %arg3: i32, %arg4: memref<1x8x128xbf16, #tpu.memory_space<vmem>>, %arg5: memref<1x8x128xbf16, #tpu.memory_space<vmem>>, %arg6: memref<1x8x128xbf16, #tpu.memory_space<vmem>>, %arg7: memref<1x1x8xi32, #tpu.memory_space<vmem>>, %arg8: memref<1x8x128xbf16, #tpu.memory_space<vmem>>, %arg9: memref<8x1xf32, #tpu.memory_space<vmem>>, %arg10: memref<8x1xf32, #tpu.memory_space<vmem>>, %arg11: memref<8x128xf32, #tpu.memory_space<vmem>>) attributes {dimension_semantics = [#tpu.dimension_semantics<parallel>, #tpu.dimension_semantics<parallel>, #tpu.dimension_semantics<parallel>, #tpu.dimension_semantics<arbitrary>], iteration_bounds = array<i64: 2, 2, 1, 1>, scalar_prefetch = 0 : i64, scratch_operands = 3 : i64, tpu.core_type = #tpu.core_type<tc>, window_params = [{transform_indices = @transform_0, window_bounds = array<i64: 1, 8, 128>}, {transform_indices = @transform_1, window_bounds = array<i64: 1, 8, 128>}, {transform_indices = @transform_2, window_bounds = array<i64: 1, 8, 128>}, {transform_indices = @transform_3, window_bounds = array<i64: 1, 1, 8>}, {transform_indices = @transform_4, window_bounds = array<i64: 1, 8, 128>}]} {
    %c0_i32 = arith.constant 0 : i32
    %0 = arith.cmpi eq, %arg3, %c0_i32 : i32
    %1 = arith.extui %0 : i1 to i32
    %c0_i32_0 = arith.constant 0 : i32
    %2 = arith.cmpi ne, %1, %c0_i32_0 : i32
    scf.if %2 {
      %cst_33 = arith.constant 0xFF800000 : f32
      %57 = vector.broadcast %cst_33 : f32 to vector<8x1xf32>
      %c0_34 = arith.constant 0 : index
      %c0_35 = arith.constant 0 : index
      %58 = vector.load %arg9[%c0_34, %c0_35] : memref<8x1xf32, #tpu.memory_space<vmem>>, vector<8x1xf32>
      tpu.vector_store %arg9[%c0_34, %c0_35], %57 {strides = array<i32>} : memref<8x1xf32, #tpu.memory_space<vmem>>, vector<8x1xf32>,
      %cst_36 = arith.constant 0.000000e+00 : f32
      %59 = vector.broadcast %cst_36 : f32 to vector<8x1xf32>
      %c0_37 = arith.constant 0 : index
      %c0_38 = arith.constant 0 : index
      %60 = vector.load %arg10[%c0_37, %c0_38] : memref<8x1xf32, #tpu.memory_space<vmem>>, vector<8x1xf32>
      tpu.vector_store %arg10[%c0_37, %c0_38], %59 {strides = array<i32>} : memref<8x1xf32, #tpu.memory_space<vmem>>, vector<8x1xf32>,
      %cst_39 = arith.constant 0.000000e+00 : f32
      %61 = vector.broadcast %cst_39 : f32 to vector<8x128xf32>
      %c0_40 = arith.constant 0 : index
      %c0_41 = arith.constant 0 : index
      %62 = vector.load %arg11[%c0_40, %c0_41] : memref<8x128xf32, #tpu.memory_space<vmem>>, vector<8x128xf32>
      tpu.vector_store %arg11[%c0_40, %c0_41], %61 {strides = array<i32>} : memref<8x128xf32, #tpu.memory_space<vmem>>, vector<8x128xf32>,
    } else {
    }
    %c0 = arith.constant 0 : index
    %c0_1 = arith.constant 0 : index
    %c0_2 = arith.constant 0 : index
    %3 = vector.load %arg4[%c0, %c0_1, %c0_2] : memref<1x8x128xbf16, #tpu.memory_space<vmem>>, vector<1x8x128xbf16>
    %4 = vector.shape_cast %3 : vector<1x8x128xbf16> to vector<8x128xbf16>
    %5 = arith.extf %4 : vector<8x128xbf16> to vector<8x128xf32>
    %c0_3 = arith.constant 0 : index
    %c0_4 = arith.constant 0 : index
    %c0_5 = arith.constant 0 : index
    %6 = vector.load %arg5[%c0_3, %c0_4, %c0_5] : memref<1x8x128xbf16, #tpu.memory_space<vmem>>, vector<1x8x128xbf16>
    %7 = vector.shape_cast %6 : vector<1x8x128xbf16> to vector<8x128xbf16>
    %8 = arith.extf %7 : vector<8x128xbf16> to vector<8x128xf32>
    %c0_6 = arith.constant 0 : index
    %c0_7 = arith.constant 0 : index
    %c0_8 = arith.constant 0 : index
    %9 = vector.load %arg6[%c0_6, %c0_7, %c0_8] : memref<1x8x128xbf16, #tpu.memory_space<vmem>>, vector<1x8x128xbf16>
    %10 = vector.shape_cast %9 : vector<1x8x128xbf16> to vector<8x128xbf16>
    %11 = arith.extf %10 : vector<8x128xbf16> to vector<8x128xf32>
    %cst = arith.constant dense<0.000000e+00> : vector<8x8xf32>
    %12 = tpu.matmul %5, %8, %cst {dimension_numbers = #tpu.dot_dimension_numbers<[1], [1], [0], [0], [0, 0, 1, 0], [], []>} : vector<8x128xf32>, vector<8x128xf32>, vector<8x8xf32> -> vector<8x8xf32>
    %cst_9 = arith.constant 0.0883883461 : f32
    %13 = vector.broadcast %cst_9 : f32 to vector<8x8xf32>
    %14 = arith.mulf %12, %13 : vector<8x8xf32>
    %c0_10 = arith.constant 0 : index
    %c0_11 = arith.constant 0 : index
    %c0_12 = arith.constant 0 : index
    %15 = vector.load %arg7[%c0_10, %c0_11, %c0_12] : memref<1x1x8xi32, #tpu.memory_space<vmem>>, vector<1x1x8xi32>
    %16 = vector.shape_cast %15 : vector<1x1x8xi32> to vector<1x8xi32>
    %c0_i32_13 = arith.constant 0 : i32
    %17 = vector.broadcast %c0_i32_13 : i32 to vector<1x8xi32>
    %18 = arith.cmpi sgt, %16, %17 : vector<1x8xi32>
    %c8_i32 = arith.constant 8 : i32
    %19 = arith.muli %arg2, %c8_i32 : i32
    %20 = tpu.iota {dimensions = array<i32: 0>} : vector<8x8xi32>
    %21 = vector.broadcast %19 : i32 to vector<8x8xi32>
    %22 = arith.addi %21, %20 : vector<8x8xi32>
    %c8_i32_14 = arith.constant 8 : i32
    %23 = arith.muli %arg3, %c8_i32_14 : i32
    %24 = tpu.iota {dimensions = array<i32: 1>} : vector<8x8xi32>
    %25 = vector.broadcast %23 : i32 to vector<8x8xi32>
    %26 = arith.addi %25, %24 : vector<8x8xi32>
    %27 = arith.cmpi sge, %22, %26 : vector<8x8xi32>
    %28 = vector.broadcast %18 : vector<1x8xi1> to vector<8x8xi1>
    %29 = arith.andi %28, %27 : vector<8x8xi1>
    %cst_15 = arith.constant -1.000000e+10 : f32
    %30 = vector.broadcast %cst_15 : f32 to vector<8x8xf32>
    %31 = arith.select %29, %14, %30 : vector<8x8xi1>, vector<8x8xf32>
    %c0_16 = arith.constant 0 : index
    %c0_17 = arith.constant 0 : index
    %32 = vector.load %arg9[%c0_16, %c0_17] : memref<8x1xf32, #tpu.memory_space<vmem>>, vector<8x1xf32>
    %cst_18 = arith.constant dense<0xFF800000> : vector<8xf32>
    %33 = vector.multi_reduction <maximumf>, %31, %cst_18 [1] : vector<8x8xf32> to vector<8xf32>
    %34 = vector.shape_cast %33 : vector<8xf32> to vector<8x1xf32>
    %35 = arith.maximumf %32, %34 : vector<8x1xf32>
    %36 = arith.subf %32, %35 : vector<8x1xf32>
    %37 = math.exp %36 : vector<8x1xf32>
    %38 = vector.broadcast %35 : vector<8x1xf32> to vector<8x8xf32>
    %39 = arith.subf %31, %38 : vector<8x8xf32>
    %40 = math.exp %39 : vector<8x8xf32>
    %c0_19 = arith.constant 0 : index
    %c0_20 = arith.constant 0 : index
    %41 = vector.load %arg10[%c0_19, %c0_20] : memref<8x1xf32, #tpu.memory_space<vmem>>, vector<8x1xf32>
    %42 = arith.mulf %37, %41 : vector<8x1xf32>
    %cst_21 = arith.constant dense<0.000000e+00> : vector<8xf32>
    %43 = vector.multi_reduction <add>, %40, %cst_21 [1] : vector<8x8xf32> to vector<8xf32>
    %44 = vector.shape_cast %43 : vector<8xf32> to vector<8x1xf32>
    %45 = arith.addf %42, %44 : vector<8x1xf32>
    %c0_22 = arith.constant 0 : index
    %c0_23 = arith.constant 0 : index
    %46 = vector.load %arg10[%c0_22, %c0_23] : memref<8x1xf32, #tpu.memory_space<vmem>>, vector<8x1xf32>
    tpu.vector_store %arg10[%c0_22, %c0_23], %45 {strides = array<i32>} : memref<8x1xf32, #tpu.memory_space<vmem>>, vector<8x1xf32>,
    %c0_24 = arith.constant 0 : index
    %c0_25 = arith.constant 0 : index
    %47 = vector.load %arg11[%c0_24, %c0_25] : memref<8x128xf32, #tpu.memory_space<vmem>>, vector<8x128xf32>
    %48 = vector.broadcast %37 : vector<8x1xf32> to vector<8x128xf32>
    %49 = arith.mulf %48, %47 : vector<8x128xf32>
    %cst_26 = arith.constant dense<0.000000e+00> : vector<8x128xf32>
    %50 = tpu.matmul %40, %11, %cst_26 {dimension_numbers = #tpu.dot_dimension_numbers<[1], [0], [0], [1], [0, 0, 1, 1], [], []>} : vector<8x8xf32>, vector<8x128xf32>, vector<8x128xf32> -> vector<8x128xf32>
    %51 = arith.addf %49, %50 : vector<8x128xf32>
    %c0_27 = arith.constant 0 : index
    %c0_28 = arith.constant 0 : index
    %52 = vector.load %arg11[%c0_27, %c0_28] : memref<8x128xf32, #tpu.memory_space<vmem>>, vector<8x128xf32>
    tpu.vector_store %arg11[%c0_27, %c0_28], %51 {strides = array<i32>} : memref<8x128xf32, #tpu.memory_space<vmem>>, vector<8x128xf32>,
    %c0_29 = arith.constant 0 : index
    %c0_30 = arith.constant 0 : index
    %53 = vector.load %arg9[%c0_29, %c0_30] : memref<8x1xf32, #tpu.memory_space<vmem>>, vector<8x1xf32>
    tpu.vector_store %arg9[%c0_29, %c0_30], %35 {strides = array<i32>} : memref<8x1xf32, #tpu.memory_space<vmem>>, vector<8x1xf32>,
    %c0_i32_31 = arith.constant 0 : i32
    %54 = arith.cmpi eq, %arg3, %c0_i32_31 : i32
    %55 = arith.extui %54 : i1 to i32
    %c0_i32_32 = arith.constant 0 : i32
    %56 = arith.cmpi ne, %55, %c0_i32_32 : i32
    scf.if %56 {
      %c0_33 = arith.constant 0 : index
      %c0_34 = arith.constant 0 : index
      %57 = vector.load %arg11[%c0_33, %c0_34] : memref<8x128xf32, #tpu.memory_space<vmem>>, vector<8x128xf32>
      %c0_35 = arith.constant 0 : index
      %c0_36 = arith.constant 0 : index
      %58 = vector.load %arg10[%c0_35, %c0_36] : memref<8x1xf32, #tpu.memory_space<vmem>>, vector<8x1xf32>
      %59 = tpu.reciprocal %58 {approx = true} : vector<8x1xf32> -> vector<8x1xf32>
      %60 = vector.broadcast %59 : vector<8x1xf32> to vector<8x128xf32>
      %61 = arith.mulf %57, %60 : vector<8x128xf32>
      %62 = arith.truncf %61 : vector<8x128xf32> to vector<8x128xbf16>
      %c0_37 = arith.constant 0 : index
      %c0_38 = arith.constant 0 : index
      %c0_39 = arith.constant 0 : index
      %63 = vector.load %arg8[%c0_37, %c0_38, %c0_39] : memref<1x8x128xbf16, #tpu.memory_space<vmem>>, vector<1x8x128xbf16>
      %64 = vector.shape_cast %63 : vector<1x8x128xbf16> to vector<8x128xbf16>
      %65 = vector.shape_cast %62 : vector<8x128xbf16> to vector<1x8x128xbf16>
      tpu.vector_store %arg8[%c0_37, %c0_38, %c0_39], %65 {strides = array<i32>} : memref<1x8x128xbf16, #tpu.memory_space<vmem>>, vector<1x8x128xbf16>,
    } else {
    }
    return
  }
  func.func @transform_0(%arg0: i32, %arg1: i32, %arg2: i32, %arg3: i32) -> (i32, i32, i32) {
    %c0_i32 = arith.constant 0 : i32
    %0 = arith.addi %c0_i32, %arg1 : i32
    %c0_i32_0 = arith.constant 0 : i32
    return %arg0, %arg2, %0 : i32, i32, i32
  }
  func.func @transform_1(%arg0: i32, %arg1: i32, %arg2: i32, %arg3: i32) -> (i32, i32, i32) {
    %c2_i32 = arith.constant 2 : i32
    %0 = arith.addi %c2_i32, %arg1 : i32
    %c0_i32 = arith.constant 0 : i32
    return %arg0, %arg3, %0 : i32, i32, i32
  }
  func.func @transform_2(%arg0: i32, %arg1: i32, %arg2: i32, %arg3: i32) -> (i32, i32, i32) {
    %c4_i32 = arith.constant 4 : i32
    %0 = arith.addi %c4_i32, %arg1 : i32
    %c0_i32 = arith.constant 0 : i32
    return %arg0, %arg3, %0 : i32, i32, i32
  }
  func.func @transform_3(%arg0: i32, %arg1: i32, %arg2: i32, %arg3: i32) -> (i32, i32, i32) {
    %c0_i32 = arith.constant 0 : i32
    %c0_i32_0 = arith.constant 0 : i32
    return %arg0, %c0_i32, %arg3 : i32, i32, i32
  }
  func.func @transform_4(%arg0: i32, %arg1: i32, %arg2: i32, %arg3: i32) -> (i32, i32, i32) {
    %c0_i32 = arith.constant 0 : i32
    return %arg0, %arg2, %arg1 : i32, i32, i32
  }
}

module attributes {stable_mosaic.version = 11 : i64} {
  func.func @_linear_res_ln_kernel(%arg0: i32, %arg1: i32, %arg2: memref<16x256xbf16, #tpu.memory_space<vmem>>, %arg3: memref<256x256xbf16, #tpu.memory_space<vmem>>, %arg4: memref<1x256xbf16, #tpu.memory_space<vmem>>, %arg5: memref<16x256xbf16, #tpu.memory_space<vmem>>, %arg6: memref<1x256xbf16, #tpu.memory_space<vmem>>, %arg7: memref<1x256xbf16, #tpu.memory_space<vmem>>, %arg8: memref<16x256xbf16, #tpu.memory_space<vmem>>, %arg9: memref<16x256xf32, #tpu.memory_space<vmem>>) attributes {dimension_semantics = [#tpu.dimension_semantics<parallel>, #tpu.dimension_semantics<arbitrary>], iteration_bounds = array<i64: 1, 1>, scalar_prefetch = 0 : i64, scratch_operands = 1 : i64, tpu.core_type = #tpu.core_type<tc>, window_params = [{transform_indices = @transform_0, window_bounds = array<i64: 16, 256>}, {transform_indices = @transform_1, window_bounds = array<i64: 256, 256>}, {pipeline_mode = #tpu.pipeline_mode<synchronous>, transform_indices = @transform_2, window_bounds = array<i64: 1, 256>}, {transform_indices = @transform_3, window_bounds = array<i64: 16, 256>}, {pipeline_mode = #tpu.pipeline_mode<synchronous>, transform_indices = @transform_4, window_bounds = array<i64: 1, 256>}, {pipeline_mode = #tpu.pipeline_mode<synchronous>, transform_indices = @transform_5, window_bounds = array<i64: 1, 256>}, {transform_indices = @transform_6, window_bounds = array<i64: 16, 256>}]} {
    %c0_i32 = arith.constant 0 : i32
    %0 = arith.cmpi eq, %arg1, %c0_i32 : i32
    %1 = arith.extui %0 : i1 to i32
    %c0_i32_0 = arith.constant 0 : i32
    %2 = arith.cmpi ne, %1, %c0_i32_0 : i32
    scf.if %2 {
      %cst_10 = arith.constant 0.000000e+00 : f32
      %12 = vector.broadcast %cst_10 : f32 to vector<16x256xf32>
      %c0_11 = arith.constant 0 : index
      %c0_12 = arith.constant 0 : index
      %13 = vector.load %arg9[%c0_11, %c0_12] : memref<16x256xf32, #tpu.memory_space<vmem>>, vector<16x256xf32>
      tpu.vector_store %arg9[%c0_11, %c0_12], %12 {strides = array<i32>} : memref<16x256xf32, #tpu.memory_space<vmem>>, vector<16x256xf32>,
    } else {
    }
    %c0 = arith.constant 0 : index
    %c0_1 = arith.constant 0 : index
    %3 = vector.load %arg9[%c0, %c0_1] : memref<16x256xf32, #tpu.memory_space<vmem>>, vector<16x256xf32>
    %c0_2 = arith.constant 0 : index
    %c0_3 = arith.constant 0 : index
    %4 = vector.load %arg2[%c0_2, %c0_3] : memref<16x256xbf16, #tpu.memory_space<vmem>>, vector<16x256xbf16>
    %c0_4 = arith.constant 0 : index
    %c0_5 = arith.constant 0 : index
    %5 = vector.load %arg3[%c0_4, %c0_5] : memref<256x256xbf16, #tpu.memory_space<vmem>>, vector<256x256xbf16>
    %cst = arith.constant dense<0.000000e+00> : vector<16x256xf32>
    %6 = tpu.matmul %4, %5, %cst {dimension_numbers = #tpu.dot_dimension_numbers<[1], [0], [0], [1], [0, 0, 1, 1], [], []>} : vector<16x256xbf16>, vector<256x256xbf16>, vector<16x256xf32> -> vector<16x256xf32>
    %7 = arith.addf %3, %6 : vector<16x256xf32>
    %c0_6 = arith.constant 0 : index
    %c0_7 = arith.constant 0 : index
    %8 = vector.load %arg9[%c0_6, %c0_7] : memref<16x256xf32, #tpu.memory_space<vmem>>, vector<16x256xf32>
    tpu.vector_store %arg9[%c0_6, %c0_7], %7 {strides = array<i32>} : memref<16x256xf32, #tpu.memory_space<vmem>>, vector<16x256xf32>,
    %c0_i32_8 = arith.constant 0 : i32
    %9 = arith.cmpi eq, %arg1, %c0_i32_8 : i32
    %10 = arith.extui %9 : i1 to i32
    %c0_i32_9 = arith.constant 0 : i32
    %11 = arith.cmpi ne, %10, %c0_i32_9 : i32
    scf.if %11 {
      %c0_10 = arith.constant 0 : index
      %c0_11 = arith.constant 0 : index
      %12 = vector.load %arg9[%c0_10, %c0_11] : memref<16x256xf32, #tpu.memory_space<vmem>>, vector<16x256xf32>
      %c0_12 = arith.constant 0 : index
      %c0_13 = arith.constant 0 : index
      %13 = vector.load %arg4[%c0_12, %c0_13] : memref<1x256xbf16, #tpu.memory_space<vmem>>, vector<1x256xbf16>
      %14 = arith.extf %13 : vector<1x256xbf16> to vector<1x256xf32>
      %15 = vector.broadcast %14 : vector<1x256xf32> to vector<16x256xf32>
      %16 = arith.addf %12, %15 : vector<16x256xf32>
      %c0_14 = arith.constant 0 : index
      %c0_15 = arith.constant 0 : index
      %17 = vector.load %arg5[%c0_14, %c0_15] : memref<16x256xbf16, #tpu.memory_space<vmem>>, vector<16x256xbf16>
      %18 = arith.extf %17 : vector<16x256xbf16> to vector<16x256xf32>
      %19 = arith.addf %16, %18 : vector<16x256xf32>
      %cst_16 = arith.constant dense<0.000000e+00> : vector<16xf32>
      %20 = vector.multi_reduction <add>, %19, %cst_16 [1] : vector<16x256xf32> to vector<16xf32>
      %21 = vector.shape_cast %20 : vector<16xf32> to vector<16x1xf32>
      %cst_17 = arith.constant 2.560000e+02 : f32
      %22 = vector.broadcast %cst_17 : f32 to vector<16x1xf32>
      %23 = arith.divf %21, %22 : vector<16x1xf32>
      %24 = arith.mulf %19, %19 : vector<16x256xf32>
      %cst_18 = arith.constant dense<0.000000e+00> : vector<16xf32>
      %25 = vector.multi_reduction <add>, %24, %cst_18 [1] : vector<16x256xf32> to vector<16xf32>
      %26 = vector.shape_cast %25 : vector<16xf32> to vector<16x1xf32>
      %cst_19 = arith.constant 2.560000e+02 : f32
      %27 = vector.broadcast %cst_19 : f32 to vector<16x1xf32>
      %28 = arith.divf %26, %27 : vector<16x1xf32>
      %29 = arith.mulf %23, %23 : vector<16x1xf32>
      %30 = arith.subf %28, %29 : vector<16x1xf32>
      %31 = vector.broadcast %23 : vector<16x1xf32> to vector<16x256xf32>
      %32 = arith.subf %19, %31 : vector<16x256xf32>
      %cst_20 = arith.constant 9.99999974E-6 : f32
      %33 = vector.broadcast %cst_20 : f32 to vector<16x1xf32>
      %34 = arith.addf %30, %33 : vector<16x1xf32>
      %35 = math.rsqrt %34 : vector<16x1xf32>
      %36 = vector.broadcast %35 : vector<16x1xf32> to vector<16x256xf32>
      %37 = arith.mulf %32, %36 : vector<16x256xf32>
      %c0_21 = arith.constant 0 : index
      %c0_22 = arith.constant 0 : index
      %38 = vector.load %arg6[%c0_21, %c0_22] : memref<1x256xbf16, #tpu.memory_space<vmem>>, vector<1x256xbf16>
      %39 = arith.extf %38 : vector<1x256xbf16> to vector<1x256xf32>
      %40 = vector.broadcast %39 : vector<1x256xf32> to vector<16x256xf32>
      %41 = arith.mulf %37, %40 : vector<16x256xf32>
      %c0_23 = arith.constant 0 : index
      %c0_24 = arith.constant 0 : index
      %42 = vector.load %arg7[%c0_23, %c0_24] : memref<1x256xbf16, #tpu.memory_space<vmem>>, vector<1x256xbf16>
      %43 = arith.extf %42 : vector<1x256xbf16> to vector<1x256xf32>
      %44 = vector.broadcast %43 : vector<1x256xf32> to vector<16x256xf32>
      %45 = arith.addf %41, %44 : vector<16x256xf32>
      %46 = arith.truncf %45 : vector<16x256xf32> to vector<16x256xbf16>
      %c0_25 = arith.constant 0 : index
      %c0_26 = arith.constant 0 : index
      %47 = vector.load %arg8[%c0_25, %c0_26] : memref<16x256xbf16, #tpu.memory_space<vmem>>, vector<16x256xbf16>
      tpu.vector_store %arg8[%c0_25, %c0_26], %46 {strides = array<i32>} : memref<16x256xbf16, #tpu.memory_space<vmem>>, vector<16x256xbf16>,
    } else {
    }
    return
  }
  func.func @transform_0(%arg0: i32, %arg1: i32) -> (i32, i32) {
    %c0_i32 = arith.constant 0 : i32
    return %arg0, %arg1 : i32, i32
  }
  func.func @transform_1(%arg0: i32, %arg1: i32) -> (i32, i32) {
    %c0_i32 = arith.constant 0 : i32
    %c0_i32_0 = arith.constant 0 : i32
    return %arg1, %c0_i32 : i32, i32
  }
  func.func @transform_2(%arg0: i32, %arg1: i32) -> (i32, i32) {
    %c0_i32 = arith.constant 0 : i32
    %c0_i32_0 = arith.constant 0 : i32
    %c0_i32_1 = arith.constant 0 : i32
    return %c0_i32, %c0_i32_0 : i32, i32
  }
  func.func @transform_3(%arg0: i32, %arg1: i32) -> (i32, i32) {
    %c0_i32 = arith.constant 0 : i32
    %c0_i32_0 = arith.constant 0 : i32
    return %arg0, %c0_i32 : i32, i32
  }
  func.func @transform_4(%arg0: i32, %arg1: i32) -> (i32, i32) {
    %c0_i32 = arith.constant 0 : i32
    %c0_i32_0 = arith.constant 0 : i32
    %c0_i32_1 = arith.constant 0 : i32
    return %c0_i32, %c0_i32_0 : i32, i32
  }
  func.func @transform_5(%arg0: i32, %arg1: i32) -> (i32, i32) {
    %c0_i32 = arith.constant 0 : i32
    %c0_i32_0 = arith.constant 0 : i32
    %c0_i32_1 = arith.constant 0 : i32
    return %c0_i32, %c0_i32_0 : i32, i32
  }
  func.func @transform_6(%arg0: i32, %arg1: i32) -> (i32, i32) {
    %c0_i32 = arith.constant 0 : i32
    %c0_i32_0 = arith.constant 0 : i32
    return %arg0, %c0_i32 : i32, i32
  }
}

module attributes {stable_mosaic.version = 11 : i64} {
  func.func @_linear_kernel(%arg0: i32, %arg1: i32, %arg2: i32, %arg3: memref<16x256xbf16, #tpu.memory_space<vmem>>, %arg4: memref<256x256xbf16, #tpu.memory_space<vmem>>, %arg5: memref<1x256xbf16, #tpu.memory_space<vmem>>, %arg6: memref<16x256xbf16, #tpu.memory_space<vmem>>, %arg7: memref<16x256xf32, #tpu.memory_space<vmem>>) attributes {dimension_semantics = [#tpu.dimension_semantics<parallel>, #tpu.dimension_semantics<parallel>, #tpu.dimension_semantics<arbitrary>], iteration_bounds = array<i64: 1, 1, 1>, scalar_prefetch = 0 : i64, scratch_operands = 1 : i64, tpu.core_type = #tpu.core_type<tc>, window_params = [{transform_indices = @transform_0, window_bounds = array<i64: 16, 256>}, {transform_indices = @transform_1, window_bounds = array<i64: 256, 256>}, {transform_indices = @transform_2, window_bounds = array<i64: 1, 256>}, {transform_indices = @transform_3, window_bounds = array<i64: 16, 256>}]} {
    %c0_i32 = arith.constant 0 : i32
    %0 = arith.cmpi eq, %arg2, %c0_i32 : i32
    %1 = arith.extui %0 : i1 to i32
    %c0_i32_0 = arith.constant 0 : i32
    %2 = arith.cmpi ne, %1, %c0_i32_0 : i32
    scf.if %2 {
      %cst_10 = arith.constant 0.000000e+00 : f32
      %12 = vector.broadcast %cst_10 : f32 to vector<16x256xf32>
      %c0_11 = arith.constant 0 : index
      %c0_12 = arith.constant 0 : index
      %13 = vector.load %arg7[%c0_11, %c0_12] : memref<16x256xf32, #tpu.memory_space<vmem>>, vector<16x256xf32>
      tpu.vector_store %arg7[%c0_11, %c0_12], %12 {strides = array<i32>} : memref<16x256xf32, #tpu.memory_space<vmem>>, vector<16x256xf32>,
    } else {
    }
    %c0 = arith.constant 0 : index
    %c0_1 = arith.constant 0 : index
    %3 = vector.load %arg7[%c0, %c0_1] : memref<16x256xf32, #tpu.memory_space<vmem>>, vector<16x256xf32>
    %c0_2 = arith.constant 0 : index
    %c0_3 = arith.constant 0 : index
    %4 = vector.load %arg3[%c0_2, %c0_3] : memref<16x256xbf16, #tpu.memory_space<vmem>>, vector<16x256xbf16>
    %c0_4 = arith.constant 0 : index
    %c0_5 = arith.constant 0 : index
    %5 = vector.load %arg4[%c0_4, %c0_5] : memref<256x256xbf16, #tpu.memory_space<vmem>>, vector<256x256xbf16>
    %cst = arith.constant dense<0.000000e+00> : vector<16x256xf32>
    %6 = tpu.matmul %4, %5, %cst {dimension_numbers = #tpu.dot_dimension_numbers<[1], [0], [0], [1], [0, 0, 1, 1], [], []>} : vector<16x256xbf16>, vector<256x256xbf16>, vector<16x256xf32> -> vector<16x256xf32>
    %7 = arith.addf %3, %6 : vector<16x256xf32>
    %c0_6 = arith.constant 0 : index
    %c0_7 = arith.constant 0 : index
    %8 = vector.load %arg7[%c0_6, %c0_7] : memref<16x256xf32, #tpu.memory_space<vmem>>, vector<16x256xf32>
    tpu.vector_store %arg7[%c0_6, %c0_7], %7 {strides = array<i32>} : memref<16x256xf32, #tpu.memory_space<vmem>>, vector<16x256xf32>,
    %c0_i32_8 = arith.constant 0 : i32
    %9 = arith.cmpi eq, %arg2, %c0_i32_8 : i32
    %10 = arith.extui %9 : i1 to i32
    %c0_i32_9 = arith.constant 0 : i32
    %11 = arith.cmpi ne, %10, %c0_i32_9 : i32
    scf.if %11 {
      %c0_10 = arith.constant 0 : index
      %c0_11 = arith.constant 0 : index
      %12 = vector.load %arg7[%c0_10, %c0_11] : memref<16x256xf32, #tpu.memory_space<vmem>>, vector<16x256xf32>
      %c0_12 = arith.constant 0 : index
      %c0_13 = arith.constant 0 : index
      %13 = vector.load %arg5[%c0_12, %c0_13] : memref<1x256xbf16, #tpu.memory_space<vmem>>, vector<1x256xbf16>
      %14 = arith.extf %13 : vector<1x256xbf16> to vector<1x256xf32>
      %15 = vector.broadcast %14 : vector<1x256xf32> to vector<16x256xf32>
      %16 = arith.addf %12, %15 : vector<16x256xf32>
      %17 = arith.truncf %16 : vector<16x256xf32> to vector<16x256xbf16>
      %c0_14 = arith.constant 0 : index
      %c0_15 = arith.constant 0 : index
      %18 = vector.load %arg6[%c0_14, %c0_15] : memref<16x256xbf16, #tpu.memory_space<vmem>>, vector<16x256xbf16>
      tpu.vector_store %arg6[%c0_14, %c0_15], %17 {strides = array<i32>} : memref<16x256xbf16, #tpu.memory_space<vmem>>, vector<16x256xbf16>,
    } else {
    }
    return
  }
  func.func @transform_0(%arg0: i32, %arg1: i32, %arg2: i32) -> (i32, i32) {
    %c0_i32 = arith.constant 0 : i32
    return %arg0, %arg2 : i32, i32
  }
  func.func @transform_1(%arg0: i32, %arg1: i32, %arg2: i32) -> (i32, i32) {
    %c0_i32 = arith.constant 0 : i32
    return %arg2, %arg1 : i32, i32
  }
  func.func @transform_2(%arg0: i32, %arg1: i32, %arg2: i32) -> (i32, i32) {
    %c0_i32 = arith.constant 0 : i32
    %c0_i32_0 = arith.constant 0 : i32
    return %c0_i32, %arg1 : i32, i32
  }
  func.func @transform_3(%arg0: i32, %arg1: i32, %arg2: i32) -> (i32, i32) {
    %c0_i32 = arith.constant 0 : i32
    return %arg0, %arg1 : i32, i32
  }
}

module attributes {stable_mosaic.version = 11 : i64} {
  func.func @_mha_flash_kernel(%arg0: i32, %arg1: i32, %arg2: i32, %arg3: i32, %arg4: memref<1x8x128xbf16, #tpu.memory_space<vmem>>, %arg5: memref<1x8x128xbf16, #tpu.memory_space<vmem>>, %arg6: memref<1x8x128xbf16, #tpu.memory_space<vmem>>, %arg7: memref<1x1x8xi32, #tpu.memory_space<vmem>>, %arg8: memref<1x8x128xbf16, #tpu.memory_space<vmem>>, %arg9: memref<8x1xf32, #tpu.memory_space<vmem>>, %arg10: memref<8x1xf32, #tpu.memory_space<vmem>>, %arg11: memref<8x128xf32, #tpu.memory_space<vmem>>) attributes {dimension_semantics = [#tpu.dimension_semantics<parallel>, #tpu.dimension_semantics<parallel>, #tpu.dimension_semantics<parallel>, #tpu.dimension_semantics<arbitrary>], iteration_bounds = array<i64: 2, 2, 1, 1>, scalar_prefetch = 0 : i64, scratch_operands = 3 : i64, tpu.core_type = #tpu.core_type<tc>, window_params = [{transform_indices = @transform_0, window_bounds = array<i64: 1, 8, 128>}, {transform_indices = @transform_1, window_bounds = array<i64: 1, 8, 128>}, {transform_indices = @transform_2, window_bounds = array<i64: 1, 8, 128>}, {transform_indices = @transform_3, window_bounds = array<i64: 1, 1, 8>}, {transform_indices = @transform_4, window_bounds = array<i64: 1, 8, 128>}]} {
    %c0_i32 = arith.constant 0 : i32
    %0 = arith.cmpi eq, %arg3, %c0_i32 : i32
    %1 = arith.extui %0 : i1 to i32
    %c0_i32_0 = arith.constant 0 : i32
    %2 = arith.cmpi ne, %1, %c0_i32_0 : i32
    scf.if %2 {
      %cst_32 = arith.constant 0xFF800000 : f32
      %48 = vector.broadcast %cst_32 : f32 to vector<8x1xf32>
      %c0_33 = arith.constant 0 : index
      %c0_34 = arith.constant 0 : index
      %49 = vector.load %arg9[%c0_33, %c0_34] : memref<8x1xf32, #tpu.memory_space<vmem>>, vector<8x1xf32>
      tpu.vector_store %arg9[%c0_33, %c0_34], %48 {strides = array<i32>} : memref<8x1xf32, #tpu.memory_space<vmem>>, vector<8x1xf32>,
      %cst_35 = arith.constant 0.000000e+00 : f32
      %50 = vector.broadcast %cst_35 : f32 to vector<8x1xf32>
      %c0_36 = arith.constant 0 : index
      %c0_37 = arith.constant 0 : index
      %51 = vector.load %arg10[%c0_36, %c0_37] : memref<8x1xf32, #tpu.memory_space<vmem>>, vector<8x1xf32>
      tpu.vector_store %arg10[%c0_36, %c0_37], %50 {strides = array<i32>} : memref<8x1xf32, #tpu.memory_space<vmem>>, vector<8x1xf32>,
      %cst_38 = arith.constant 0.000000e+00 : f32
      %52 = vector.broadcast %cst_38 : f32 to vector<8x128xf32>
      %c0_39 = arith.constant 0 : index
      %c0_40 = arith.constant 0 : index
      %53 = vector.load %arg11[%c0_39, %c0_40] : memref<8x128xf32, #tpu.memory_space<vmem>>, vector<8x128xf32>
      tpu.vector_store %arg11[%c0_39, %c0_40], %52 {strides = array<i32>} : memref<8x128xf32, #tpu.memory_space<vmem>>, vector<8x128xf32>,
    } else {
    }
    %c0 = arith.constant 0 : index
    %c0_1 = arith.constant 0 : index
    %c0_2 = arith.constant 0 : index
    %3 = vector.load %arg4[%c0, %c0_1, %c0_2] : memref<1x8x128xbf16, #tpu.memory_space<vmem>>, vector<1x8x128xbf16>
    %4 = vector.shape_cast %3 : vector<1x8x128xbf16> to vector<8x128xbf16>
    %5 = arith.extf %4 : vector<8x128xbf16> to vector<8x128xf32>
    %c0_3 = arith.constant 0 : index
    %c0_4 = arith.constant 0 : index
    %c0_5 = arith.constant 0 : index
    %6 = vector.load %arg5[%c0_3, %c0_4, %c0_5] : memref<1x8x128xbf16, #tpu.memory_space<vmem>>, vector<1x8x128xbf16>
    %7 = vector.shape_cast %6 : vector<1x8x128xbf16> to vector<8x128xbf16>
    %8 = arith.extf %7 : vector<8x128xbf16> to vector<8x128xf32>
    %c0_6 = arith.constant 0 : index
    %c0_7 = arith.constant 0 : index
    %c0_8 = arith.constant 0 : index
    %9 = vector.load %arg6[%c0_6, %c0_7, %c0_8] : memref<1x8x128xbf16, #tpu.memory_space<vmem>>, vector<1x8x128xbf16>
    %10 = vector.shape_cast %9 : vector<1x8x128xbf16> to vector<8x128xbf16>
    %11 = arith.extf %10 : vector<8x128xbf16> to vector<8x128xf32>
    %cst = arith.constant dense<0.000000e+00> : vector<8x8xf32>
    %12 = tpu.matmul %5, %8, %cst {dimension_numbers = #tpu.dot_dimension_numbers<[1], [1], [0], [0], [0, 0, 1, 0], [], []>} : vector<8x128xf32>, vector<8x128xf32>, vector<8x8xf32> -> vector<8x8xf32>
    %cst_9 = arith.constant 0.0883883461 : f32
    %13 = vector.broadcast %cst_9 : f32 to vector<8x8xf32>
    %14 = arith.mulf %12, %13 : vector<8x8xf32>
    %c0_10 = arith.constant 0 : index
    %c0_11 = arith.constant 0 : index
    %c0_12 = arith.constant 0 : index
    %15 = vector.load %arg7[%c0_10, %c0_11, %c0_12] : memref<1x1x8xi32, #tpu.memory_space<vmem>>, vector<1x1x8xi32>
    %16 = vector.shape_cast %15 : vector<1x1x8xi32> to vector<1x8xi32>
    %c0_i32_13 = arith.constant 0 : i32
    %17 = vector.broadcast %c0_i32_13 : i32 to vector<1x8xi32>
    %18 = arith.cmpi sgt, %16, %17 : vector<1x8xi32>
    %cst_14 = arith.constant -1.000000e+10 : f32
    %19 = vector.shape_cast %18 : vector<1x8xi1> to vector<1x8xi1>
    %20 = vector.broadcast %19 : vector<1x8xi1> to vector<8x8xi1>
    %21 = vector.broadcast %cst_14 : f32 to vector<8x8xf32>
    %22 = arith.select %20, %14, %21 : vector<8x8xi1>, vector<8x8xf32>
    %c0_15 = arith.constant 0 : index
    %c0_16 = arith.constant 0 : index
    %23 = vector.load %arg9[%c0_15, %c0_16] : memref<8x1xf32, #tpu.memory_space<vmem>>, vector<8x1xf32>
    %cst_17 = arith.constant dense<0xFF800000> : vector<8xf32>
    %24 = vector.multi_reduction <maximumf>, %22, %cst_17 [1] : vector<8x8xf32> to vector<8xf32>
    %25 = vector.shape_cast %24 : vector<8xf32> to vector<8x1xf32>
    %26 = arith.maximumf %23, %25 : vector<8x1xf32>
    %27 = arith.subf %23, %26 : vector<8x1xf32>
    %28 = math.exp %27 : vector<8x1xf32>
    %29 = vector.broadcast %26 : vector<8x1xf32> to vector<8x8xf32>
    %30 = arith.subf %22, %29 : vector<8x8xf32>
    %31 = math.exp %30 : vector<8x8xf32>
    %c0_18 = arith.constant 0 : index
    %c0_19 = arith.constant 0 : index
    %32 = vector.load %arg10[%c0_18, %c0_19] : memref<8x1xf32, #tpu.memory_space<vmem>>, vector<8x1xf32>
    %33 = arith.mulf %28, %32 : vector<8x1xf32>
    %cst_20 = arith.constant dense<0.000000e+00> : vector<8xf32>
    %34 = vector.multi_reduction <add>, %31, %cst_20 [1] : vector<8x8xf32> to vector<8xf32>
    %35 = vector.shape_cast %34 : vector<8xf32> to vector<8x1xf32>
    %36 = arith.addf %33, %35 : vector<8x1xf32>
    %c0_21 = arith.constant 0 : index
    %c0_22 = arith.constant 0 : index
    %37 = vector.load %arg10[%c0_21, %c0_22] : memref<8x1xf32, #tpu.memory_space<vmem>>, vector<8x1xf32>
    tpu.vector_store %arg10[%c0_21, %c0_22], %36 {strides = array<i32>} : memref<8x1xf32, #tpu.memory_space<vmem>>, vector<8x1xf32>,
    %c0_23 = arith.constant 0 : index
    %c0_24 = arith.constant 0 : index
    %38 = vector.load %arg11[%c0_23, %c0_24] : memref<8x128xf32, #tpu.memory_space<vmem>>, vector<8x128xf32>
    %39 = vector.broadcast %28 : vector<8x1xf32> to vector<8x128xf32>
    %40 = arith.mulf %39, %38 : vector<8x128xf32>
    %cst_25 = arith.constant dense<0.000000e+00> : vector<8x128xf32>
    %41 = tpu.matmul %31, %11, %cst_25 {dimension_numbers = #tpu.dot_dimension_numbers<[1], [0], [0], [1], [0, 0, 1, 1], [], []>} : vector<8x8xf32>, vector<8x128xf32>, vector<8x128xf32> -> vector<8x128xf32>
    %42 = arith.addf %40, %41 : vector<8x128xf32>
    %c0_26 = arith.constant 0 : index
    %c0_27 = arith.constant 0 : index
    %43 = vector.load %arg11[%c0_26, %c0_27] : memref<8x128xf32, #tpu.memory_space<vmem>>, vector<8x128xf32>
    tpu.vector_store %arg11[%c0_26, %c0_27], %42 {strides = array<i32>} : memref<8x128xf32, #tpu.memory_space<vmem>>, vector<8x128xf32>,
    %c0_28 = arith.constant 0 : index
    %c0_29 = arith.constant 0 : index
    %44 = vector.load %arg9[%c0_28, %c0_29] : memref<8x1xf32, #tpu.memory_space<vmem>>, vector<8x1xf32>
    tpu.vector_store %arg9[%c0_28, %c0_29], %26 {strides = array<i32>} : memref<8x1xf32, #tpu.memory_space<vmem>>, vector<8x1xf32>,
    %c0_i32_30 = arith.constant 0 : i32
    %45 = arith.cmpi eq, %arg3, %c0_i32_30 : i32
    %46 = arith.extui %45 : i1 to i32
    %c0_i32_31 = arith.constant 0 : i32
    %47 = arith.cmpi ne, %46, %c0_i32_31 : i32
    scf.if %47 {
      %c0_32 = arith.constant 0 : index
      %c0_33 = arith.constant 0 : index
      %48 = vector.load %arg11[%c0_32, %c0_33] : memref<8x128xf32, #tpu.memory_space<vmem>>, vector<8x128xf32>
      %c0_34 = arith.constant 0 : index
      %c0_35 = arith.constant 0 : index
      %49 = vector.load %arg10[%c0_34, %c0_35] : memref<8x1xf32, #tpu.memory_space<vmem>>, vector<8x1xf32>
      %50 = tpu.reciprocal %49 {approx = true} : vector<8x1xf32> -> vector<8x1xf32>
      %51 = vector.broadcast %50 : vector<8x1xf32> to vector<8x128xf32>
      %52 = arith.mulf %48, %51 : vector<8x128xf32>
      %53 = arith.truncf %52 : vector<8x128xf32> to vector<8x128xbf16>
      %c0_36 = arith.constant 0 : index
      %c0_37 = arith.constant 0 : index
      %c0_38 = arith.constant 0 : index
      %54 = vector.load %arg8[%c0_36, %c0_37, %c0_38] : memref<1x8x128xbf16, #tpu.memory_space<vmem>>, vector<1x8x128xbf16>
      %55 = vector.shape_cast %54 : vector<1x8x128xbf16> to vector<8x128xbf16>
      %56 = vector.shape_cast %53 : vector<8x128xbf16> to vector<1x8x128xbf16>
      tpu.vector_store %arg8[%c0_36, %c0_37, %c0_38], %56 {strides = array<i32>} : memref<1x8x128xbf16, #tpu.memory_space<vmem>>, vector<1x8x128xbf16>,
    } else {
    }
    return
  }
  func.func @transform_0(%arg0: i32, %arg1: i32, %arg2: i32, %arg3: i32) -> (i32, i32, i32) {
    %c0_i32 = arith.constant 0 : i32
    %0 = arith.addi %c0_i32, %arg1 : i32
    %c0_i32_0 = arith.constant 0 : i32
    return %arg0, %arg2, %0 : i32, i32, i32
  }
  func.func @transform_1(%arg0: i32, %arg1: i32, %arg2: i32, %arg3: i32) -> (i32, i32, i32) {
    %c2_i32 = arith.constant 2 : i32
    %0 = arith.addi %c2_i32, %arg1 : i32
    %c0_i32 = arith.constant 0 : i32
    return %arg0, %arg3, %0 : i32, i32, i32
  }
  func.func @transform_2(%arg0: i32, %arg1: i32, %arg2: i32, %arg3: i32) -> (i32, i32, i32) {
    %c4_i32 = arith.constant 4 : i32
    %0 = arith.addi %c4_i32, %arg1 : i32
    %c0_i32 = arith.constant 0 : i32
    return %arg0, %arg3, %0 : i32, i32, i32
  }
  func.func @transform_3(%arg0: i32, %arg1: i32, %arg2: i32, %arg3: i32) -> (i32, i32, i32) {
    %c0_i32 = arith.constant 0 : i32
    %c0_i32_0 = arith.constant 0 : i32
    return %arg0, %c0_i32, %arg3 : i32, i32, i32
  }
  func.func @transform_4(%arg0: i32, %arg1: i32, %arg2: i32, %arg3: i32) -> (i32, i32, i32) {
    %c0_i32 = arith.constant 0 : i32
    return %arg0, %arg2, %arg1 : i32, i32, i32
  }
}

module attributes {stable_mosaic.version = 11 : i64} {
  func.func @_linear_kernel(%arg0: i32, %arg1: i32, %arg2: i32, %arg3: memref<16x256xbf16, #tpu.memory_space<vmem>>, %arg4: memref<256x512xbf16, #tpu.memory_space<vmem>>, %arg5: memref<1x512xbf16, #tpu.memory_space<vmem>>, %arg6: memref<16x512xbf16, #tpu.memory_space<vmem>>, %arg7: memref<16x512xf32, #tpu.memory_space<vmem>>) attributes {dimension_semantics = [#tpu.dimension_semantics<parallel>, #tpu.dimension_semantics<parallel>, #tpu.dimension_semantics<arbitrary>], iteration_bounds = array<i64: 1, 1, 1>, scalar_prefetch = 0 : i64, scratch_operands = 1 : i64, tpu.core_type = #tpu.core_type<tc>, window_params = [{transform_indices = @transform_0, window_bounds = array<i64: 16, 256>}, {transform_indices = @transform_1, window_bounds = array<i64: 256, 512>}, {transform_indices = @transform_2, window_bounds = array<i64: 1, 512>}, {transform_indices = @transform_3, window_bounds = array<i64: 16, 512>}]} {
    %c0_i32 = arith.constant 0 : i32
    %0 = arith.cmpi eq, %arg2, %c0_i32 : i32
    %1 = arith.extui %0 : i1 to i32
    %c0_i32_0 = arith.constant 0 : i32
    %2 = arith.cmpi ne, %1, %c0_i32_0 : i32
    scf.if %2 {
      %cst_10 = arith.constant 0.000000e+00 : f32
      %12 = vector.broadcast %cst_10 : f32 to vector<16x512xf32>
      %c0_11 = arith.constant 0 : index
      %c0_12 = arith.constant 0 : index
      %13 = vector.load %arg7[%c0_11, %c0_12] : memref<16x512xf32, #tpu.memory_space<vmem>>, vector<16x512xf32>
      tpu.vector_store %arg7[%c0_11, %c0_12], %12 {strides = array<i32>} : memref<16x512xf32, #tpu.memory_space<vmem>>, vector<16x512xf32>,
    } else {
    }
    %c0 = arith.constant 0 : index
    %c0_1 = arith.constant 0 : index
    %3 = vector.load %arg7[%c0, %c0_1] : memref<16x512xf32, #tpu.memory_space<vmem>>, vector<16x512xf32>
    %c0_2 = arith.constant 0 : index
    %c0_3 = arith.constant 0 : index
    %4 = vector.load %arg3[%c0_2, %c0_3] : memref<16x256xbf16, #tpu.memory_space<vmem>>, vector<16x256xbf16>
    %c0_4 = arith.constant 0 : index
    %c0_5 = arith.constant 0 : index
    %5 = vector.load %arg4[%c0_4, %c0_5] : memref<256x512xbf16, #tpu.memory_space<vmem>>, vector<256x512xbf16>
    %cst = arith.constant dense<0.000000e+00> : vector<16x512xf32>
    %6 = tpu.matmul %4, %5, %cst {dimension_numbers = #tpu.dot_dimension_numbers<[1], [0], [0], [1], [0, 0, 1, 1], [], []>} : vector<16x256xbf16>, vector<256x512xbf16>, vector<16x512xf32> -> vector<16x512xf32>
    %7 = arith.addf %3, %6 : vector<16x512xf32>
    %c0_6 = arith.constant 0 : index
    %c0_7 = arith.constant 0 : index
    %8 = vector.load %arg7[%c0_6, %c0_7] : memref<16x512xf32, #tpu.memory_space<vmem>>, vector<16x512xf32>
    tpu.vector_store %arg7[%c0_6, %c0_7], %7 {strides = array<i32>} : memref<16x512xf32, #tpu.memory_space<vmem>>, vector<16x512xf32>,
    %c0_i32_8 = arith.constant 0 : i32
    %9 = arith.cmpi eq, %arg2, %c0_i32_8 : i32
    %10 = arith.extui %9 : i1 to i32
    %c0_i32_9 = arith.constant 0 : i32
    %11 = arith.cmpi ne, %10, %c0_i32_9 : i32
    scf.if %11 {
      %c0_10 = arith.constant 0 : index
      %c0_11 = arith.constant 0 : index
      %12 = vector.load %arg7[%c0_10, %c0_11] : memref<16x512xf32, #tpu.memory_space<vmem>>, vector<16x512xf32>
      %c0_12 = arith.constant 0 : index
      %c0_13 = arith.constant 0 : index
      %13 = vector.load %arg5[%c0_12, %c0_13] : memref<1x512xbf16, #tpu.memory_space<vmem>>, vector<1x512xbf16>
      %14 = arith.extf %13 : vector<1x512xbf16> to vector<1x512xf32>
      %15 = vector.broadcast %14 : vector<1x512xf32> to vector<16x512xf32>
      %16 = arith.addf %12, %15 : vector<16x512xf32>
      %cst_14 = arith.constant 0.000000e+00 : f32
      %17 = vector.broadcast %cst_14 : f32 to vector<16x512xf32>
      %18 = arith.maximumf %16, %17 : vector<16x512xf32>
      %19 = arith.truncf %18 : vector<16x512xf32> to vector<16x512xbf16>
      %c0_15 = arith.constant 0 : index
      %c0_16 = arith.constant 0 : index
      %20 = vector.load %arg6[%c0_15, %c0_16] : memref<16x512xbf16, #tpu.memory_space<vmem>>, vector<16x512xbf16>
      tpu.vector_store %arg6[%c0_15, %c0_16], %19 {strides = array<i32>} : memref<16x512xbf16, #tpu.memory_space<vmem>>, vector<16x512xbf16>,
    } else {
    }
    return
  }
  func.func @transform_0(%arg0: i32, %arg1: i32, %arg2: i32) -> (i32, i32) {
    %c0_i32 = arith.constant 0 : i32
    return %arg0, %arg2 : i32, i32
  }
  func.func @transform_1(%arg0: i32, %arg1: i32, %arg2: i32) -> (i32, i32) {
    %c0_i32 = arith.constant 0 : i32
    return %arg2, %arg1 : i32, i32
  }
  func.func @transform_2(%arg0: i32, %arg1: i32, %arg2: i32) -> (i32, i32) {
    %c0_i32 = arith.constant 0 : i32
    %c0_i32_0 = arith.constant 0 : i32
    return %c0_i32, %arg1 : i32, i32
  }
  func.func @transform_3(%arg0: i32, %arg1: i32, %arg2: i32) -> (i32, i32) {
    %c0_i32 = arith.constant 0 : i32
    return %arg0, %arg1 : i32, i32
  }
}

module attributes {stable_mosaic.version = 11 : i64} {
  func.func @_linear_res_ln_kernel(%arg0: i32, %arg1: i32, %arg2: memref<16x512xbf16, #tpu.memory_space<vmem>>, %arg3: memref<512x256xbf16, #tpu.memory_space<vmem>>, %arg4: memref<1x256xbf16, #tpu.memory_space<vmem>>, %arg5: memref<16x256xbf16, #tpu.memory_space<vmem>>, %arg6: memref<1x256xbf16, #tpu.memory_space<vmem>>, %arg7: memref<1x256xbf16, #tpu.memory_space<vmem>>, %arg8: memref<16x256xbf16, #tpu.memory_space<vmem>>, %arg9: memref<16x256xf32, #tpu.memory_space<vmem>>) attributes {dimension_semantics = [#tpu.dimension_semantics<parallel>, #tpu.dimension_semantics<arbitrary>], iteration_bounds = array<i64: 1, 1>, scalar_prefetch = 0 : i64, scratch_operands = 1 : i64, tpu.core_type = #tpu.core_type<tc>, window_params = [{transform_indices = @transform_0, window_bounds = array<i64: 16, 512>}, {transform_indices = @transform_1, window_bounds = array<i64: 512, 256>}, {pipeline_mode = #tpu.pipeline_mode<synchronous>, transform_indices = @transform_2, window_bounds = array<i64: 1, 256>}, {transform_indices = @transform_3, window_bounds = array<i64: 16, 256>}, {pipeline_mode = #tpu.pipeline_mode<synchronous>, transform_indices = @transform_4, window_bounds = array<i64: 1, 256>}, {pipeline_mode = #tpu.pipeline_mode<synchronous>, transform_indices = @transform_5, window_bounds = array<i64: 1, 256>}, {transform_indices = @transform_6, window_bounds = array<i64: 16, 256>}]} {
    %c0_i32 = arith.constant 0 : i32
    %0 = arith.cmpi eq, %arg1, %c0_i32 : i32
    %1 = arith.extui %0 : i1 to i32
    %c0_i32_0 = arith.constant 0 : i32
    %2 = arith.cmpi ne, %1, %c0_i32_0 : i32
    scf.if %2 {
      %cst_10 = arith.constant 0.000000e+00 : f32
      %12 = vector.broadcast %cst_10 : f32 to vector<16x256xf32>
      %c0_11 = arith.constant 0 : index
      %c0_12 = arith.constant 0 : index
      %13 = vector.load %arg9[%c0_11, %c0_12] : memref<16x256xf32, #tpu.memory_space<vmem>>, vector<16x256xf32>
      tpu.vector_store %arg9[%c0_11, %c0_12], %12 {strides = array<i32>} : memref<16x256xf32, #tpu.memory_space<vmem>>, vector<16x256xf32>,
    } else {
    }
    %c0 = arith.constant 0 : index
    %c0_1 = arith.constant 0 : index
    %3 = vector.load %arg9[%c0, %c0_1] : memref<16x256xf32, #tpu.memory_space<vmem>>, vector<16x256xf32>
    %c0_2 = arith.constant 0 : index
    %c0_3 = arith.constant 0 : index
    %4 = vector.load %arg2[%c0_2, %c0_3] : memref<16x512xbf16, #tpu.memory_space<vmem>>, vector<16x512xbf16>
    %c0_4 = arith.constant 0 : index
    %c0_5 = arith.constant 0 : index
    %5 = vector.load %arg3[%c0_4, %c0_5] : memref<512x256xbf16, #tpu.memory_space<vmem>>, vector<512x256xbf16>
    %cst = arith.constant dense<0.000000e+00> : vector<16x256xf32>
    %6 = tpu.matmul %4, %5, %cst {dimension_numbers = #tpu.dot_dimension_numbers<[1], [0], [0], [1], [0, 0, 1, 1], [], []>} : vector<16x512xbf16>, vector<512x256xbf16>, vector<16x256xf32> -> vector<16x256xf32>
    %7 = arith.addf %3, %6 : vector<16x256xf32>
    %c0_6 = arith.constant 0 : index
    %c0_7 = arith.constant 0 : index
    %8 = vector.load %arg9[%c0_6, %c0_7] : memref<16x256xf32, #tpu.memory_space<vmem>>, vector<16x256xf32>
    tpu.vector_store %arg9[%c0_6, %c0_7], %7 {strides = array<i32>} : memref<16x256xf32, #tpu.memory_space<vmem>>, vector<16x256xf32>,
    %c0_i32_8 = arith.constant 0 : i32
    %9 = arith.cmpi eq, %arg1, %c0_i32_8 : i32
    %10 = arith.extui %9 : i1 to i32
    %c0_i32_9 = arith.constant 0 : i32
    %11 = arith.cmpi ne, %10, %c0_i32_9 : i32
    scf.if %11 {
      %c0_10 = arith.constant 0 : index
      %c0_11 = arith.constant 0 : index
      %12 = vector.load %arg9[%c0_10, %c0_11] : memref<16x256xf32, #tpu.memory_space<vmem>>, vector<16x256xf32>
      %c0_12 = arith.constant 0 : index
      %c0_13 = arith.constant 0 : index
      %13 = vector.load %arg4[%c0_12, %c0_13] : memref<1x256xbf16, #tpu.memory_space<vmem>>, vector<1x256xbf16>
      %14 = arith.extf %13 : vector<1x256xbf16> to vector<1x256xf32>
      %15 = vector.broadcast %14 : vector<1x256xf32> to vector<16x256xf32>
      %16 = arith.addf %12, %15 : vector<16x256xf32>
      %c0_14 = arith.constant 0 : index
      %c0_15 = arith.constant 0 : index
      %17 = vector.load %arg5[%c0_14, %c0_15] : memref<16x256xbf16, #tpu.memory_space<vmem>>, vector<16x256xbf16>
      %18 = arith.extf %17 : vector<16x256xbf16> to vector<16x256xf32>
      %19 = arith.addf %16, %18 : vector<16x256xf32>
      %cst_16 = arith.constant dense<0.000000e+00> : vector<16xf32>
      %20 = vector.multi_reduction <add>, %19, %cst_16 [1] : vector<16x256xf32> to vector<16xf32>
      %21 = vector.shape_cast %20 : vector<16xf32> to vector<16x1xf32>
      %cst_17 = arith.constant 2.560000e+02 : f32
      %22 = vector.broadcast %cst_17 : f32 to vector<16x1xf32>
      %23 = arith.divf %21, %22 : vector<16x1xf32>
      %24 = arith.mulf %19, %19 : vector<16x256xf32>
      %cst_18 = arith.constant dense<0.000000e+00> : vector<16xf32>
      %25 = vector.multi_reduction <add>, %24, %cst_18 [1] : vector<16x256xf32> to vector<16xf32>
      %26 = vector.shape_cast %25 : vector<16xf32> to vector<16x1xf32>
      %cst_19 = arith.constant 2.560000e+02 : f32
      %27 = vector.broadcast %cst_19 : f32 to vector<16x1xf32>
      %28 = arith.divf %26, %27 : vector<16x1xf32>
      %29 = arith.mulf %23, %23 : vector<16x1xf32>
      %30 = arith.subf %28, %29 : vector<16x1xf32>
      %31 = vector.broadcast %23 : vector<16x1xf32> to vector<16x256xf32>
      %32 = arith.subf %19, %31 : vector<16x256xf32>
      %cst_20 = arith.constant 9.99999974E-6 : f32
      %33 = vector.broadcast %cst_20 : f32 to vector<16x1xf32>
      %34 = arith.addf %30, %33 : vector<16x1xf32>
      %35 = math.rsqrt %34 : vector<16x1xf32>
      %36 = vector.broadcast %35 : vector<16x1xf32> to vector<16x256xf32>
      %37 = arith.mulf %32, %36 : vector<16x256xf32>
      %c0_21 = arith.constant 0 : index
      %c0_22 = arith.constant 0 : index
      %38 = vector.load %arg6[%c0_21, %c0_22] : memref<1x256xbf16, #tpu.memory_space<vmem>>, vector<1x256xbf16>
      %39 = arith.extf %38 : vector<1x256xbf16> to vector<1x256xf32>
      %40 = vector.broadcast %39 : vector<1x256xf32> to vector<16x256xf32>
      %41 = arith.mulf %37, %40 : vector<16x256xf32>
      %c0_23 = arith.constant 0 : index
      %c0_24 = arith.constant 0 : index
      %42 = vector.load %arg7[%c0_23, %c0_24] : memref<1x256xbf16, #tpu.memory_space<vmem>>, vector<1x256xbf16>
      %43 = arith.extf %42 : vector<1x256xbf16> to vector<1x256xf32>
      %44 = vector.broadcast %43 : vector<1x256xf32> to vector<16x256xf32>
      %45 = arith.addf %41, %44 : vector<16x256xf32>
      %46 = arith.truncf %45 : vector<16x256xf32> to vector<16x256xbf16>
      %c0_25 = arith.constant 0 : index
      %c0_26 = arith.constant 0 : index
      %47 = vector.load %arg8[%c0_25, %c0_26] : memref<16x256xbf16, #tpu.memory_space<vmem>>, vector<16x256xbf16>
      tpu.vector_store %arg8[%c0_25, %c0_26], %46 {strides = array<i32>} : memref<16x256xbf16, #tpu.memory_space<vmem>>, vector<16x256xbf16>,
    } else {
    }
    return
  }
  func.func @transform_0(%arg0: i32, %arg1: i32) -> (i32, i32) {
    %c0_i32 = arith.constant 0 : i32
    return %arg0, %arg1 : i32, i32
  }
  func.func @transform_1(%arg0: i32, %arg1: i32) -> (i32, i32) {
    %c0_i32 = arith.constant 0 : i32
    %c0_i32_0 = arith.constant 0 : i32
    return %arg1, %c0_i32 : i32, i32
  }
  func.func @transform_2(%arg0: i32, %arg1: i32) -> (i32, i32) {
    %c0_i32 = arith.constant 0 : i32
    %c0_i32_0 = arith.constant 0 : i32
    %c0_i32_1 = arith.constant 0 : i32
    return %c0_i32, %c0_i32_0 : i32, i32
  }
  func.func @transform_3(%arg0: i32, %arg1: i32) -> (i32, i32) {
    %c0_i32 = arith.constant 0 : i32
    %c0_i32_0 = arith.constant 0 : i32
    return %arg0, %c0_i32 : i32, i32
  }
  func.func @transform_4(%arg0: i32, %arg1: i32) -> (i32, i32) {
    %c0_i32 = arith.constant 0 : i32
    %c0_i32_0 = arith.constant 0 : i32
    %c0_i32_1 = arith.constant 0 : i32
    return %c0_i32, %c0_i32_0 : i32, i32
  }
  func.func @transform_5(%arg0: i32, %arg1: i32) -> (i32, i32) {
    %c0_i32 = arith.constant 0 : i32
    %c0_i32_0 = arith.constant 0 : i32
    %c0_i32_1 = arith.constant 0 : i32
    return %c0_i32, %c0_i32_0 : i32, i32
  }
  func.func @transform_6(%arg0: i32, %arg1: i32) -> (i32, i32) {
    %c0_i32 = arith.constant 0 : i32
    %c0_i32_0 = arith.constant 0 : i32
    return %arg0, %c0_i32 : i32, i32
  }
}

module attributes {stable_mosaic.version = 11 : i64} {
  func.func @_linear_kernel(%arg0: i32, %arg1: i32, %arg2: i32, %arg3: memref<16x256xbf16, #tpu.memory_space<vmem>>, %arg4: memref<256x512xbf16, #tpu.memory_space<vmem>>, %arg5: memref<1x512xbf16, #tpu.memory_space<vmem>>, %arg6: memref<16x512xbf16, #tpu.memory_space<vmem>>, %arg7: memref<16x512xf32, #tpu.memory_space<vmem>>) attributes {dimension_semantics = [#tpu.dimension_semantics<parallel>, #tpu.dimension_semantics<parallel>, #tpu.dimension_semantics<arbitrary>], iteration_bounds = array<i64: 1, 1, 1>, scalar_prefetch = 0 : i64, scratch_operands = 1 : i64, tpu.core_type = #tpu.core_type<tc>, window_params = [{transform_indices = @transform_0, window_bounds = array<i64: 16, 256>}, {transform_indices = @transform_1, window_bounds = array<i64: 256, 512>}, {transform_indices = @transform_2, window_bounds = array<i64: 1, 512>}, {transform_indices = @transform_3, window_bounds = array<i64: 16, 512>}]} {
    %c0_i32 = arith.constant 0 : i32
    %0 = arith.cmpi eq, %arg2, %c0_i32 : i32
    %1 = arith.extui %0 : i1 to i32
    %c0_i32_0 = arith.constant 0 : i32
    %2 = arith.cmpi ne, %1, %c0_i32_0 : i32
    scf.if %2 {
      %cst_10 = arith.constant 0.000000e+00 : f32
      %12 = vector.broadcast %cst_10 : f32 to vector<16x512xf32>
      %c0_11 = arith.constant 0 : index
      %c0_12 = arith.constant 0 : index
      %13 = vector.load %arg7[%c0_11, %c0_12] : memref<16x512xf32, #tpu.memory_space<vmem>>, vector<16x512xf32>
      tpu.vector_store %arg7[%c0_11, %c0_12], %12 {strides = array<i32>} : memref<16x512xf32, #tpu.memory_space<vmem>>, vector<16x512xf32>,
    } else {
    }
    %c0 = arith.constant 0 : index
    %c0_1 = arith.constant 0 : index
    %3 = vector.load %arg7[%c0, %c0_1] : memref<16x512xf32, #tpu.memory_space<vmem>>, vector<16x512xf32>
    %c0_2 = arith.constant 0 : index
    %c0_3 = arith.constant 0 : index
    %4 = vector.load %arg3[%c0_2, %c0_3] : memref<16x256xbf16, #tpu.memory_space<vmem>>, vector<16x256xbf16>
    %c0_4 = arith.constant 0 : index
    %c0_5 = arith.constant 0 : index
    %5 = vector.load %arg4[%c0_4, %c0_5] : memref<256x512xbf16, #tpu.memory_space<vmem>>, vector<256x512xbf16>
    %cst = arith.constant dense<0.000000e+00> : vector<16x512xf32>
    %6 = tpu.matmul %4, %5, %cst {dimension_numbers = #tpu.dot_dimension_numbers<[1], [0], [0], [1], [0, 0, 1, 1], [], []>} : vector<16x256xbf16>, vector<256x512xbf16>, vector<16x512xf32> -> vector<16x512xf32>
    %7 = arith.addf %3, %6 : vector<16x512xf32>
    %c0_6 = arith.constant 0 : index
    %c0_7 = arith.constant 0 : index
    %8 = vector.load %arg7[%c0_6, %c0_7] : memref<16x512xf32, #tpu.memory_space<vmem>>, vector<16x512xf32>
    tpu.vector_store %arg7[%c0_6, %c0_7], %7 {strides = array<i32>} : memref<16x512xf32, #tpu.memory_space<vmem>>, vector<16x512xf32>,
    %c0_i32_8 = arith.constant 0 : i32
    %9 = arith.cmpi eq, %arg2, %c0_i32_8 : i32
    %10 = arith.extui %9 : i1 to i32
    %c0_i32_9 = arith.constant 0 : i32
    %11 = arith.cmpi ne, %10, %c0_i32_9 : i32
    scf.if %11 {
      %c0_10 = arith.constant 0 : index
      %c0_11 = arith.constant 0 : index
      %12 = vector.load %arg7[%c0_10, %c0_11] : memref<16x512xf32, #tpu.memory_space<vmem>>, vector<16x512xf32>
      %c0_12 = arith.constant 0 : index
      %c0_13 = arith.constant 0 : index
      %13 = vector.load %arg5[%c0_12, %c0_13] : memref<1x512xbf16, #tpu.memory_space<vmem>>, vector<1x512xbf16>
      %14 = arith.extf %13 : vector<1x512xbf16> to vector<1x512xf32>
      %15 = vector.broadcast %14 : vector<1x512xf32> to vector<16x512xf32>
      %16 = arith.addf %12, %15 : vector<16x512xf32>
      %17 = arith.truncf %16 : vector<16x512xf32> to vector<16x512xbf16>
      %c0_14 = arith.constant 0 : index
      %c0_15 = arith.constant 0 : index
      %18 = vector.load %arg6[%c0_14, %c0_15] : memref<16x512xbf16, #tpu.memory_space<vmem>>, vector<16x512xbf16>
      tpu.vector_store %arg6[%c0_14, %c0_15], %17 {strides = array<i32>} : memref<16x512xbf16, #tpu.memory_space<vmem>>, vector<16x512xbf16>,
    } else {
    }
    return
  }
  func.func @transform_0(%arg0: i32, %arg1: i32, %arg2: i32) -> (i32, i32) {
    %c0_i32 = arith.constant 0 : i32
    return %arg0, %arg2 : i32, i32
  }
  func.func @transform_1(%arg0: i32, %arg1: i32, %arg2: i32) -> (i32, i32) {
    %c0_i32 = arith.constant 0 : i32
    return %arg2, %arg1 : i32, i32
  }
  func.func @transform_2(%arg0: i32, %arg1: i32, %arg2: i32) -> (i32, i32) {
    %c0_i32 = arith.constant 0 : i32
    %c0_i32_0 = arith.constant 0 : i32
    return %c0_i32, %arg1 : i32, i32
  }
  func.func @transform_3(%arg0: i32, %arg1: i32, %arg2: i32) -> (i32, i32) {
    %c0_i32 = arith.constant 0 : i32
    return %arg0, %arg1 : i32, i32
  }
}

module attributes {stable_mosaic.version = 11 : i64} {
  func.func @_mha_flash_kernel(%arg0: i32, %arg1: i32, %arg2: i32, %arg3: i32, %arg4: memref<1x8x128xbf16, #tpu.memory_space<vmem>>, %arg5: memref<1x8x128xbf16, #tpu.memory_space<vmem>>, %arg6: memref<1x8x128xbf16, #tpu.memory_space<vmem>>, %arg7: memref<1x1x8xi32, #tpu.memory_space<vmem>>, %arg8: memref<1x8x128xbf16, #tpu.memory_space<vmem>>, %arg9: memref<8x1xf32, #tpu.memory_space<vmem>>, %arg10: memref<8x1xf32, #tpu.memory_space<vmem>>, %arg11: memref<8x128xf32, #tpu.memory_space<vmem>>) attributes {dimension_semantics = [#tpu.dimension_semantics<parallel>, #tpu.dimension_semantics<parallel>, #tpu.dimension_semantics<parallel>, #tpu.dimension_semantics<arbitrary>], iteration_bounds = array<i64: 2, 2, 1, 1>, scalar_prefetch = 0 : i64, scratch_operands = 3 : i64, tpu.core_type = #tpu.core_type<tc>, window_params = [{transform_indices = @transform_0, window_bounds = array<i64: 1, 8, 128>}, {transform_indices = @transform_1, window_bounds = array<i64: 1, 8, 128>}, {transform_indices = @transform_2, window_bounds = array<i64: 1, 8, 128>}, {transform_indices = @transform_3, window_bounds = array<i64: 1, 1, 8>}, {transform_indices = @transform_4, window_bounds = array<i64: 1, 8, 128>}]} {
    %c0_i32 = arith.constant 0 : i32
    %0 = arith.cmpi eq, %arg3, %c0_i32 : i32
    %1 = arith.extui %0 : i1 to i32
    %c0_i32_0 = arith.constant 0 : i32
    %2 = arith.cmpi ne, %1, %c0_i32_0 : i32
    scf.if %2 {
      %cst_32 = arith.constant 0xFF800000 : f32
      %48 = vector.broadcast %cst_32 : f32 to vector<8x1xf32>
      %c0_33 = arith.constant 0 : index
      %c0_34 = arith.constant 0 : index
      %49 = vector.load %arg9[%c0_33, %c0_34] : memref<8x1xf32, #tpu.memory_space<vmem>>, vector<8x1xf32>
      tpu.vector_store %arg9[%c0_33, %c0_34], %48 {strides = array<i32>} : memref<8x1xf32, #tpu.memory_space<vmem>>, vector<8x1xf32>,
      %cst_35 = arith.constant 0.000000e+00 : f32
      %50 = vector.broadcast %cst_35 : f32 to vector<8x1xf32>
      %c0_36 = arith.constant 0 : index
      %c0_37 = arith.constant 0 : index
      %51 = vector.load %arg10[%c0_36, %c0_37] : memref<8x1xf32, #tpu.memory_space<vmem>>, vector<8x1xf32>
      tpu.vector_store %arg10[%c0_36, %c0_37], %50 {strides = array<i32>} : memref<8x1xf32, #tpu.memory_space<vmem>>, vector<8x1xf32>,
      %cst_38 = arith.constant 0.000000e+00 : f32
      %52 = vector.broadcast %cst_38 : f32 to vector<8x128xf32>
      %c0_39 = arith.constant 0 : index
      %c0_40 = arith.constant 0 : index
      %53 = vector.load %arg11[%c0_39, %c0_40] : memref<8x128xf32, #tpu.memory_space<vmem>>, vector<8x128xf32>
      tpu.vector_store %arg11[%c0_39, %c0_40], %52 {strides = array<i32>} : memref<8x128xf32, #tpu.memory_space<vmem>>, vector<8x128xf32>,
    } else {
    }
    %c0 = arith.constant 0 : index
    %c0_1 = arith.constant 0 : index
    %c0_2 = arith.constant 0 : index
    %3 = vector.load %arg4[%c0, %c0_1, %c0_2] : memref<1x8x128xbf16, #tpu.memory_space<vmem>>, vector<1x8x128xbf16>
    %4 = vector.shape_cast %3 : vector<1x8x128xbf16> to vector<8x128xbf16>
    %5 = arith.extf %4 : vector<8x128xbf16> to vector<8x128xf32>
    %c0_3 = arith.constant 0 : index
    %c0_4 = arith.constant 0 : index
    %c0_5 = arith.constant 0 : index
    %6 = vector.load %arg5[%c0_3, %c0_4, %c0_5] : memref<1x8x128xbf16, #tpu.memory_space<vmem>>, vector<1x8x128xbf16>
    %7 = vector.shape_cast %6 : vector<1x8x128xbf16> to vector<8x128xbf16>
    %8 = arith.extf %7 : vector<8x128xbf16> to vector<8x128xf32>
    %c0_6 = arith.constant 0 : index
    %c0_7 = arith.constant 0 : index
    %c0_8 = arith.constant 0 : index
    %9 = vector.load %arg6[%c0_6, %c0_7, %c0_8] : memref<1x8x128xbf16, #tpu.memory_space<vmem>>, vector<1x8x128xbf16>
    %10 = vector.shape_cast %9 : vector<1x8x128xbf16> to vector<8x128xbf16>
    %11 = arith.extf %10 : vector<8x128xbf16> to vector<8x128xf32>
    %cst = arith.constant dense<0.000000e+00> : vector<8x8xf32>
    %12 = tpu.matmul %5, %8, %cst {dimension_numbers = #tpu.dot_dimension_numbers<[1], [1], [0], [0], [0, 0, 1, 0], [], []>} : vector<8x128xf32>, vector<8x128xf32>, vector<8x8xf32> -> vector<8x8xf32>
    %cst_9 = arith.constant 0.0883883461 : f32
    %13 = vector.broadcast %cst_9 : f32 to vector<8x8xf32>
    %14 = arith.mulf %12, %13 : vector<8x8xf32>
    %c0_10 = arith.constant 0 : index
    %c0_11 = arith.constant 0 : index
    %c0_12 = arith.constant 0 : index
    %15 = vector.load %arg7[%c0_10, %c0_11, %c0_12] : memref<1x1x8xi32, #tpu.memory_space<vmem>>, vector<1x1x8xi32>
    %16 = vector.shape_cast %15 : vector<1x1x8xi32> to vector<1x8xi32>
    %c0_i32_13 = arith.constant 0 : i32
    %17 = vector.broadcast %c0_i32_13 : i32 to vector<1x8xi32>
    %18 = arith.cmpi sgt, %16, %17 : vector<1x8xi32>
    %cst_14 = arith.constant -1.000000e+10 : f32
    %19 = vector.shape_cast %18 : vector<1x8xi1> to vector<1x8xi1>
    %20 = vector.broadcast %19 : vector<1x8xi1> to vector<8x8xi1>
    %21 = vector.broadcast %cst_14 : f32 to vector<8x8xf32>
    %22 = arith.select %20, %14, %21 : vector<8x8xi1>, vector<8x8xf32>
    %c0_15 = arith.constant 0 : index
    %c0_16 = arith.constant 0 : index
    %23 = vector.load %arg9[%c0_15, %c0_16] : memref<8x1xf32, #tpu.memory_space<vmem>>, vector<8x1xf32>
    %cst_17 = arith.constant dense<0xFF800000> : vector<8xf32>
    %24 = vector.multi_reduction <maximumf>, %22, %cst_17 [1] : vector<8x8xf32> to vector<8xf32>
    %25 = vector.shape_cast %24 : vector<8xf32> to vector<8x1xf32>
    %26 = arith.maximumf %23, %25 : vector<8x1xf32>
    %27 = arith.subf %23, %26 : vector<8x1xf32>
    %28 = math.exp %27 : vector<8x1xf32>
    %29 = vector.broadcast %26 : vector<8x1xf32> to vector<8x8xf32>
    %30 = arith.subf %22, %29 : vector<8x8xf32>
    %31 = math.exp %30 : vector<8x8xf32>
    %c0_18 = arith.constant 0 : index
    %c0_19 = arith.constant 0 : index
    %32 = vector.load %arg10[%c0_18, %c0_19] : memref<8x1xf32, #tpu.memory_space<vmem>>, vector<8x1xf32>
    %33 = arith.mulf %28, %32 : vector<8x1xf32>
    %cst_20 = arith.constant dense<0.000000e+00> : vector<8xf32>
    %34 = vector.multi_reduction <add>, %31, %cst_20 [1] : vector<8x8xf32> to vector<8xf32>
    %35 = vector.shape_cast %34 : vector<8xf32> to vector<8x1xf32>
    %36 = arith.addf %33, %35 : vector<8x1xf32>
    %c0_21 = arith.constant 0 : index
    %c0_22 = arith.constant 0 : index
    %37 = vector.load %arg10[%c0_21, %c0_22] : memref<8x1xf32, #tpu.memory_space<vmem>>, vector<8x1xf32>
    tpu.vector_store %arg10[%c0_21, %c0_22], %36 {strides = array<i32>} : memref<8x1xf32, #tpu.memory_space<vmem>>, vector<8x1xf32>,
    %c0_23 = arith.constant 0 : index
    %c0_24 = arith.constant 0 : index
    %38 = vector.load %arg11[%c0_23, %c0_24] : memref<8x128xf32, #tpu.memory_space<vmem>>, vector<8x128xf32>
    %39 = vector.broadcast %28 : vector<8x1xf32> to vector<8x128xf32>
    %40 = arith.mulf %39, %38 : vector<8x128xf32>
    %cst_25 = arith.constant dense<0.000000e+00> : vector<8x128xf32>
    %41 = tpu.matmul %31, %11, %cst_25 {dimension_numbers = #tpu.dot_dimension_numbers<[1], [0], [0], [1], [0, 0, 1, 1], [], []>} : vector<8x8xf32>, vector<8x128xf32>, vector<8x128xf32> -> vector<8x128xf32>
    %42 = arith.addf %40, %41 : vector<8x128xf32>
    %c0_26 = arith.constant 0 : index
    %c0_27 = arith.constant 0 : index
    %43 = vector.load %arg11[%c0_26, %c0_27] : memref<8x128xf32, #tpu.memory_space<vmem>>, vector<8x128xf32>
    tpu.vector_store %arg11[%c0_26, %c0_27], %42 {strides = array<i32>} : memref<8x128xf32, #tpu.memory_space<vmem>>, vector<8x128xf32>,
    %c0_28 = arith.constant 0 : index
    %c0_29 = arith.constant 0 : index
    %44 = vector.load %arg9[%c0_28, %c0_29] : memref<8x1xf32, #tpu.memory_space<vmem>>, vector<8x1xf32>
    tpu.vector_store %arg9[%c0_28, %c0_29], %26 {strides = array<i32>} : memref<8x1xf32, #tpu.memory_space<vmem>>, vector<8x1xf32>,
    %c0_i32_30 = arith.constant 0 : i32
    %45 = arith.cmpi eq, %arg3, %c0_i32_30 : i32
    %46 = arith.extui %45 : i1 to i32
    %c0_i32_31 = arith.constant 0 : i32
    %47 = arith.cmpi ne, %46, %c0_i32_31 : i32
    scf.if %47 {
      %c0_32 = arith.constant 0 : index
      %c0_33 = arith.constant 0 : index
      %48 = vector.load %arg11[%c0_32, %c0_33] : memref<8x128xf32, #tpu.memory_space<vmem>>, vector<8x128xf32>
      %c0_34 = arith.constant 0 : index
      %c0_35 = arith.constant 0 : index
      %49 = vector.load %arg10[%c0_34, %c0_35] : memref<8x1xf32, #tpu.memory_space<vmem>>, vector<8x1xf32>
      %50 = tpu.reciprocal %49 {approx = true} : vector<8x1xf32> -> vector<8x1xf32>
      %51 = vector.broadcast %50 : vector<8x1xf32> to vector<8x128xf32>
      %52 = arith.mulf %48, %51 : vector<8x128xf32>
      %53 = arith.truncf %52 : vector<8x128xf32> to vector<8x128xbf16>
      %c0_36 = arith.constant 0 : index
      %c0_37 = arith.constant 0 : index
      %c0_38 = arith.constant 0 : index
      %54 = vector.load %arg8[%c0_36, %c0_37, %c0_38] : memref<1x8x128xbf16, #tpu.memory_space<vmem>>, vector<1x8x128xbf16>
      %55 = vector.shape_cast %54 : vector<1x8x128xbf16> to vector<8x128xbf16>
      %56 = vector.shape_cast %53 : vector<8x128xbf16> to vector<1x8x128xbf16>
      tpu.vector_store %arg8[%c0_36, %c0_37, %c0_38], %56 {strides = array<i32>} : memref<1x8x128xbf16, #tpu.memory_space<vmem>>, vector<1x8x128xbf16>,
    } else {
    }
    return
  }
  func.func @transform_0(%arg0: i32, %arg1: i32, %arg2: i32, %arg3: i32) -> (i32, i32, i32) {
    %c0_i32 = arith.constant 0 : i32
    %0 = arith.addi %c0_i32, %arg1 : i32
    %c0_i32_0 = arith.constant 0 : i32
    return %arg0, %arg2, %0 : i32, i32, i32
  }
  func.func @transform_1(%arg0: i32, %arg1: i32, %arg2: i32, %arg3: i32) -> (i32, i32, i32) {
    %c0_i32 = arith.constant 0 : i32
    %0 = arith.addi %c0_i32, %arg1 : i32
    %c0_i32_0 = arith.constant 0 : i32
    return %arg0, %arg3, %0 : i32, i32, i32
  }
  func.func @transform_2(%arg0: i32, %arg1: i32, %arg2: i32, %arg3: i32) -> (i32, i32, i32) {
    %c2_i32 = arith.constant 2 : i32
    %0 = arith.addi %c2_i32, %arg1 : i32
    %c0_i32 = arith.constant 0 : i32
    return %arg0, %arg3, %0 : i32, i32, i32
  }
  func.func @transform_3(%arg0: i32, %arg1: i32, %arg2: i32, %arg3: i32) -> (i32, i32, i32) {
    %c0_i32 = arith.constant 0 : i32
    %c0_i32_0 = arith.constant 0 : i32
    return %arg0, %c0_i32, %arg3 : i32, i32, i32
  }
  func.func @transform_4(%arg0: i32, %arg1: i32, %arg2: i32, %arg3: i32) -> (i32, i32, i32) {
    %c0_i32 = arith.constant 0 : i32
    return %arg0, %arg2, %arg1 : i32, i32, i32
  }
}

module attributes {stable_mosaic.version = 11 : i64} {
  func.func @_mha_flash_kernel(%arg0: i32, %arg1: i32, %arg2: i32, %arg3: i32, %arg4: memref<1x8x128xbf16, #tpu.memory_space<vmem>>, %arg5: memref<1x8x128xbf16, #tpu.memory_space<vmem>>, %arg6: memref<1x8x128xbf16, #tpu.memory_space<vmem>>, %arg7: memref<1x1x8xi32, #tpu.memory_space<vmem>>, %arg8: memref<1x8x128xbf16, #tpu.memory_space<vmem>>, %arg9: memref<1x1x8x8xf32, #tpu.memory_space<vmem>>, %arg10: memref<8x1xf32, #tpu.memory_space<vmem>>, %arg11: memref<8x1xf32, #tpu.memory_space<vmem>>, %arg12: memref<8x128xf32, #tpu.memory_space<vmem>>) attributes {dimension_semantics = [#tpu.dimension_semantics<parallel>, #tpu.dimension_semantics<parallel>, #tpu.dimension_semantics<parallel>, #tpu.dimension_semantics<arbitrary>], iteration_bounds = array<i64: 2, 2, 1, 1>, scalar_prefetch = 0 : i64, scratch_operands = 3 : i64, tpu.core_type = #tpu.core_type<tc>, window_params = [{transform_indices = @transform_0, window_bounds = array<i64: 1, 8, 128>}, {transform_indices = @transform_1, window_bounds = array<i64: 1, 8, 128>}, {transform_indices = @transform_2, window_bounds = array<i64: 1, 8, 128>}, {transform_indices = @transform_3, window_bounds = array<i64: 1, 1, 8>}, {transform_indices = @transform_4, window_bounds = array<i64: 1, 8, 128>}, {transform_indices = @transform_5, window_bounds = array<i64: 1, 1, 8, 8>}]} {
    %c0_i32 = arith.constant 0 : i32
    %0 = arith.cmpi eq, %arg3, %c0_i32 : i32
    %1 = arith.extui %0 : i1 to i32
    %c0_i32_0 = arith.constant 0 : i32
    %2 = arith.cmpi ne, %1, %c0_i32_0 : i32
    scf.if %2 {
      %cst_32 = arith.constant 0xFF800000 : f32
      %48 = vector.broadcast %cst_32 : f32 to vector<8x1xf32>
      %c0_33 = arith.constant 0 : index
      %c0_34 = arith.constant 0 : index
      %49 = vector.load %arg10[%c0_33, %c0_34] : memref<8x1xf32, #tpu.memory_space<vmem>>, vector<8x1xf32>
      tpu.vector_store %arg10[%c0_33, %c0_34], %48 {strides = array<i32>} : memref<8x1xf32, #tpu.memory_space<vmem>>, vector<8x1xf32>,
      %cst_35 = arith.constant 0.000000e+00 : f32
      %50 = vector.broadcast %cst_35 : f32 to vector<8x1xf32>
      %c0_36 = arith.constant 0 : index
      %c0_37 = arith.constant 0 : index
      %51 = vector.load %arg11[%c0_36, %c0_37] : memref<8x1xf32, #tpu.memory_space<vmem>>, vector<8x1xf32>
      tpu.vector_store %arg11[%c0_36, %c0_37], %50 {strides = array<i32>} : memref<8x1xf32, #tpu.memory_space<vmem>>, vector<8x1xf32>,
      %cst_38 = arith.constant 0.000000e+00 : f32
      %52 = vector.broadcast %cst_38 : f32 to vector<8x128xf32>
      %c0_39 = arith.constant 0 : index
      %c0_40 = arith.constant 0 : index
      %53 = vector.load %arg12[%c0_39, %c0_40] : memref<8x128xf32, #tpu.memory_space<vmem>>, vector<8x128xf32>
      tpu.vector_store %arg12[%c0_39, %c0_40], %52 {strides = array<i32>} : memref<8x128xf32, #tpu.memory_space<vmem>>, vector<8x128xf32>,
    } else {
    }
    %c0 = arith.constant 0 : index
    %c0_1 = arith.constant 0 : index
    %c0_2 = arith.constant 0 : index
    %3 = vector.load %arg4[%c0, %c0_1, %c0_2] : memref<1x8x128xbf16, #tpu.memory_space<vmem>>, vector<1x8x128xbf16>
    %4 = vector.shape_cast %3 : vector<1x8x128xbf16> to vector<8x128xbf16>
    %5 = arith.extf %4 : vector<8x128xbf16> to vector<8x128xf32>
    %c0_3 = arith.constant 0 : index
    %c0_4 = arith.constant 0 : index
    %c0_5 = arith.constant 0 : index
    %6 = vector.load %arg5[%c0_3, %c0_4, %c0_5] : memref<1x8x128xbf16, #tpu.memory_space<vmem>>, vector<1x8x128xbf16>
    %7 = vector.shape_cast %6 : vector<1x8x128xbf16> to vector<8x128xbf16>
    %8 = arith.extf %7 : vector<8x128xbf16> to vector<8x128xf32>
    %c0_6 = arith.constant 0 : index
    %c0_7 = arith.constant 0 : index
    %c0_8 = arith.constant 0 : index
    %9 = vector.load %arg6[%c0_6, %c0_7, %c0_8] : memref<1x8x128xbf16, #tpu.memory_space<vmem>>, vector<1x8x128xbf16>
    %10 = vector.shape_cast %9 : vector<1x8x128xbf16> to vector<8x128xbf16>
    %11 = arith.extf %10 : vector<8x128xbf16> to vector<8x128xf32>
    %cst = arith.constant dense<0.000000e+00> : vector<8x8xf32>
    %12 = tpu.matmul %5, %8, %cst {dimension_numbers = #tpu.dot_dimension_numbers<[1], [1], [0], [0], [0, 0, 1, 0], [], []>} : vector<8x128xf32>, vector<8x128xf32>, vector<8x8xf32> -> vector<8x8xf32>
    %cst_9 = arith.constant 0.0883883461 : f32
    %13 = vector.broadcast %cst_9 : f32 to vector<8x8xf32>
    %14 = arith.mulf %12, %13 : vector<8x8xf32>
    %c0_10 = arith.constant 0 : index
    %c0_11 = arith.constant 0 : index
    %c0_12 = arith.constant 0 : index
    %15 = vector.load %arg7[%c0_10, %c0_11, %c0_12] : memref<1x1x8xi32, #tpu.memory_space<vmem>>, vector<1x1x8xi32>
    %16 = vector.shape_cast %15 : vector<1x1x8xi32> to vector<1x8xi32>
    %c0_i32_13 = arith.constant 0 : i32
    %17 = vector.broadcast %c0_i32_13 : i32 to vector<1x8xi32>
    %18 = arith.cmpi sgt, %16, %17 : vector<1x8xi32>
    %cst_14 = arith.constant -1.000000e+10 : f32
    %19 = vector.shape_cast %18 : vector<1x8xi1> to vector<1x8xi1>
    %20 = vector.broadcast %19 : vector<1x8xi1> to vector<8x8xi1>
    %21 = vector.broadcast %cst_14 : f32 to vector<8x8xf32>
    %22 = arith.select %20, %14, %21 : vector<8x8xi1>, vector<8x8xf32>
    %c0_15 = arith.constant 0 : index
    %c0_16 = arith.constant 0 : index
    %23 = vector.load %arg10[%c0_15, %c0_16] : memref<8x1xf32, #tpu.memory_space<vmem>>, vector<8x1xf32>
    %cst_17 = arith.constant dense<0xFF800000> : vector<8xf32>
    %24 = vector.multi_reduction <maximumf>, %22, %cst_17 [1] : vector<8x8xf32> to vector<8xf32>
    %25 = vector.shape_cast %24 : vector<8xf32> to vector<8x1xf32>
    %26 = arith.maximumf %23, %25 : vector<8x1xf32>
    %27 = arith.subf %23, %26 : vector<8x1xf32>
    %28 = math.exp %27 : vector<8x1xf32>
    %29 = vector.broadcast %26 : vector<8x1xf32> to vector<8x8xf32>
    %30 = arith.subf %22, %29 : vector<8x8xf32>
    %31 = math.exp %30 : vector<8x8xf32>
    %c0_18 = arith.constant 0 : index
    %c0_19 = arith.constant 0 : index
    %32 = vector.load %arg11[%c0_18, %c0_19] : memref<8x1xf32, #tpu.memory_space<vmem>>, vector<8x1xf32>
    %33 = arith.mulf %28, %32 : vector<8x1xf32>
    %cst_20 = arith.constant dense<0.000000e+00> : vector<8xf32>
    %34 = vector.multi_reduction <add>, %31, %cst_20 [1] : vector<8x8xf32> to vector<8xf32>
    %35 = vector.shape_cast %34 : vector<8xf32> to vector<8x1xf32>
    %36 = arith.addf %33, %35 : vector<8x1xf32>
    %c0_21 = arith.constant 0 : index
    %c0_22 = arith.constant 0 : index
    %37 = vector.load %arg11[%c0_21, %c0_22] : memref<8x1xf32, #tpu.memory_space<vmem>>, vector<8x1xf32>
    tpu.vector_store %arg11[%c0_21, %c0_22], %36 {strides = array<i32>} : memref<8x1xf32, #tpu.memory_space<vmem>>, vector<8x1xf32>,
    %c0_23 = arith.constant 0 : index
    %c0_24 = arith.constant 0 : index
    %38 = vector.load %arg12[%c0_23, %c0_24] : memref<8x128xf32, #tpu.memory_space<vmem>>, vector<8x128xf32>
    %39 = vector.broadcast %28 : vector<8x1xf32> to vector<8x128xf32>
    %40 = arith.mulf %39, %38 : vector<8x128xf32>
    %cst_25 = arith.constant dense<0.000000e+00> : vector<8x128xf32>
    %41 = tpu.matmul %31, %11, %cst_25 {dimension_numbers = #tpu.dot_dimension_numbers<[1], [0], [0], [1], [0, 0, 1, 1], [], []>} : vector<8x8xf32>, vector<8x128xf32>, vector<8x128xf32> -> vector<8x128xf32>
    %42 = arith.addf %40, %41 : vector<8x128xf32>
    %c0_26 = arith.constant 0 : index
    %c0_27 = arith.constant 0 : index
    %43 = vector.load %arg12[%c0_26, %c0_27] : memref<8x128xf32, #tpu.memory_space<vmem>>, vector<8x128xf32>
    tpu.vector_store %arg12[%c0_26, %c0_27], %42 {strides = array<i32>} : memref<8x128xf32, #tpu.memory_space<vmem>>, vector<8x128xf32>,
    %c0_28 = arith.constant 0 : index
    %c0_29 = arith.constant 0 : index
    %44 = vector.load %arg10[%c0_28, %c0_29] : memref<8x1xf32, #tpu.memory_space<vmem>>, vector<8x1xf32>
    tpu.vector_store %arg10[%c0_28, %c0_29], %26 {strides = array<i32>} : memref<8x1xf32, #tpu.memory_space<vmem>>, vector<8x1xf32>,
    %c0_i32_30 = arith.constant 0 : i32
    %45 = arith.cmpi eq, %arg3, %c0_i32_30 : i32
    %46 = arith.extui %45 : i1 to i32
    %c0_i32_31 = arith.constant 0 : i32
    %47 = arith.cmpi ne, %46, %c0_i32_31 : i32
    scf.if %47 {
      %c0_32 = arith.constant 0 : index
      %c0_33 = arith.constant 0 : index
      %48 = vector.load %arg12[%c0_32, %c0_33] : memref<8x128xf32, #tpu.memory_space<vmem>>, vector<8x128xf32>
      %c0_34 = arith.constant 0 : index
      %c0_35 = arith.constant 0 : index
      %49 = vector.load %arg11[%c0_34, %c0_35] : memref<8x1xf32, #tpu.memory_space<vmem>>, vector<8x1xf32>
      %50 = tpu.reciprocal %49 {approx = true} : vector<8x1xf32> -> vector<8x1xf32>
      %51 = vector.broadcast %50 : vector<8x1xf32> to vector<8x128xf32>
      %52 = arith.mulf %48, %51 : vector<8x128xf32>
      %53 = arith.truncf %52 : vector<8x128xf32> to vector<8x128xbf16>
      %c0_36 = arith.constant 0 : index
      %c0_37 = arith.constant 0 : index
      %c0_38 = arith.constant 0 : index
      %54 = vector.load %arg8[%c0_36, %c0_37, %c0_38] : memref<1x8x128xbf16, #tpu.memory_space<vmem>>, vector<1x8x128xbf16>
      %55 = vector.shape_cast %54 : vector<1x8x128xbf16> to vector<8x128xbf16>
      %56 = vector.shape_cast %53 : vector<8x128xbf16> to vector<1x8x128xbf16>
      tpu.vector_store %arg8[%c0_36, %c0_37, %c0_38], %56 {strides = array<i32>} : memref<1x8x128xbf16, #tpu.memory_space<vmem>>, vector<1x8x128xbf16>,
      %c0_39 = arith.constant 0 : index
      %c0_40 = arith.constant 0 : index
      %57 = vector.load %arg11[%c0_39, %c0_40] : memref<8x1xf32, #tpu.memory_space<vmem>>, vector<8x1xf32>
      %58 = vector.broadcast %57 : vector<8x1xf32> to vector<8x8xf32>
      %59 = arith.divf %31, %58 : vector<8x8xf32>
      %c0_41 = arith.constant 0 : index
      %c0_42 = arith.constant 0 : index
      %c0_43 = arith.constant 0 : index
      %c0_44 = arith.constant 0 : index
      %60 = vector.load %arg9[%c0_41, %c0_42, %c0_43, %c0_44] : memref<1x1x8x8xf32, #tpu.memory_space<vmem>>, vector<1x1x8x8xf32>
      %61 = vector.shape_cast %60 : vector<1x1x8x8xf32> to vector<8x8xf32>
      %62 = vector.shape_cast %59 : vector<8x8xf32> to vector<1x1x8x8xf32>
      tpu.vector_store %arg9[%c0_41, %c0_42, %c0_43, %c0_44], %62 {strides = array<i32>} : memref<1x1x8x8xf32, #tpu.memory_space<vmem>>, vector<1x1x8x8xf32>,
    } else {
    }
    return
  }
  func.func @transform_0(%arg0: i32, %arg1: i32, %arg2: i32, %arg3: i32) -> (i32, i32, i32) {
    %c0_i32 = arith.constant 0 : i32
    %0 = arith.addi %c0_i32, %arg1 : i32
    %c0_i32_0 = arith.constant 0 : i32
    return %arg0, %arg2, %0 : i32, i32, i32
  }
  func.func @transform_1(%arg0: i32, %arg1: i32, %arg2: i32, %arg3: i32) -> (i32, i32, i32) {
    %c0_i32 = arith.constant 0 : i32
    %0 = arith.addi %c0_i32, %arg1 : i32
    %c0_i32_0 = arith.constant 0 : i32
    return %arg0, %arg3, %0 : i32, i32, i32
  }
  func.func @transform_2(%arg0: i32, %arg1: i32, %arg2: i32, %arg3: i32) -> (i32, i32, i32) {
    %c2_i32 = arith.constant 2 : i32
    %0 = arith.addi %c2_i32, %arg1 : i32
    %c0_i32 = arith.constant 0 : i32
    return %arg0, %arg3, %0 : i32, i32, i32
  }
  func.func @transform_3(%arg0: i32, %arg1: i32, %arg2: i32, %arg3: i32) -> (i32, i32, i32) {
    %c0_i32 = arith.constant 0 : i32
    %c0_i32_0 = arith.constant 0 : i32
    return %arg0, %c0_i32, %arg3 : i32, i32, i32
  }
  func.func @transform_4(%arg0: i32, %arg1: i32, %arg2: i32, %arg3: i32) -> (i32, i32, i32) {
    %c0_i32 = arith.constant 0 : i32
    return %arg0, %arg2, %arg1 : i32, i32, i32
  }
  func.func @transform_5(%arg0: i32, %arg1: i32, %arg2: i32, %arg3: i32) -> (i32, i32, i32, i32) {
    %c0_i32 = arith.constant 0 : i32
    %c0_i32_0 = arith.constant 0 : i32
    return %arg0, %arg1, %arg2, %c0_i32 : i32, i32, i32, i32
  }
}

module attributes {stable_mosaic.version = 11 : i64} {
  func.func @_linear_kernel(%arg0: i32, %arg1: i32, %arg2: i32, %arg3: memref<16x256xbf16, #tpu.memory_space<vmem>>, %arg4: memref<256x256xbf16, #tpu.memory_space<vmem>>, %arg5: memref<1x256xbf16, #tpu.memory_space<vmem>>, %arg6: memref<16x256xf32, #tpu.memory_space<vmem>>, %arg7: memref<16x256xf32, #tpu.memory_space<vmem>>) attributes {dimension_semantics = [#tpu.dimension_semantics<parallel>, #tpu.dimension_semantics<parallel>, #tpu.dimension_semantics<arbitrary>], iteration_bounds = array<i64: 1, 1, 1>, scalar_prefetch = 0 : i64, scratch_operands = 1 : i64, tpu.core_type = #tpu.core_type<tc>, window_params = [{transform_indices = @transform_0, window_bounds = array<i64: 16, 256>}, {transform_indices = @transform_1, window_bounds = array<i64: 256, 256>}, {transform_indices = @transform_2, window_bounds = array<i64: 1, 256>}, {transform_indices = @transform_3, window_bounds = array<i64: 16, 256>}]} {
    %c0_i32 = arith.constant 0 : i32
    %0 = arith.cmpi eq, %arg2, %c0_i32 : i32
    %1 = arith.extui %0 : i1 to i32
    %c0_i32_0 = arith.constant 0 : i32
    %2 = arith.cmpi ne, %1, %c0_i32_0 : i32
    scf.if %2 {
      %cst_10 = arith.constant 0.000000e+00 : f32
      %12 = vector.broadcast %cst_10 : f32 to vector<16x256xf32>
      %c0_11 = arith.constant 0 : index
      %c0_12 = arith.constant 0 : index
      %13 = vector.load %arg7[%c0_11, %c0_12] : memref<16x256xf32, #tpu.memory_space<vmem>>, vector<16x256xf32>
      tpu.vector_store %arg7[%c0_11, %c0_12], %12 {strides = array<i32>} : memref<16x256xf32, #tpu.memory_space<vmem>>, vector<16x256xf32>,
    } else {
    }
    %c0 = arith.constant 0 : index
    %c0_1 = arith.constant 0 : index
    %3 = vector.load %arg7[%c0, %c0_1] : memref<16x256xf32, #tpu.memory_space<vmem>>, vector<16x256xf32>
    %c0_2 = arith.constant 0 : index
    %c0_3 = arith.constant 0 : index
    %4 = vector.load %arg3[%c0_2, %c0_3] : memref<16x256xbf16, #tpu.memory_space<vmem>>, vector<16x256xbf16>
    %c0_4 = arith.constant 0 : index
    %c0_5 = arith.constant 0 : index
    %5 = vector.load %arg4[%c0_4, %c0_5] : memref<256x256xbf16, #tpu.memory_space<vmem>>, vector<256x256xbf16>
    %cst = arith.constant dense<0.000000e+00> : vector<16x256xf32>
    %6 = tpu.matmul %4, %5, %cst {dimension_numbers = #tpu.dot_dimension_numbers<[1], [0], [0], [1], [0, 0, 1, 1], [], []>} : vector<16x256xbf16>, vector<256x256xbf16>, vector<16x256xf32> -> vector<16x256xf32>
    %7 = arith.addf %3, %6 : vector<16x256xf32>
    %c0_6 = arith.constant 0 : index
    %c0_7 = arith.constant 0 : index
    %8 = vector.load %arg7[%c0_6, %c0_7] : memref<16x256xf32, #tpu.memory_space<vmem>>, vector<16x256xf32>
    tpu.vector_store %arg7[%c0_6, %c0_7], %7 {strides = array<i32>} : memref<16x256xf32, #tpu.memory_space<vmem>>, vector<16x256xf32>,
    %c0_i32_8 = arith.constant 0 : i32
    %9 = arith.cmpi eq, %arg2, %c0_i32_8 : i32
    %10 = arith.extui %9 : i1 to i32
    %c0_i32_9 = arith.constant 0 : i32
    %11 = arith.cmpi ne, %10, %c0_i32_9 : i32
    scf.if %11 {
      %c0_10 = arith.constant 0 : index
      %c0_11 = arith.constant 0 : index
      %12 = vector.load %arg7[%c0_10, %c0_11] : memref<16x256xf32, #tpu.memory_space<vmem>>, vector<16x256xf32>
      %c0_12 = arith.constant 0 : index
      %c0_13 = arith.constant 0 : index
      %13 = vector.load %arg5[%c0_12, %c0_13] : memref<1x256xbf16, #tpu.memory_space<vmem>>, vector<1x256xbf16>
      %14 = arith.extf %13 : vector<1x256xbf16> to vector<1x256xf32>
      %15 = vector.broadcast %14 : vector<1x256xf32> to vector<16x256xf32>
      %16 = arith.addf %12, %15 : vector<16x256xf32>
      %c0_14 = arith.constant 0 : index
      %c0_15 = arith.constant 0 : index
      %17 = vector.load %arg6[%c0_14, %c0_15] : memref<16x256xf32, #tpu.memory_space<vmem>>, vector<16x256xf32>
      tpu.vector_store %arg6[%c0_14, %c0_15], %16 {strides = array<i32>} : memref<16x256xf32, #tpu.memory_space<vmem>>, vector<16x256xf32>,
    } else {
    }
    return
  }
  func.func @transform_0(%arg0: i32, %arg1: i32, %arg2: i32) -> (i32, i32) {
    %c0_i32 = arith.constant 0 : i32
    return %arg1, %arg2 : i32, i32
  }
  func.func @transform_1(%arg0: i32, %arg1: i32, %arg2: i32) -> (i32, i32) {
    %c0_i32 = arith.constant 0 : i32
    return %arg2, %arg0 : i32, i32
  }
  func.func @transform_2(%arg0: i32, %arg1: i32, %arg2: i32) -> (i32, i32) {
    %c0_i32 = arith.constant 0 : i32
    %c0_i32_0 = arith.constant 0 : i32
    return %c0_i32, %arg0 : i32, i32
  }
  func.func @transform_3(%arg0: i32, %arg1: i32, %arg2: i32) -> (i32, i32) {
    %c0_i32 = arith.constant 0 : i32
    return %arg1, %arg0 : i32, i32
  }
}

</mosaic_0001>

<bundles_post_ra>
// kernel: seq2seq_forward.40
= control target key start
LH: loop header
LB: loop body
LE: loop exit
PB: predicated region body
PF: predicated region fallthrough
CT: control target
= control target key end

     0   :  { %s1853_s0 = inlined_call_operand.hbm [shape: bf16[2,8,768], index: 0, kind: input, shape index: {}, may-alias: {0,1,2}]   ;;  %s1854_s1 = inlined_call_operand.hbm [shape: bf16[2,8,768], index: 1, kind: input, shape index: {}, may-alias: {0,1,2}]   ;;  %s1855_s2 = inlined_call_operand.hbm [shape: bf16[2,8,768], index: 2, kind: input, shape index: {}, may-alias: {0,1,2}]   ;;  %s1856_s3 = inlined_call_operand.hbm [shape: s32[2,1,8], index: 3, kind: input, shape index: {}]   ;;  %s1857_s4 = inlined_call_operand.hbm [shape: bf16[2,8,256], index: 4, kind: output, shape index: {}]  }
   0x1   :  { %1878 = sst [smem:[#allocation32_spill]] %s1853_s0 }
   0x2   :  { %1879 = sst [smem:[#allocation33_spill]] %s1854_s1 }
   0x3   :  { %1880 = sst [smem:[#allocation34_spill]] %s1855_s2 }
   0x4   :  { %1881 = sst [smem:[#allocation35_spill]] %s1856_s3 }
   0x5   :  { %1882 = sst [smem:[#allocation36_spill]] %s1857_s4 }
   0x6   :  { %9 = vsyncpa [#allocation6], 0 }
   0x7   :  { %11 = vsyncpa [#allocation6 + $0x1], 0 }
   0x8   :  { %12 = vsyncpa [#allocation9], 0 }
   0x9   :  { %14 = vsyncpa [#allocation9 + $0x1], 0 }
   0xa   :  { %15 = vsyncpa [#allocation12], 0 }
   0xb   :  { %17 = vsyncpa [#allocation12 + $0x1], 0 }
   0xc   :  { %18 = vsyncpa [#allocation7], 0 }
   0xd   :  { %20 = vsyncpa [#allocation7 + $0x1], 0  ;;  %s1352_s15 = smov 0   ;;  %s1354_s16 = smov 0  }
   0xe   :  { %s1356_s17 = smov 0   ;;  %s1358_s18 = smov 0  }
   0xf   :  { %s1360_s19 = smov 0   ;;  %s1362_s20 = smov 0  }
  0x10   :  { %s1364_s21 = smov 0   ;;  %s1366_s22 = smov 0  }
  0x11   :  { %s1368_s23 = smov 0   ;;  %s1370_s24 = smov 0  }
  0x12   :  { %s1372_s25 = smov 0   ;;  %s1374_s26 = smov 0  }
  0x13   :  { %s1376_s27 = smov 0   ;;  %s1378_s28 = smov 0  }
  0x14   :  { %s1380_s29 = smov 0   ;;  %s1382_s30 = smov 0  }
  0x15   :  { %s1384_s5 = smov 0  }
  0x16 LB: > { %1883 = sst [smem:[#allocation19_spill]] %s1252_s15  ;;  %s1438_s6 = sadd.s32 4294967295, %s1316_s5   ;;  %s1316_s5 = sphi %s1384_s5, %s26_s5   ;;  %s1312_s30 = sphi %s1382_s30, %s1960_s30   ;;  %s1308_s29 = sphi %s1380_s29, %s1948_s29   ;;  %s1304_s28 = sphi %s1378_s28, %s1959_s28   ;;  %s1300_s27 = sphi %s1376_s27, %s1947_s27   ;;  %s1296_s26 = sphi %s1374_s26, %s1946_s26   ;;  %s1292_s25 = sphi %s1372_s25, %s1958_s25   ;;  %s1288_s24 = sphi %s1370_s24, %s1957_s24   ;;  %s1284_s23 = sphi %s1368_s23, %s1956_s23   ;;  %s1280_s22 = sphi %s1366_s22, %s1955_s22   ;;  %s1276_s21 = sphi %s1364_s21, %s1954_s21   ;;  %s1272_s20 = sphi %s1362_s20, %s1953_s20   ;;  %s1268_s19 = sphi %s1360_s19, %s1952_s19   ;;  %s1264_s18 = sphi %s1358_s18, %s1951_s18   ;;  %s1260_s17 = sphi %s1356_s17, %s1950_s17   ;;  %s1256_s16 = sphi %s1354_s16, %s1942_s16   ;;  %s1252_s15 = sphi %s1352_s15, %s1941_s15  }
  0x17   : > { %1884 = sst [smem:[#allocation20_spill]] %s1256_s16  ;;  %s48_s7 = sadd.s32 1, %s1308_s29 }
  0x18   : > { %1885 = sst [smem:[#allocation21_spill]] %s1260_s17  ;;  %p50_p0 = scmp.ge.s32.totalorder %s48_s7, 2 }
  0x19   : > { %1886 = sst [smem:[#allocation22_spill]] %s1280_s22  ;;  %s52_s8 = sadd.s32 1, %s1312_s30 }
  0x1a   : > { %1887 = sst [smem:[#allocation23_spill]] %s1296_s26  ;;  %p1869_p1 = scmp.eq.s32.totalorder %s1316_s5, 0 }
  0x1b   : > { %1888 = sst [smem:[#allocation24_spill]] %s1300_s27  ;;  %p1868_p2 = scmp.eq.s32.totalorder %s1438_s6, 0 }
  0x1c   : > { %1889 = sst [smem:[#allocation25_spill]] %s1304_s28  ;;  %s1962_s7 = smov (%p50_p0, %s48_s7), 0 }
  0x1d   : > { %1890 = sst [smem:[#allocation26_spill]] %s1308_s29  ;;  %s1964_s8 = smov (!%p50_p0, %s52_s8), %s1312_s30 }
  0x1e   : > { %1891 = sst [smem:[#allocation27_spill]] %s1962_s7  ;;  %s86_s9 = sadd.s32 2, %s1308_s29 }
  0x1f   : > { %s87_s10 = sadd.s32 2, %s1962_s7  ;;  %p54_p3 = scmp.ge.s32.totalorder %s1964_s8, 2 }
  0x20   : > { %s91_s11 = ssub.s32 %s86_s9, %s87_s10  ;;  %s95_s12 = sadd.s32 1, %s1284_s23 }
  0x21   : > { %p102_p4 = scmp.ne.s32.totalorder %s1284_s23, %s1280_s22  ;;  %s1966_s8 = smov (%p54_p3, %s1964_s8), 0 }
  0x22   : > { %1892 = sst [smem:[#allocation28_spill]] %s1966_s8  ;;  %p108_p6 = scmp.ne.s32.totalorder %s1280_s22, %s1276_s21 }
  0x23   : > { %p1456_p5 = por %p102_p4, %p1869_p1  ;;  %s1464_s14 = ssub.s32 %s1312_s30, %s1966_s8 }
  0x24   : > { %s118_s4 = sadd.s32 4, %s1308_s29  ;;  %s92_s27 = sor.u32 %s91_s11, %s1464_s14 }
  0x25   : > { %p1470_p7 = por %p108_p6, %p1868_p2  ;;  %p93_p8 = scmp.eq.s32.totalorder %s92_s27, 0 }
  0x26   : > { %s119_s10 = sadd.s32 4, %s1962_s7  ;;  %p1867_p9 = scmp.lt.s32.totalorder %s1316_s5, 4 }
  0x27   : > { %s1894_s9 = scalar_select %p1470_p7, 1, 0 }
  0x28   : > { %s1475_s28 = ssub.s32 %s118_s4, %s119_s10  ;;  %s834_s21 = smul.u32 6, %s1312_s30 }
  0x29   : > { %1895 = sst [smem:[#allocation29_spill]] %s1894_s9  ;;  %s244_s8 = sand.u32 1, %s1316_s5  }
  0x2a   : > { %s1478_s3 = scalar_select %p93_p8, %s1284_s23, %s95_s12  }
  0x2b   : > { %s246_s22 = sand.u32 1, %s1284_s23   ;;  %s233_s11 = sadd.s32 %s1308_s29, %s834_s21 }
  0x2c   : > { %1896 = sst [smem:[#allocation30_spill]] %s1478_s3  ;;  %s1485_s15 = sshll.u32 %s233_s11, 6 }
  0x2d   : > { %s804_s16 = sshll.u32 %s246_s22, 2  ;;  %s1897_s1 = sld [smem:[#allocation33_spill]] }
  0x2e   : > { %s248_s4 = scalar_lea.vmem [#allocation8], %s804_s16  ;;  %p1499_p10 = pnand %p1867_p9, %p1456_p5 }
  0x2f   : > { %s260_s12 = sshll.u32 %s248_s4, 4  ;;  %s1505_s22 = scalar_lea.sflag [#allocation9], %s244_s8  ;;  %s1493_s12 = int_to_ptr.vmem [resolvable:$true] %s260_s12 }
  0x30   : > { %p1014_p0 = pneg %p1499_p10 }
  0x33   : > { %s676_s17 = scalar_lea.hbm %s1897_s1, %s1485_s15  ;;  %s1017_s21 = scalar_lea.hbm %s1897_s1, 768 }
  0x34   : > { %s1491_s2 = scalar_lea.hbm %s676_s17, 128  ;;  %s1042_s9 = scalar_lea.hbm %s676_s17, 192 }
  0x35   : > { %p1013_p13 = scmp.ne.s32.totalorder %s1491_s2, %s1042_s9  ;;  %p1018_p5 = scmp.lt.u32.totalorder %s1491_s2, %s1897_s1 }
  0x36   : > { %p1019_p6 = scmp.lt.u32.totalorder %s1017_s21, %s1042_s9  ;;  %p1021_p9 = scmp.lt.u32.totalorder %s1042_s9, %s1491_s2 }
  0x37   : > { %p1015_p3 = pnand %p1014_p0, %p1013_p13 }
  0x38   : > { %p1020_p8 = por %p1019_p6, %p1018_p5 }
  0x39   : > { %p1016_p4 = pneg %p1015_p3 }
  0x3a   : > { %p1022_p2 = por %p1021_p9, %p1020_p8 }
  0x3c   : > { %p1023_p1 = pnand %p1022_p2, %p1016_p4 }
  0x3e   : > { %1026 = shalt.err (!%p1023_p1)
}
  0x3f   : > { %s1027_s17 = scalar_lea.vmem %s1493_s12, 64  ;;  %s1318_s8 = smov [#allocation8]  }
  0x40   : > { %p1028_p13 = scmp.ne.s32.totalorder %s1493_s12, %s1027_s17  ;;  %s1032_s4 = sshll.u32 %s1318_s8, 4  ;;  %s1033_s4 = int_to_ptr.vmem [resolvable:$false] %s1032_s4 }
  0x41   : > { %s1034_s16 = scalar_lea.vmem %s1033_s4, 128  ;;  %p1035_p12 = scmp.lt.s32.totalorder %s1493_s12, %s1033_s4 }
  0x42   : > { %p1030_p3 = pnand %p1028_p13, %p1014_p0  ;;  %p1036_p5 = scmp.lt.s32.totalorder %s1034_s16, %s1027_s17 }
  0x44   : > { %p1031_p11 = pneg %p1030_p3  ;;  %p1037_p6 = por %p1036_p5, %p1035_p12 }
  0x46   : > { %p1038_p9 = pnand %p1037_p6, %p1031_p11 }
  0x48   : > { %1041 = shalt.err (!%p1038_p9)
}
  0x49   : > { %851 = dma.hbm_to_vmem [thread:$0]  (!%p1499_p10), %s1491_s2, 64, %s1493_s12, %s1505_s22  }
  0x4a   : > { %p1899_p1 = scmp.lt.s32.totalorder %s1316_s5, 5  ;;  %p1900_p2 = scmp.ge.s32.totalorder %s1316_s5, 1 }
  0x4b   : > { %s799_s9 = sadd.s32 4294967294, %s1316_s5   ;;  %s59_s13 = ssub.s32 %s1308_s29, %s1962_s7 }
  0x4c   : > { %p1536_p11 = pnand %p1900_p2, %p1899_p1  ;;  %s60_s21 = sor.u32 %s59_s13, %s1464_s14 }
  0x4d   : > { %s63_s11 = sadd.s32 1, %s1296_s26  ;;  %p61_p12 = scmp.eq.s32.totalorder %s60_s21, 0 }
  0x4e   : > { %s1901_s10 = scalar_select %p1536_p11, 1, 0 }
  0x4f   : > { %p70_p0 = scmp.ne.s32.totalorder %s1296_s26, %s1292_s25  ;;  %p76_p4 = scmp.ne.s32.totalorder %s1292_s25, %s1288_s24 }
  0x50   : > { %p196_p8 = scmp.eq.s32.totalorder %s1438_s6, 3  ;;  %p1903_p13 = scmp.eq.s32.totalorder %s1316_s5, 0 }
  0x51   : > { %s1551_s27 = scalar_select %p61_p12, %s1296_s26, %s63_s11  }
  0x52   : > { %p72_p10 = por %p1903_p13, %p70_p0  ;;  %p1904_p3 = scmp.eq.s32.totalorder %s1438_s6, 0 }
  0x53   : > { %1902 = sst [smem:[#allocation31_spill]] %s1551_s27  ;;  %p1561_p6 = por %p196_p8, %p70_p0 }
  0x54   : > { %p1557_p5 = por %p1904_p3, %p76_p4  ;;  %p202_p9 = scmp.eq.s32.totalorder %s799_s9, 3 }
  0x55   : > { %s1906_s12 = scalar_select %p1561_p6, 1, 0 }
  0x56   : > { %s1905_s2 = scalar_select %p1557_p5, 1, 0 }
  0x57   : > { %s222_s17 = sand.u32 1, %s1296_s26   ;;  %s1907_s0 = sld [smem:[#allocation32_spill]] }
  0x58   : > { %p1572_p1 = por %p202_p9, %p76_p4  ;;  %s802_s21 = sshll.u32 %s222_s17, 2 }
  0x59   : > { %p1909_p2 = scmp.lt.s32.totalorder %s1316_s5, 4  ;;  %s226_s9 = scalar_lea.vmem [#allocation5], %s802_s21 }
  0x5a   : > { %s1908_s13 = scalar_select %p1572_p1, 1, 0 }
  0x5b   : > { %p1578_p12 = pnand %p1909_p2, %p72_p10  ;;  %s237_s8 = sshll.u32 %s226_s9, 4  ;;  %s1582_s8 = int_to_ptr.vmem [resolvable:$true] %s237_s8 }
  0x5c   : > { %s223_s4 = scalar_lea.sflag [#allocation6], %s222_s17 }
  0x5d   : > { %s1570_s16 = scalar_lea.hbm %s1907_s0, %s1485_s15  ;;  %p1045_p4 = pneg %p1578_p12 }
  0x5e   : > { %s1043_s1 = scalar_lea.hbm %s1570_s16, 64  ;;  %s1048_s27 = scalar_lea.hbm %s1907_s0, 768 }
  0x5f   : > { %p1044_p0 = scmp.ne.s32.totalorder %s1570_s16, %s1043_s1  ;;  %p1049_p10 = scmp.lt.u32.totalorder %s1570_s16, %s1907_s0 }
  0x60   : > { %p1050_p3 = scmp.lt.u32.totalorder %s1048_s27, %s1043_s1  ;;  %p1052_p2 = scmp.lt.u32.totalorder %s1043_s1, %s1570_s16 }
  0x61   : > { %p1046_p8 = pnand %p1045_p4, %p1044_p0 }
  0x62   : > { %p1051_p9 = por %p1050_p3, %p1049_p10 }
  0x63   : > { %p1047_p13 = pneg %p1046_p8 }
  0x64   : > { %p1053_p1 = por %p1052_p2, %p1051_p9 }
  0x66   : > { %p1054_p6 = pnand %p1053_p1, %p1047_p13 }
  0x68   : > { %1057 = shalt.err (!%p1054_p6)
}
  0x69   : > { %s1058_s17 = scalar_lea.vmem %s1582_s8, 64  ;;  %s1319_s29 = smov [#allocation5]  }
  0x6a   : > { %p1059_p0 = scmp.ne.s32.totalorder %s1582_s8, %s1058_s17  ;;  %s1063_s7 = sshll.u32 %s1319_s29, 4  ;;  %s1064_s7 = int_to_ptr.vmem [resolvable:$false] %s1063_s7 }
  0x6b   : > { %s1065_s3 = scalar_lea.vmem %s1064_s7, 128  ;;  %p1066_p5 = scmp.lt.s32.totalorder %s1582_s8, %s1064_s7 }
  0x6c   : > { %p1061_p8 = pnand %p1059_p0, %p1045_p4  ;;  %p1067_p10 = scmp.lt.s32.totalorder %s1065_s3, %s1058_s17 }
  0x6e   : > { %p1062_p7 = pneg %p1061_p8  ;;  %p1068_p3 = por %p1067_p10, %p1066_p5 }
  0x70   : > { %p1069_p9 = pnand %p1068_p3, %p1062_p7 }
  0x72   : > { %1072 = shalt.err (!%p1069_p9)
}
  0x73   : > { %848 = dma.hbm_to_vmem [thread:$0]  (!%p1578_p12), %s1570_s16, 64, %s1582_s8, %s223_s4  }
  0x74   : > { %s124_s1 = sor.u32 %s1475_s28, %s1464_s14  ;;  %s127_s26 = sadd.s32 1, %s1272_s20 }
  0x75   : > { %p125_p7 = scmp.eq.s32.totalorder %s124_s1, 0  ;;  %p134_p5 = scmp.ne.s32.totalorder %s1272_s20, %s1268_s19 }
  0x76   : > { %p140_p6 = scmp.ne.s32.totalorder %s1268_s19, %s1264_s18  ;;  %s269_s27 = sand.u32 1, %s1272_s20  }
  0x77   : > { %s1618_s21 = scalar_select %p125_p7, %s1272_s20, %s127_s26  }
  0x78   : > { %p1911_p1 = scmp.eq.s32.totalorder %s1316_s5, 0  ;;  %p1912_p13 = scmp.eq.s32.totalorder %s1438_s6, 0 }
  0x79   : > { %s806_s9 = sshll.u32 %s269_s27, 2  ;;  %s1914_s7 = sld [smem:[#allocation34_spill]] }
  0x7a   : > { %p136_p4 = por %p134_p5, %p1911_p1  ;;  %p1624_p2 = por %p140_p6, %p1912_p13 }
  0x7b   : > { %s271_s18 = scalar_lea.vmem [#allocation10], %s806_s9  ;;  %p1915_p12 = scmp.lt.s32.totalorder %s1316_s5, 4 }
  0x7c   : > { %s1913_s11 = scalar_select %p1624_p2, 1, 0 }
  0x7d   : > { %s283_s8 = sshll.u32 %s271_s18, 4  ;;  %p1636_p0 = pnand %p1915_p12, %p136_p4  ;;  %s284_s8 = int_to_ptr.vmem [resolvable:$true] %s283_s8 }
  0x7f   : > { %s686_s16 = scalar_lea.hbm %s1914_s7, %s1485_s15  ;;  %p1075_p10 = pneg %p1636_p0 }
  0x80   : > { %s1632_s28 = scalar_lea.hbm %s686_s16, 256  ;;  %s1103_s3 = scalar_lea.hbm %s686_s16, 320 }
  0x81   : > { %p1074_p8 = scmp.ne.s32.totalorder %s1632_s28, %s1103_s3  ;;  %s1078_s26 = scalar_lea.hbm %s1914_s7, 768 }
  0x82   : > { %p1079_p7 = scmp.lt.u32.totalorder %s1632_s28, %s1914_s7  ;;  %p1080_p5 = scmp.lt.u32.totalorder %s1078_s26, %s1103_s3 }
  0x83   : > { %p1076_p3 = pnand %p1075_p10, %p1074_p8  ;;  %p1082_p1 = scmp.lt.u32.totalorder %s1103_s3, %s1632_s28 }
  0x84   : > { %p1081_p6 = por %p1080_p5, %p1079_p7 }
  0x85   : > { %p1077_p9 = pneg %p1076_p3 }
  0x86   : > { %p1083_p4 = por %p1082_p1, %p1081_p6 }
  0x88   : > { %p1084_p13 = pnand %p1083_p4, %p1077_p9 }
  0x8a   : > { %1087 = shalt.err (!%p1084_p13)
}
  0x8b   : > { %s1088_s17 = scalar_lea.vmem %s284_s8, 64  ;;  %s1320_s29 = smov [#allocation10]  }
  0x8c   : > { %p1089_p12 = scmp.ne.s32.totalorder %s284_s8, %s1088_s17  ;;  %s1093_s16 = sshll.u32 %s1320_s29, 4  ;;  %s1094_s16 = int_to_ptr.vmem [resolvable:$false] %s1093_s16 }
  0x8d   : > { %s1095_s18 = scalar_lea.vmem %s1094_s16, 128  ;;  %p1096_p2 = scmp.lt.s32.totalorder %s284_s8, %s1094_s16 }
  0x8e   : > { %p1091_p8 = pnand %p1089_p12, %p1075_p10  ;;  %p1097_p11 = scmp.lt.s32.totalorder %s1095_s18, %s1088_s17 }
  0x90   : > { %p1092_p3 = pneg %p1091_p8  ;;  %p1098_p5 = por %p1097_p11, %p1096_p2 }
  0x92   : > { %p1099_p7 = pnand %p1098_p5, %p1092_p3 }
  0x94   : > { %1102 = shalt.err (!%p1099_p7)
}
  0x95   : > { %s1917_s3 = sld [smem:[#allocation21_spill]]  ;;  %s1918_s15 = sld [smem:[#allocation20_spill]] }
  0x96   : > { %s1919_s1 = sld [smem:[#allocation19_spill]]  ;;  %p153_p11 = scmp.eq.s32.totalorder %s1464_s14, 0 }
  0x97   : > { %854 = dma.hbm_to_vmem [thread:$0]  (!%p1636_p0), %s1632_s28, 64, %s284_s8, %s1505_s22  }
  0x98   : > { %p1920_p9 = scmp.eq.s32.totalorder %s1316_s5, 0  ;;  %p1921_p1 = scmp.eq.s32.totalorder %s1438_s6, 0 }
  0x99   : > { %s808_s17 = sshll.u32 %s1312_s30, 4  ;;  %s1923_s18 = sld [smem:[#allocation35_spill]] }
  0x9a   : > { %p1925_p0 = scmp.lt.s32.totalorder %s1316_s5, 4 }
  0x9b   : > { %s155_s26 = sadd.s32 1, %s1917_s3  ;;  %p162_p2 = scmp.ne.s32.totalorder %s1917_s3, %s1918_s15 }
  0x9c   : > { %p168_p10 = scmp.ne.s32.totalorder %s1918_s15, %s1919_s1  ;;  %s290_s9 = sand.u32 1, %s1917_s3  }
  0x9d   : > { %s1668_s4 = scalar_select %p153_p11, %s1917_s3, %s155_s26  }
  0x9e   : > { %p164_p6 = por %p162_p2, %p1920_p9  ;;  %p1674_p4 = por %p168_p10, %p1921_p1 }
  0x9f   : > { %s1924_s0 = smov %s1923_s18  ;;  %s1683_s7 = scalar_lea.hbm %s1923_s18, %s808_s17 }
  0xa0   : > { %s293_s14 = scalar_lea.vmem [#allocation11], %s290_s9  ;;  %p1689_p13 = pnand %p1925_p0, %p164_p6 }
  0xa1   : > { %s301_s22 = sshll.u32 %s293_s14, 4  ;;  %s291_s8 = scalar_lea.sflag [#allocation12], %s290_s9  ;;  %s1685_s22 = int_to_ptr.vmem [resolvable:$true] %s301_s22 }
  0xa2   : > { %s1104_s3 = scalar_lea.hbm %s1683_s7, 16  ;;  %p1106_p8 = pneg %p1689_p13 }
  0xa3   : > { %p1105_p12 = scmp.ne.s32.totalorder %s1683_s7, %s1104_s3  ;;  %s1109_s26 = scalar_lea.hbm %s1924_s0, 32 }
  0xa4   : > { %p1110_p7 = scmp.lt.u32.totalorder %s1683_s7, %s1924_s0  ;;  %p1111_p11 = scmp.lt.u32.totalorder %s1109_s26, %s1104_s3 }
  0xa5   : > { %p1107_p3 = pnand %p1106_p8, %p1105_p12  ;;  %p1113_p10 = scmp.lt.u32.totalorder %s1104_s3, %s1683_s7 }
  0xa6   : > { %p1112_p2 = por %p1111_p11, %p1110_p7 }
  0xa7   : > { %p1108_p5 = pneg %p1107_p3 }
  0xa8   : > { %p1114_p9 = por %p1113_p10, %p1112_p2 }
  0xaa   : > { %p1115_p6 = pnand %p1114_p9, %p1108_p5 }
  0xac   : > { %1118 = shalt.err (!%p1115_p6)
}
  0xad   : > { %s1119_s9 = scalar_lea.vmem %s1685_s22, 16  ;;  %s1321_s16 = smov [#allocation11]  }
  0xae   : > { %p1120_p1 = scmp.ne.s32.totalorder %s1685_s22, %s1119_s9  ;;  %s1124_s18 = sshll.u32 %s1321_s16, 4  ;;  %s1125_s18 = int_to_ptr.vmem [resolvable:$false] %s1124_s18 }
  0xaf   : > { %s1126_s14 = scalar_lea.vmem %s1125_s18, 32  ;;  %p1127_p3 = scmp.lt.s32.totalorder %s1685_s22, %s1125_s18 }
  0xb0   : > { %p1122_p0 = pnand %p1120_p1, %p1106_p8  ;;  %p1128_p7 = scmp.lt.s32.totalorder %s1126_s14, %s1119_s9 }
  0xb2   : > { %p1123_p12 = pneg %p1122_p0  ;;  %p1129_p11 = por %p1128_p7, %p1127_p3 }
  0xb4   : > { %p1130_p2 = pnand %p1129_p11, %p1123_p12 }
  0xb6   : > { %1133 = shalt.err (!%p1130_p2)
}
  0xb7   : > { %857 = dma.hbm_to_vmem [thread:$0]  (!%p1689_p13), %s1683_s7, 16, %s1685_s22, %s291_s8  }
  0xb8   : > { %p1927_p5 = scmp.ne.s32.totalorder %s1901_s10, 0 }
  0xb9   : > { %s1721_s3 = sand.u32 (!%p1927_p5), 1, %s1292_s25   ;;  %p1928_p8 = scmp.ne.s32.totalorder (!%p1927_p5), %s1905_s2, 0 }
  0xba   : > { %310 = sbr.rel (%p1927_p5) target bundleno = 1036 (0x40c), region = 36  ;;  %s810_s15 = sshll.u32 (!%p1927_p5), %s1721_s3, 2 }
  0xbb   : > { %s313_s1 = scalar_lea.sflag (!%p1927_p5), [#allocation6], %s1721_s3  ;;  %s316_s26 = scalar_lea.vmem (!%p1927_p5), [#allocation5], %s810_s15 }
  0xc1   : > { %1231 = dma.done.wait (%p1928_p8), %s313_s1, 64  }
  0xc2   : > { %1233 = vsyncadd (%p1928_p8), %s313_s1, 4294967232  ;;  %s1929_s7 = sld [smem:[#allocation22_spill]]  ;;  %s1930_s10 = sld [smem:[#allocation29_spill]] }
  0xc3   : > { %s321_s22 = sand.u32 1, %s1438_s6  }
  0xc4   : > { %s322_s17 = scalar_lea.sflag [#allocation9], %s321_s22 }
  0xc8   : > { %s323_s28 = sand.u32 1, %s1929_s7   ;;  %p1931_p13 = scmp.ne.s32.totalorder %s1930_s10, 0 }
  0xc9   : > { %s811_s8 = sshll.u32 %s323_s28, 2 }
  0xca   : > { %s325_s29 = scalar_lea.vmem [#allocation8], %s811_s8 }
  0xcb   : > { %1235 = dma.done.wait (%p1931_p13), %s322_s17, 64  }
  0xcc   : > { %1237 = vsyncadd (%p1931_p13), %s322_s17, 4294967232  ;;  %s332_s9 = sand.u32 1, %s1268_s19   ;;  %p1932_p10 = scmp.ne.s32.totalorder %s1913_s11, 0 }
  0xcd   : > { %s1738_s16 = sshll.u32 %s332_s9, 2 }
  0xce   : > { %s334_s2 = scalar_lea.vmem [#allocation10], %s1738_s16 }
  0xcf   : > { %1239 = dma.done.wait (%p1932_p10), %s322_s17, 64  }
  0xd0   : > { %1241 = vsyncadd (%p1932_p10), %s322_s17, 4294967232  ;;  %s1933_s6 = sld [smem:[#allocation20_spill]] }
  0xd6   : > { %s339_s18 = sand.u32 1, %s1933_s6  }
  0xd7   : > { %s340_s14 = scalar_lea.sflag [#allocation12], %s339_s18  ;;  %s342_s1 = scalar_lea.vmem [#allocation11], %s339_s18 }
  0xd8   : > { %1243 = dma.done.wait (%p1674_p4), %s340_s14, 16  }
  0xd9   : > { %1245 = vsyncadd (%p1674_p4), %s340_s14, 4294967280  ;;  %vm387_vm0 = vcmask 7168   ;;  %v1322_v0 = vmov 0.0   ;;  %vm1323_vm1 = vmmov 0   ;;  %v393_v1 = vld [vmem:[%s325_s29] sm:$0xf]  ;;  %v471_v7 = vlaneseq }
  0xda   : > { %389 = vst.msk [vmem:[#allocation3] sm:$0xff] %vm387_vm0, %v1322_v0  ;;  %824 = vmatprep.subr.mxu0 %v1322_v0  ;;  %826 = vmatprep.mubr.msk.f32.mxu0 %vm1323_vm1, %v1322_v0  ;;  %v391_v2 = vld [vmem:[%s316_s26] sm:$0xf]  ;;  %v394_v3 = vunpack.c.l.bf16 %v393_v1  ;;  %v1324_v5 = vmov 0   ;;  %v1325_v6 = vmov -inf   ;;  %vm490_vm6 = vcmask 64512  }
  0xdb   : > { %829 = vmatprep.subr.mxu1 %v1322_v0  ;;  %831 = vmatprep.mubr.msk.f32.mxu1 %vm1323_vm1, %v1322_v0  ;;  %v392_v4 = vunpack.c.l.bf16 %v391_v2  ;;  %388 = vst.msk [vmem:[#allocation2] sm:$0xff] %vm387_vm0, %v1325_v6  ;;  %v468_v8 = vld [vmem:[%s342_s1] sm:$0x1]  ;;  %v472_v9 = vshrl.u32 %v471_v7, 7  ;;  %v477_v12 = vand.u32 127, %v471_v7  ;;  %s1934_s11 = sld [smem:[#allocation25_spill]] }
  0xdc   : > { %825 = vmatpush3.xpose.msra.mxu0 %v394_v3  ;;  %1004 = vset.pattern.permute.xlu0 %v1324_v5  ;;  %vm469_vm2 = vcmp.gt.s32.totalorder %v468_v8, 0  ;;  %v395_v23 = vld [vmem:[%s334_s2] sm:$0xf]  ;;  %s1935_s27 = sld [smem:[#allocation24_spill]]  ;;  %s380_s22 = scalar_lea.vmem [#allocation13], %s810_s15 }
  0xdd   : > { %1005 = vset.pattern.permute.xlu1 %v1324_v5  ;;  %v484_v10 = vsub.s32 0, %v472_v9  ;;  %v481_v11 = vsel %vm469_vm2, 1, %v1324_v5  ;;  %vm480_vm3 = vcmp.ge.s32.totalorder %v472_v9, %v477_v12  ;;  %v396_v24 = vunpack.c.l.bf16 %v395_v23  ;;  %s629_s28 = sshll.u32 %s380_s22, 4  ;;  %s1936_s29 = sld [smem:[#allocation36_spill]]  ;;  %s1768_s28 = int_to_ptr.vmem [resolvable:$true] %s629_s28 }
  0xde   : > { %s612_s2 = scalar_lea.sflag [#allocation7], %s1721_s3  ;;  %s1134_s6 = scalar_lea.vmem %s1768_s28, 64 }
  0xdf   : > { %827 = vmatmul.mubr.f32.vlgmr.msra.gmra.mrb[0].mxu0 %v392_v4  ;;  %v485_v13 = vrot.slane %v481_v11, %v484_v10  ;;  %830 = vmatpush3.msra.mxu1 %v396_v24  ;;  %p1135_p4 = scmp.ne.s32.totalorder %s1768_s28, %s1134_s6  ;;  %p1938_p9 = scmp.ne.s32.totalorder %s1906_s12, 0 }
  0xe0   : > { %s1326_s15 = smov [#allocation13]  }
  0xe1   : > { %vm486_vm4 = vcmp.eq.s32.totalorder %v485_v13, 1  ;;  %v506_v32 = vld [vmem:[#allocation3] sm:$0xff]  ;;  %s816_s26 = sshll.u32 %s1934_s11, 1  ;;  %p1136_p6 = pnand %p1135_p4, %p1938_p9 }
  0xe2   : > { %vm487_vm5 = vmand %vm486_vm4, %vm480_vm3  ;;  %v489_v19 = vld [vmem:[#allocation2] sm:$0xff]  ;;  %s625_s7 = sadd.s32 %s1935_s27, %s816_s26  ;;  %s1138_s18 = sshll.u32 %s1326_s15, 4  ;;  %s1139_s18 = int_to_ptr.vmem [resolvable:$false] %s1138_s18 }
  0xe3   : > { %s817_s10 = sshll.u32 %s625_s7, 6  ;;  %s1937_s9 = smov %s1936_s29 }
  0xe4   : > { %s1766_s16 = scalar_lea.hbm %s1936_s29, %s817_s10  ;;  %p1137_p1 = pneg %p1136_p6 }
  0xe5   : > { %s1140_s14 = scalar_lea.vmem %s1139_s18, 128  ;;  %p1141_p0 = scmp.lt.s32.totalorder %s1768_s28, %s1139_s18 }
  0xe6   : > { %p1142_p12 = scmp.lt.s32.totalorder %s1140_s14, %s1134_s6 }
  0xe8   : > { %p1143_p3 = por %p1142_p12, %p1141_p0 }
  0xea   : > { %p1144_p7 = pnand %p1143_p3, %p1137_p1 }
 0x1b2   : > { %v463_v14 = vpop.f32.mrb[0].mxu0 }
 0x1b3   : > { %v467_v15 = vmul.f32 0.088388346, %v463_v14  ;;  %v828_v16 = vpop.f32.mrb[1].mxu0 }
 0x1b5   : > { %v488_v17 = vsel %vm487_vm5, %v467_v15, -1e+10 }
 0x1b6   : > { %v491_v18 = vsel %vm490_vm6, %v488_v17, -inf }
 0x1b7   : > { %492 = vmax.xlane.f32.xlu0 %v491_v18 }
 0x244   : > { %v493_v20 = vpop.xlane.xlu0 %492 }
 0x245   : > { %v494_v21 = vmax.f32 %v489_v19, %v493_v20 }
 0x247   : > { %v495_v22 = vsub.f32 %v489_v19, %v494_v21  ;;  %596 = vst.msk [vmem:[#allocation2] sm:$0xff] %vm387_vm0, %v494_v21  ;;  %500 = vperm.xlu0 %1004, %v494_v21  }
 0x249   : > { %v496_v30 = vmul.f32 1.442695, %v495_v22 }
 0x2c6   : > { %v501_v25 = vpop.permute.xlu0 %500 }
 0x2c7   : > { %v503_v26 = vsub.f32 %v488_v17, %v501_v25 }
 0x2c9   : > { %v504_v27 = vmul.f32 1.442695, %v503_v26 }
 0x2cb   : > { %1006 = vpow2.f32 %v504_v27 }
 0x2cc   : > { %1008 = vpow2.f32 %v496_v30 }
 0x2d5   : > { %v1007_v28 = vpop.eup %1006 }
 0x2d6   : > { %832 = vmatmul.mubr.msk.f32.vlgmr.msra.gmra.mrb[0].mxu1 %vm490_vm6, %v1007_v28  ;;  %v508_v29 = vsel %vm490_vm6, %v1007_v28, 0.0  ;;  %v1009_v31 = vpop.eup %1008 }
 0x2d7   : > { %509 = vadd.xlane.f32.xlu1 %v508_v29  ;;  %v507_v33 = vmul.f32 %v1009_v31, %v506_v32 }
 0x2e8   : > { %517 = vperm.xlu1 %1005, %v1009_v31  }
 0x364   : > { %v510_v34 = vpop.xlane.xlu1 %509 }
 0x365   : > { %v511_v35 = vadd.f32 %v510_v34, %v507_v33 }
 0x367   : > { %513 = vst.msk [vmem:[#allocation3] sm:$0xff] %vm387_vm0, %v511_v35 }
 0x368   : > { %v518_v40 = vpop.permute.xlu1 %517 }
 0x369   : > { %v520_v41 = vmul.f32 0.0, %v518_v40 }
 0x36e   : > { %v601_v36 = vld [vmem:[#allocation3] sm:$0xff] }
 0x36f   : > { %1010 = vrcp.f32 %v601_v36 }
 0x379   : > { %v1011_v37 = vpop.eup %1010 }
 0x37a   : > { %605 = vperm.xlu1 %1005, %v1011_v37  }
 0x3a9   : > { %v590_v38 = vpop.f32.mrb[0].mxu1 }
 0x3aa   : > { %v833_v39 = vpop.f32.mrb[1].mxu1  ;;  %v594_v42 = vadd.f32 %v590_v38, %v520_v41 }
 0x3f9   : > { %v606_v43 = vpop.permute.xlu1 %605 }
 0x3fa   : > { %v608_v44 = vmul.f32 %v606_v43, %v594_v42 }
 0x3fc   : > { %v609_v45 = vpack.c.bf16 %v608_v44, %v608_v44 }
 0x3fe   : > { %610 = vst [vmem:[%s380_s22] sm:$0xf] %v609_v45 }
 0x3ff   : > { %1147 = shalt.err (!%p1144_p7)
}
 0x400   : > { %s1148_s3 = scalar_lea.hbm %s1766_s16, 64  ;;  %s1152_s27 = scalar_lea.hbm %s1937_s9, 256 }
 0x401   : > { %p1149_p11 = scmp.ne.s32.totalorder %s1766_s16, %s1148_s3  ;;  %p1153_p8 = scmp.lt.u32.totalorder %s1766_s16, %s1937_s9 }
 0x402   : > { %p1154_p13 = scmp.lt.u32.totalorder %s1152_s27, %s1148_s3  ;;  %p1156_p4 = scmp.lt.u32.totalorder %s1148_s3, %s1766_s16 }
 0x403   : > { %p1150_p2 = pnand %p1149_p11, %p1938_p9 }
 0x404   : > { %p1155_p10 = por %p1154_p13, %p1153_p8 }
 0x405   : > { %p1151_p5 = pneg %p1150_p2 }
 0x406   : > { %p1157_p6 = por %p1156_p4, %p1155_p10 }
 0x408   : > { %p1158_p1 = pnand %p1157_p6, %p1151_p5 }
 0x40a   : > { %1161 = shalt.err (!%p1158_p1)
}
 0x40b   : > { %843 = dma.vmem_to_hbm [thread:$0]  (%p1938_p9), %s1768_s28, 64, %s1766_s16, %s612_s2  }
 0x40c PF: > { %p863_p0 = scmp.ge.s32.totalorder %s1316_s5, 2  ;;  %s641_s10 = sand.u32 1, %s1288_s24  }
 0x40d   : > { %p1939_p12 = scmp.ne.s32.totalorder %s1908_s13, 0  ;;  %s642_s22 = scalar_lea.sflag [#allocation7], %s641_s10 }
 0x40f   : > { %p859_p3 = pnand %p863_p0, %p1939_p12 }
 0x411   : > { %1247 = dma.done.wait (!%p859_p3), %s642_s22, 64  }
 0x412   : > { %1249 = vsyncadd (!%p859_p3), %s642_s22, 4294967232  ;;  %s26_s5 = sadd.s32 1, %s1316_s5   ;;  %s1941_s15 = sld [smem:[#allocation20_spill]] }
 0x413   : > { %p1797_p7 = scmp.ge.s32.totalorder %s26_s5, 6   ;;  %s1942_s16 = sld [smem:[#allocation21_spill]] }
 0x414   : > { %s1943_s12 = sld [smem:[#allocation22_spill]]  ;;  %s1944_s24 = sld [smem:[#allocation30_spill]] }
 0x415   : > { %s1945_s13 = sld [smem:[#allocation23_spill]]  ;;  %s1946_s26 = sld [smem:[#allocation31_spill]] }
 0x416   : > { %s1947_s27 = sld [smem:[#allocation26_spill]]  ;;  %s1948_s29 = sld [smem:[#allocation27_spill]] }
 0x417   : > { %s1949_s2 = sld [smem:[#allocation28_spill]]  ;;  %s1950_s17 = smov %s1668_s4 }
 0x418   : > { %s1951_s18 = smov %s1268_s19  ;;  %s1952_s19 = smov %s1272_s20 }
 0x419   : > { %s1953_s20 = smov %s1618_s21  ;;  %s1955_s22 = smov %s1284_s23 }
 0x41a   : > { %s1954_s21 = smov %s1943_s12  ;;  %s1956_s23 = smov %s1944_s24 }
 0x41b   : > { %s1957_s24 = smov %s1292_s25  ;;  %s1958_s25 = smov %s1945_s13 }
 0x41c   : > { %s1959_s28 = smov %s1312_s30  ;;  %25 = sbr.rel (!%p1797_p7) target bundleno = 22 (0x16), region = 126 }
 0x41d   : > { %s1960_s30 = smov %s1949_s2 }
 0x423   :  { %647 = vsyncpa [#allocation6], 1 }
 0x424   :  { %649 = vsyncpa [#allocation6 + $0x1], 1 }
 0x425   :  { %650 = vsyncpa [#allocation9], 1 }
 0x426   :  { %652 = vsyncpa [#allocation9 + $0x1], 1 }
 0x427   :  { %653 = vsyncpa [#allocation12], 1 }
 0x428   :  { %655 = vsyncpa [#allocation12 + $0x1], 1 }
 0x429   :  { %656 = vsyncpa [#allocation7], 1 }
 0x42a   :  { %658 = vsyncpa [#allocation7 + $0x1], 1 }

// kernel: seq2seq_forward.42
= control target key start
LH: loop header
LB: loop body
LE: loop exit
PB: predicated region body
PF: predicated region fallthrough
CT: control target
= control target key end

     0   :  { %8 = vsyncpa [#allocation4], 0  ;;  %s664_s0 = inlined_call_operand.hbm [shape: bf16[16,256], index: 0, kind: input, shape index: {}]   ;;  %s665_s1 = inlined_call_operand.hbm [shape: bf16[256,256], index: 1, kind: input, shape index: {}]   ;;  %s666_s2 = inlined_call_operand.hbm [shape: bf16[1,256], index: 2, kind: input, shape index: {}]   ;;  %s667_s3 = inlined_call_operand.hbm [shape: bf16[16,256], index: 3, kind: output, shape index: {}]  }
   0x1   :  { %9 = vsyncpa [#allocation7], 0 }
   0x2   :  { %10 = vsyncpa [#allocation5], 0  ;;  %s574_s12 = smov [#allocation6]   ;;  %s575_s14 = smov [#allocation3]  }
   0x3   :  { %s28_s13 = sshll.u32 %s574_s12, 4  ;;  %s16_s15 = sshll.u32 %s575_s14, 4  ;;  %s29_s13 = int_to_ptr.vmem [resolvable:$true] %s28_s13  ;;  %s600_s15 = int_to_ptr.vmem [resolvable:$true] %s16_s15 }
   0x4   :  { %s480_s18 = scalar_lea.hbm %s665_s1, 4096 }
   0x5   :  { %p481_p0 = scmp.ne.s32.totalorder %s665_s1, %s480_s18  ;;  %p484_p1 = scmp.lt.u32.totalorder %s480_s18, %s665_s1 }
   0x7   :  { %p486_p2 = pnand %p484_p1, %p481_p0 }
   0x9   :  { %489 = shalt.err (!%p486_p2)
}
   0xa   :  { %s490_s23 = scalar_lea.vmem %s29_s13, 4096  ;;  %p495_p4 = scmp.lt.s32.totalorder %s29_s13, %s29_s13 }
   0xb   :  { %p491_p3 = scmp.ne.s32.totalorder %s29_s13, %s490_s23  ;;  %p496_p5 = scmp.lt.s32.totalorder %s490_s23, %s490_s23 }
   0xd   :  { %p497_p6 = por %p496_p5, %p495_p4 }
   0xf   :  { %p498_p7 = pnand %p497_p6, %p491_p3 }
  0x11   :  { %501 = shalt.err (!%p498_p7)
}
  0x12   :  { %s576_s24 = smov 128   ;;  %s577_s25 = smov 8  }
  0x13   :  { %34 = dma.hbm_to_vmem [thread:$0]  %s665_s1, 4096, %s29_s13, [#allocation7], %s576_s24, %s576_s24, %s577_s25  }
  0x14   :  { %s502_s30 = scalar_lea.hbm %s664_s0, 256 }
  0x15   :  { %p503_p8 = scmp.ne.s32.totalorder %s664_s0, %s502_s30  ;;  %p506_p9 = scmp.lt.u32.totalorder %s502_s30, %s664_s0 }
  0x17   :  { %p508_p10 = pnand %p506_p9, %p503_p8 }
  0x19   :  { %511 = shalt.err (!%p508_p10)
}
  0x1a   :  { %s512_s8 = scalar_lea.vmem %s600_s15, 256  ;;  %p517_p12 = scmp.lt.s32.totalorder %s600_s15, %s600_s15 }
  0x1b   :  { %p513_p11 = scmp.ne.s32.totalorder %s600_s15, %s512_s8  ;;  %p518_p13 = scmp.lt.s32.totalorder %s512_s8, %s512_s8 }
  0x1d   :  { %p519_p0 = por %p518_p13, %p517_p12 }
  0x1f   :  { %p520_p1 = pnand %p519_p0, %p513_p11 }
  0x21   :  { %523 = shalt.err (!%p520_p1)
}
  0x22   :  { %22 = dma.hbm_to_vmem [thread:$0]  %s664_s0, 256, %s600_s15, [#allocation4], %s576_s24, %s576_s24, %s577_s25  }
  0x23   :  { %s578_s10 = smov [#allocation8]   ;;  %s524_s14 = scalar_lea.hbm %s666_s2, 32 }
  0x24   :  { %s41_s11 = sshll.u32 %s578_s10, 4  ;;  %p525_p2 = scmp.ne.s32.totalorder %s666_s2, %s524_s14  ;;  %s42_s11 = int_to_ptr.vmem [resolvable:$true] %s41_s11 }
  0x25   :  { %p528_p3 = scmp.lt.u32.totalorder %s524_s14, %s666_s2 }
  0x27   :  { %p530_p4 = pnand %p528_p3, %p525_p2 }
  0x29   :  { %533 = shalt.err (!%p530_p4)
}
  0x2a   :  { %s534_s20 = scalar_lea.vmem %s42_s11, 32  ;;  %p539_p6 = scmp.lt.s32.totalorder %s42_s11, %s42_s11 }
  0x2b   :  { %p535_p5 = scmp.ne.s32.totalorder %s42_s11, %s534_s20  ;;  %p540_p7 = scmp.lt.s32.totalorder %s534_s20, %s534_s20 }
  0x2d   :  { %p541_p8 = por %p540_p7, %p539_p6 }
  0x2f   :  { %p542_p9 = pnand %p541_p8, %p535_p5 }
  0x31   :  { %545 = shalt.err (!%p542_p9)
}
  0x32   :  { %44 = dma.hbm_to_vmem [thread:$0]  %s666_s2, 32, %s42_s11, [#allocation7]  }
  0x33   :  { %568 = dma.done.wait [#allocation4], 256  }
  0x34   :  { %569 = vsyncadd [#allocation4], 4294967040 }
  0x35   :  { %570 = dma.done.wait [#allocation7], 4128  }
  0x36   :  { %571 = vsyncadd [#allocation7], 4294963168  ;;  %v429_v0 = vld [vmem:[#allocation6 + $0x4] ss:$8 sps:$4 sm:$0xff]   ;;  %v431_v1 = vld [vmem:[#allocation6] ss:$8 sps:$4 sm:$0xff]   ;;  %v331_v34 = vlaneseq }
  0x37   :  { %270 = vmatprep.subr.bf16.mxu0 %v429_v0  ;;  %v432_v2 = vld [vmem:[#allocation6 + $0x14] ss:$8 sps:$4 sm:$0xff]   ;;  %v434_v3 = vld [vmem:[#allocation6 + $0x10] ss:$8 sps:$4 sm:$0xff]   ;;  %v435_v4 = vld [vmem:[#allocation6 + $0x24] ss:$8 sps:$4 sm:$0xff]  }
  0x38   :  { %271 = vmatpush1.bf16.msra.mxu0 %v431_v1  ;;  %v437_v5 = vld [vmem:[#allocation6 + $0x20] ss:$8 sps:$4 sm:$0xff]   ;;  %v438_v6 = vld [vmem:[#allocation6 + $0x34] ss:$8 sps:$4 sm:$0xff]   ;;  %v440_v7 = vld [vmem:[#allocation6 + $0x30] ss:$8 sps:$4 sm:$0xff]  }
  0x39   :  { %272 = vmatprep.subr.bf16.mxu0 %v432_v2  ;;  %v441_v8 = vld [vmem:[#allocation6 + $0x44] ss:$8 sps:$4 sm:$0xff]   ;;  %v443_v9 = vld [vmem:[#allocation6 + $0x40] ss:$8 sps:$4 sm:$0xff]   ;;  %v444_v10 = vld [vmem:[#allocation6 + $0x54] ss:$8 sps:$4 sm:$0xff]  }
  0x3a   :  { %v446_v11 = vld [vmem:[#allocation6 + $0x50] ss:$8 sps:$4 sm:$0xff]   ;;  %v447_v12 = vld [vmem:[#allocation6 + $0x64] ss:$8 sps:$4 sm:$0xff]   ;;  %v479_v13 = vld [vmem:[#allocation3 + $0x4] ss:$8 sps:$4 sm:$0xff]  }
  0x3b   :  { %v449_v14 = vld [vmem:[#allocation6 + $0x60] ss:$8 sps:$4 sm:$0xff]   ;;  %v450_v15 = vld [vmem:[#allocation6 + $0x74] ss:$8 sps:$4 sm:$0xff]   ;;  %302 = vmatprep.mubr.bf16.mxu0 %v479_v13  ;;  %v452_v16 = vld [vmem:[#allocation6 + $0x70] ss:$8 sps:$4 sm:$0xff]  }
  0x3c   :  { %273 = vmatpush1.bf16.msra.mxu0 %v434_v3  ;;  %v453_v17 = vld [vmem:[#allocation6 + $0x84] ss:$8 sps:$4 sm:$0xff]   ;;  %v455_v18 = vld [vmem:[#allocation6 + $0x80] ss:$8 sps:$4 sm:$0xff]   ;;  %v456_v19 = vld [vmem:[#allocation6 + $0x94] ss:$8 sps:$4 sm:$0xff]  }
  0x3d   :  { %274 = vmatprep.subr.bf16.mxu0 %v435_v4  ;;  %v458_v20 = vld [vmem:[#allocation6 + $0x90] ss:$8 sps:$4 sm:$0xff]   ;;  %v459_v21 = vld [vmem:[#allocation6 + $0xa4] ss:$8 sps:$4 sm:$0xff]   ;;  %v461_v22 = vld [vmem:[#allocation6 + $0xa0] ss:$8 sps:$4 sm:$0xff]  }
  0x3e   :  { %v462_v23 = vld [vmem:[#allocation6 + $0xb4] ss:$8 sps:$4 sm:$0xff]   ;;  %v464_v24 = vld [vmem:[#allocation6 + $0xb0] ss:$8 sps:$4 sm:$0xff]   ;;  %v465_v25 = vld [vmem:[#allocation6 + $0xc4] ss:$8 sps:$4 sm:$0xff]  }
  0x3f   :  { %v467_v26 = vld [vmem:[#allocation6 + $0xc0] ss:$8 sps:$4 sm:$0xff]   ;;  %v468_v27 = vld [vmem:[#allocation6 + $0xd4] ss:$8 sps:$4 sm:$0xff]   ;;  %v470_v28 = vld [vmem:[#allocation6 + $0xd0] ss:$8 sps:$4 sm:$0xff]  }
  0x40   :  { %275 = vmatpush1.bf16.msra.mxu0 %v437_v5  ;;  %v471_v29 = vld [vmem:[#allocation6 + $0xe4] ss:$8 sps:$4 sm:$0xff]   ;;  %v473_v30 = vld [vmem:[#allocation6 + $0xe0] ss:$8 sps:$4 sm:$0xff]   ;;  %v474_v31 = vld [vmem:[#allocation6 + $0xf4] ss:$8 sps:$4 sm:$0xff]  }
  0x41   :  { %276 = vmatprep.subr.bf16.mxu0 %v438_v6  ;;  %v476_v32 = vld [vmem:[#allocation6 + $0xf0] ss:$8 sps:$4 sm:$0xff]   ;;  %v332_v35 = vshrl.u32 %v331_v34, 7  ;;  %v328_v36 = vld [vmem:[#allocation8] sm:$0x3]  ;;  %s579_s2 = smov [#allocation9]  }
  0x42   :  { %v477_v33 = vld [vmem:[#allocation3] ss:$8 sps:$4 sm:$0xff]   ;;  %v329_v37 = vunpack.c.l.bf16 %v328_v36  ;;  %s372_s21 = sshll.u32 %s579_s2, 4  ;;  %s373_s21 = int_to_ptr.vmem [resolvable:$true] %s372_s21 }
  0x43   :  { %v333_v38 = vsub.s32 0, %v332_v35  ;;  %v337_v39 = vsub.s32 2, %v332_v35  ;;  %s546_s22 = scalar_lea.vmem %s373_s21, 256  ;;  %p551_p11 = scmp.lt.s32.totalorder %s373_s21, %s373_s21 }
  0x44   :  { %277 = vmatpush1.bf16.msra.mxu0 %v440_v7  ;;  %p547_p10 = scmp.ne.s32.totalorder %s373_s21, %s546_s22  ;;  %p552_p12 = scmp.lt.s32.totalorder %s546_s22, %s546_s22 }
  0x45   :  { %278 = vmatprep.subr.bf16.mxu0 %v441_v8  ;;  %v334_v40 = vrot.slane %v329_v37, %v333_v38  ;;  %v338_v41 = vrot.slane %v329_v37, %v337_v39 }
  0x46   :  { %p553_p13 = por %p552_p12, %p551_p11 }
  0x47   :  { %v344_v42 = vrot.slane %v334_v40, %v333_v38  ;;  %v348_v43 = vrot.slane %v338_v41, %v333_v38 }
  0x48   :  { %279 = vmatpush1.bf16.msra.mxu0 %v443_v9  ;;  %p554_p0 = pnand %p553_p13, %p547_p10 }
  0x49   :  { %280 = vmatprep.subr.bf16.mxu0 %v444_v10 }
  0x4c   :  { %281 = vmatpush1.bf16.msra.mxu0 %v446_v11 }
  0x4d   :  { %282 = vmatprep.subr.bf16.mxu0 %v447_v12 }
  0x50   :  { %283 = vmatpush1.bf16.msra.mxu0 %v449_v14 }
  0x51   :  { %284 = vmatprep.subr.bf16.mxu0 %v450_v15 }
  0x54   :  { %285 = vmatpush1.bf16.msra.mxu0 %v452_v16 }
  0x55   :  { %286 = vmatprep.subr.bf16.mxu0 %v453_v17 }
  0x58   :  { %287 = vmatpush1.bf16.msra.mxu0 %v455_v18 }
  0x59   :  { %288 = vmatprep.subr.bf16.mxu0 %v456_v19 }
  0x5c   :  { %289 = vmatpush1.bf16.msra.mxu0 %v458_v20 }
  0x5d   :  { %290 = vmatprep.subr.bf16.mxu0 %v459_v21 }
  0x60   :  { %291 = vmatpush1.bf16.msra.mxu0 %v461_v22 }
  0x61   :  { %292 = vmatprep.subr.bf16.mxu0 %v462_v23 }
  0x64   :  { %293 = vmatpush1.bf16.msra.mxu0 %v464_v24 }
  0x65   :  { %294 = vmatprep.subr.bf16.mxu0 %v465_v25 }
  0x68   :  { %295 = vmatpush1.bf16.msra.mxu0 %v467_v26 }
  0x69   :  { %296 = vmatprep.subr.bf16.mxu0 %v468_v27 }
  0x6c   :  { %297 = vmatpush1.bf16.msra.mxu0 %v470_v28 }
  0x6d   :  { %298 = vmatprep.subr.bf16.mxu0 %v471_v29 }
  0x70   :  { %299 = vmatpush1.bf16.msra.mxu0 %v473_v30 }
  0x71   :  { %300 = vmatprep.subr.bf16.mxu0 %v474_v31 }
  0x74   :  { %301 = vmatpush1.bf16.msra.mxu0 %v476_v32 }
  0x77   :  { %303 = vmatmul.mubr.bf16.vlgmr.msra.gmra.mrb[0].mxu0 %v477_v33 }
 0x14a   :  { %v304_v44 = vpop.f32.mrb[0].mxu0 }
 0x14b   :  { %v349_v45 = vadd.f32 %v344_v42, %v304_v44  ;;  %v306_v46 = vpop.f32.mrb[1].mxu0 }
 0x14c   :  { %v350_v47 = vadd.f32 %v348_v43, %v306_v46  ;;  %v308_v48 = vpop.f32.mrb[2].mxu0 }
 0x14d   :  { %v351_v49 = vadd.f32 %v344_v42, %v308_v48  ;;  %v310_v50 = vpop.f32.mrb[3].mxu0 }
 0x14e   :  { %v421_v51 = vpack.c.bf16 %v350_v47, %v349_v45  ;;  %v352_v52 = vadd.f32 %v348_v43, %v310_v50 }
 0x150   :  { %365 = vst [vmem:[#allocation9] sm:$0xff] %v421_v51  ;;  %v422_v53 = vpack.c.bf16 %v352_v52, %v351_v49 }
 0x152   :  { %366 = vst [vmem:[#allocation9 + $0x8] sm:$0xff] %v422_v53 }
 0x153   :  { %557 = shalt.err (!%p554_p0)
}
 0x154   :  { %s558_s27 = scalar_lea.hbm %s667_s3, 256 }
 0x155   :  { %p559_p1 = scmp.ne.s32.totalorder %s667_s3, %s558_s27  ;;  %p562_p2 = scmp.lt.u32.totalorder %s558_s27, %s667_s3 }
 0x157   :  { %p564_p3 = pnand %p562_p2, %p559_p1 }
 0x159   :  { %567 = shalt.err (!%p564_p3)
}
 0x15a   :  { %378 = dma.vmem_to_hbm [thread:$0]  %s373_s21, 256, %s667_s3, [#allocation5], %s576_s24, %s576_s24, %s577_s25  }
 0x15b   :  { %572 = dma.done.wait [#allocation5], 256  }
 0x15c   :  { %573 = vsyncadd [#allocation5], 4294967040 }
 0x15d   :  { %382 = vsyncpa [#allocation4], 1 }
 0x15e   :  { %383 = vsyncpa [#allocation7], 1 }
 0x15f   :  { %384 = vsyncpa [#allocation5], 1 }

// kernel: seq2seq_forward.39
= control target key start
LH: loop header
LB: loop body
LE: loop exit
PB: predicated region body
PF: predicated region fallthrough
CT: control target
= control target key end

     0   :  { %s1713_s0 = inlined_call_operand.hbm [shape: bf16[16,256], index: 0, kind: input, shape index: {}]   ;;  %s1714_s1 = inlined_call_operand.hbm [shape: bf16[256,768], index: 1, kind: input, shape index: {}]   ;;  %s1715_s2 = inlined_call_operand.hbm [shape: bf16[1,768], index: 2, kind: input, shape index: {}]   ;;  %s1716_s3 = inlined_call_operand.hbm [shape: bf16[16,768], index: 3, kind: output, shape index: {}]  }
   0x1   :  { %1725 = sst [smem:[#allocation14_spill]] %s1714_s1 }
   0x2   :  { %8 = vsyncpa [#allocation4], 0 }
   0x3   :  { %9 = vsyncpa [#allocation7], 0 }
   0x4   :  { %11 = vsyncpa [#allocation7 + $0x1], 0 }
   0x5   :  { %12 = vsyncpa [#allocation5], 0 }
   0x6   :  { %14 = vsyncpa [#allocation5 + $0x1], 0  ;;  %s1404_s12 = smov 0   ;;  %s1406_s13 = smov 0  }
   0x7   :  { %s1408_s14 = smov 0   ;;  %s1410_s15 = smov 0  }
   0x8   :  { %s1412_s16 = smov 0   ;;  %s1414_s17 = smov 0  }
   0x9 LB: > { %s35_s18 = sadd.s32 1, %s1366_s16  ;;  %s76_s19 = sadd.s32 1, %s1358_s14  ;;  %s1370_s17 = sphi %s1414_s17, %s20_s17   ;;  %s1366_s16 = sphi %s1412_s16, %s1749_s16   ;;  %s1362_s15 = sphi %s1410_s15, %s1748_s15   ;;  %s1358_s14 = sphi %s1408_s14, %s1747_s14   ;;  %s1354_s13 = sphi %s1406_s13, %s1746_s13   ;;  %s1350_s12 = sphi %s1404_s12, %s1745_s12  }
   0xa   : > { %p37_p0 = scmp.ge.s32.totalorder %s35_s18, 2  ;;  %p83_p1 = scmp.ne.s32.totalorder %s1358_s14, %s1354_s13 }
   0xb   : > { %p84_p2 = scmp.eq.s32.totalorder %s1370_s17, 0  ;;  %p1069_p5 = scmp.lt.s32.totalorder %s1370_s17, 2 }
   0xc   : > { %s1751_s18 = smov (%p37_p0, %s35_s18), 0  ;;  %s186_s21 = sand.u32 1, %s1370_s17  }
   0xd   : > { %1726 = sst [smem:[#allocation13_spill]] %s1751_s18  ;;  %p85_p4 = por %p84_p2, %p83_p1 }
   0xe   : > { %s72_s20 = ssub.s32 %s1366_s16, %s1751_s18  ;;  %s188_s22 = sand.u32 1, %s1358_s14  }
   0xf   : > { %p74_p6 = scmp.eq.s32.totalorder %s72_s20, 0  ;;  %s1009_s23 = smul.u32 192, %s1366_s16 }
  0x10   : > { %s1038_s25 = smul.u32 384, %s188_s22  ;;  %s1727_s1 = sld [smem:[#allocation14_spill]] }
  0x11   : > { %s1452_s24 = scalar_select %p74_p6, %s1358_s14, %s76_s19  }
  0x12   : > { %p1461_p7 = pnand %p1069_p5, %p85_p4  ;;  %s190_s30 = scalar_lea.vmem [#allocation6], %s1038_s25 }
  0x13   : > { %s200_s4 = sshll.u32 %s190_s30, 4  ;;  %s1467_s5 = scalar_lea.sflag [#allocation7], %s186_s21  ;;  %s1465_s4 = int_to_ptr.vmem [resolvable:$true] %s200_s4 }
  0x14   : > { %s1728_s29 = scalar_select %p1461_p7, 1, 0 }
  0x15   : > { %p1719_p9 = pneg %p1461_p7 }
  0x16   : > { %s1459_s28 = scalar_lea.hbm %s1727_s1, %s1009_s23  ;;  %s1201_s9 = scalar_lea.hbm %s1727_s1, 12288 }
  0x17   : > { %s1196_s6 = scalar_lea.hbm %s1459_s28, 6144  ;;  %p1202_p12 = scmp.lt.u32.totalorder %s1459_s28, %s1727_s1 }
  0x18   : > { %p1197_p8 = scmp.ne.s32.totalorder %s1459_s28, %s1196_s6  ;;  %p1203_p13 = scmp.lt.u32.totalorder %s1201_s9, %s1196_s6 }
  0x19   : > { %p1205_p2 = scmp.lt.u32.totalorder %s1196_s6, %s1459_s28 }
  0x1a   : > { %p1199_p10 = pnand %p1719_p9, %p1197_p8  ;;  %p1204_p0 = por %p1203_p13, %p1202_p12 }
  0x1c   : > { %p1200_p11 = pneg %p1199_p10  ;;  %p1206_p4 = por %p1205_p2, %p1204_p0 }
  0x1e   : > { %p1207_p5 = pnand %p1206_p4, %p1200_p11 }
  0x20   : > { %1210 = shalt.err (!%p1207_p5)
}
  0x21   : > { %s1211_s19 = scalar_lea.vmem %s1465_s4, 6144  ;;  %s1372_s20 = smov [#allocation6]  }
  0x22   : > { %p1212_p6 = scmp.ne.s32.totalorder %s1465_s4, %s1211_s19  ;;  %s1216_s21 = sshll.u32 %s1372_s20, 4  ;;  %s1217_s21 = int_to_ptr.vmem [resolvable:$false] %s1216_s21 }
  0x23   : > { %s1218_s23 = scalar_lea.vmem %s1217_s21, 12288  ;;  %p1219_p3 = scmp.lt.s32.totalorder %s1465_s4, %s1217_s21 }
  0x24   : > { %p1214_p8 = pnand %p1212_p6, %p1719_p9  ;;  %p1220_p12 = scmp.lt.s32.totalorder %s1218_s23, %s1211_s19 }
  0x26   : > { %p1215_p10 = pneg %p1214_p8  ;;  %p1221_p13 = por %p1220_p12, %p1219_p3 }
  0x28   : > { %p1222_p0 = pnand %p1221_p13, %p1215_p10 }
  0x2a   : > { %1225 = shalt.err (!%p1222_p0)
}
  0x2b   : > { %s1373_s25 = smov 384   ;;  %s1374_s26 = smov 192  }
  0x2c   : > { %s1375_s27 = smov 12   ;;  %s1496_s30 = sadd.s32 4294967295, %s1370_s17  }
  0x2d   : > { %1060 = dma.hbm_to_vmem [thread:$0]  (!%p1461_p7), %s1459_s28, 6144, %s1465_s4, %s1467_s5, %s1373_s25, %s1374_s26, %s1375_s27  }
  0x2e   : > { %s944_s6 = sadd.s32 4294967294, %s1370_s17   ;;  %p89_p3 = scmp.ne.s32.totalorder %s1354_s13, %s1350_s12 }
  0x2f   : > { %p1718_p11 = scmp.eq.s32.totalorder %s1496_s30, 0  ;;  %p141_p2 = scmp.eq.s32.totalorder %s1496_s30, 1 }
  0x30   : > { %p147_p4 = scmp.eq.s32.totalorder %s944_s6, 1  ;;  %p945_p6 = scmp.ge.s32.totalorder %s1370_s17, 1 }
  0x31   : > { %p1505_p5 = por %p1718_p11, %p89_p3  ;;  %p1513_p8 = por %p141_p2, %p83_p1 }
  0x32   : > { %p1517_p10 = por %p147_p4, %p89_p3  ;;  %p154_p12 = scmp.lt.s32.totalorder %s1370_s17, 3 }
  0x33   : > { %s1729_s7 = scalar_select %p1505_p5, 1, 0 }
  0x34   : > { %s1730_s28 = scalar_select %p1513_p8, 1, 0 }
  0x35   : > { %s1731_s4 = scalar_select %p1517_p10, 1, 0 }
  0x36   : > { %p1522_p13 = pnand %p945_p6, %p154_p12  ;;  %s1376_s9 = smov [#allocation3]  }
  0x37   : > { %s172_s10 = sshll.u32 %s1376_s9, 4  ;;  %s1039_s11 = smul.u32 3, %s188_s22  ;;  %s1526_s10 = int_to_ptr.vmem [resolvable:$true] %s172_s10 }
  0x38   : > { %s1732_s8 = scalar_select %p1522_p13, 1, 0 }
  0x39   : > { %p1053_p0 = pneg %p1522_p13  ;;  %s1010_s19 = smul.u32 48, %s1366_s16 }
  0x3a   : > { %s214_s26 = scalar_lea.vmem [#allocation8], %s1039_s11  ;;  %s1226_s22 = scalar_lea.hbm %s1713_s0, 256 }
  0x3b   : > { %p1535_p1 = pnand %p1053_p0, %p1718_p11  ;;  %s1542_s25 = scalar_lea.hbm %s1715_s2, %s1010_s19 }
  0x3c   : > { %s222_s27 = sshll.u32 %s214_s26, 4  ;;  %p1227_p3 = scmp.ne.s32.totalorder %s1713_s0, %s1226_s22  ;;  %s1544_s27 = int_to_ptr.vmem [resolvable:$true] %s222_s27 }
  0x3d   : > { %p1228_p2 = pneg %p1535_p1  ;;  %p1233_p12 = scmp.lt.u32.totalorder %s1226_s22, %s1713_s0 }
  0x3f   : > { %p1229_p4 = pnand %p1228_p2, %p1227_p3 }
  0x41   : > { %p1230_p6 = pneg %p1229_p4 }
  0x43   : > { %p1235_p0 = pnand %p1233_p12, %p1230_p6 }
  0x45   : > { %1238 = shalt.err (!%p1235_p0)
}
  0x46   : > { %s1239_s11 = scalar_lea.vmem %s1526_s10, 256  ;;  %p1247_p8 = scmp.lt.s32.totalorder %s1526_s10, %s1526_s10 }
  0x47   : > { %p1240_p11 = scmp.ne.s32.totalorder %s1526_s10, %s1239_s11  ;;  %p1248_p5 = scmp.lt.s32.totalorder %s1239_s11, %s1239_s11 }
  0x49   : > { %p1242_p9 = pnand %p1240_p11, %p1228_p2  ;;  %p1249_p13 = por %p1248_p5, %p1247_p8 }
  0x4b   : > { %p1243_p10 = pneg %p1242_p9 }
  0x4d   : > { %p1250_p7 = pnand %p1249_p13, %p1243_p10 }
  0x4f   : > { %1253 = shalt.err (!%p1250_p7)
}
  0x50   : > { %s1377_s1 = smov 128   ;;  %s1378_s18 = smov 8  }
  0x51   : > { %1056 = dma.hbm_to_vmem [thread:$0]  (!%p1535_p1), %s1713_s0, 256, %s1526_s10, [#allocation4], %s1377_s1, %s1377_s1, %s1378_s18  }
  0x52   : > { %s1254_s6 = scalar_lea.hbm %s1542_s25, 48  ;;  %p1734_p11 = scmp.ne.s32.totalorder %s1728_s29, 0 }
  0x53   : > { %p1255_p9 = scmp.ne.s32.totalorder %s1542_s25, %s1254_s6  ;;  %s1259_s21 = scalar_lea.hbm %s1715_s2, 96 }
  0x54   : > { %p1735_p5 = pneg %p1734_p11  ;;  %p1260_p10 = scmp.lt.u32.totalorder %s1542_s25, %s1715_s2 }
  0x55   : > { %p1261_p13 = scmp.lt.u32.totalorder %s1259_s21, %s1254_s6  ;;  %p1263_p2 = scmp.lt.u32.totalorder %s1254_s6, %s1542_s25 }
  0x56   : > { %p1257_p8 = pnand %p1255_p9, %p1735_p5 }
  0x57   : > { %p1262_p3 = por %p1261_p13, %p1260_p10 }
  0x58   : > { %p1258_p7 = pneg %p1257_p8 }
  0x59   : > { %p1264_p4 = por %p1263_p2, %p1262_p3 }
  0x5b   : > { %p1265_p6 = pnand %p1264_p4, %p1258_p7 }
  0x5d   : > { %1268 = shalt.err (!%p1265_p6)
}
  0x5e   : > { %s1269_s10 = scalar_lea.vmem %s1544_s27, 48  ;;  %p1736_p12 = pmov %p1735_p5 }
  0x5f   : > { %p1270_p1 = scmp.ne.s32.totalorder %s1544_s27, %s1269_s10  ;;  %s1379_s20 = smov [#allocation8]  }
  0x60   : > { %s1274_s1 = sshll.u32 %s1379_s20, 4  ;;  %s1275_s1 = int_to_ptr.vmem [resolvable:$false] %s1274_s1 }
  0x61   : > { %p1272_p0 = pnand %p1270_p1, %p1736_p12  ;;  %s1276_s18 = scalar_lea.vmem %s1275_s1, 96 }
  0x62   : > { %p1277_p5 = scmp.lt.s32.totalorder %s1544_s27, %s1275_s1  ;;  %p1278_p8 = scmp.lt.s32.totalorder %s1276_s18, %s1269_s10 }
  0x63   : > { %p1273_p9 = pneg %p1272_p0 }
  0x64   : > { %p1279_p10 = por %p1278_p8, %p1277_p5 }
  0x66   : > { %p1280_p13 = pnand %p1279_p10, %p1273_p9 }
  0x68   : > { %1283 = shalt.err (!%p1280_p13)
}
  0x69   : > { %1063 = dma.hbm_to_vmem [thread:$0]  (!%p1734_p11), %s1542_s25, 48, %s1544_s27, %s1467_s5  }
  0x6a   : > { %p1737_p7 = scmp.ne.s32.totalorder %s1732_s8, 0 }
  0x6b   : > { %p1738_p3 = scmp.eq.s32.totalorder (!%p1737_p7), %s1496_s30, 0 }
  0x6c   : > { %231 = sbr.rel (%p1737_p7) target bundleno = 421 (0x1a5), region = 32 }
  0x73   : > { %1337 = dma.done.wait (%p1738_p3), [#allocation4], 256   ;;  %p1739_p2 = pmov %p1738_p3 }
  0x74   : > { %s237_s19 = sand.u32 1, %s1496_s30   ;;  %s1599_s26 = sand.u32 1, %s1354_s13  }
  0x75   : > { %1339 = vsyncadd (%p1739_p2), [#allocation4], 4294967040  ;;  %s1040_s29 = smul.u32 384, %s1599_s26  ;;  %s238_s6 = scalar_lea.sflag [#allocation7], %s237_s19 }
  0x76   : > { %p1740_p11 = scmp.ne.s32.totalorder %s1729_s7, 0 }
  0x77   : > { %s1602_s9 = scalar_lea.vmem [#allocation6], %s1040_s29 }
  0x78   : > { %1341 = dma.done.wait (%p1740_p11), %s238_s6, 6192  }
  0x79   : > { %1343 = vsyncadd (%p1740_p11), %s238_s6, 4294961104  ;;  %v1129_v0 = vld [vmem:[%s1602_s9 + $0x4] ss:$12 sps:$4 sm:$0xff]   ;;  %v1131_v1 = vld [vmem:[%s1602_s9] ss:$12 sps:$4 sm:$0xff]   ;;  %s1041_s5 = smul.u32 3, %s1599_s26  ;;  %v742_v50 = vlaneseq }
  0x7a   : > { %634 = vmatprep.subr.bf16.mxu0 %v1129_v0  ;;  %v1132_v2 = vld [vmem:[%s1602_s9 + $0x1c] ss:$12 sps:$4 sm:$0xff]   ;;  %v1134_v3 = vld [vmem:[%s1602_s9 + $0x18] ss:$12 sps:$4 sm:$0xff]   ;;  %v1135_v4 = vld [vmem:[%s1602_s9 + $0x34] ss:$12 sps:$4 sm:$0xff]  }
  0x7b   : > { %635 = vmatpush1.bf16.msra.mxu0 %v1131_v1  ;;  %v1137_v5 = vld [vmem:[%s1602_s9 + $0x30] ss:$12 sps:$4 sm:$0xff]   ;;  %v1138_v6 = vld [vmem:[%s1602_s9 + $0x4c] ss:$12 sps:$4 sm:$0xff]   ;;  %v1150_v7 = vld [vmem:[%s1602_s9 + $0xc8] ss:$12 sps:$4 sm:$0xff]  }
  0x7c   : > { %636 = vmatprep.subr.bf16.mxu0 %v1132_v2  ;;  %v1140_v8 = vld [vmem:[%s1602_s9 + $0x48] ss:$12 sps:$4 sm:$0xff]   ;;  %v1141_v9 = vld [vmem:[%s1602_s9 + $0x64] ss:$12 sps:$4 sm:$0xff]   ;;  %1016 = vmatprep.subr.bf16.mxu1 %v1150_v7  ;;  %v1155_v11 = vld [vmem:[%s1602_s9 + $0xe0] ss:$12 sps:$4 sm:$0xff]  }
  0x7d   : > { %v1153_v10 = vld [vmem:[%s1602_s9 + $0x8] ss:$12 sps:$4 sm:$0xff]   ;;  %v1143_v12 = vld [vmem:[%s1602_s9 + $0x60] ss:$12 sps:$4 sm:$0xff]   ;;  %v1160_v15 = vld [vmem:[%s1602_s9 + $0xf8] ss:$12 sps:$4 sm:$0xff]  }
  0x7e   : > { %1017 = vmatpush3.bf16.msra.mxu1 %v1153_v10  ;;  %v1144_v13 = vld [vmem:[%s1602_s9 + $0x7c] ss:$12 sps:$4 sm:$0xff]   ;;  %v1158_v14 = vld [vmem:[%s1602_s9 + $0x20] ss:$12 sps:$4 sm:$0xff]   ;;  %v1146_v16 = vld [vmem:[%s1602_s9 + $0x78] ss:$12 sps:$4 sm:$0xff]  }
  0x7f   : > { %637 = vmatpush1.bf16.msra.mxu0 %v1134_v3  ;;  %1018 = vmatprep.subr.bf16.mxu1 %v1155_v11  ;;  %v1163_v17 = vld [vmem:[%s1602_s9 + $0x38] ss:$12 sps:$4 sm:$0xff]   ;;  %v1147_v18 = vld [vmem:[%s1602_s9 + $0x94] ss:$12 sps:$4 sm:$0xff]   ;;  %v1165_v19 = vld [vmem:[%s1602_s9 + $0x110] ss:$12 sps:$4 sm:$0xff]  }
  0x80   : > { %638 = vmatprep.subr.bf16.mxu0 %v1135_v4  ;;  %v1149_v20 = vld [vmem:[%s1602_s9 + $0x90] ss:$12 sps:$4 sm:$0xff]   ;;  %v1170_v22 = vld [vmem:[%s1602_s9 + $0x128] ss:$12 sps:$4 sm:$0xff]   ;;  %v1151_v23 = vld [vmem:[%s1602_s9 + $0xac] ss:$12 sps:$4 sm:$0xff]  }
  0x81   : > { %v1168_v21 = vld [vmem:[%s1602_s9 + $0x50] ss:$12 sps:$4 sm:$0xff]   ;;  %v1154_v24 = vld [vmem:[%s1602_s9 + $0xa8] ss:$12 sps:$4 sm:$0xff]   ;;  %v1175_v26 = vld [vmem:[%s1602_s9 + $0x140] ss:$12 sps:$4 sm:$0xff]  }
  0x82   : > { %1019 = vmatpush3.bf16.msra.mxu1 %v1158_v14  ;;  %v1173_v25 = vld [vmem:[%s1602_s9 + $0x68] ss:$12 sps:$4 sm:$0xff]   ;;  %v1156_v27 = vld [vmem:[%s1602_s9 + $0xc4] ss:$12 sps:$4 sm:$0xff]   ;;  %v1159_v28 = vld [vmem:[%s1602_s9 + $0xc0] ss:$12 sps:$4 sm:$0xff]  }
  0x83   : > { %639 = vmatpush1.bf16.msra.mxu0 %v1137_v5  ;;  %1020 = vmatprep.subr.bf16.mxu1 %v1160_v15  ;;  %v1178_v29 = vld [vmem:[%s1602_s9 + $0x80] ss:$12 sps:$4 sm:$0xff]   ;;  %v1180_v30 = vld [vmem:[%s1602_s9 + $0x158] ss:$12 sps:$4 sm:$0xff]   ;;  %v1161_v31 = vld [vmem:[%s1602_s9 + $0xdc] ss:$12 sps:$4 sm:$0xff]  }
  0x84   : > { %640 = vmatprep.subr.bf16.mxu0 %v1138_v6  ;;  %v1183_v32 = vld [vmem:[%s1602_s9 + $0x98] ss:$12 sps:$4 sm:$0xff]   ;;  %v1185_v34 = vld [vmem:[%s1602_s9 + $0x170] ss:$12 sps:$4 sm:$0xff]   ;;  %v1166_v35 = vld [vmem:[%s1602_s9 + $0xf4] ss:$12 sps:$4 sm:$0xff]  }
  0x85   : > { %v1164_v33 = vld [vmem:[%s1602_s9 + $0xd8] ss:$12 sps:$4 sm:$0xff]   ;;  %v1192_v36 = vld [vmem:[#allocation3 + $0x4] ss:$8 sps:$4 sm:$0xff]   ;;  %v1179_v43 = vld [vmem:[%s1602_s9 + $0x120] ss:$12 sps:$4 sm:$0xff]  }
  0x86   : > { %1021 = vmatpush3.bf16.msra.mxu1 %v1163_v17  ;;  %v1188_v37 = vld [vmem:[%s1602_s9 + $0xb0] ss:$12 sps:$4 sm:$0xff]   ;;  %v1171_v39 = vld [vmem:[%s1602_s9 + $0x10c] ss:$12 sps:$4 sm:$0xff]   ;;  %709 = vmatprep.mubr.bf16.mxu1 %v1192_v36  ;;  %v1174_v41 = vld [vmem:[%s1602_s9 + $0x108] ss:$12 sps:$4 sm:$0xff]  }
  0x87   : > { %641 = vmatpush1.bf16.msra.mxu0 %v1140_v8  ;;  %1022 = vmatprep.subr.bf16.mxu1 %v1165_v19  ;;  %v1169_v38 = vld [vmem:[%s1602_s9 + $0xf0] ss:$12 sps:$4 sm:$0xff]   ;;  %v1184_v45 = vld [vmem:[%s1602_s9 + $0x138] ss:$12 sps:$4 sm:$0xff]   ;;  %v1186_v46 = vld [vmem:[%s1602_s9 + $0x154] ss:$12 sps:$4 sm:$0xff]  }
  0x88   : > { %642 = vmatprep.subr.bf16.mxu0 %v1141_v9  ;;  %v1190_v40 = vld [vmem:[#allocation3] ss:$8 sps:$4 sm:$0xff]   ;;  %666 = vmatprep.mubr.bf16.mxu0 %v1192_v36  ;;  %v1181_v44 = vld [vmem:[%s1602_s9 + $0x13c] ss:$12 sps:$4 sm:$0xff]   ;;  %v743_v51 = vshrl.u32 %v742_v50, 7  ;;  %s250_s30 = scalar_lea.vmem [#allocation8], %s1041_s5 }
  0x89   : > { %v1176_v42 = vld [vmem:[%s1602_s9 + $0x124] ss:$12 sps:$4 sm:$0xff]   ;;  %v1193_v48 = vld [vmem:[%s1602_s9 + $0x16c] ss:$12 sps:$4 sm:$0xff]   ;;  %v1195_v49 = vld [vmem:[%s1602_s9 + $0x168] ss:$12 sps:$4 sm:$0xff]  }
  0x8a   : > { %1023 = vmatpush3.bf16.msra.mxu1 %v1168_v21  ;;  %v1189_v47 = vld [vmem:[%s1602_s9 + $0x150] ss:$12 sps:$4 sm:$0xff]   ;;  %v739_v52 = vld [vmem:[%s250_s30] sm:$0x7]  ;;  %v752_v54 = vsub.s32 4, %v743_v51  ;;  %v744_v56 = vsub.s32 0, %v743_v51 }
  0x8b   : > { %643 = vmatpush1.bf16.msra.mxu0 %v1143_v12  ;;  %1024 = vmatprep.subr.bf16.mxu1 %v1170_v22  ;;  %v740_v53 = vunpack.c.l.bf16 %v739_v52  ;;  %s1042_s7 = smul.u32 24, %s1599_s26  ;;  %v748_v4 = vsub.s32 2, %v743_v51  ;;  %p1741_p6 = scmp.ne.s32.totalorder %s1730_s28, 0 }
  0x8c   : > { %644 = vmatprep.subr.bf16.mxu0 %v1144_v13  ;;  %s1015_s27 = smul.u32 192, %s1362_s15  ;;  %s800_s15 = scalar_lea.sflag [#allocation5], %s1599_s26 }
  0x8d   : > { %v753_v55 = vrot.slane %v740_v53, %v752_v54  ;;  %s277_s8 = scalar_lea.vmem [#allocation9], %s1042_s7  ;;  %v745_v5 = vrot.slane %v740_v53, %v744_v56  ;;  %v749_v6 = vrot.slane %v740_v53, %v748_v4  ;;  %s1380_s10 = smov [#allocation9]  }
  0x8e   : > { %1025 = vmatpush3.bf16.msra.mxu1 %v1173_v25  ;;  %s816_s25 = sshll.u32 %s277_s8, 4  ;;  %s1664_s23 = scalar_lea.hbm %s1716_s3, %s1015_s27  ;;  %s1659_s25 = int_to_ptr.vmem [resolvable:$true] %s816_s25 }
  0x8f   : > { %645 = vmatpush1.bf16.msra.mxu0 %v1146_v16  ;;  %1026 = vmatprep.subr.bf16.mxu1 %v1175_v26  ;;  %v768_v58 = vrot.slane %v753_v55, %v744_v56  ;;  %v760_v7 = vrot.slane %v745_v5, %v744_v56  ;;  %v764_v8 = vrot.slane %v749_v6, %v744_v56  ;;  %s1284_s11 = scalar_lea.vmem %s1659_s25, 384  ;;  %s1288_s20 = sshll.u32 %s1380_s10, 4  ;;  %s1289_s20 = int_to_ptr.vmem [resolvable:$false] %s1288_s20 }
  0x90   : > { %646 = vmatprep.subr.bf16.mxu0 %v1147_v18  ;;  %p1285_p4 = scmp.ne.s32.totalorder %s1659_s25, %s1284_s11  ;;  %s1290_s1 = scalar_lea.vmem %s1289_s20, 768 }
  0x91   : > { %p1291_p0 = scmp.lt.s32.totalorder %s1659_s25, %s1289_s20  ;;  %p1292_p9 = scmp.lt.s32.totalorder %s1290_s1, %s1284_s11 }
  0x92   : > { %1027 = vmatpush3.bf16.msra.mxu1 %v1178_v29  ;;  %p1286_p1 = pnand %p1285_p4, %p1741_p6 }
  0x93   : > { %647 = vmatpush1.bf16.msra.mxu0 %v1149_v20  ;;  %1028 = vmatprep.subr.bf16.mxu1 %v1180_v30  ;;  %p1293_p5 = por %p1292_p9, %p1291_p0 }
  0x94   : > { %648 = vmatprep.subr.bf16.mxu0 %v1151_v23  ;;  %p1287_p12 = pneg %p1286_p1 }
  0x96   : > { %1029 = vmatpush3.bf16.msra.mxu1 %v1183_v32  ;;  %p1294_p8 = pnand %p1293_p5, %p1287_p12 }
  0x97   : > { %649 = vmatpush1.bf16.msra.mxu0 %v1154_v24  ;;  %1030 = vmatprep.subr.bf16.mxu1 %v1185_v34 }
  0x98   : > { %650 = vmatprep.subr.bf16.mxu0 %v1156_v27 }
  0x9a   : > { %1031 = vmatpush3.bf16.msra.mxu1 %v1188_v37 }
  0x9b   : > { %651 = vmatpush1.bf16.msra.mxu0 %v1159_v28 }
  0x9c   : > { %652 = vmatprep.subr.bf16.mxu0 %v1161_v31 }
  0x9d   : > { %710 = vmatmul.mubr.bf16.vlgmr.msra.gmra.mrb[0].mxu1 %v1190_v40 }
  0x9f   : > { %653 = vmatpush1.bf16.msra.mxu0 %v1164_v33 }
  0xa0   : > { %654 = vmatprep.subr.bf16.mxu0 %v1166_v35 }
  0xa3   : > { %655 = vmatpush1.bf16.msra.mxu0 %v1169_v38 }
  0xa4   : > { %656 = vmatprep.subr.bf16.mxu0 %v1171_v39 }
  0xa7   : > { %657 = vmatpush1.bf16.msra.mxu0 %v1174_v41 }
  0xa8   : > { %658 = vmatprep.subr.bf16.mxu0 %v1176_v42 }
  0xab   : > { %659 = vmatpush1.bf16.msra.mxu0 %v1179_v43 }
  0xac   : > { %660 = vmatprep.subr.bf16.mxu0 %v1181_v44 }
  0xaf   : > { %661 = vmatpush1.bf16.msra.mxu0 %v1184_v45 }
  0xb0   : > { %662 = vmatprep.subr.bf16.mxu0 %v1186_v46 }
  0xb3   : > { %663 = vmatpush1.bf16.msra.mxu0 %v1189_v47 }
  0xb4   : > { %664 = vmatprep.subr.bf16.mxu0 %v1193_v48 }
  0xb7   : > { %665 = vmatpush1.bf16.msra.mxu0 %v1195_v49 }
  0xba   : > { %667 = vmatmul.mubr.bf16.vlgmr.msra.gmra.mrb[0].mxu0 %v1190_v40 }
 0x170   : > { %v1032_v57 = vpop.f32.mrb[0].mxu1 }
 0x171   : > { %v1033_v59 = vpop.f32.mrb[1].mxu1 }
 0x172   : > { %v1034_v60 = vadd.f32 %v1033_v59, %v1032_v57  ;;  %v1035_v61 = vpop.f32.mrb[2].mxu1 }
 0x173   : > { %v1036_v62 = vpop.f32.mrb[3].mxu1 }
 0x174   : > { %v771_v63 = vadd.f32 %v1034_v60, %v768_v58  ;;  %v1037_v0 = vadd.f32 %v1036_v62, %v1035_v61 }
 0x176   : > { %v1012_v1 = vpack.c.bf16 %v771_v63, %v771_v63  ;;  %v774_v2 = vadd.f32 %v1037_v0, %v768_v58 }
 0x178   : > { %796 = vst [vmem:[%s277_s8 + $0x8] sm:$0xf] %v1012_v1  ;;  %v1014_v3 = vpack.c.bf16 %v774_v2, %v774_v2 }
 0x17a   : > { %798 = vst [vmem:[%s277_s8 + $0x14] sm:$0xf] %v1014_v3 }
 0x18d   : > { %v668_v9 = vpop.f32.mrb[0].mxu0 }
 0x18e   : > { %v769_v10 = vadd.f32 %v760_v7, %v668_v9  ;;  %v670_v11 = vpop.f32.mrb[1].mxu0 }
 0x18f   : > { %v770_v12 = vadd.f32 %v764_v8, %v670_v11  ;;  %v672_v13 = vpop.f32.mrb[2].mxu0 }
 0x190   : > { %v772_v14 = vadd.f32 %v760_v7, %v672_v13  ;;  %v674_v15 = vpop.f32.mrb[3].mxu0 }
 0x191   : > { %v1011_v16 = vpack.c.bf16 %v770_v12, %v769_v10  ;;  %v773_v17 = vadd.f32 %v764_v8, %v674_v15 }
 0x193   : > { %795 = vst [vmem:[%s277_s8] sm:$0xff] %v1011_v16  ;;  %v1013_v18 = vpack.c.bf16 %v773_v17, %v772_v14 }
 0x195   : > { %797 = vst [vmem:[%s277_s8 + $0xc] sm:$0xff] %v1013_v18 }
 0x196   : > { %1297 = shalt.err (!%p1294_p8)
}
 0x197   : > { %s1298_s18 = scalar_lea.hbm %s1664_s23, 384  ;;  %s1302_s6 = scalar_lea.hbm %s1716_s3, 768 }
 0x198   : > { %p1299_p10 = scmp.ne.s32.totalorder %s1664_s23, %s1298_s18  ;;  %p1303_p3 = scmp.lt.u32.totalorder %s1664_s23, %s1716_s3 }
 0x199   : > { %p1304_p2 = scmp.lt.u32.totalorder %s1302_s6, %s1298_s18  ;;  %p1306_p4 = scmp.lt.u32.totalorder %s1298_s18, %s1664_s23 }
 0x19a   : > { %p1300_p13 = pnand %p1299_p10, %p1741_p6 }
 0x19b   : > { %p1305_p11 = por %p1304_p2, %p1303_p3 }
 0x19c   : > { %p1301_p7 = pneg %p1300_p13 }
 0x19d   : > { %p1307_p1 = por %p1306_p4, %p1305_p11 }
 0x19f   : > { %p1308_p12 = pnand %p1307_p1, %p1301_p7 }
 0x1a1   : > { %1311 = shalt.err (!%p1308_p12)
}
 0x1a2   : > { %s1381_s30 = smov 192   ;;  %s1382_s7 = smov 384  }
 0x1a3   : > { %s1383_s8 = smov 12  }
 0x1a4   : > { %1051 = dma.vmem_to_hbm [thread:$0]  (%p1741_p6), %s1659_s25, 384, %s1664_s23, %s800_s15, %s1381_s30, %s1382_s7, %s1383_s8  }
 0x1a5 PF: > { %s831_s27 = sand.u32 1, %s1350_s12   ;;  %p1742_p0 = scmp.ne.s32.totalorder %s1731_s4, 0 }
 0x1a6   : > { %p1743_p9 = scmp.ge.s32.totalorder %s1370_s17, 2  ;;  %s832_s22 = scalar_lea.sflag [#allocation5], %s831_s27 }
 0x1a8   : > { %p1065_p5 = pnand %p1743_p9, %p1742_p0 }
 0x1aa   : > { %1345 = dma.done.wait (!%p1065_p5), %s832_s22, 384  }
 0x1ab   : > { %1347 = vsyncadd (!%p1065_p5), %s832_s22, 4294966912  ;;  %s20_s17 = sadd.s32 1, %s1370_s17   ;;  %s1744_s28 = sld [smem:[#allocation13_spill]] }
 0x1ac   : > { %p17_p8 = scmp.ge.s32.totalorder %s20_s17, 4   ;;  %s1745_s12 = smov %s1354_s13 }
 0x1ad   : > { %s1746_s13 = smov %s1358_s14  ;;  %s1747_s14 = smov %s1452_s24 }
 0x1ae   : > { %s1748_s15 = smov %s1366_s16  ;;  %19 = sbr.rel (!%p17_p8) target bundleno = 9 (0x9), region = 102 }
 0x1b1   : > { %s1749_s16 = smov %s1744_s28 }
 0x1b5   :  { %837 = vsyncpa [#allocation4], 1 }
 0x1b6   :  { %839 = vsyncpa [#allocation4 + $0x1], 1 }
 0x1b7   :  { %840 = vsyncpa [#allocation7], 1 }
 0x1b8   :  { %842 = vsyncpa [#allocation7 + $0x1], 1 }
 0x1b9   :  { %843 = vsyncpa [#allocation5], 1 }
 0x1ba   :  { %845 = vsyncpa [#allocation5 + $0x1], 1 }

// kernel: seq2seq_forward.41
= control target key start
LH: loop header
LB: loop body
LE: loop exit
PB: predicated region body
PF: predicated region fallthrough
CT: control target
= control target key end

     0   :  { %11 = vsyncpa [#allocation4], 0  ;;  %s954_s0 = inlined_call_operand.hbm [shape: bf16[16,256], index: 0, kind: input, shape index: {}]   ;;  %s955_s1 = inlined_call_operand.hbm [shape: bf16[256,256], index: 1, kind: input, shape index: {}]   ;;  %s956_s2 = inlined_call_operand.hbm [shape: bf16[1,256], index: 2, kind: input, shape index: {}]   ;;  %s957_s3 = inlined_call_operand.hbm [shape: bf16[16,256], index: 3, kind: input, shape index: {}]   ;;  %s958_s4 = inlined_call_operand.hbm [shape: bf16[1,256], index: 4, kind: input, shape index: {}]   ;;  %s959_s5 = inlined_call_operand.hbm [shape: bf16[1,256], index: 5, kind: input, shape index: {}]   ;;  %s960_s6 = inlined_call_operand.hbm [shape: bf16[16,256], index: 6, kind: output, shape index: {}]  }
   0x1   :  { %12 = vsyncpa [#allocation7], 0 }
   0x2   :  { %13 = vsyncpa [#allocation10], 0 }
   0x3   :  { %14 = vsyncpa [#allocation13], 0 }
   0x4   :  { %15 = vsyncpa [#allocation5], 0  ;;  %s796_s21 = smov [#allocation6]   ;;  %s797_s23 = smov [#allocation9]  }
   0x5   :  { %s33_s22 = sshll.u32 %s796_s21, 4  ;;  %s55_s24 = sshll.u32 %s797_s23, 4  ;;  %s34_s22 = int_to_ptr.vmem [resolvable:$true] %s33_s22  ;;  %s840_s24 = int_to_ptr.vmem [resolvable:$true] %s55_s24 }
   0x6   :  { %s632_s27 = scalar_lea.hbm %s955_s1, 4096 }
   0x7   :  { %p633_p0 = scmp.ne.s32.totalorder %s955_s1, %s632_s27  ;;  %p636_p1 = scmp.lt.u32.totalorder %s632_s27, %s955_s1 }
   0x9   :  { %p638_p2 = pnand %p636_p1, %p633_p0 }
   0xb   :  { %641 = shalt.err (!%p638_p2)
}
   0xc   :  { %s642_s8 = scalar_lea.vmem %s34_s22, 4096  ;;  %p647_p4 = scmp.lt.s32.totalorder %s34_s22, %s34_s22 }
   0xd   :  { %p643_p3 = scmp.ne.s32.totalorder %s34_s22, %s642_s8  ;;  %p648_p5 = scmp.lt.s32.totalorder %s642_s8, %s642_s8 }
   0xf   :  { %p649_p6 = por %p648_p5, %p647_p4 }
  0x11   :  { %p650_p7 = pnand %p649_p6, %p643_p3 }
  0x13   :  { %653 = shalt.err (!%p650_p7)
}
  0x14   :  { %s798_s9 = smov 128   ;;  %s799_s10 = smov 8  }
  0x15   :  { %39 = dma.hbm_to_vmem [thread:$0]  %s955_s1, 4096, %s34_s22, [#allocation7], %s798_s9, %s798_s9, %s799_s10  }
  0x16   :  { %s654_s15 = scalar_lea.hbm %s957_s3, 256 }
  0x17   :  { %p655_p8 = scmp.ne.s32.totalorder %s957_s3, %s654_s15  ;;  %p658_p9 = scmp.lt.u32.totalorder %s654_s15, %s957_s3 }
  0x19   :  { %p660_p10 = pnand %p658_p9, %p655_p8 }
  0x1b   :  { %663 = shalt.err (!%p660_p10)
}
  0x1c   :  { %s664_s20 = scalar_lea.vmem %s840_s24, 256  ;;  %p669_p12 = scmp.lt.s32.totalorder %s840_s24, %s840_s24 }
  0x1d   :  { %p665_p11 = scmp.ne.s32.totalorder %s840_s24, %s664_s20  ;;  %p670_p13 = scmp.lt.s32.totalorder %s664_s20, %s664_s20 }
  0x1f   :  { %p671_p0 = por %p670_p13, %p669_p12 }
  0x21   :  { %p672_p1 = pnand %p671_p0, %p665_p11 }
  0x23   :  { %675 = shalt.err (!%p672_p1)
}
  0x24   :  { %61 = dma.hbm_to_vmem [thread:$0]  %s957_s3, 256, %s840_s24, [#allocation10], %s798_s9, %s798_s9, %s799_s10  }
  0x25   :  { %s800_s22 = smov [#allocation3]   ;;  %s801_s25 = smov [#allocation8]  }
  0x26   :  { %s21_s23 = sshll.u32 %s800_s22, 4  ;;  %s46_s26 = sshll.u32 %s801_s25, 4  ;;  %s22_s23 = int_to_ptr.vmem [resolvable:$true] %s21_s23  ;;  %s47_s26 = int_to_ptr.vmem [resolvable:$true] %s46_s26 }
  0x27   :  { %s676_s29 = scalar_lea.hbm %s954_s0, 256 }
  0x28   :  { %p677_p2 = scmp.ne.s32.totalorder %s954_s0, %s676_s29  ;;  %p680_p3 = scmp.lt.u32.totalorder %s676_s29, %s954_s0 }
  0x2a   :  { %p682_p4 = pnand %p680_p3, %p677_p2 }
  0x2c   :  { %685 = shalt.err (!%p682_p4)
}
  0x2d   :  { %s686_s3 = scalar_lea.vmem %s22_s23, 256  ;;  %p691_p6 = scmp.lt.s32.totalorder %s22_s23, %s22_s23 }
  0x2e   :  { %p687_p5 = scmp.ne.s32.totalorder %s22_s23, %s686_s3  ;;  %p692_p7 = scmp.lt.s32.totalorder %s686_s3, %s686_s3 }
  0x30   :  { %p693_p8 = por %p692_p7, %p691_p6 }
  0x32   :  { %p694_p9 = pnand %p693_p8, %p687_p5 }
  0x34   :  { %697 = shalt.err (!%p694_p9)
}
  0x35   :  { %27 = dma.hbm_to_vmem [thread:$0]  %s954_s0, 256, %s22_s23, [#allocation4], %s798_s9, %s798_s9, %s799_s10  }
  0x36   :  { %s698_s15 = scalar_lea.hbm %s956_s2, 32 }
  0x37   :  { %p699_p10 = scmp.ne.s32.totalorder %s956_s2, %s698_s15  ;;  %p702_p11 = scmp.lt.u32.totalorder %s698_s15, %s956_s2 }
  0x39   :  { %p704_p12 = pnand %p702_p11, %p699_p10 }
  0x3b   :  { %707 = shalt.err (!%p704_p12)
}
  0x3c   :  { %s708_s20 = scalar_lea.vmem %s47_s26, 32  ;;  %p713_p0 = scmp.lt.s32.totalorder %s47_s26, %s47_s26 }
  0x3d   :  { %p709_p13 = scmp.ne.s32.totalorder %s47_s26, %s708_s20  ;;  %p714_p1 = scmp.lt.s32.totalorder %s708_s20, %s708_s20 }
  0x3f   :  { %p715_p2 = por %p714_p1, %p713_p0 }
  0x41   :  { %p716_p3 = pnand %p715_p2, %p709_p13 }
  0x43   :  { %719 = shalt.err (!%p716_p3)
}
  0x44   :  { %49 = dma.hbm_to_vmem [thread:$0]  %s956_s2, 32, %s47_s26, [#allocation7]  }
  0x45   :  { %s802_s21 = smov [#allocation11]   ;;  %s803_s23 = smov [#allocation12]  }
  0x46   :  { %s68_s22 = sshll.u32 %s802_s21, 4  ;;  %s78_s25 = sshll.u32 %s803_s23, 4  ;;  %s69_s22 = int_to_ptr.vmem [resolvable:$true] %s68_s22  ;;  %s79_s25 = int_to_ptr.vmem [resolvable:$true] %s78_s25 }
  0x47   :  { %s720_s29 = scalar_lea.hbm %s958_s4, 32 }
  0x48   :  { %p721_p4 = scmp.ne.s32.totalorder %s958_s4, %s720_s29  ;;  %p724_p5 = scmp.lt.u32.totalorder %s720_s29, %s958_s4 }
  0x4a   :  { %p726_p6 = pnand %p724_p5, %p721_p4 }
  0x4c   :  { %729 = shalt.err (!%p726_p6)
}
  0x4d   :  { %s730_s2 = scalar_lea.vmem %s69_s22, 32  ;;  %p735_p8 = scmp.lt.s32.totalorder %s69_s22, %s69_s22 }
  0x4e   :  { %p731_p7 = scmp.ne.s32.totalorder %s69_s22, %s730_s2  ;;  %p736_p9 = scmp.lt.s32.totalorder %s730_s2, %s730_s2 }
  0x50   :  { %p737_p10 = por %p736_p9, %p735_p8 }
  0x52   :  { %p738_p11 = pnand %p737_p10, %p731_p7 }
  0x54   :  { %741 = shalt.err (!%p738_p11)
}
  0x55   :  { %71 = dma.hbm_to_vmem [thread:$0]  %s958_s4, 32, %s69_s22, [#allocation10]  }
  0x56   :  { %s742_s13 = scalar_lea.hbm %s959_s5, 32 }
  0x57   :  { %p743_p12 = scmp.ne.s32.totalorder %s959_s5, %s742_s13  ;;  %p746_p13 = scmp.lt.u32.totalorder %s742_s13, %s959_s5 }
  0x59   :  { %p748_p0 = pnand %p746_p13, %p743_p12 }
  0x5b   :  { %751 = shalt.err (!%p748_p0)
}
  0x5c   :  { %s752_s18 = scalar_lea.vmem %s79_s25, 32  ;;  %p757_p2 = scmp.lt.s32.totalorder %s79_s25, %s79_s25 }
  0x5d   :  { %p753_p1 = scmp.ne.s32.totalorder %s79_s25, %s752_s18  ;;  %p758_p3 = scmp.lt.s32.totalorder %s752_s18, %s752_s18 }
  0x5f   :  { %p759_p4 = por %p758_p3, %p757_p2 }
  0x61   :  { %p760_p5 = pnand %p759_p4, %p753_p1 }
  0x63   :  { %763 = shalt.err (!%p760_p5)
}
  0x64   :  { %81 = dma.hbm_to_vmem [thread:$0]  %s959_s5, 32, %s79_s25, [#allocation13]  }
  0x65   :  { %786 = dma.done.wait [#allocation4], 256  }
  0x66   :  { %787 = vsyncadd [#allocation4], 4294967040 }
  0x67   :  { %788 = dma.done.wait [#allocation7], 4128  }
  0x68   :  { %789 = vsyncadd [#allocation7], 4294963168 }
  0x69   :  { %790 = dma.done.wait [#allocation10], 288  }
  0x6a   :  { %791 = vsyncadd [#allocation10], 4294967008 }
  0x6b   :  { %792 = dma.done.wait [#allocation13], 32  }
  0x6c   :  { %793 = vsyncadd [#allocation13], 4294967264  ;;  %v577_v0 = vld [vmem:[#allocation6 + $0x4] ss:$8 sps:$4 sm:$0xff]   ;;  %v579_v1 = vld [vmem:[#allocation6] ss:$8 sps:$4 sm:$0xff]   ;;  %v377_v34 = vlaneseq }
  0x6d   :  { %316 = vmatprep.subr.bf16.mxu0 %v577_v0  ;;  %v580_v2 = vld [vmem:[#allocation6 + $0x14] ss:$8 sps:$4 sm:$0xff]   ;;  %v582_v3 = vld [vmem:[#allocation6 + $0x10] ss:$8 sps:$4 sm:$0xff]   ;;  %v583_v4 = vld [vmem:[#allocation6 + $0x24] ss:$8 sps:$4 sm:$0xff]  }
  0x6e   :  { %317 = vmatpush1.bf16.msra.mxu0 %v579_v1  ;;  %v585_v5 = vld [vmem:[#allocation6 + $0x20] ss:$8 sps:$4 sm:$0xff]   ;;  %v586_v6 = vld [vmem:[#allocation6 + $0x34] ss:$8 sps:$4 sm:$0xff]   ;;  %v588_v7 = vld [vmem:[#allocation6 + $0x30] ss:$8 sps:$4 sm:$0xff]  }
  0x6f   :  { %318 = vmatprep.subr.bf16.mxu0 %v580_v2  ;;  %v589_v8 = vld [vmem:[#allocation6 + $0x44] ss:$8 sps:$4 sm:$0xff]   ;;  %v591_v9 = vld [vmem:[#allocation6 + $0x40] ss:$8 sps:$4 sm:$0xff]   ;;  %v592_v10 = vld [vmem:[#allocation6 + $0x54] ss:$8 sps:$4 sm:$0xff]  }
  0x70   :  { %v594_v11 = vld [vmem:[#allocation6 + $0x50] ss:$8 sps:$4 sm:$0xff]   ;;  %v595_v12 = vld [vmem:[#allocation6 + $0x64] ss:$8 sps:$4 sm:$0xff]   ;;  %v627_v13 = vld [vmem:[#allocation3 + $0x4] ss:$8 sps:$4 sm:$0xff]  }
  0x71   :  { %v597_v14 = vld [vmem:[#allocation6 + $0x60] ss:$8 sps:$4 sm:$0xff]   ;;  %v598_v15 = vld [vmem:[#allocation6 + $0x74] ss:$8 sps:$4 sm:$0xff]   ;;  %348 = vmatprep.mubr.bf16.mxu0 %v627_v13  ;;  %v600_v16 = vld [vmem:[#allocation6 + $0x70] ss:$8 sps:$4 sm:$0xff]  }
  0x72   :  { %319 = vmatpush1.bf16.msra.mxu0 %v582_v3  ;;  %v601_v17 = vld [vmem:[#allocation6 + $0x84] ss:$8 sps:$4 sm:$0xff]   ;;  %v603_v18 = vld [vmem:[#allocation6 + $0x80] ss:$8 sps:$4 sm:$0xff]   ;;  %v604_v19 = vld [vmem:[#allocation6 + $0x94] ss:$8 sps:$4 sm:$0xff]  }
  0x73   :  { %320 = vmatprep.subr.bf16.mxu0 %v583_v4  ;;  %v606_v20 = vld [vmem:[#allocation6 + $0x90] ss:$8 sps:$4 sm:$0xff]   ;;  %v607_v21 = vld [vmem:[#allocation6 + $0xa4] ss:$8 sps:$4 sm:$0xff]   ;;  %v609_v22 = vld [vmem:[#allocation6 + $0xa0] ss:$8 sps:$4 sm:$0xff]  }
  0x74   :  { %v610_v23 = vld [vmem:[#allocation6 + $0xb4] ss:$8 sps:$4 sm:$0xff]   ;;  %v612_v24 = vld [vmem:[#allocation6 + $0xb0] ss:$8 sps:$4 sm:$0xff]   ;;  %v613_v25 = vld [vmem:[#allocation6 + $0xc4] ss:$8 sps:$4 sm:$0xff]  }
  0x75   :  { %v615_v26 = vld [vmem:[#allocation6 + $0xc0] ss:$8 sps:$4 sm:$0xff]   ;;  %v616_v27 = vld [vmem:[#allocation6 + $0xd4] ss:$8 sps:$4 sm:$0xff]   ;;  %v618_v28 = vld [vmem:[#allocation6 + $0xd0] ss:$8 sps:$4 sm:$0xff]  }
  0x76   :  { %321 = vmatpush1.bf16.msra.mxu0 %v585_v5  ;;  %v619_v29 = vld [vmem:[#allocation6 + $0xe4] ss:$8 sps:$4 sm:$0xff]   ;;  %v621_v30 = vld [vmem:[#allocation6 + $0xe0] ss:$8 sps:$4 sm:$0xff]   ;;  %v622_v31 = vld [vmem:[#allocation6 + $0xf4] ss:$8 sps:$4 sm:$0xff]  }
  0x77   :  { %322 = vmatprep.subr.bf16.mxu0 %v586_v6  ;;  %v624_v32 = vld [vmem:[#allocation6 + $0xf0] ss:$8 sps:$4 sm:$0xff]   ;;  %v378_v35 = vshrl.u32 %v377_v34, 7  ;;  %v374_v36 = vld [vmem:[#allocation8] sm:$0x3]  ;;  %v399_v42 = vld [vmem:[#allocation9] sm:$0xff] }
  0x78   :  { %v625_v33 = vld [vmem:[#allocation3] ss:$8 sps:$4 sm:$0xff]   ;;  %v375_v37 = vunpack.c.l.bf16 %v374_v36  ;;  %v401_v46 = vunpack.c.l.bf16 %v399_v42  ;;  %v402_v48 = vunpack.c.h.bf16 %v399_v42  ;;  %s804_s5 = smov [#allocation14]  }
  0x79   :  { %v928_v38 = vsub.s32 0, %v378_v35  ;;  %v383_v39 = vsub.s32 2, %v378_v35  ;;  %v400_v45 = vld [vmem:[#allocation9 + $0x8] sm:$0xff]  ;;  %s515_s20 = sshll.u32 %s804_s5, 4  ;;  %s516_s20 = int_to_ptr.vmem [resolvable:$true] %s515_s20 }
  0x7a   :  { %323 = vmatpush1.bf16.msra.mxu0 %v588_v7  ;;  %v403_v51 = vunpack.c.l.bf16 %v400_v45  ;;  %v404_v54 = vunpack.c.h.bf16 %v400_v45  ;;  %s764_s0 = scalar_lea.vmem %s516_s20, 256  ;;  %p769_p7 = scmp.lt.s32.totalorder %s516_s20, %s516_s20 }
  0x7b   :  { %324 = vmatprep.subr.bf16.mxu0 %v589_v8  ;;  %v380_v40 = vrot.slane %v375_v37, %v928_v38  ;;  %v384_v41 = vrot.slane %v375_v37, %v383_v39  ;;  %p765_p6 = scmp.ne.s32.totalorder %s516_s20, %s764_s0  ;;  %p770_p8 = scmp.lt.s32.totalorder %s764_s0, %s764_s0 }
  0x7d   :  { %v390_v43 = vrot.slane %v380_v40, %v928_v38  ;;  %v394_v44 = vrot.slane %v384_v41, %v928_v38  ;;  %p771_p9 = por %p770_p8, %p769_p7 }
  0x7e   :  { %325 = vmatpush1.bf16.msra.mxu0 %v591_v9 }
  0x7f   :  { %326 = vmatprep.subr.bf16.mxu0 %v592_v10  ;;  %p772_p10 = pnand %p771_p9, %p765_p6 }
  0x82   :  { %327 = vmatpush1.bf16.msra.mxu0 %v594_v11 }
  0x83   :  { %328 = vmatprep.subr.bf16.mxu0 %v595_v12 }
  0x86   :  { %329 = vmatpush1.bf16.msra.mxu0 %v597_v14 }
  0x87   :  { %330 = vmatprep.subr.bf16.mxu0 %v598_v15 }
  0x8a   :  { %331 = vmatpush1.bf16.msra.mxu0 %v600_v16 }
  0x8b   :  { %332 = vmatprep.subr.bf16.mxu0 %v601_v17  ;;  %v446_v17 = vld [vmem:[#allocation11] sm:$0x3] }
  0x8e   :  { %333 = vmatpush1.bf16.msra.mxu0 %v603_v18 }
  0x8f   :  { %334 = vmatprep.subr.bf16.mxu0 %v604_v19  ;;  %v471_v19 = vld [vmem:[#allocation12] sm:$0x3] }
  0x92   :  { %335 = vmatpush1.bf16.msra.mxu0 %v606_v20 }
  0x93   :  { %336 = vmatprep.subr.bf16.mxu0 %v607_v21  ;;  %v447_v21 = vunpack.c.l.bf16 %v446_v17 }
  0x96   :  { %337 = vmatpush1.bf16.msra.mxu0 %v609_v22 }
  0x97   :  { %338 = vmatprep.subr.bf16.mxu0 %v610_v23  ;;  %v472_v23 = vunpack.c.l.bf16 %v471_v19 }
  0x9a   :  { %339 = vmatpush1.bf16.msra.mxu0 %v612_v24  ;;  %v452_v24 = vrot.slane %v447_v21, %v928_v38 }
  0x9b   :  { %340 = vmatprep.subr.bf16.mxu0 %v613_v25  ;;  %v456_v25 = vrot.slane %v447_v21, %v383_v39 }
  0x9e   :  { %341 = vmatpush1.bf16.msra.mxu0 %v615_v26  ;;  %v477_v26 = vrot.slane %v472_v23, %v928_v38 }
  0x9f   :  { %342 = vmatprep.subr.bf16.mxu0 %v616_v27  ;;  %v481_v27 = vrot.slane %v472_v23, %v383_v39 }
  0xa0   :  { %v487_v35 = vrot.slane %v477_v26, %v928_v38 }
  0xa1   :  { %v491_v36 = vrot.slane %v481_v27, %v928_v38 }
  0xa2   :  { %343 = vmatpush1.bf16.msra.mxu0 %v618_v28 }
  0xa3   :  { %344 = vmatprep.subr.bf16.mxu0 %v619_v29 }
  0xa6   :  { %345 = vmatpush1.bf16.msra.mxu0 %v621_v30  ;;  %v462_v30 = vrot.slane %v452_v24, %v928_v38 }
  0xa7   :  { %346 = vmatprep.subr.bf16.mxu0 %v622_v31  ;;  %v466_v31 = vrot.slane %v456_v25, %v928_v38 }
  0xaa   :  { %347 = vmatpush1.bf16.msra.mxu0 %v624_v32 }
  0xad   :  { %349 = vmatmul.mubr.bf16.vlgmr.msra.gmra.mrb[0].mxu0 %v625_v33 }
 0x180   :  { %v350_v47 = vpop.f32.mrb[0].mxu0 }
 0x181   :  { %v395_v49 = vadd.f32 %v390_v43, %v350_v47  ;;  %v352_v50 = vpop.f32.mrb[1].mxu0 }
 0x182   :  { %v396_v52 = vadd.f32 %v394_v44, %v352_v50  ;;  %v354_v53 = vpop.f32.mrb[2].mxu0 }
 0x183   :  { %v405_v55 = vadd.f32 %v401_v46, %v395_v49  ;;  %v397_v56 = vadd.f32 %v390_v43, %v354_v53  ;;  %v356_v57 = vpop.f32.mrb[3].mxu0 }
 0x184   :  { %v406_v58 = vadd.f32 %v402_v48, %v396_v52  ;;  %v398_v59 = vadd.f32 %v394_v44, %v356_v57 }
 0x185   :  { %v407_v60 = vadd.f32 %v403_v51, %v397_v56  ;;  %v418_v61 = vmul.f32 %v405_v55, %v405_v55 }
 0x186   :  { %v408_v62 = vadd.f32 %v404_v54, %v398_v59  ;;  %v409_v63 = vadd.f32 %v406_v58, %v405_v55  ;;  %v419_v0 = vmul.f32 %v406_v58, %v406_v58 }
 0x187   :  { %v420_v2 = vmul.f32 %v407_v60, %v407_v60 }
 0x188   :  { %410 = vadd.xlane.f32.xlu0 %v409_v63  ;;  %v422_v1 = vadd.f32 %v419_v0, %v418_v61  ;;  %v421_v3 = vmul.f32 %v408_v62, %v408_v62  ;;  %v412_v4 = vadd.f32 %v408_v62, %v407_v60 }
 0x18a   :  { %423 = vadd.xlane.f32.xlu1 %v422_v1  ;;  %v425_v5 = vadd.f32 %v421_v3, %v420_v2 }
 0x18c   :  { %413 = vadd.xlane.f32.xlu0 %v412_v4 }
 0x18e   :  { %426 = vadd.xlane.f32.xlu1 %v425_v5 }
 0x215   :  { %v411_v6 = vpop.xlane.xlu0 %410 }
 0x216   :  { %v416_v7 = vmul.f32 0.00390625, %v411_v6 }
 0x217   :  { %v424_v8 = vpop.xlane.xlu1 %423 }
 0x218   :  { %v428_v9 = vmul.f32 0.00390625, %v424_v8  ;;  %v430_v10 = vmul.f32 %v416_v7, %v416_v7  ;;  %v434_v28 = vsub.f32 %v405_v55, %v416_v7  ;;  %v435_v29 = vsub.f32 %v406_v58, %v416_v7 }
 0x219   :  { %v414_v11 = vpop.xlane.xlu0 %413 }
 0x21a   :  { %v432_v12 = vsub.f32 %v428_v9, %v430_v10  ;;  %v417_v13 = vmul.f32 0.00390625, %v414_v11 }
 0x21b   :  { %v427_v14 = vpop.xlane.xlu1 %426 }
 0x21c   :  { %v438_v15 = vadd.f32 1e-05, %v432_v12  ;;  %v429_v16 = vmul.f32 0.00390625, %v427_v14  ;;  %v431_v18 = vmul.f32 %v417_v13, %v417_v13  ;;  %v436_v41 = vsub.f32 %v407_v60, %v417_v13 }
 0x21d   :  { %v437_v42 = vsub.f32 %v408_v62, %v417_v13 }
 0x21e   :  { %628 = vrsqrt.f32 %v438_v15  ;;  %v433_v20 = vsub.f32 %v429_v16, %v431_v18 }
 0x220   :  { %v439_v22 = vadd.f32 1e-05, %v433_v20 }
 0x222   :  { %630 = vrsqrt.f32 %v439_v22 }
 0x228   :  { %v629_v32 = vpop.eup %628 }
 0x229   :  { %v442_v33 = vmul.f32 %v629_v32, %v434_v28  ;;  %v443_v34 = vmul.f32 %v629_v32, %v435_v29 }
 0x22b   :  { %v467_v37 = vmul.f32 %v462_v30, %v442_v33  ;;  %v468_v40 = vmul.f32 %v466_v31, %v443_v34 }
 0x22c   :  { %v631_v43 = vpop.eup %630 }
 0x22d   :  { %v492_v44 = vadd.f32 %v487_v35, %v467_v37  ;;  %v493_v39 = vadd.f32 %v491_v36, %v468_v40  ;;  %v444_v45 = vmul.f32 %v631_v43, %v436_v41  ;;  %v445_v46 = vmul.f32 %v631_v43, %v437_v42 }
 0x22f   :  { %v566_v47 = vpack.c.bf16 %v493_v39, %v492_v44  ;;  %v469_v48 = vmul.f32 %v462_v30, %v444_v45  ;;  %v470_v49 = vmul.f32 %v466_v31, %v445_v46 }
 0x231   :  { %508 = vst [vmem:[#allocation14] sm:$0xff] %v566_v47  ;;  %v494_v50 = vadd.f32 %v487_v35, %v469_v48  ;;  %v495_v51 = vadd.f32 %v491_v36, %v470_v49 }
 0x233   :  { %v567_v52 = vpack.c.bf16 %v495_v51, %v494_v50 }
 0x235   :  { %509 = vst [vmem:[#allocation14 + $0x8] sm:$0xff] %v567_v52 }
 0x236   :  { %775 = shalt.err (!%p772_p10)
}
 0x237   :  { %s776_s22 = scalar_lea.hbm %s960_s6, 256 }
 0x238   :  { %p777_p11 = scmp.ne.s32.totalorder %s960_s6, %s776_s22  ;;  %p780_p12 = scmp.lt.u32.totalorder %s776_s22, %s960_s6 }
 0x23a   :  { %p782_p13 = pnand %p780_p12, %p777_p11 }
 0x23c   :  { %785 = shalt.err (!%p782_p13)
}
 0x23d   :  { %521 = dma.vmem_to_hbm [thread:$0]  %s516_s20, 256, %s960_s6, [#allocation5], %s798_s9, %s798_s9, %s799_s10  }
 0x23e   :  { %794 = dma.done.wait [#allocation5], 256  }
 0x23f   :  { %795 = vsyncadd [#allocation5], 4294967040 }
 0x240   :  { %525 = vsyncpa [#allocation4], 1 }
 0x241   :  { %526 = vsyncpa [#allocation7], 1 }
 0x242   :  { %527 = vsyncpa [#allocation10], 1 }
 0x243   :  { %528 = vsyncpa [#allocation13], 1 }
 0x244   :  { %529 = vsyncpa [#allocation5], 1 }

// kernel: seq2seq_forward.30
= control target key start
LH: loop header
LB: loop body
LE: loop exit
PB: predicated region body
PF: predicated region fallthrough
CT: control target
= control target key end

     0   :  { %s1841_s0 = inlined_call_operand.hbm [shape: bf16[2,8,768], index: 0, kind: input, shape index: {}, may-alias: {0,1,2}]   ;;  %s1842_s1 = inlined_call_operand.hbm [shape: bf16[2,8,768], index: 1, kind: input, shape index: {}, may-alias: {0,1,2}]   ;;  %s1843_s2 = inlined_call_operand.hbm [shape: bf16[2,8,768], index: 2, kind: input, shape index: {}, may-alias: {0,1,2}]   ;;  %s1844_s3 = inlined_call_operand.hbm [shape: s32[2,1,8], index: 3, kind: input, shape index: {}]   ;;  %s1845_s4 = inlined_call_operand.hbm [shape: bf16[2,8,256], index: 4, kind: output, shape index: {}]  }
   0x1   :  { %1866 = sst [smem:[#allocation32_spill]] %s1841_s0 }
   0x2   :  { %1867 = sst [smem:[#allocation33_spill]] %s1842_s1 }
   0x3   :  { %1868 = sst [smem:[#allocation34_spill]] %s1843_s2 }
   0x4   :  { %1869 = sst [smem:[#allocation35_spill]] %s1844_s3 }
   0x5   :  { %1870 = sst [smem:[#allocation36_spill]] %s1845_s4 }
   0x6   :  { %9 = vsyncpa [#allocation6], 0 }
   0x7   :  { %11 = vsyncpa [#allocation6 + $0x1], 0 }
   0x8   :  { %12 = vsyncpa [#allocation9], 0 }
   0x9   :  { %14 = vsyncpa [#allocation9 + $0x1], 0 }
   0xa   :  { %15 = vsyncpa [#allocation12], 0 }
   0xb   :  { %17 = vsyncpa [#allocation12 + $0x1], 0 }
   0xc   :  { %18 = vsyncpa [#allocation7], 0 }
   0xd   :  { %20 = vsyncpa [#allocation7 + $0x1], 0  ;;  %s1340_s15 = smov 0   ;;  %s1342_s16 = smov 0  }
   0xe   :  { %s1344_s17 = smov 0   ;;  %s1346_s18 = smov 0  }
   0xf   :  { %s1348_s19 = smov 0   ;;  %s1350_s20 = smov 0  }
  0x10   :  { %s1352_s21 = smov 0   ;;  %s1354_s22 = smov 0  }
  0x11   :  { %s1356_s23 = smov 0   ;;  %s1358_s24 = smov 0  }
  0x12   :  { %s1360_s25 = smov 0   ;;  %s1362_s26 = smov 0  }
  0x13   :  { %s1364_s27 = smov 0   ;;  %s1366_s28 = smov 0  }
  0x14   :  { %s1368_s29 = smov 0   ;;  %s1370_s30 = smov 0  }
  0x15   :  { %s1372_s5 = smov 0  }
  0x16 LB: > { %1871 = sst [smem:[#allocation19_spill]] %s1240_s15  ;;  %s1426_s6 = sadd.s32 4294967295, %s1304_s5   ;;  %s1304_s5 = sphi %s1372_s5, %s26_s5   ;;  %s1300_s30 = sphi %s1370_s30, %s1948_s30   ;;  %s1296_s29 = sphi %s1368_s29, %s1936_s29   ;;  %s1292_s28 = sphi %s1366_s28, %s1947_s28   ;;  %s1288_s27 = sphi %s1364_s27, %s1935_s27   ;;  %s1284_s26 = sphi %s1362_s26, %s1934_s26   ;;  %s1280_s25 = sphi %s1360_s25, %s1946_s25   ;;  %s1276_s24 = sphi %s1358_s24, %s1945_s24   ;;  %s1272_s23 = sphi %s1356_s23, %s1944_s23   ;;  %s1268_s22 = sphi %s1354_s22, %s1943_s22   ;;  %s1264_s21 = sphi %s1352_s21, %s1942_s21   ;;  %s1260_s20 = sphi %s1350_s20, %s1941_s20   ;;  %s1256_s19 = sphi %s1348_s19, %s1940_s19   ;;  %s1252_s18 = sphi %s1346_s18, %s1939_s18   ;;  %s1248_s17 = sphi %s1344_s17, %s1938_s17   ;;  %s1244_s16 = sphi %s1342_s16, %s1930_s16   ;;  %s1240_s15 = sphi %s1340_s15, %s1929_s15  }
  0x17   : > { %1872 = sst [smem:[#allocation20_spill]] %s1244_s16  ;;  %s48_s7 = sadd.s32 1, %s1296_s29 }
  0x18   : > { %1873 = sst [smem:[#allocation21_spill]] %s1248_s17  ;;  %p50_p0 = scmp.ge.s32.totalorder %s48_s7, 2 }
  0x19   : > { %1874 = sst [smem:[#allocation22_spill]] %s1268_s22  ;;  %s52_s8 = sadd.s32 1, %s1300_s30 }
  0x1a   : > { %1875 = sst [smem:[#allocation23_spill]] %s1284_s26  ;;  %p1857_p1 = scmp.eq.s32.totalorder %s1304_s5, 0 }
  0x1b   : > { %1876 = sst [smem:[#allocation24_spill]] %s1288_s27  ;;  %p1856_p2 = scmp.eq.s32.totalorder %s1426_s6, 0 }
  0x1c   : > { %1877 = sst [smem:[#allocation25_spill]] %s1292_s28  ;;  %s1950_s7 = smov (%p50_p0, %s48_s7), 0 }
  0x1d   : > { %1878 = sst [smem:[#allocation26_spill]] %s1296_s29  ;;  %s1952_s8 = smov (!%p50_p0, %s52_s8), %s1300_s30 }
  0x1e   : > { %1879 = sst [smem:[#allocation27_spill]] %s1950_s7  ;;  %s86_s9 = sadd.s32 2, %s1296_s29 }
  0x1f   : > { %s87_s10 = sadd.s32 2, %s1950_s7  ;;  %p54_p3 = scmp.ge.s32.totalorder %s1952_s8, 2 }
  0x20   : > { %s91_s11 = ssub.s32 %s86_s9, %s87_s10  ;;  %s95_s12 = sadd.s32 1, %s1272_s23 }
  0x21   : > { %p102_p4 = scmp.ne.s32.totalorder %s1272_s23, %s1268_s22  ;;  %s1954_s8 = smov (%p54_p3, %s1952_s8), 0 }
  0x22   : > { %1880 = sst [smem:[#allocation28_spill]] %s1954_s8  ;;  %p108_p6 = scmp.ne.s32.totalorder %s1268_s22, %s1264_s21 }
  0x23   : > { %p1444_p5 = por %p102_p4, %p1857_p1  ;;  %s1452_s14 = ssub.s32 %s1300_s30, %s1954_s8 }
  0x24   : > { %s118_s4 = sadd.s32 4, %s1296_s29  ;;  %s92_s27 = sor.u32 %s91_s11, %s1452_s14 }
  0x25   : > { %p1458_p7 = por %p108_p6, %p1856_p2  ;;  %p93_p8 = scmp.eq.s32.totalorder %s92_s27, 0 }
  0x26   : > { %s119_s10 = sadd.s32 4, %s1950_s7  ;;  %p1855_p9 = scmp.lt.s32.totalorder %s1304_s5, 4 }
  0x27   : > { %s1882_s9 = scalar_select %p1458_p7, 1, 0 }
  0x28   : > { %s1463_s28 = ssub.s32 %s118_s4, %s119_s10  ;;  %s822_s21 = smul.u32 6, %s1300_s30 }
  0x29   : > { %1883 = sst [smem:[#allocation29_spill]] %s1882_s9  ;;  %s244_s8 = sand.u32 1, %s1304_s5  }
  0x2a   : > { %s1466_s3 = scalar_select %p93_p8, %s1272_s23, %s95_s12  }
  0x2b   : > { %s246_s22 = sand.u32 1, %s1272_s23   ;;  %s233_s11 = sadd.s32 %s1296_s29, %s822_s21 }
  0x2c   : > { %1884 = sst [smem:[#allocation30_spill]] %s1466_s3  ;;  %s1473_s15 = sshll.u32 %s233_s11, 6 }
  0x2d   : > { %s792_s16 = sshll.u32 %s246_s22, 2  ;;  %s1885_s1 = sld [smem:[#allocation33_spill]] }
  0x2e   : > { %s248_s4 = scalar_lea.vmem [#allocation8], %s792_s16  ;;  %p1487_p10 = pnand %p1855_p9, %p1444_p5 }
  0x2f   : > { %s260_s12 = sshll.u32 %s248_s4, 4  ;;  %s1493_s22 = scalar_lea.sflag [#allocation9], %s244_s8  ;;  %s1481_s12 = int_to_ptr.vmem [resolvable:$true] %s260_s12 }
  0x30   : > { %p1002_p0 = pneg %p1487_p10 }
  0x33   : > { %s664_s17 = scalar_lea.hbm %s1885_s1, %s1473_s15  ;;  %s1005_s21 = scalar_lea.hbm %s1885_s1, 768 }
  0x34   : > { %s1479_s2 = scalar_lea.hbm %s664_s17, 128  ;;  %s1030_s9 = scalar_lea.hbm %s664_s17, 192 }
  0x35   : > { %p1001_p13 = scmp.ne.s32.totalorder %s1479_s2, %s1030_s9  ;;  %p1006_p5 = scmp.lt.u32.totalorder %s1479_s2, %s1885_s1 }
  0x36   : > { %p1007_p6 = scmp.lt.u32.totalorder %s1005_s21, %s1030_s9  ;;  %p1009_p9 = scmp.lt.u32.totalorder %s1030_s9, %s1479_s2 }
  0x37   : > { %p1003_p3 = pnand %p1002_p0, %p1001_p13 }
  0x38   : > { %p1008_p8 = por %p1007_p6, %p1006_p5 }
  0x39   : > { %p1004_p4 = pneg %p1003_p3 }
  0x3a   : > { %p1010_p2 = por %p1009_p9, %p1008_p8 }
  0x3c   : > { %p1011_p1 = pnand %p1010_p2, %p1004_p4 }
  0x3e   : > { %1014 = shalt.err (!%p1011_p1)
}
  0x3f   : > { %s1015_s17 = scalar_lea.vmem %s1481_s12, 64  ;;  %s1306_s8 = smov [#allocation8]  }
  0x40   : > { %p1016_p13 = scmp.ne.s32.totalorder %s1481_s12, %s1015_s17  ;;  %s1020_s4 = sshll.u32 %s1306_s8, 4  ;;  %s1021_s4 = int_to_ptr.vmem [resolvable:$false] %s1020_s4 }
  0x41   : > { %s1022_s16 = scalar_lea.vmem %s1021_s4, 128  ;;  %p1023_p12 = scmp.lt.s32.totalorder %s1481_s12, %s1021_s4 }
  0x42   : > { %p1018_p3 = pnand %p1016_p13, %p1002_p0  ;;  %p1024_p5 = scmp.lt.s32.totalorder %s1022_s16, %s1015_s17 }
  0x44   : > { %p1019_p11 = pneg %p1018_p3  ;;  %p1025_p6 = por %p1024_p5, %p1023_p12 }
  0x46   : > { %p1026_p9 = pnand %p1025_p6, %p1019_p11 }
  0x48   : > { %1029 = shalt.err (!%p1026_p9)
}
  0x49   : > { %839 = dma.hbm_to_vmem [thread:$0]  (!%p1487_p10), %s1479_s2, 64, %s1481_s12, %s1493_s22  }
  0x4a   : > { %p1887_p1 = scmp.lt.s32.totalorder %s1304_s5, 5  ;;  %p1888_p2 = scmp.ge.s32.totalorder %s1304_s5, 1 }
  0x4b   : > { %s787_s9 = sadd.s32 4294967294, %s1304_s5   ;;  %s59_s13 = ssub.s32 %s1296_s29, %s1950_s7 }
  0x4c   : > { %p1524_p11 = pnand %p1888_p2, %p1887_p1  ;;  %s60_s21 = sor.u32 %s59_s13, %s1452_s14 }
  0x4d   : > { %s63_s11 = sadd.s32 1, %s1284_s26  ;;  %p61_p12 = scmp.eq.s32.totalorder %s60_s21, 0 }
  0x4e   : > { %s1889_s10 = scalar_select %p1524_p11, 1, 0 }
  0x4f   : > { %p70_p0 = scmp.ne.s32.totalorder %s1284_s26, %s1280_s25  ;;  %p76_p4 = scmp.ne.s32.totalorder %s1280_s25, %s1276_s24 }
  0x50   : > { %p196_p8 = scmp.eq.s32.totalorder %s1426_s6, 3  ;;  %p1891_p13 = scmp.eq.s32.totalorder %s1304_s5, 0 }
  0x51   : > { %s1539_s27 = scalar_select %p61_p12, %s1284_s26, %s63_s11  }
  0x52   : > { %p72_p10 = por %p1891_p13, %p70_p0  ;;  %p1892_p3 = scmp.eq.s32.totalorder %s1426_s6, 0 }
  0x53   : > { %1890 = sst [smem:[#allocation31_spill]] %s1539_s27  ;;  %p1549_p6 = por %p196_p8, %p70_p0 }
  0x54   : > { %p1545_p5 = por %p1892_p3, %p76_p4  ;;  %p202_p9 = scmp.eq.s32.totalorder %s787_s9, 3 }
  0x55   : > { %s1894_s12 = scalar_select %p1549_p6, 1, 0 }
  0x56   : > { %s1893_s2 = scalar_select %p1545_p5, 1, 0 }
  0x57   : > { %s222_s17 = sand.u32 1, %s1284_s26   ;;  %s1895_s0 = sld [smem:[#allocation32_spill]] }
  0x58   : > { %p1560_p1 = por %p202_p9, %p76_p4  ;;  %s790_s21 = sshll.u32 %s222_s17, 2 }
  0x59   : > { %p1897_p2 = scmp.lt.s32.totalorder %s1304_s5, 4  ;;  %s226_s9 = scalar_lea.vmem [#allocation5], %s790_s21 }
  0x5a   : > { %s1896_s13 = scalar_select %p1560_p1, 1, 0 }
  0x5b   : > { %p1566_p12 = pnand %p1897_p2, %p72_p10  ;;  %s237_s8 = sshll.u32 %s226_s9, 4  ;;  %s1570_s8 = int_to_ptr.vmem [resolvable:$true] %s237_s8 }
  0x5c   : > { %s223_s4 = scalar_lea.sflag [#allocation6], %s222_s17 }
  0x5d   : > { %s1558_s16 = scalar_lea.hbm %s1895_s0, %s1473_s15  ;;  %p1033_p4 = pneg %p1566_p12 }
  0x5e   : > { %s1031_s1 = scalar_lea.hbm %s1558_s16, 64  ;;  %s1036_s27 = scalar_lea.hbm %s1895_s0, 768 }
  0x5f   : > { %p1032_p0 = scmp.ne.s32.totalorder %s1558_s16, %s1031_s1  ;;  %p1037_p10 = scmp.lt.u32.totalorder %s1558_s16, %s1895_s0 }
  0x60   : > { %p1038_p3 = scmp.lt.u32.totalorder %s1036_s27, %s1031_s1  ;;  %p1040_p2 = scmp.lt.u32.totalorder %s1031_s1, %s1558_s16 }
  0x61   : > { %p1034_p8 = pnand %p1033_p4, %p1032_p0 }
  0x62   : > { %p1039_p9 = por %p1038_p3, %p1037_p10 }
  0x63   : > { %p1035_p13 = pneg %p1034_p8 }
  0x64   : > { %p1041_p1 = por %p1040_p2, %p1039_p9 }
  0x66   : > { %p1042_p6 = pnand %p1041_p1, %p1035_p13 }
  0x68   : > { %1045 = shalt.err (!%p1042_p6)
}
  0x69   : > { %s1046_s17 = scalar_lea.vmem %s1570_s8, 64  ;;  %s1307_s29 = smov [#allocation5]  }
  0x6a   : > { %p1047_p0 = scmp.ne.s32.totalorder %s1570_s8, %s1046_s17  ;;  %s1051_s7 = sshll.u32 %s1307_s29, 4  ;;  %s1052_s7 = int_to_ptr.vmem [resolvable:$false] %s1051_s7 }
  0x6b   : > { %s1053_s3 = scalar_lea.vmem %s1052_s7, 128  ;;  %p1054_p5 = scmp.lt.s32.totalorder %s1570_s8, %s1052_s7 }
  0x6c   : > { %p1049_p8 = pnand %p1047_p0, %p1033_p4  ;;  %p1055_p10 = scmp.lt.s32.totalorder %s1053_s3, %s1046_s17 }
  0x6e   : > { %p1050_p7 = pneg %p1049_p8  ;;  %p1056_p3 = por %p1055_p10, %p1054_p5 }
  0x70   : > { %p1057_p9 = pnand %p1056_p3, %p1050_p7 }
  0x72   : > { %1060 = shalt.err (!%p1057_p9)
}
  0x73   : > { %836 = dma.hbm_to_vmem [thread:$0]  (!%p1566_p12), %s1558_s16, 64, %s1570_s8, %s223_s4  }
  0x74   : > { %s124_s1 = sor.u32 %s1463_s28, %s1452_s14  ;;  %s127_s26 = sadd.s32 1, %s1260_s20 }
  0x75   : > { %p125_p7 = scmp.eq.s32.totalorder %s124_s1, 0  ;;  %p134_p5 = scmp.ne.s32.totalorder %s1260_s20, %s1256_s19 }
  0x76   : > { %p140_p6 = scmp.ne.s32.totalorder %s1256_s19, %s1252_s18  ;;  %s269_s27 = sand.u32 1, %s1260_s20  }
  0x77   : > { %s1606_s21 = scalar_select %p125_p7, %s1260_s20, %s127_s26  }
  0x78   : > { %p1899_p1 = scmp.eq.s32.totalorder %s1304_s5, 0  ;;  %p1900_p13 = scmp.eq.s32.totalorder %s1426_s6, 0 }
  0x79   : > { %s794_s9 = sshll.u32 %s269_s27, 2  ;;  %s1902_s7 = sld [smem:[#allocation34_spill]] }
  0x7a   : > { %p136_p4 = por %p134_p5, %p1899_p1  ;;  %p1612_p2 = por %p140_p6, %p1900_p13 }
  0x7b   : > { %s271_s18 = scalar_lea.vmem [#allocation10], %s794_s9  ;;  %p1903_p12 = scmp.lt.s32.totalorder %s1304_s5, 4 }
  0x7c   : > { %s1901_s11 = scalar_select %p1612_p2, 1, 0 }
  0x7d   : > { %s283_s8 = sshll.u32 %s271_s18, 4  ;;  %p1624_p0 = pnand %p1903_p12, %p136_p4  ;;  %s284_s8 = int_to_ptr.vmem [resolvable:$true] %s283_s8 }
  0x7f   : > { %s674_s16 = scalar_lea.hbm %s1902_s7, %s1473_s15  ;;  %p1063_p10 = pneg %p1624_p0 }
  0x80   : > { %s1620_s28 = scalar_lea.hbm %s674_s16, 256  ;;  %s1091_s3 = scalar_lea.hbm %s674_s16, 320 }
  0x81   : > { %p1062_p8 = scmp.ne.s32.totalorder %s1620_s28, %s1091_s3  ;;  %s1066_s26 = scalar_lea.hbm %s1902_s7, 768 }
  0x82   : > { %p1067_p7 = scmp.lt.u32.totalorder %s1620_s28, %s1902_s7  ;;  %p1068_p5 = scmp.lt.u32.totalorder %s1066_s26, %s1091_s3 }
  0x83   : > { %p1064_p3 = pnand %p1063_p10, %p1062_p8  ;;  %p1070_p1 = scmp.lt.u32.totalorder %s1091_s3, %s1620_s28 }
  0x84   : > { %p1069_p6 = por %p1068_p5, %p1067_p7 }
  0x85   : > { %p1065_p9 = pneg %p1064_p3 }
  0x86   : > { %p1071_p4 = por %p1070_p1, %p1069_p6 }
  0x88   : > { %p1072_p13 = pnand %p1071_p4, %p1065_p9 }
  0x8a   : > { %1075 = shalt.err (!%p1072_p13)
}
  0x8b   : > { %s1076_s17 = scalar_lea.vmem %s284_s8, 64  ;;  %s1308_s29 = smov [#allocation10]  }
  0x8c   : > { %p1077_p12 = scmp.ne.s32.totalorder %s284_s8, %s1076_s17  ;;  %s1081_s16 = sshll.u32 %s1308_s29, 4  ;;  %s1082_s16 = int_to_ptr.vmem [resolvable:$false] %s1081_s16 }
  0x8d   : > { %s1083_s18 = scalar_lea.vmem %s1082_s16, 128  ;;  %p1084_p2 = scmp.lt.s32.totalorder %s284_s8, %s1082_s16 }
  0x8e   : > { %p1079_p8 = pnand %p1077_p12, %p1063_p10  ;;  %p1085_p11 = scmp.lt.s32.totalorder %s1083_s18, %s1076_s17 }
  0x90   : > { %p1080_p3 = pneg %p1079_p8  ;;  %p1086_p5 = por %p1085_p11, %p1084_p2 }
  0x92   : > { %p1087_p7 = pnand %p1086_p5, %p1080_p3 }
  0x94   : > { %1090 = shalt.err (!%p1087_p7)
}
  0x95   : > { %s1905_s3 = sld [smem:[#allocation21_spill]]  ;;  %s1906_s15 = sld [smem:[#allocation20_spill]] }
  0x96   : > { %s1907_s1 = sld [smem:[#allocation19_spill]]  ;;  %p153_p11 = scmp.eq.s32.totalorder %s1452_s14, 0 }
  0x97   : > { %842 = dma.hbm_to_vmem [thread:$0]  (!%p1624_p0), %s1620_s28, 64, %s284_s8, %s1493_s22  }
  0x98   : > { %p1908_p9 = scmp.eq.s32.totalorder %s1304_s5, 0  ;;  %p1909_p1 = scmp.eq.s32.totalorder %s1426_s6, 0 }
  0x99   : > { %s796_s17 = sshll.u32 %s1300_s30, 4  ;;  %s1911_s18 = sld [smem:[#allocation35_spill]] }
  0x9a   : > { %p1913_p0 = scmp.lt.s32.totalorder %s1304_s5, 4 }
  0x9b   : > { %s155_s26 = sadd.s32 1, %s1905_s3  ;;  %p162_p2 = scmp.ne.s32.totalorder %s1905_s3, %s1906_s15 }
  0x9c   : > { %p168_p10 = scmp.ne.s32.totalorder %s1906_s15, %s1907_s1  ;;  %s290_s9 = sand.u32 1, %s1905_s3  }
  0x9d   : > { %s1656_s4 = scalar_select %p153_p11, %s1905_s3, %s155_s26  }
  0x9e   : > { %p164_p6 = por %p162_p2, %p1908_p9  ;;  %p1662_p4 = por %p168_p10, %p1909_p1 }
  0x9f   : > { %s1912_s0 = smov %s1911_s18  ;;  %s1671_s7 = scalar_lea.hbm %s1911_s18, %s796_s17 }
  0xa0   : > { %s293_s14 = scalar_lea.vmem [#allocation11], %s290_s9  ;;  %p1677_p13 = pnand %p1913_p0, %p164_p6 }
  0xa1   : > { %s301_s22 = sshll.u32 %s293_s14, 4  ;;  %s291_s8 = scalar_lea.sflag [#allocation12], %s290_s9  ;;  %s1673_s22 = int_to_ptr.vmem [resolvable:$true] %s301_s22 }
  0xa2   : > { %s1092_s3 = scalar_lea.hbm %s1671_s7, 16  ;;  %p1094_p8 = pneg %p1677_p13 }
  0xa3   : > { %p1093_p12 = scmp.ne.s32.totalorder %s1671_s7, %s1092_s3  ;;  %s1097_s26 = scalar_lea.hbm %s1912_s0, 32 }
  0xa4   : > { %p1098_p7 = scmp.lt.u32.totalorder %s1671_s7, %s1912_s0  ;;  %p1099_p11 = scmp.lt.u32.totalorder %s1097_s26, %s1092_s3 }
  0xa5   : > { %p1095_p3 = pnand %p1094_p8, %p1093_p12  ;;  %p1101_p10 = scmp.lt.u32.totalorder %s1092_s3, %s1671_s7 }
  0xa6   : > { %p1100_p2 = por %p1099_p11, %p1098_p7 }
  0xa7   : > { %p1096_p5 = pneg %p1095_p3 }
  0xa8   : > { %p1102_p9 = por %p1101_p10, %p1100_p2 }
  0xaa   : > { %p1103_p6 = pnand %p1102_p9, %p1096_p5 }
  0xac   : > { %1106 = shalt.err (!%p1103_p6)
}
  0xad   : > { %s1107_s9 = scalar_lea.vmem %s1673_s22, 16  ;;  %s1309_s16 = smov [#allocation11]  }
  0xae   : > { %p1108_p1 = scmp.ne.s32.totalorder %s1673_s22, %s1107_s9  ;;  %s1112_s18 = sshll.u32 %s1309_s16, 4  ;;  %s1113_s18 = int_to_ptr.vmem [resolvable:$false] %s1112_s18 }
  0xaf   : > { %s1114_s14 = scalar_lea.vmem %s1113_s18, 32  ;;  %p1115_p3 = scmp.lt.s32.totalorder %s1673_s22, %s1113_s18 }
  0xb0   : > { %p1110_p0 = pnand %p1108_p1, %p1094_p8  ;;  %p1116_p7 = scmp.lt.s32.totalorder %s1114_s14, %s1107_s9 }
  0xb2   : > { %p1111_p12 = pneg %p1110_p0  ;;  %p1117_p11 = por %p1116_p7, %p1115_p3 }
  0xb4   : > { %p1118_p2 = pnand %p1117_p11, %p1111_p12 }
  0xb6   : > { %1121 = shalt.err (!%p1118_p2)
}
  0xb7   : > { %845 = dma.hbm_to_vmem [thread:$0]  (!%p1677_p13), %s1671_s7, 16, %s1673_s22, %s291_s8  }
  0xb8   : > { %p1915_p5 = scmp.ne.s32.totalorder %s1889_s10, 0 }
  0xb9   : > { %s1709_s3 = sand.u32 (!%p1915_p5), 1, %s1280_s25   ;;  %p1916_p8 = scmp.ne.s32.totalorder (!%p1915_p5), %s1893_s2, 0 }
  0xba   : > { %310 = sbr.rel (%p1915_p5) target bundleno = 1036 (0x40c), region = 36  ;;  %s798_s15 = sshll.u32 (!%p1915_p5), %s1709_s3, 2 }
  0xbb   : > { %s313_s1 = scalar_lea.sflag (!%p1915_p5), [#allocation6], %s1709_s3  ;;  %s316_s26 = scalar_lea.vmem (!%p1915_p5), [#allocation5], %s798_s15 }
  0xc1   : > { %1219 = dma.done.wait (%p1916_p8), %s313_s1, 64  }
  0xc2   : > { %1221 = vsyncadd (%p1916_p8), %s313_s1, 4294967232  ;;  %s1917_s7 = sld [smem:[#allocation22_spill]]  ;;  %s1918_s10 = sld [smem:[#allocation29_spill]] }
  0xc3   : > { %s321_s22 = sand.u32 1, %s1426_s6  }
  0xc4   : > { %s322_s17 = scalar_lea.sflag [#allocation9], %s321_s22 }
  0xc8   : > { %s323_s28 = sand.u32 1, %s1917_s7   ;;  %p1919_p13 = scmp.ne.s32.totalorder %s1918_s10, 0 }
  0xc9   : > { %s799_s8 = sshll.u32 %s323_s28, 2 }
  0xca   : > { %s325_s29 = scalar_lea.vmem [#allocation8], %s799_s8 }
  0xcb   : > { %1223 = dma.done.wait (%p1919_p13), %s322_s17, 64  }
  0xcc   : > { %1225 = vsyncadd (%p1919_p13), %s322_s17, 4294967232  ;;  %s332_s9 = sand.u32 1, %s1256_s19   ;;  %p1920_p10 = scmp.ne.s32.totalorder %s1901_s11, 0 }
  0xcd   : > { %s1726_s16 = sshll.u32 %s332_s9, 2 }
  0xce   : > { %s334_s2 = scalar_lea.vmem [#allocation10], %s1726_s16 }
  0xcf   : > { %1227 = dma.done.wait (%p1920_p10), %s322_s17, 64  }
  0xd0   : > { %1229 = vsyncadd (%p1920_p10), %s322_s17, 4294967232  ;;  %s1921_s6 = sld [smem:[#allocation20_spill]] }
  0xd6   : > { %s339_s18 = sand.u32 1, %s1921_s6  }
  0xd7   : > { %s340_s14 = scalar_lea.sflag [#allocation12], %s339_s18  ;;  %s342_s1 = scalar_lea.vmem [#allocation11], %s339_s18 }
  0xd8   : > { %1231 = dma.done.wait (%p1662_p4), %s340_s14, 16  }
  0xd9   : > { %1233 = vsyncadd (%p1662_p4), %s340_s14, 4294967280  ;;  %vm387_vm0 = vcmask 7168   ;;  %v1310_v0 = vmov 0.0   ;;  %vm1311_vm1 = vmmov 0   ;;  %v393_v1 = vld [vmem:[%s325_s29] sm:$0xf]  ;;  %v471_v7 = vlaneseq }
  0xda   : > { %389 = vst.msk [vmem:[#allocation3] sm:$0xff] %vm387_vm0, %v1310_v0  ;;  %812 = vmatprep.subr.mxu0 %v1310_v0  ;;  %814 = vmatprep.mubr.msk.f32.mxu0 %vm1311_vm1, %v1310_v0  ;;  %v391_v2 = vld [vmem:[%s316_s26] sm:$0xf]  ;;  %v394_v3 = vunpack.c.l.bf16 %v393_v1  ;;  %v1312_v5 = vmov 0   ;;  %v1313_v6 = vmov -inf   ;;  %vm478_vm4 = vcmask 64512  }
  0xdb   : > { %817 = vmatprep.subr.mxu1 %v1310_v0  ;;  %819 = vmatprep.mubr.msk.f32.mxu1 %vm1311_vm1, %v1310_v0  ;;  %v392_v4 = vunpack.c.l.bf16 %v391_v2  ;;  %388 = vst.msk [vmem:[#allocation2] sm:$0xff] %vm387_vm0, %v1313_v6  ;;  %v468_v8 = vld [vmem:[%s342_s1] sm:$0x1]  ;;  %v472_v9 = vshrl.u32 %v471_v7, 7  ;;  %s1922_s11 = sld [smem:[#allocation25_spill]]  ;;  %s1923_s27 = sld [smem:[#allocation24_spill]] }
  0xdc   : > { %813 = vmatpush3.xpose.msra.mxu0 %v394_v3  ;;  %992 = vset.pattern.permute.xlu0 %v1312_v5  ;;  %vm469_vm2 = vcmp.gt.s32.totalorder %v468_v8, 0  ;;  %v395_v22 = vld [vmem:[%s334_s2] sm:$0xf]  ;;  %s380_s22 = scalar_lea.vmem [#allocation13], %s798_s15  ;;  %s1924_s29 = sld [smem:[#allocation36_spill]] }
  0xdd   : > { %993 = vset.pattern.permute.xlu1 %v1312_v5  ;;  %v473_v10 = vsub.s32 0, %v472_v9  ;;  %v470_v11 = vsel %vm469_vm2, 1, %v1312_v5  ;;  %v396_v23 = vunpack.c.l.bf16 %v395_v22  ;;  %s617_s28 = sshll.u32 %s380_s22, 4  ;;  %s600_s2 = scalar_lea.sflag [#allocation7], %s1709_s3  ;;  %s1756_s28 = int_to_ptr.vmem [resolvable:$true] %s617_s28 }
  0xde   : > { %s1122_s6 = scalar_lea.vmem %s1756_s28, 64  ;;  %p1926_p9 = scmp.ne.s32.totalorder %s1894_s12, 0 }
  0xdf   : > { %815 = vmatmul.mubr.f32.vlgmr.msra.gmra.mrb[0].mxu0 %v392_v4  ;;  %v474_v12 = vrot.slane %v470_v11, %v473_v10  ;;  %818 = vmatpush3.msra.mxu1 %v396_v23  ;;  %p1123_p4 = scmp.ne.s32.totalorder %s1756_s28, %s1122_s6  ;;  %s1314_s15 = smov [#allocation13]  }
  0xe0   : > { %s1126_s18 = sshll.u32 %s1314_s15, 4  ;;  %s1127_s18 = int_to_ptr.vmem [resolvable:$false] %s1126_s18 }
  0xe1   : > { %vm475_vm3 = vcmp.eq.s32.totalorder %v474_v12, 1  ;;  %v494_v31 = vld [vmem:[#allocation3] sm:$0xff]  ;;  %s804_s26 = sshll.u32 %s1922_s11, 1  ;;  %p1124_p6 = pnand %p1123_p4, %p1926_p9 }
  0xe2   : > { %v477_v18 = vld [vmem:[#allocation2] sm:$0xff]  ;;  %s613_s7 = sadd.s32 %s1923_s27, %s804_s26  ;;  %s1925_s9 = smov %s1924_s29 }
  0xe3   : > { %s805_s10 = sshll.u32 %s613_s7, 6  ;;  %p1125_p1 = pneg %p1124_p6 }
  0xe4   : > { %s1754_s16 = scalar_lea.hbm %s1924_s29, %s805_s10  ;;  %s1128_s14 = scalar_lea.vmem %s1127_s18, 128 }
  0xe5   : > { %p1129_p0 = scmp.lt.s32.totalorder %s1756_s28, %s1127_s18  ;;  %p1130_p12 = scmp.lt.s32.totalorder %s1128_s14, %s1122_s6 }
  0xe7   : > { %p1131_p3 = por %p1130_p12, %p1129_p0 }
  0xe9   : > { %p1132_p7 = pnand %p1131_p3, %p1125_p1 }
 0x1b2   : > { %v463_v13 = vpop.f32.mrb[0].mxu0 }
 0x1b3   : > { %v467_v14 = vmul.f32 0.088388346, %v463_v13  ;;  %v816_v15 = vpop.f32.mrb[1].mxu0 }
 0x1b5   : > { %v476_v16 = vsel %vm475_vm3, %v467_v14, -1e+10 }
 0x1b6   : > { %v479_v17 = vsel %vm478_vm4, %v476_v16, -inf }
 0x1b7   : > { %480 = vmax.xlane.f32.xlu0 %v479_v17 }
 0x244   : > { %v481_v19 = vpop.xlane.xlu0 %480 }
 0x245   : > { %v482_v20 = vmax.f32 %v477_v18, %v481_v19 }
 0x247   : > { %v483_v21 = vsub.f32 %v477_v18, %v482_v20  ;;  %584 = vst.msk [vmem:[#allocation2] sm:$0xff] %vm387_vm0, %v482_v20  ;;  %488 = vperm.xlu0 %992, %v482_v20  }
 0x249   : > { %v484_v29 = vmul.f32 1.442695, %v483_v21 }
 0x2c6   : > { %v489_v24 = vpop.permute.xlu0 %488 }
 0x2c7   : > { %v491_v25 = vsub.f32 %v476_v16, %v489_v24 }
 0x2c9   : > { %v492_v26 = vmul.f32 1.442695, %v491_v25 }
 0x2cb   : > { %994 = vpow2.f32 %v492_v26 }
 0x2cc   : > { %996 = vpow2.f32 %v484_v29 }
 0x2d5   : > { %v995_v27 = vpop.eup %994 }
 0x2d6   : > { %820 = vmatmul.mubr.msk.f32.vlgmr.msra.gmra.mrb[0].mxu1 %vm478_vm4, %v995_v27  ;;  %v496_v28 = vsel %vm478_vm4, %v995_v27, 0.0  ;;  %v997_v30 = vpop.eup %996 }
 0x2d7   : > { %497 = vadd.xlane.f32.xlu1 %v496_v28  ;;  %v495_v32 = vmul.f32 %v997_v30, %v494_v31 }
 0x2e8   : > { %505 = vperm.xlu1 %993, %v997_v30  }
 0x364   : > { %v498_v33 = vpop.xlane.xlu1 %497 }
 0x365   : > { %v499_v34 = vadd.f32 %v498_v33, %v495_v32 }
 0x367   : > { %501 = vst.msk [vmem:[#allocation3] sm:$0xff] %vm387_vm0, %v499_v34 }
 0x368   : > { %v506_v39 = vpop.permute.xlu1 %505 }
 0x369   : > { %v508_v40 = vmul.f32 0.0, %v506_v39 }
 0x36e   : > { %v589_v35 = vld [vmem:[#allocation3] sm:$0xff] }
 0x36f   : > { %998 = vrcp.f32 %v589_v35 }
 0x379   : > { %v999_v36 = vpop.eup %998 }
 0x37a   : > { %593 = vperm.xlu1 %993, %v999_v36  }
 0x3a9   : > { %v578_v37 = vpop.f32.mrb[0].mxu1 }
 0x3aa   : > { %v821_v38 = vpop.f32.mrb[1].mxu1  ;;  %v582_v41 = vadd.f32 %v578_v37, %v508_v40 }
 0x3f9   : > { %v594_v42 = vpop.permute.xlu1 %593 }
 0x3fa   : > { %v596_v43 = vmul.f32 %v594_v42, %v582_v41 }
 0x3fc   : > { %v597_v44 = vpack.c.bf16 %v596_v43, %v596_v43 }
 0x3fe   : > { %598 = vst [vmem:[%s380_s22] sm:$0xf] %v597_v44 }
 0x3ff   : > { %1135 = shalt.err (!%p1132_p7)
}
 0x400   : > { %s1136_s3 = scalar_lea.hbm %s1754_s16, 64  ;;  %s1140_s27 = scalar_lea.hbm %s1925_s9, 256 }
 0x401   : > { %p1137_p11 = scmp.ne.s32.totalorder %s1754_s16, %s1136_s3  ;;  %p1141_p8 = scmp.lt.u32.totalorder %s1754_s16, %s1925_s9 }
 0x402   : > { %p1142_p13 = scmp.lt.u32.totalorder %s1140_s27, %s1136_s3  ;;  %p1144_p4 = scmp.lt.u32.totalorder %s1136_s3, %s1754_s16 }
 0x403   : > { %p1138_p2 = pnand %p1137_p11, %p1926_p9 }
 0x404   : > { %p1143_p10 = por %p1142_p13, %p1141_p8 }
 0x405   : > { %p1139_p5 = pneg %p1138_p2 }
 0x406   : > { %p1145_p6 = por %p1144_p4, %p1143_p10 }
 0x408   : > { %p1146_p1 = pnand %p1145_p6, %p1139_p5 }
 0x40a   : > { %1149 = shalt.err (!%p1146_p1)
}
 0x40b   : > { %831 = dma.vmem_to_hbm [thread:$0]  (%p1926_p9), %s1756_s28, 64, %s1754_s16, %s600_s2  }
 0x40c PF: > { %p851_p0 = scmp.ge.s32.totalorder %s1304_s5, 2  ;;  %s629_s10 = sand.u32 1, %s1276_s24  }
 0x40d   : > { %p1927_p12 = scmp.ne.s32.totalorder %s1896_s13, 0  ;;  %s630_s22 = scalar_lea.sflag [#allocation7], %s629_s10 }
 0x40f   : > { %p847_p3 = pnand %p851_p0, %p1927_p12 }
 0x411   : > { %1235 = dma.done.wait (!%p847_p3), %s630_s22, 64  }
 0x412   : > { %1237 = vsyncadd (!%p847_p3), %s630_s22, 4294967232  ;;  %s26_s5 = sadd.s32 1, %s1304_s5   ;;  %s1929_s15 = sld [smem:[#allocation20_spill]] }
 0x413   : > { %p1785_p7 = scmp.ge.s32.totalorder %s26_s5, 6   ;;  %s1930_s16 = sld [smem:[#allocation21_spill]] }
 0x414   : > { %s1931_s12 = sld [smem:[#allocation22_spill]]  ;;  %s1932_s24 = sld [smem:[#allocation30_spill]] }
 0x415   : > { %s1933_s13 = sld [smem:[#allocation23_spill]]  ;;  %s1934_s26 = sld [smem:[#allocation31_spill]] }
 0x416   : > { %s1935_s27 = sld [smem:[#allocation26_spill]]  ;;  %s1936_s29 = sld [smem:[#allocation27_spill]] }
 0x417   : > { %s1937_s2 = sld [smem:[#allocation28_spill]]  ;;  %s1938_s17 = smov %s1656_s4 }
 0x418   : > { %s1939_s18 = smov %s1256_s19  ;;  %s1940_s19 = smov %s1260_s20 }
 0x419   : > { %s1941_s20 = smov %s1606_s21  ;;  %s1943_s22 = smov %s1272_s23 }
 0x41a   : > { %s1942_s21 = smov %s1931_s12  ;;  %s1944_s23 = smov %s1932_s24 }
 0x41b   : > { %s1945_s24 = smov %s1280_s25  ;;  %s1946_s25 = smov %s1933_s13 }
 0x41c   : > { %s1947_s28 = smov %s1300_s30  ;;  %25 = sbr.rel (!%p1785_p7) target bundleno = 22 (0x16), region = 126 }
 0x41d   : > { %s1948_s30 = smov %s1937_s2 }
 0x423   :  { %635 = vsyncpa [#allocation6], 1 }
 0x424   :  { %637 = vsyncpa [#allocation6 + $0x1], 1 }
 0x425   :  { %638 = vsyncpa [#allocation9], 1 }
 0x426   :  { %640 = vsyncpa [#allocation9 + $0x1], 1 }
 0x427   :  { %641 = vsyncpa [#allocation12], 1 }
 0x428   :  { %643 = vsyncpa [#allocation12 + $0x1], 1 }
 0x429   :  { %644 = vsyncpa [#allocation7], 1 }
 0x42a   :  { %646 = vsyncpa [#allocation7 + $0x1], 1 }

// kernel: seq2seq_forward.32
= control target key start
LH: loop header
LB: loop body
LE: loop exit
PB: predicated region body
PF: predicated region fallthrough
CT: control target
= control target key end

     0   :  { %8 = vsyncpa [#allocation4], 0  ;;  %s1041_s0 = inlined_call_operand.hbm [shape: bf16[16,256], index: 0, kind: input, shape index: {}]   ;;  %s1042_s1 = inlined_call_operand.hbm [shape: bf16[256,512], index: 1, kind: input, shape index: {}]   ;;  %s1043_s2 = inlined_call_operand.hbm [shape: bf16[1,512], index: 2, kind: input, shape index: {}]   ;;  %s1044_s3 = inlined_call_operand.hbm [shape: bf16[16,512], index: 3, kind: output, shape index: {}]  }
   0x1   :  { %9 = vsyncpa [#allocation7], 0 }
   0x2   :  { %10 = vsyncpa [#allocation5], 0  ;;  %s959_s12 = smov [#allocation6]   ;;  %s865_s16 = scalar_lea.hbm %s1042_s1, 8192 }
   0x3   :  { %s28_s13 = sshll.u32 %s959_s12, 4  ;;  %p866_p0 = scmp.ne.s32.totalorder %s1042_s1, %s865_s16  ;;  %s29_s13 = int_to_ptr.vmem [resolvable:$true] %s28_s13 }
   0x4   :  { %p869_p1 = scmp.lt.u32.totalorder %s865_s16, %s1042_s1 }
   0x6   :  { %p871_p2 = pnand %p869_p1, %p866_p0 }
   0x8   :  { %874 = shalt.err (!%p871_p2)
}
   0x9   :  { %s875_s21 = scalar_lea.vmem %s29_s13, 8192  ;;  %p880_p4 = scmp.lt.s32.totalorder %s29_s13, %s29_s13 }
   0xa   :  { %p876_p3 = scmp.ne.s32.totalorder %s29_s13, %s875_s21  ;;  %p881_p5 = scmp.lt.s32.totalorder %s875_s21, %s875_s21 }
   0xc   :  { %p882_p6 = por %p881_p5, %p880_p4 }
   0xe   :  { %p883_p7 = pnand %p882_p6, %p876_p3 }
  0x10   :  { %886 = shalt.err (!%p883_p7)
}
  0x11   :  { %s960_s22 = smov 256   ;;  %s961_s23 = smov 16  }
  0x12   :  { %34 = dma.hbm_to_vmem [thread:$0]  %s1042_s1, 8192, %s29_s13, [#allocation7], %s960_s22, %s960_s22, %s961_s23  }
  0x13   :  { %s962_s26 = smov [#allocation3]   ;;  %s887_s30 = scalar_lea.hbm %s1041_s0, 256 }
  0x14   :  { %s16_s27 = sshll.u32 %s962_s26, 4  ;;  %p888_p8 = scmp.ne.s32.totalorder %s1041_s0, %s887_s30  ;;  %s17_s27 = int_to_ptr.vmem [resolvable:$true] %s16_s27 }
  0x15   :  { %p891_p9 = scmp.lt.u32.totalorder %s887_s30, %s1041_s0 }
  0x17   :  { %p893_p10 = pnand %p891_p9, %p888_p8 }
  0x19   :  { %896 = shalt.err (!%p893_p10)
}
  0x1a   :  { %s897_s8 = scalar_lea.vmem %s17_s27, 256  ;;  %p902_p12 = scmp.lt.s32.totalorder %s17_s27, %s17_s27 }
  0x1b   :  { %p898_p11 = scmp.ne.s32.totalorder %s17_s27, %s897_s8  ;;  %p903_p13 = scmp.lt.s32.totalorder %s897_s8, %s897_s8 }
  0x1d   :  { %p904_p0 = por %p903_p13, %p902_p12 }
  0x1f   :  { %p905_p1 = pnand %p904_p0, %p898_p11 }
  0x21   :  { %908 = shalt.err (!%p905_p1)
}
  0x22   :  { %s963_s1 = smov 128   ;;  %s964_s9 = smov 8  }
  0x23   :  { %22 = dma.hbm_to_vmem [thread:$0]  %s1041_s0, 256, %s17_s27, [#allocation4], %s963_s1, %s963_s1, %s964_s9  }
  0x24   :  { %s965_s12 = smov [#allocation8]   ;;  %s909_s16 = scalar_lea.hbm %s1043_s2, 64 }
  0x25   :  { %s41_s13 = sshll.u32 %s965_s12, 4  ;;  %p910_p2 = scmp.ne.s32.totalorder %s1043_s2, %s909_s16  ;;  %s42_s13 = int_to_ptr.vmem [resolvable:$true] %s41_s13 }
  0x26   :  { %p913_p3 = scmp.lt.u32.totalorder %s909_s16, %s1043_s2 }
  0x28   :  { %p915_p4 = pnand %p913_p3, %p910_p2 }
  0x2a   :  { %918 = shalt.err (!%p915_p4)
}
  0x2b   :  { %s919_s21 = scalar_lea.vmem %s42_s13, 64  ;;  %p924_p6 = scmp.lt.s32.totalorder %s42_s13, %s42_s13 }
  0x2c   :  { %p920_p5 = scmp.ne.s32.totalorder %s42_s13, %s919_s21  ;;  %p925_p7 = scmp.lt.s32.totalorder %s919_s21, %s919_s21 }
  0x2e   :  { %p926_p8 = por %p925_p7, %p924_p6 }
  0x30   :  { %p927_p9 = pnand %p926_p8, %p920_p5 }
  0x32   :  { %930 = shalt.err (!%p927_p9)
}
  0x33   :  { %44 = dma.hbm_to_vmem [thread:$0]  %s1043_s2, 64, %s42_s13, [#allocation7]  }
  0x34   :  { %953 = dma.done.wait [#allocation4], 256  }
  0x35   :  { %954 = vsyncadd [#allocation4], 4294967040 }
  0x36   :  { %955 = dma.done.wait [#allocation7], 8256  }
  0x37   :  { %956 = vsyncadd [#allocation7], 4294959040  ;;  %v766_v0 = vld [vmem:[#allocation6 + $0x4] ss:$16 sps:$4 sm:$0xff]   ;;  %v768_v1 = vld [vmem:[#allocation6 + $0xc] ss:$16 sps:$4 sm:$0xff]  }
  0x38   :  { %470 = vmatprep.subr.bf16.mxu0 %v766_v0  ;;  %v770_v2 = vld [vmem:[#allocation6] ss:$16 sps:$4 sm:$0xff]   ;;  %v771_v3 = vld [vmem:[#allocation6 + $0x8] ss:$16 sps:$4 sm:$0xff]   ;;  %513 = vmatprep.subr.bf16.mxu1 %v768_v1  ;;  %v772_v4 = vld [vmem:[#allocation6 + $0x24] ss:$16 sps:$4 sm:$0xff]  }
  0x39   :  { %471 = vmatpush1.bf16.msra.mxu0 %v770_v2  ;;  %514 = vmatpush1.bf16.msra.mxu1 %v771_v3  ;;  %v774_v5 = vld [vmem:[#allocation6 + $0x2c] ss:$16 sps:$4 sm:$0xff]   ;;  %v776_v6 = vld [vmem:[#allocation6 + $0x20] ss:$16 sps:$4 sm:$0xff]   ;;  %v777_v7 = vld [vmem:[#allocation6 + $0x28] ss:$16 sps:$4 sm:$0xff]   ;;  %v586_v2 = vlaneseq }
  0x3a   :  { %472 = vmatprep.subr.bf16.mxu0 %v772_v4  ;;  %515 = vmatprep.subr.bf16.mxu1 %v774_v5  ;;  %v778_v8 = vld [vmem:[#allocation6 + $0x44] ss:$16 sps:$4 sm:$0xff]   ;;  %v780_v9 = vld [vmem:[#allocation6 + $0x4c] ss:$16 sps:$4 sm:$0xff]   ;;  %v782_v10 = vld [vmem:[#allocation6 + $0x40] ss:$16 sps:$4 sm:$0xff]  }
  0x3b   :  { %v783_v11 = vld [vmem:[#allocation6 + $0x48] ss:$16 sps:$4 sm:$0xff]   ;;  %v784_v12 = vld [vmem:[#allocation6 + $0x64] ss:$16 sps:$4 sm:$0xff]   ;;  %v786_v13 = vld [vmem:[#allocation6 + $0x6c] ss:$16 sps:$4 sm:$0xff]  }
  0x3c   :  { %v788_v14 = vld [vmem:[#allocation6 + $0x60] ss:$16 sps:$4 sm:$0xff]   ;;  %v789_v15 = vld [vmem:[#allocation6 + $0x68] ss:$16 sps:$4 sm:$0xff]   ;;  %v790_v16 = vld [vmem:[#allocation6 + $0x84] ss:$16 sps:$4 sm:$0xff]  }
  0x3d   :  { %473 = vmatpush1.bf16.msra.mxu0 %v776_v6  ;;  %516 = vmatpush1.bf16.msra.mxu1 %v777_v7  ;;  %v792_v17 = vld [vmem:[#allocation6 + $0x8c] ss:$16 sps:$4 sm:$0xff]   ;;  %v794_v18 = vld [vmem:[#allocation6 + $0x80] ss:$16 sps:$4 sm:$0xff]   ;;  %v795_v19 = vld [vmem:[#allocation6 + $0x88] ss:$16 sps:$4 sm:$0xff]  }
  0x3e   :  { %474 = vmatprep.subr.bf16.mxu0 %v778_v8  ;;  %517 = vmatprep.subr.bf16.mxu1 %v780_v9  ;;  %v796_v20 = vld [vmem:[#allocation6 + $0xa4] ss:$16 sps:$4 sm:$0xff]   ;;  %v798_v21 = vld [vmem:[#allocation6 + $0xac] ss:$16 sps:$4 sm:$0xff]   ;;  %v800_v22 = vld [vmem:[#allocation6 + $0xa0] ss:$16 sps:$4 sm:$0xff]  }
  0x3f   :  { %v801_v23 = vld [vmem:[#allocation6 + $0xa8] ss:$16 sps:$4 sm:$0xff]   ;;  %v802_v24 = vld [vmem:[#allocation6 + $0xc4] ss:$16 sps:$4 sm:$0xff]   ;;  %v804_v25 = vld [vmem:[#allocation6 + $0xcc] ss:$16 sps:$4 sm:$0xff]  }
  0x40   :  { %v806_v26 = vld [vmem:[#allocation6 + $0xc0] ss:$16 sps:$4 sm:$0xff]   ;;  %v807_v27 = vld [vmem:[#allocation6 + $0xc8] ss:$16 sps:$4 sm:$0xff]   ;;  %v808_v28 = vld [vmem:[#allocation6 + $0xe4] ss:$16 sps:$4 sm:$0xff]  }
  0x41   :  { %475 = vmatpush1.bf16.msra.mxu0 %v782_v10  ;;  %518 = vmatpush1.bf16.msra.mxu1 %v783_v11  ;;  %v810_v29 = vld [vmem:[#allocation6 + $0xec] ss:$16 sps:$4 sm:$0xff]   ;;  %v812_v30 = vld [vmem:[#allocation6 + $0xe0] ss:$16 sps:$4 sm:$0xff]   ;;  %v813_v31 = vld [vmem:[#allocation6 + $0xe8] ss:$16 sps:$4 sm:$0xff]  }
  0x42   :  { %476 = vmatprep.subr.bf16.mxu0 %v784_v12  ;;  %519 = vmatprep.subr.bf16.mxu1 %v786_v13  ;;  %v814_v32 = vld [vmem:[#allocation6 + $0x104] ss:$16 sps:$4 sm:$0xff]   ;;  %v816_v33 = vld [vmem:[#allocation6 + $0x10c] ss:$16 sps:$4 sm:$0xff]   ;;  %v818_v34 = vld [vmem:[#allocation6 + $0x100] ss:$16 sps:$4 sm:$0xff]  }
  0x43   :  { %v819_v35 = vld [vmem:[#allocation6 + $0x108] ss:$16 sps:$4 sm:$0xff]   ;;  %v820_v36 = vld [vmem:[#allocation6 + $0x124] ss:$16 sps:$4 sm:$0xff]   ;;  %v822_v37 = vld [vmem:[#allocation6 + $0x12c] ss:$16 sps:$4 sm:$0xff]  }
  0x44   :  { %v824_v38 = vld [vmem:[#allocation6 + $0x120] ss:$16 sps:$4 sm:$0xff]   ;;  %v825_v39 = vld [vmem:[#allocation6 + $0x128] ss:$16 sps:$4 sm:$0xff]   ;;  %v826_v40 = vld [vmem:[#allocation6 + $0x144] ss:$16 sps:$4 sm:$0xff]  }
  0x45   :  { %477 = vmatpush1.bf16.msra.mxu0 %v788_v14  ;;  %520 = vmatpush1.bf16.msra.mxu1 %v789_v15  ;;  %v828_v41 = vld [vmem:[#allocation6 + $0x14c] ss:$16 sps:$4 sm:$0xff]   ;;  %v830_v42 = vld [vmem:[#allocation6 + $0x140] ss:$16 sps:$4 sm:$0xff]   ;;  %v831_v43 = vld [vmem:[#allocation6 + $0x148] ss:$16 sps:$4 sm:$0xff]  }
  0x46   :  { %478 = vmatprep.subr.bf16.mxu0 %v790_v16  ;;  %521 = vmatprep.subr.bf16.mxu1 %v792_v17  ;;  %v832_v44 = vld [vmem:[#allocation6 + $0x164] ss:$16 sps:$4 sm:$0xff]   ;;  %v834_v45 = vld [vmem:[#allocation6 + $0x16c] ss:$16 sps:$4 sm:$0xff]   ;;  %v836_v47 = vld [vmem:[#allocation6 + $0x160] ss:$16 sps:$4 sm:$0xff]  }
  0x47   :  { %v864_v46 = vld [vmem:[#allocation3 + $0x4] ss:$8 sps:$4 sm:$0xff]   ;;  %v837_v48 = vld [vmem:[#allocation6 + $0x168] ss:$16 sps:$4 sm:$0xff]   ;;  %v842_v51 = vld [vmem:[#allocation6 + $0x180] ss:$16 sps:$4 sm:$0xff]  }
  0x48   :  { %v838_v49 = vld [vmem:[#allocation6 + $0x184] ss:$16 sps:$4 sm:$0xff]   ;;  %v840_v50 = vld [vmem:[#allocation6 + $0x18c] ss:$16 sps:$4 sm:$0xff]   ;;  %502 = vmatprep.mubr.bf16.mxu0 %v864_v46  ;;  %545 = vmatprep.mubr.bf16.mxu1 %v864_v46  ;;  %v843_v52 = vld [vmem:[#allocation6 + $0x188] ss:$16 sps:$4 sm:$0xff]  }
  0x49   :  { %479 = vmatpush1.bf16.msra.mxu0 %v794_v18  ;;  %522 = vmatpush1.bf16.msra.mxu1 %v795_v19  ;;  %v844_v53 = vld [vmem:[#allocation6 + $0x1a4] ss:$16 sps:$4 sm:$0xff]   ;;  %v846_v54 = vld [vmem:[#allocation6 + $0x1ac] ss:$16 sps:$4 sm:$0xff]   ;;  %v848_v55 = vld [vmem:[#allocation6 + $0x1a0] ss:$16 sps:$4 sm:$0xff]  }
  0x4a   :  { %480 = vmatprep.subr.bf16.mxu0 %v796_v20  ;;  %523 = vmatprep.subr.bf16.mxu1 %v798_v21  ;;  %v849_v56 = vld [vmem:[#allocation6 + $0x1a8] ss:$16 sps:$4 sm:$0xff]   ;;  %v850_v57 = vld [vmem:[#allocation6 + $0x1c4] ss:$16 sps:$4 sm:$0xff]   ;;  %v852_v58 = vld [vmem:[#allocation6 + $0x1cc] ss:$16 sps:$4 sm:$0xff]  }
  0x4b   :  { %v854_v59 = vld [vmem:[#allocation6 + $0x1c0] ss:$16 sps:$4 sm:$0xff]   ;;  %v855_v60 = vld [vmem:[#allocation6 + $0x1c8] ss:$16 sps:$4 sm:$0xff]   ;;  %v856_v61 = vld [vmem:[#allocation6 + $0x1e4] ss:$16 sps:$4 sm:$0xff]  }
  0x4c   :  { %v858_v62 = vld [vmem:[#allocation6 + $0x1ec] ss:$16 sps:$4 sm:$0xff]   ;;  %v860_v63 = vld [vmem:[#allocation6 + $0x1e0] ss:$16 sps:$4 sm:$0xff]   ;;  %v861_v0 = vld [vmem:[#allocation6 + $0x1e8] ss:$16 sps:$4 sm:$0xff]  }
  0x4d   :  { %481 = vmatpush1.bf16.msra.mxu0 %v800_v22  ;;  %524 = vmatpush1.bf16.msra.mxu1 %v801_v23  ;;  %v862_v1 = vld [vmem:[#allocation3] ss:$8 sps:$4 sm:$0xff]   ;;  %v587_v3 = vshrl.u32 %v586_v2, 7  ;;  %v583_v4 = vld [vmem:[#allocation8] sm:$0xf]  ;;  %s966_s2 = smov [#allocation9]  }
  0x4e   :  { %482 = vmatprep.subr.bf16.mxu0 %v802_v24  ;;  %525 = vmatprep.subr.bf16.mxu1 %v804_v25  ;;  %v584_v5 = vunpack.c.l.bf16 %v583_v4  ;;  %s671_s25 = sshll.u32 %s966_s2, 4  ;;  %s672_s25 = int_to_ptr.vmem [resolvable:$true] %s671_s25 }
  0x4f   :  { %v588_v6 = vsub.s32 0, %v587_v3  ;;  %v596_v7 = vsub.s32 4, %v587_v3  ;;  %v592_v8 = vsub.s32 2, %v587_v3  ;;  %v600_v9 = vsub.s32 6, %v587_v3  ;;  %s931_s26 = scalar_lea.vmem %s672_s25, 512  ;;  %p936_p11 = scmp.lt.s32.totalorder %s672_s25, %s672_s25 }
  0x50   :  { %p932_p10 = scmp.ne.s32.totalorder %s672_s25, %s931_s26  ;;  %p937_p12 = scmp.lt.s32.totalorder %s931_s26, %s931_s26 }
  0x51   :  { %483 = vmatpush1.bf16.msra.mxu0 %v806_v26  ;;  %526 = vmatpush1.bf16.msra.mxu1 %v807_v27  ;;  %v589_v10 = vrot.slane %v584_v5, %v588_v6  ;;  %v597_v11 = vrot.slane %v584_v5, %v596_v7  ;;  %v593_v12 = vrot.slane %v584_v5, %v592_v8 }
  0x52   :  { %484 = vmatprep.subr.bf16.mxu0 %v808_v28  ;;  %527 = vmatprep.subr.bf16.mxu1 %v810_v29  ;;  %v601_v13 = vrot.slane %v584_v5, %v600_v9  ;;  %p938_p13 = por %p937_p12, %p936_p11 }
  0x53   :  { %v609_v14 = vrot.slane %v589_v10, %v588_v6  ;;  %v617_v15 = vrot.slane %v597_v11, %v588_v6  ;;  %v613_v16 = vrot.slane %v593_v12, %v588_v6 }
  0x54   :  { %v621_v17 = vrot.slane %v601_v13, %v588_v6  ;;  %p939_p0 = pnand %p938_p13, %p932_p10 }
  0x55   :  { %485 = vmatpush1.bf16.msra.mxu0 %v812_v30  ;;  %528 = vmatpush1.bf16.msra.mxu1 %v813_v31 }
  0x56   :  { %486 = vmatprep.subr.bf16.mxu0 %v814_v32  ;;  %529 = vmatprep.subr.bf16.mxu1 %v816_v33 }
  0x59   :  { %487 = vmatpush1.bf16.msra.mxu0 %v818_v34  ;;  %530 = vmatpush1.bf16.msra.mxu1 %v819_v35 }
  0x5a   :  { %488 = vmatprep.subr.bf16.mxu0 %v820_v36  ;;  %531 = vmatprep.subr.bf16.mxu1 %v822_v37 }
  0x5d   :  { %489 = vmatpush1.bf16.msra.mxu0 %v824_v38  ;;  %532 = vmatpush1.bf16.msra.mxu1 %v825_v39 }
  0x5e   :  { %490 = vmatprep.subr.bf16.mxu0 %v826_v40  ;;  %533 = vmatprep.subr.bf16.mxu1 %v828_v41 }
  0x61   :  { %491 = vmatpush1.bf16.msra.mxu0 %v830_v42  ;;  %534 = vmatpush1.bf16.msra.mxu1 %v831_v43 }
  0x62   :  { %492 = vmatprep.subr.bf16.mxu0 %v832_v44  ;;  %535 = vmatprep.subr.bf16.mxu1 %v834_v45 }
  0x65   :  { %493 = vmatpush1.bf16.msra.mxu0 %v836_v47  ;;  %536 = vmatpush1.bf16.msra.mxu1 %v837_v48 }
  0x66   :  { %494 = vmatprep.subr.bf16.mxu0 %v838_v49  ;;  %537 = vmatprep.subr.bf16.mxu1 %v840_v50 }
  0x69   :  { %495 = vmatpush1.bf16.msra.mxu0 %v842_v51  ;;  %538 = vmatpush1.bf16.msra.mxu1 %v843_v52 }
  0x6a   :  { %496 = vmatprep.subr.bf16.mxu0 %v844_v53  ;;  %539 = vmatprep.subr.bf16.mxu1 %v846_v54 }
  0x6d   :  { %497 = vmatpush1.bf16.msra.mxu0 %v848_v55  ;;  %540 = vmatpush1.bf16.msra.mxu1 %v849_v56 }
  0x6e   :  { %498 = vmatprep.subr.bf16.mxu0 %v850_v57  ;;  %541 = vmatprep.subr.bf16.mxu1 %v852_v58 }
  0x71   :  { %499 = vmatpush1.bf16.msra.mxu0 %v854_v59  ;;  %542 = vmatpush1.bf16.msra.mxu1 %v855_v60 }
  0x72   :  { %500 = vmatprep.subr.bf16.mxu0 %v856_v61  ;;  %543 = vmatprep.subr.bf16.mxu1 %v858_v62 }
  0x75   :  { %501 = vmatpush1.bf16.msra.mxu0 %v860_v63  ;;  %544 = vmatpush1.bf16.msra.mxu1 %v861_v0 }
  0x78   :  { %503 = vmatmul.mubr.bf16.vlgmr.msra.gmra.mrb[0].mxu0 %v862_v1  ;;  %546 = vmatmul.mubr.bf16.vlgmr.msra.gmra.mrb[0].mxu1 %v862_v1 }
 0x14b   :  { %v504_v18 = vpop.f32.mrb[0].mxu0  ;;  %v547_v19 = vpop.f32.mrb[0].mxu1 }
 0x14c   :  { %v622_v20 = vadd.f32 %v609_v14, %v504_v18  ;;  %v624_v21 = vadd.f32 %v617_v15, %v547_v19  ;;  %v506_v22 = vpop.f32.mrb[1].mxu0  ;;  %v549_v23 = vpop.f32.mrb[1].mxu1 }
 0x14d   :  { %v623_v24 = vadd.f32 %v613_v16, %v506_v22  ;;  %v625_v25 = vadd.f32 %v621_v17, %v549_v23  ;;  %v508_v26 = vpop.f32.mrb[2].mxu0  ;;  %v551_v27 = vpop.f32.mrb[2].mxu1 }
 0x14e   :  { %v630_v28 = vmax.f32 %v622_v20, 0.0  ;;  %v632_v29 = vmax.f32 %v624_v21, 0.0  ;;  %v626_v30 = vadd.f32 %v609_v14, %v508_v26  ;;  %v628_v31 = vadd.f32 %v617_v15, %v551_v27  ;;  %v510_v32 = vpop.f32.mrb[3].mxu0  ;;  %v553_v33 = vpop.f32.mrb[3].mxu1 }
 0x14f   :  { %v631_v34 = vmax.f32 %v623_v24, 0.0  ;;  %v633_v35 = vmax.f32 %v625_v25, 0.0  ;;  %v627_v36 = vadd.f32 %v613_v16, %v510_v32  ;;  %v629_v37 = vadd.f32 %v621_v17, %v553_v33 }
 0x150   :  { %v634_v38 = vmax.f32 %v626_v30, 0.0  ;;  %v636_v39 = vmax.f32 %v628_v31, 0.0 }
 0x151   :  { %v754_v40 = vpack.c.bf16 %v631_v34, %v630_v28  ;;  %v755_v41 = vpack.c.bf16 %v633_v35, %v632_v29  ;;  %v635_v42 = vmax.f32 %v627_v36, 0.0  ;;  %v637_v43 = vmax.f32 %v629_v37, 0.0 }
 0x153   :  { %662 = vst [vmem:[#allocation9] sm:$0xff] %v754_v40  ;;  %663 = vst [vmem:[#allocation9 + $0x8] sm:$0xff] %v755_v41  ;;  %v756_v44 = vpack.c.bf16 %v635_v42, %v634_v38  ;;  %v757_v45 = vpack.c.bf16 %v637_v43, %v636_v39 }
 0x155   :  { %664 = vst [vmem:[#allocation9 + $0x10] sm:$0xff] %v756_v44  ;;  %665 = vst [vmem:[#allocation9 + $0x18] sm:$0xff] %v757_v45 }
 0x156   :  { %942 = shalt.err (!%p939_p0)
}
 0x157   :  { %s943_s29 = scalar_lea.hbm %s1044_s3, 512 }
 0x158   :  { %p944_p1 = scmp.ne.s32.totalorder %s1044_s3, %s943_s29  ;;  %p947_p2 = scmp.lt.u32.totalorder %s943_s29, %s1044_s3 }
 0x15a   :  { %p949_p3 = pnand %p947_p2, %p944_p1 }
 0x15c   :  { %952 = shalt.err (!%p949_p3)
}
 0x15d   :  { %677 = dma.vmem_to_hbm [thread:$0]  %s672_s25, 512, %s1044_s3, [#allocation5], %s960_s22, %s960_s22, %s961_s23  }
 0x15e   :  { %957 = dma.done.wait [#allocation5], 512  }
 0x15f   :  { %958 = vsyncadd [#allocation5], 4294966784 }
 0x160   :  { %681 = vsyncpa [#allocation4], 1 }
 0x161   :  { %682 = vsyncpa [#allocation7], 1 }
 0x162   :  { %683 = vsyncpa [#allocation5], 1 }

// kernel: seq2seq_forward.43
= control target key start
LH: loop header
LB: loop body
LE: loop exit
PB: predicated region body
PF: predicated region fallthrough
CT: control target
= control target key end

     0   :  { %8 = vsyncpa [#allocation4], 0  ;;  %s1033_s0 = inlined_call_operand.hbm [shape: bf16[16,256], index: 0, kind: input, shape index: {}]   ;;  %s1034_s1 = inlined_call_operand.hbm [shape: bf16[256,512], index: 1, kind: input, shape index: {}]   ;;  %s1035_s2 = inlined_call_operand.hbm [shape: bf16[1,512], index: 2, kind: input, shape index: {}]   ;;  %s1036_s3 = inlined_call_operand.hbm [shape: bf16[16,512], index: 3, kind: output, shape index: {}]  }
   0x1   :  { %9 = vsyncpa [#allocation7], 0 }
   0x2   :  { %10 = vsyncpa [#allocation5], 0  ;;  %s951_s12 = smov [#allocation6]   ;;  %s857_s16 = scalar_lea.hbm %s1034_s1, 8192 }
   0x3   :  { %s28_s13 = sshll.u32 %s951_s12, 4  ;;  %p858_p0 = scmp.ne.s32.totalorder %s1034_s1, %s857_s16  ;;  %s29_s13 = int_to_ptr.vmem [resolvable:$true] %s28_s13 }
   0x4   :  { %p861_p1 = scmp.lt.u32.totalorder %s857_s16, %s1034_s1 }
   0x6   :  { %p863_p2 = pnand %p861_p1, %p858_p0 }
   0x8   :  { %866 = shalt.err (!%p863_p2)
}
   0x9   :  { %s867_s21 = scalar_lea.vmem %s29_s13, 8192  ;;  %p872_p4 = scmp.lt.s32.totalorder %s29_s13, %s29_s13 }
   0xa   :  { %p868_p3 = scmp.ne.s32.totalorder %s29_s13, %s867_s21  ;;  %p873_p5 = scmp.lt.s32.totalorder %s867_s21, %s867_s21 }
   0xc   :  { %p874_p6 = por %p873_p5, %p872_p4 }
   0xe   :  { %p875_p7 = pnand %p874_p6, %p868_p3 }
  0x10   :  { %878 = shalt.err (!%p875_p7)
}
  0x11   :  { %s952_s22 = smov 256   ;;  %s953_s23 = smov 16  }
  0x12   :  { %34 = dma.hbm_to_vmem [thread:$0]  %s1034_s1, 8192, %s29_s13, [#allocation7], %s952_s22, %s952_s22, %s953_s23  }
  0x13   :  { %s954_s26 = smov [#allocation3]   ;;  %s879_s30 = scalar_lea.hbm %s1033_s0, 256 }
  0x14   :  { %s16_s27 = sshll.u32 %s954_s26, 4  ;;  %p880_p8 = scmp.ne.s32.totalorder %s1033_s0, %s879_s30  ;;  %s17_s27 = int_to_ptr.vmem [resolvable:$true] %s16_s27 }
  0x15   :  { %p883_p9 = scmp.lt.u32.totalorder %s879_s30, %s1033_s0 }
  0x17   :  { %p885_p10 = pnand %p883_p9, %p880_p8 }
  0x19   :  { %888 = shalt.err (!%p885_p10)
}
  0x1a   :  { %s889_s8 = scalar_lea.vmem %s17_s27, 256  ;;  %p894_p12 = scmp.lt.s32.totalorder %s17_s27, %s17_s27 }
  0x1b   :  { %p890_p11 = scmp.ne.s32.totalorder %s17_s27, %s889_s8  ;;  %p895_p13 = scmp.lt.s32.totalorder %s889_s8, %s889_s8 }
  0x1d   :  { %p896_p0 = por %p895_p13, %p894_p12 }
  0x1f   :  { %p897_p1 = pnand %p896_p0, %p890_p11 }
  0x21   :  { %900 = shalt.err (!%p897_p1)
}
  0x22   :  { %s955_s1 = smov 128   ;;  %s956_s9 = smov 8  }
  0x23   :  { %22 = dma.hbm_to_vmem [thread:$0]  %s1033_s0, 256, %s17_s27, [#allocation4], %s955_s1, %s955_s1, %s956_s9  }
  0x24   :  { %s957_s12 = smov [#allocation8]   ;;  %s901_s16 = scalar_lea.hbm %s1035_s2, 64 }
  0x25   :  { %s41_s13 = sshll.u32 %s957_s12, 4  ;;  %p902_p2 = scmp.ne.s32.totalorder %s1035_s2, %s901_s16  ;;  %s42_s13 = int_to_ptr.vmem [resolvable:$true] %s41_s13 }
  0x26   :  { %p905_p3 = scmp.lt.u32.totalorder %s901_s16, %s1035_s2 }
  0x28   :  { %p907_p4 = pnand %p905_p3, %p902_p2 }
  0x2a   :  { %910 = shalt.err (!%p907_p4)
}
  0x2b   :  { %s911_s21 = scalar_lea.vmem %s42_s13, 64  ;;  %p916_p6 = scmp.lt.s32.totalorder %s42_s13, %s42_s13 }
  0x2c   :  { %p912_p5 = scmp.ne.s32.totalorder %s42_s13, %s911_s21  ;;  %p917_p7 = scmp.lt.s32.totalorder %s911_s21, %s911_s21 }
  0x2e   :  { %p918_p8 = por %p917_p7, %p916_p6 }
  0x30   :  { %p919_p9 = pnand %p918_p8, %p912_p5 }
  0x32   :  { %922 = shalt.err (!%p919_p9)
}
  0x33   :  { %44 = dma.hbm_to_vmem [thread:$0]  %s1035_s2, 64, %s42_s13, [#allocation7]  }
  0x34   :  { %945 = dma.done.wait [#allocation4], 256  }
  0x35   :  { %946 = vsyncadd [#allocation4], 4294967040 }
  0x36   :  { %947 = dma.done.wait [#allocation7], 8256  }
  0x37   :  { %948 = vsyncadd [#allocation7], 4294959040  ;;  %v758_v0 = vld [vmem:[#allocation6 + $0x4] ss:$16 sps:$4 sm:$0xff]   ;;  %v760_v1 = vld [vmem:[#allocation6 + $0xc] ss:$16 sps:$4 sm:$0xff]  }
  0x38   :  { %470 = vmatprep.subr.bf16.mxu0 %v758_v0  ;;  %v762_v2 = vld [vmem:[#allocation6] ss:$16 sps:$4 sm:$0xff]   ;;  %v763_v3 = vld [vmem:[#allocation6 + $0x8] ss:$16 sps:$4 sm:$0xff]   ;;  %513 = vmatprep.subr.bf16.mxu1 %v760_v1  ;;  %v764_v4 = vld [vmem:[#allocation6 + $0x24] ss:$16 sps:$4 sm:$0xff]  }
  0x39   :  { %471 = vmatpush1.bf16.msra.mxu0 %v762_v2  ;;  %514 = vmatpush1.bf16.msra.mxu1 %v763_v3  ;;  %v766_v5 = vld [vmem:[#allocation6 + $0x2c] ss:$16 sps:$4 sm:$0xff]   ;;  %v768_v6 = vld [vmem:[#allocation6 + $0x20] ss:$16 sps:$4 sm:$0xff]   ;;  %v769_v7 = vld [vmem:[#allocation6 + $0x28] ss:$16 sps:$4 sm:$0xff]   ;;  %v586_v2 = vlaneseq }
  0x3a   :  { %472 = vmatprep.subr.bf16.mxu0 %v764_v4  ;;  %515 = vmatprep.subr.bf16.mxu1 %v766_v5  ;;  %v770_v8 = vld [vmem:[#allocation6 + $0x44] ss:$16 sps:$4 sm:$0xff]   ;;  %v772_v9 = vld [vmem:[#allocation6 + $0x4c] ss:$16 sps:$4 sm:$0xff]   ;;  %v774_v10 = vld [vmem:[#allocation6 + $0x40] ss:$16 sps:$4 sm:$0xff]  }
  0x3b   :  { %v775_v11 = vld [vmem:[#allocation6 + $0x48] ss:$16 sps:$4 sm:$0xff]   ;;  %v776_v12 = vld [vmem:[#allocation6 + $0x64] ss:$16 sps:$4 sm:$0xff]   ;;  %v778_v13 = vld [vmem:[#allocation6 + $0x6c] ss:$16 sps:$4 sm:$0xff]  }
  0x3c   :  { %v780_v14 = vld [vmem:[#allocation6 + $0x60] ss:$16 sps:$4 sm:$0xff]   ;;  %v781_v15 = vld [vmem:[#allocation6 + $0x68] ss:$16 sps:$4 sm:$0xff]   ;;  %v782_v16 = vld [vmem:[#allocation6 + $0x84] ss:$16 sps:$4 sm:$0xff]  }
  0x3d   :  { %473 = vmatpush1.bf16.msra.mxu0 %v768_v6  ;;  %516 = vmatpush1.bf16.msra.mxu1 %v769_v7  ;;  %v784_v17 = vld [vmem:[#allocation6 + $0x8c] ss:$16 sps:$4 sm:$0xff]   ;;  %v786_v18 = vld [vmem:[#allocation6 + $0x80] ss:$16 sps:$4 sm:$0xff]   ;;  %v787_v19 = vld [vmem:[#allocation6 + $0x88] ss:$16 sps:$4 sm:$0xff]  }
  0x3e   :  { %474 = vmatprep.subr.bf16.mxu0 %v770_v8  ;;  %517 = vmatprep.subr.bf16.mxu1 %v772_v9  ;;  %v788_v20 = vld [vmem:[#allocation6 + $0xa4] ss:$16 sps:$4 sm:$0xff]   ;;  %v790_v21 = vld [vmem:[#allocation6 + $0xac] ss:$16 sps:$4 sm:$0xff]   ;;  %v792_v22 = vld [vmem:[#allocation6 + $0xa0] ss:$16 sps:$4 sm:$0xff]  }
  0x3f   :  { %v793_v23 = vld [vmem:[#allocation6 + $0xa8] ss:$16 sps:$4 sm:$0xff]   ;;  %v794_v24 = vld [vmem:[#allocation6 + $0xc4] ss:$16 sps:$4 sm:$0xff]   ;;  %v796_v25 = vld [vmem:[#allocation6 + $0xcc] ss:$16 sps:$4 sm:$0xff]  }
  0x40   :  { %v798_v26 = vld [vmem:[#allocation6 + $0xc0] ss:$16 sps:$4 sm:$0xff]   ;;  %v799_v27 = vld [vmem:[#allocation6 + $0xc8] ss:$16 sps:$4 sm:$0xff]   ;;  %v800_v28 = vld [vmem:[#allocation6 + $0xe4] ss:$16 sps:$4 sm:$0xff]  }
  0x41   :  { %475 = vmatpush1.bf16.msra.mxu0 %v774_v10  ;;  %518 = vmatpush1.bf16.msra.mxu1 %v775_v11  ;;  %v802_v29 = vld [vmem:[#allocation6 + $0xec] ss:$16 sps:$4 sm:$0xff]   ;;  %v804_v30 = vld [vmem:[#allocation6 + $0xe0] ss:$16 sps:$4 sm:$0xff]   ;;  %v805_v31 = vld [vmem:[#allocation6 + $0xe8] ss:$16 sps:$4 sm:$0xff]  }
  0x42   :  { %476 = vmatprep.subr.bf16.mxu0 %v776_v12  ;;  %519 = vmatprep.subr.bf16.mxu1 %v778_v13  ;;  %v806_v32 = vld [vmem:[#allocation6 + $0x104] ss:$16 sps:$4 sm:$0xff]   ;;  %v808_v33 = vld [vmem:[#allocation6 + $0x10c] ss:$16 sps:$4 sm:$0xff]   ;;  %v810_v34 = vld [vmem:[#allocation6 + $0x100] ss:$16 sps:$4 sm:$0xff]  }
  0x43   :  { %v811_v35 = vld [vmem:[#allocation6 + $0x108] ss:$16 sps:$4 sm:$0xff]   ;;  %v812_v36 = vld [vmem:[#allocation6 + $0x124] ss:$16 sps:$4 sm:$0xff]   ;;  %v814_v37 = vld [vmem:[#allocation6 + $0x12c] ss:$16 sps:$4 sm:$0xff]  }
  0x44   :  { %v816_v38 = vld [vmem:[#allocation6 + $0x120] ss:$16 sps:$4 sm:$0xff]   ;;  %v817_v39 = vld [vmem:[#allocation6 + $0x128] ss:$16 sps:$4 sm:$0xff]   ;;  %v818_v40 = vld [vmem:[#allocation6 + $0x144] ss:$16 sps:$4 sm:$0xff]  }
  0x45   :  { %477 = vmatpush1.bf16.msra.mxu0 %v780_v14  ;;  %520 = vmatpush1.bf16.msra.mxu1 %v781_v15  ;;  %v820_v41 = vld [vmem:[#allocation6 + $0x14c] ss:$16 sps:$4 sm:$0xff]   ;;  %v822_v42 = vld [vmem:[#allocation6 + $0x140] ss:$16 sps:$4 sm:$0xff]   ;;  %v823_v43 = vld [vmem:[#allocation6 + $0x148] ss:$16 sps:$4 sm:$0xff]  }
  0x46   :  { %478 = vmatprep.subr.bf16.mxu0 %v782_v16  ;;  %521 = vmatprep.subr.bf16.mxu1 %v784_v17  ;;  %v824_v44 = vld [vmem:[#allocation6 + $0x164] ss:$16 sps:$4 sm:$0xff]   ;;  %v826_v45 = vld [vmem:[#allocation6 + $0x16c] ss:$16 sps:$4 sm:$0xff]   ;;  %v828_v47 = vld [vmem:[#allocation6 + $0x160] ss:$16 sps:$4 sm:$0xff]  }
  0x47   :  { %v856_v46 = vld [vmem:[#allocation3 + $0x4] ss:$8 sps:$4 sm:$0xff]   ;;  %v829_v48 = vld [vmem:[#allocation6 + $0x168] ss:$16 sps:$4 sm:$0xff]   ;;  %v834_v51 = vld [vmem:[#allocation6 + $0x180] ss:$16 sps:$4 sm:$0xff]  }
  0x48   :  { %v830_v49 = vld [vmem:[#allocation6 + $0x184] ss:$16 sps:$4 sm:$0xff]   ;;  %v832_v50 = vld [vmem:[#allocation6 + $0x18c] ss:$16 sps:$4 sm:$0xff]   ;;  %502 = vmatprep.mubr.bf16.mxu0 %v856_v46  ;;  %545 = vmatprep.mubr.bf16.mxu1 %v856_v46  ;;  %v835_v52 = vld [vmem:[#allocation6 + $0x188] ss:$16 sps:$4 sm:$0xff]  }
  0x49   :  { %479 = vmatpush1.bf16.msra.mxu0 %v786_v18  ;;  %522 = vmatpush1.bf16.msra.mxu1 %v787_v19  ;;  %v836_v53 = vld [vmem:[#allocation6 + $0x1a4] ss:$16 sps:$4 sm:$0xff]   ;;  %v838_v54 = vld [vmem:[#allocation6 + $0x1ac] ss:$16 sps:$4 sm:$0xff]   ;;  %v840_v55 = vld [vmem:[#allocation6 + $0x1a0] ss:$16 sps:$4 sm:$0xff]  }
  0x4a   :  { %480 = vmatprep.subr.bf16.mxu0 %v788_v20  ;;  %523 = vmatprep.subr.bf16.mxu1 %v790_v21  ;;  %v841_v56 = vld [vmem:[#allocation6 + $0x1a8] ss:$16 sps:$4 sm:$0xff]   ;;  %v842_v57 = vld [vmem:[#allocation6 + $0x1c4] ss:$16 sps:$4 sm:$0xff]   ;;  %v844_v58 = vld [vmem:[#allocation6 + $0x1cc] ss:$16 sps:$4 sm:$0xff]  }
  0x4b   :  { %v846_v59 = vld [vmem:[#allocation6 + $0x1c0] ss:$16 sps:$4 sm:$0xff]   ;;  %v847_v60 = vld [vmem:[#allocation6 + $0x1c8] ss:$16 sps:$4 sm:$0xff]   ;;  %v848_v61 = vld [vmem:[#allocation6 + $0x1e4] ss:$16 sps:$4 sm:$0xff]  }
  0x4c   :  { %v850_v62 = vld [vmem:[#allocation6 + $0x1ec] ss:$16 sps:$4 sm:$0xff]   ;;  %v852_v63 = vld [vmem:[#allocation6 + $0x1e0] ss:$16 sps:$4 sm:$0xff]   ;;  %v853_v0 = vld [vmem:[#allocation6 + $0x1e8] ss:$16 sps:$4 sm:$0xff]  }
  0x4d   :  { %481 = vmatpush1.bf16.msra.mxu0 %v792_v22  ;;  %524 = vmatpush1.bf16.msra.mxu1 %v793_v23  ;;  %v854_v1 = vld [vmem:[#allocation3] ss:$8 sps:$4 sm:$0xff]   ;;  %v587_v3 = vshrl.u32 %v586_v2, 7  ;;  %v583_v4 = vld [vmem:[#allocation8] sm:$0xf]  ;;  %s958_s2 = smov [#allocation9]  }
  0x4e   :  { %482 = vmatprep.subr.bf16.mxu0 %v794_v24  ;;  %525 = vmatprep.subr.bf16.mxu1 %v796_v25  ;;  %v584_v5 = vunpack.c.l.bf16 %v583_v4  ;;  %s663_s25 = sshll.u32 %s958_s2, 4  ;;  %s664_s25 = int_to_ptr.vmem [resolvable:$true] %s663_s25 }
  0x4f   :  { %v588_v6 = vsub.s32 0, %v587_v3  ;;  %v596_v7 = vsub.s32 4, %v587_v3  ;;  %v592_v8 = vsub.s32 2, %v587_v3  ;;  %v600_v9 = vsub.s32 6, %v587_v3  ;;  %s923_s26 = scalar_lea.vmem %s664_s25, 512  ;;  %p928_p11 = scmp.lt.s32.totalorder %s664_s25, %s664_s25 }
  0x50   :  { %p924_p10 = scmp.ne.s32.totalorder %s664_s25, %s923_s26  ;;  %p929_p12 = scmp.lt.s32.totalorder %s923_s26, %s923_s26 }
  0x51   :  { %483 = vmatpush1.bf16.msra.mxu0 %v798_v26  ;;  %526 = vmatpush1.bf16.msra.mxu1 %v799_v27  ;;  %v589_v10 = vrot.slane %v584_v5, %v588_v6  ;;  %v597_v11 = vrot.slane %v584_v5, %v596_v7  ;;  %v593_v12 = vrot.slane %v584_v5, %v592_v8 }
  0x52   :  { %484 = vmatprep.subr.bf16.mxu0 %v800_v28  ;;  %527 = vmatprep.subr.bf16.mxu1 %v802_v29  ;;  %v601_v13 = vrot.slane %v584_v5, %v600_v9  ;;  %p930_p13 = por %p929_p12, %p928_p11 }
  0x53   :  { %v609_v14 = vrot.slane %v589_v10, %v588_v6  ;;  %v617_v15 = vrot.slane %v597_v11, %v588_v6  ;;  %v613_v16 = vrot.slane %v593_v12, %v588_v6 }
  0x54   :  { %v621_v17 = vrot.slane %v601_v13, %v588_v6  ;;  %p931_p0 = pnand %p930_p13, %p924_p10 }
  0x55   :  { %485 = vmatpush1.bf16.msra.mxu0 %v804_v30  ;;  %528 = vmatpush1.bf16.msra.mxu1 %v805_v31 }
  0x56   :  { %486 = vmatprep.subr.bf16.mxu0 %v806_v32  ;;  %529 = vmatprep.subr.bf16.mxu1 %v808_v33 }
  0x59   :  { %487 = vmatpush1.bf16.msra.mxu0 %v810_v34  ;;  %530 = vmatpush1.bf16.msra.mxu1 %v811_v35 }
  0x5a   :  { %488 = vmatprep.subr.bf16.mxu0 %v812_v36  ;;  %531 = vmatprep.subr.bf16.mxu1 %v814_v37 }
  0x5d   :  { %489 = vmatpush1.bf16.msra.mxu0 %v816_v38  ;;  %532 = vmatpush1.bf16.msra.mxu1 %v817_v39 }
  0x5e   :  { %490 = vmatprep.subr.bf16.mxu0 %v818_v40  ;;  %533 = vmatprep.subr.bf16.mxu1 %v820_v41 }
  0x61   :  { %491 = vmatpush1.bf16.msra.mxu0 %v822_v42  ;;  %534 = vmatpush1.bf16.msra.mxu1 %v823_v43 }
  0x62   :  { %492 = vmatprep.subr.bf16.mxu0 %v824_v44  ;;  %535 = vmatprep.subr.bf16.mxu1 %v826_v45 }
  0x65   :  { %493 = vmatpush1.bf16.msra.mxu0 %v828_v47  ;;  %536 = vmatpush1.bf16.msra.mxu1 %v829_v48 }
  0x66   :  { %494 = vmatprep.subr.bf16.mxu0 %v830_v49  ;;  %537 = vmatprep.subr.bf16.mxu1 %v832_v50 }
  0x69   :  { %495 = vmatpush1.bf16.msra.mxu0 %v834_v51  ;;  %538 = vmatpush1.bf16.msra.mxu1 %v835_v52 }
  0x6a   :  { %496 = vmatprep.subr.bf16.mxu0 %v836_v53  ;;  %539 = vmatprep.subr.bf16.mxu1 %v838_v54 }
  0x6d   :  { %497 = vmatpush1.bf16.msra.mxu0 %v840_v55  ;;  %540 = vmatpush1.bf16.msra.mxu1 %v841_v56 }
  0x6e   :  { %498 = vmatprep.subr.bf16.mxu0 %v842_v57  ;;  %541 = vmatprep.subr.bf16.mxu1 %v844_v58 }
  0x71   :  { %499 = vmatpush1.bf16.msra.mxu0 %v846_v59  ;;  %542 = vmatpush1.bf16.msra.mxu1 %v847_v60 }
  0x72   :  { %500 = vmatprep.subr.bf16.mxu0 %v848_v61  ;;  %543 = vmatprep.subr.bf16.mxu1 %v850_v62 }
  0x75   :  { %501 = vmatpush1.bf16.msra.mxu0 %v852_v63  ;;  %544 = vmatpush1.bf16.msra.mxu1 %v853_v0 }
  0x78   :  { %503 = vmatmul.mubr.bf16.vlgmr.msra.gmra.mrb[0].mxu0 %v854_v1  ;;  %546 = vmatmul.mubr.bf16.vlgmr.msra.gmra.mrb[0].mxu1 %v854_v1 }
 0x14b   :  { %v504_v18 = vpop.f32.mrb[0].mxu0  ;;  %v547_v19 = vpop.f32.mrb[0].mxu1 }
 0x14c   :  { %v622_v20 = vadd.f32 %v609_v14, %v504_v18  ;;  %v624_v21 = vadd.f32 %v617_v15, %v547_v19  ;;  %v506_v22 = vpop.f32.mrb[1].mxu0  ;;  %v549_v23 = vpop.f32.mrb[1].mxu1 }
 0x14d   :  { %v623_v24 = vadd.f32 %v613_v16, %v506_v22  ;;  %v625_v25 = vadd.f32 %v621_v17, %v549_v23  ;;  %v508_v26 = vpop.f32.mrb[2].mxu0  ;;  %v551_v27 = vpop.f32.mrb[2].mxu1 }
 0x14e   :  { %v626_v28 = vadd.f32 %v609_v14, %v508_v26  ;;  %v628_v29 = vadd.f32 %v617_v15, %v551_v27  ;;  %v510_v30 = vpop.f32.mrb[3].mxu0  ;;  %v553_v31 = vpop.f32.mrb[3].mxu1 }
 0x14f   :  { %v746_v32 = vpack.c.bf16 %v623_v24, %v622_v20  ;;  %v747_v33 = vpack.c.bf16 %v625_v25, %v624_v21  ;;  %v627_v34 = vadd.f32 %v613_v16, %v510_v30  ;;  %v629_v35 = vadd.f32 %v621_v17, %v553_v31 }
 0x151   :  { %654 = vst [vmem:[#allocation9] sm:$0xff] %v746_v32  ;;  %655 = vst [vmem:[#allocation9 + $0x8] sm:$0xff] %v747_v33  ;;  %v748_v36 = vpack.c.bf16 %v627_v34, %v626_v28  ;;  %v749_v37 = vpack.c.bf16 %v629_v35, %v628_v29 }
 0x153   :  { %656 = vst [vmem:[#allocation9 + $0x10] sm:$0xff] %v748_v36  ;;  %657 = vst [vmem:[#allocation9 + $0x18] sm:$0xff] %v749_v37 }
 0x154   :  { %934 = shalt.err (!%p931_p0)
}
 0x155   :  { %s935_s29 = scalar_lea.hbm %s1036_s3, 512 }
 0x156   :  { %p936_p1 = scmp.ne.s32.totalorder %s1036_s3, %s935_s29  ;;  %p939_p2 = scmp.lt.u32.totalorder %s935_s29, %s1036_s3 }
 0x158   :  { %p941_p3 = pnand %p939_p2, %p936_p1 }
 0x15a   :  { %944 = shalt.err (!%p941_p3)
}
 0x15b   :  { %669 = dma.vmem_to_hbm [thread:$0]  %s664_s25, 512, %s1036_s3, [#allocation5], %s952_s22, %s952_s22, %s953_s23  }
 0x15c   :  { %949 = dma.done.wait [#allocation5], 512  }
 0x15d   :  { %950 = vsyncadd [#allocation5], 4294966784 }
 0x15e   :  { %673 = vsyncpa [#allocation4], 1 }
 0x15f   :  { %674 = vsyncpa [#allocation7], 1 }
 0x160   :  { %675 = vsyncpa [#allocation5], 1 }

// kernel: seq2seq_forward.33
= control target key start
LH: loop header
LB: loop body
LE: loop exit
PB: predicated region body
PF: predicated region fallthrough
CT: control target
= control target key end

     0   :  { %11 = vsyncpa [#allocation4], 0  ;;  %s1289_s0 = inlined_call_operand.hbm [shape: bf16[16,512], index: 0, kind: input, shape index: {}]   ;;  %s1290_s1 = inlined_call_operand.hbm [shape: bf16[512,256], index: 1, kind: input, shape index: {}]   ;;  %s1291_s2 = inlined_call_operand.hbm [shape: bf16[1,256], index: 2, kind: input, shape index: {}]   ;;  %s1292_s3 = inlined_call_operand.hbm [shape: bf16[16,256], index: 3, kind: input, shape index: {}]   ;;  %s1293_s4 = inlined_call_operand.hbm [shape: bf16[1,256], index: 4, kind: input, shape index: {}]   ;;  %s1294_s5 = inlined_call_operand.hbm [shape: bf16[1,256], index: 5, kind: input, shape index: {}]   ;;  %s1295_s6 = inlined_call_operand.hbm [shape: bf16[16,256], index: 6, kind: output, shape index: {}]  }
   0x1   :  { %12 = vsyncpa [#allocation7], 0 }
   0x2   :  { %13 = vsyncpa [#allocation10], 0 }
   0x3   :  { %14 = vsyncpa [#allocation13], 0 }
   0x4   :  { %15 = vsyncpa [#allocation5], 0  ;;  %s1134_s21 = smov [#allocation6]   ;;  %s970_s25 = scalar_lea.hbm %s1290_s1, 8192 }
   0x5   :  { %s33_s22 = sshll.u32 %s1134_s21, 4  ;;  %p971_p0 = scmp.ne.s32.totalorder %s1290_s1, %s970_s25  ;;  %s34_s22 = int_to_ptr.vmem [resolvable:$true] %s33_s22 }
   0x6   :  { %p974_p1 = scmp.lt.u32.totalorder %s970_s25, %s1290_s1 }
   0x8   :  { %p976_p2 = pnand %p974_p1, %p971_p0 }
   0xa   :  { %979 = shalt.err (!%p976_p2)
}
   0xb   :  { %s980_s30 = scalar_lea.vmem %s34_s22, 8192  ;;  %p985_p4 = scmp.lt.s32.totalorder %s34_s22, %s34_s22 }
   0xc   :  { %p981_p3 = scmp.ne.s32.totalorder %s34_s22, %s980_s30  ;;  %p986_p5 = scmp.lt.s32.totalorder %s980_s30, %s980_s30 }
   0xe   :  { %p987_p6 = por %p986_p5, %p985_p4 }
  0x10   :  { %p988_p7 = pnand %p987_p6, %p981_p3 }
  0x12   :  { %991 = shalt.err (!%p988_p7)
}
  0x13   :  { %s1135_s7 = smov 128   ;;  %s1136_s8 = smov 8  }
  0x14   :  { %39 = dma.hbm_to_vmem [thread:$0]  %s1290_s1, 8192, %s34_s22, [#allocation7], %s1135_s7, %s1135_s7, %s1136_s8  }
  0x15   :  { %s1137_s11 = smov [#allocation9]   ;;  %s1138_s13 = smov [#allocation3]  }
  0x16   :  { %s55_s12 = sshll.u32 %s1137_s11, 4  ;;  %s21_s14 = sshll.u32 %s1138_s13, 4  ;;  %s56_s12 = int_to_ptr.vmem [resolvable:$true] %s55_s12  ;;  %s22_s14 = int_to_ptr.vmem [resolvable:$true] %s21_s14 }
  0x17   :  { %s992_s17 = scalar_lea.hbm %s1292_s3, 256 }
  0x18   :  { %p993_p8 = scmp.ne.s32.totalorder %s1292_s3, %s992_s17  ;;  %p996_p9 = scmp.lt.u32.totalorder %s992_s17, %s1292_s3 }
  0x1a   :  { %p998_p10 = pnand %p996_p9, %p993_p8 }
  0x1c   :  { %1001 = shalt.err (!%p998_p10)
}
  0x1d   :  { %s1002_s1 = scalar_lea.vmem %s56_s12, 256  ;;  %p1007_p12 = scmp.lt.s32.totalorder %s56_s12, %s56_s12 }
  0x1e   :  { %p1003_p11 = scmp.ne.s32.totalorder %s56_s12, %s1002_s1  ;;  %p1008_p13 = scmp.lt.s32.totalorder %s1002_s1, %s1002_s1 }
  0x20   :  { %p1009_p0 = por %p1008_p13, %p1007_p12 }
  0x22   :  { %p1010_p1 = pnand %p1009_p0, %p1003_p11 }
  0x24   :  { %1013 = shalt.err (!%p1010_p1)
}
  0x25   :  { %61 = dma.hbm_to_vmem [thread:$0]  %s1292_s3, 256, %s56_s12, [#allocation10], %s1135_s7, %s1135_s7, %s1136_s8  }
  0x26   :  { %s1014_s26 = scalar_lea.hbm %s1289_s0, 512 }
  0x27   :  { %p1015_p2 = scmp.ne.s32.totalorder %s1289_s0, %s1014_s26  ;;  %p1018_p3 = scmp.lt.u32.totalorder %s1014_s26, %s1289_s0 }
  0x29   :  { %p1020_p4 = pnand %p1018_p3, %p1015_p2 }
  0x2b   :  { %1023 = shalt.err (!%p1020_p4)
}
  0x2c   :  { %s1024_s9 = scalar_lea.vmem %s22_s14, 512  ;;  %p1029_p6 = scmp.lt.s32.totalorder %s22_s14, %s22_s14 }
  0x2d   :  { %p1025_p5 = scmp.ne.s32.totalorder %s22_s14, %s1024_s9  ;;  %p1030_p7 = scmp.lt.s32.totalorder %s1024_s9, %s1024_s9 }
  0x2f   :  { %p1031_p8 = por %p1030_p7, %p1029_p6 }
  0x31   :  { %p1032_p9 = pnand %p1031_p8, %p1025_p5 }
  0x33   :  { %1035 = shalt.err (!%p1032_p9)
}
  0x34   :  { %s1139_s3 = smov 256   ;;  %s1140_s10 = smov 16  }
  0x35   :  { %27 = dma.hbm_to_vmem [thread:$0]  %s1289_s0, 512, %s22_s14, [#allocation4], %s1139_s3, %s1139_s3, %s1140_s10  }
  0x36   :  { %s1141_s13 = smov [#allocation8]   ;;  %s1142_s16 = smov [#allocation11]  }
  0x37   :  { %s46_s15 = sshll.u32 %s1141_s13, 4  ;;  %s68_s17 = sshll.u32 %s1142_s16, 4  ;;  %s47_s15 = int_to_ptr.vmem [resolvable:$true] %s46_s15  ;;  %s69_s17 = int_to_ptr.vmem [resolvable:$true] %s68_s17 }
  0x38   :  { %s1036_s20 = scalar_lea.hbm %s1291_s2, 32 }
  0x39   :  { %p1037_p10 = scmp.ne.s32.totalorder %s1291_s2, %s1036_s20  ;;  %p1040_p11 = scmp.lt.u32.totalorder %s1036_s20, %s1291_s2 }
  0x3b   :  { %p1042_p12 = pnand %p1040_p11, %p1037_p10 }
  0x3d   :  { %1045 = shalt.err (!%p1042_p12)
}
  0x3e   :  { %s1046_s0 = scalar_lea.vmem %s47_s15, 32  ;;  %p1051_p0 = scmp.lt.s32.totalorder %s47_s15, %s47_s15 }
  0x3f   :  { %p1047_p13 = scmp.ne.s32.totalorder %s47_s15, %s1046_s0  ;;  %p1052_p1 = scmp.lt.s32.totalorder %s1046_s0, %s1046_s0 }
  0x41   :  { %p1053_p2 = por %p1052_p1, %p1051_p0 }
  0x43   :  { %p1054_p3 = pnand %p1053_p2, %p1047_p13 }
  0x45   :  { %1057 = shalt.err (!%p1054_p3)
}
  0x46   :  { %49 = dma.hbm_to_vmem [thread:$0]  %s1291_s2, 32, %s47_s15, [#allocation7]  }
  0x47   :  { %s1058_s27 = scalar_lea.hbm %s1293_s4, 32 }
  0x48   :  { %p1059_p4 = scmp.ne.s32.totalorder %s1293_s4, %s1058_s27  ;;  %p1062_p5 = scmp.lt.u32.totalorder %s1058_s27, %s1293_s4 }
  0x4a   :  { %p1064_p6 = pnand %p1062_p5, %p1059_p4 }
  0x4c   :  { %1067 = shalt.err (!%p1064_p6)
}
  0x4d   :  { %s1068_s3 = scalar_lea.vmem %s69_s17, 32  ;;  %p1073_p8 = scmp.lt.s32.totalorder %s69_s17, %s69_s17 }
  0x4e   :  { %p1069_p7 = scmp.ne.s32.totalorder %s69_s17, %s1068_s3  ;;  %p1074_p9 = scmp.lt.s32.totalorder %s1068_s3, %s1068_s3 }
  0x50   :  { %p1075_p10 = por %p1074_p9, %p1073_p8 }
  0x52   :  { %p1076_p11 = pnand %p1075_p10, %p1069_p7 }
  0x54   :  { %1079 = shalt.err (!%p1076_p11)
}
  0x55   :  { %71 = dma.hbm_to_vmem [thread:$0]  %s1293_s4, 32, %s69_s17, [#allocation10]  }
  0x56   :  { %s1143_s11 = smov [#allocation12]   ;;  %s1080_s16 = scalar_lea.hbm %s1294_s5, 32 }
  0x57   :  { %s78_s12 = sshll.u32 %s1143_s11, 4  ;;  %p1081_p12 = scmp.ne.s32.totalorder %s1294_s5, %s1080_s16  ;;  %s79_s12 = int_to_ptr.vmem [resolvable:$true] %s78_s12 }
  0x58   :  { %p1084_p13 = scmp.lt.u32.totalorder %s1080_s16, %s1294_s5 }
  0x5a   :  { %p1086_p0 = pnand %p1084_p13, %p1081_p12 }
  0x5c   :  { %1089 = shalt.err (!%p1086_p0)
}
  0x5d   :  { %s1090_s1 = scalar_lea.vmem %s79_s12, 32  ;;  %p1095_p2 = scmp.lt.s32.totalorder %s79_s12, %s79_s12 }
  0x5e   :  { %p1091_p1 = scmp.ne.s32.totalorder %s79_s12, %s1090_s1  ;;  %p1096_p3 = scmp.lt.s32.totalorder %s1090_s1, %s1090_s1 }
  0x60   :  { %p1097_p4 = por %p1096_p3, %p1095_p2 }
  0x62   :  { %p1098_p5 = pnand %p1097_p4, %p1091_p1 }
  0x64   :  { %1101 = shalt.err (!%p1098_p5)
}
  0x65   :  { %81 = dma.hbm_to_vmem [thread:$0]  %s1294_s5, 32, %s79_s12, [#allocation13]  }
  0x66   :  { %1124 = dma.done.wait [#allocation4], 512  }
  0x67   :  { %1125 = vsyncadd [#allocation4], 4294966784 }
  0x68   :  { %1126 = dma.done.wait [#allocation7], 8224  }
  0x69   :  { %1127 = vsyncadd [#allocation7], 4294959072 }
  0x6a   :  { %1128 = dma.done.wait [#allocation10], 288  }
  0x6b   :  { %1129 = vsyncadd [#allocation10], 4294967008 }
  0x6c   :  { %1130 = dma.done.wait [#allocation13], 32  }
  0x6d   :  { %1131 = vsyncadd [#allocation13], 4294967264  ;;  %v864_v0 = vld [vmem:[#allocation6 + $0x4] ss:$8 sps:$4 sm:$0xff]   ;;  %v868_v2 = vld [vmem:[#allocation6] ss:$8 sps:$4 sm:$0xff]  }
  0x6e   :  { %v866_v1 = vld [vmem:[#allocation6 + $0x104] ss:$8 sps:$4 sm:$0xff]   ;;  %520 = vmatprep.subr.bf16.mxu1 %v864_v0  ;;  %v869_v3 = vld [vmem:[#allocation6 + $0x100] ss:$8 sps:$4 sm:$0xff]   ;;  %v870_v4 = vld [vmem:[#allocation6 + $0x14] ss:$8 sps:$4 sm:$0xff]  }
  0x6f   :  { %563 = vmatprep.subr.bf16.mxu0 %v866_v1  ;;  %521 = vmatpush1.bf16.msra.mxu1 %v868_v2  ;;  %v872_v5 = vld [vmem:[#allocation6 + $0x114] ss:$8 sps:$4 sm:$0xff]   ;;  %v874_v6 = vld [vmem:[#allocation6 + $0x10] ss:$8 sps:$4 sm:$0xff]   ;;  %v876_v8 = vld [vmem:[#allocation6 + $0x24] ss:$8 sps:$4 sm:$0xff]  }
  0x70   :  { %564 = vmatpush1.bf16.msra.mxu0 %v869_v3  ;;  %522 = vmatprep.subr.bf16.mxu1 %v870_v4  ;;  %v875_v7 = vld [vmem:[#allocation6 + $0x110] ss:$8 sps:$4 sm:$0xff]   ;;  %v878_v9 = vld [vmem:[#allocation6 + $0x124] ss:$8 sps:$4 sm:$0xff]   ;;  %v880_v10 = vld [vmem:[#allocation6 + $0x20] ss:$8 sps:$4 sm:$0xff]   ;;  %v624_v4 = vlaneseq }
  0x71   :  { %565 = vmatprep.subr.bf16.mxu0 %v872_v5  ;;  %v881_v11 = vld [vmem:[#allocation6 + $0x120] ss:$8 sps:$4 sm:$0xff]   ;;  %v882_v12 = vld [vmem:[#allocation6 + $0x34] ss:$8 sps:$4 sm:$0xff]   ;;  %v886_v14 = vld [vmem:[#allocation6 + $0x30] ss:$8 sps:$4 sm:$0xff]  }
  0x72   :  { %v884_v13 = vld [vmem:[#allocation6 + $0x134] ss:$8 sps:$4 sm:$0xff]   ;;  %v887_v15 = vld [vmem:[#allocation6 + $0x130] ss:$8 sps:$4 sm:$0xff]   ;;  %v888_v16 = vld [vmem:[#allocation6 + $0x44] ss:$8 sps:$4 sm:$0xff]  }
  0x73   :  { %523 = vmatpush1.bf16.msra.mxu1 %v874_v6  ;;  %v890_v17 = vld [vmem:[#allocation6 + $0x144] ss:$8 sps:$4 sm:$0xff]   ;;  %v892_v18 = vld [vmem:[#allocation6 + $0x40] ss:$8 sps:$4 sm:$0xff]   ;;  %v894_v20 = vld [vmem:[#allocation6 + $0x54] ss:$8 sps:$4 sm:$0xff]  }
  0x74   :  { %566 = vmatpush1.bf16.msra.mxu0 %v875_v7  ;;  %524 = vmatprep.subr.bf16.mxu1 %v876_v8  ;;  %v893_v19 = vld [vmem:[#allocation6 + $0x140] ss:$8 sps:$4 sm:$0xff]   ;;  %v896_v21 = vld [vmem:[#allocation6 + $0x154] ss:$8 sps:$4 sm:$0xff]   ;;  %v898_v22 = vld [vmem:[#allocation6 + $0x50] ss:$8 sps:$4 sm:$0xff]  }
  0x75   :  { %567 = vmatprep.subr.bf16.mxu0 %v878_v9  ;;  %v899_v23 = vld [vmem:[#allocation6 + $0x150] ss:$8 sps:$4 sm:$0xff]   ;;  %v900_v24 = vld [vmem:[#allocation6 + $0x64] ss:$8 sps:$4 sm:$0xff]   ;;  %v904_v26 = vld [vmem:[#allocation6 + $0x60] ss:$8 sps:$4 sm:$0xff]  }
  0x76   :  { %v902_v25 = vld [vmem:[#allocation6 + $0x164] ss:$8 sps:$4 sm:$0xff]   ;;  %v905_v27 = vld [vmem:[#allocation6 + $0x160] ss:$8 sps:$4 sm:$0xff]   ;;  %v906_v28 = vld [vmem:[#allocation6 + $0x74] ss:$8 sps:$4 sm:$0xff]  }
  0x77   :  { %525 = vmatpush1.bf16.msra.mxu1 %v880_v10  ;;  %v908_v29 = vld [vmem:[#allocation6 + $0x174] ss:$8 sps:$4 sm:$0xff]   ;;  %v910_v30 = vld [vmem:[#allocation6 + $0x70] ss:$8 sps:$4 sm:$0xff]   ;;  %v912_v32 = vld [vmem:[#allocation6 + $0x84] ss:$8 sps:$4 sm:$0xff]  }
  0x78   :  { %568 = vmatpush1.bf16.msra.mxu0 %v881_v11  ;;  %526 = vmatprep.subr.bf16.mxu1 %v882_v12  ;;  %v911_v31 = vld [vmem:[#allocation6 + $0x170] ss:$8 sps:$4 sm:$0xff]   ;;  %v914_v33 = vld [vmem:[#allocation6 + $0x184] ss:$8 sps:$4 sm:$0xff]   ;;  %v916_v34 = vld [vmem:[#allocation6 + $0x80] ss:$8 sps:$4 sm:$0xff]  }
  0x79   :  { %569 = vmatprep.subr.bf16.mxu0 %v884_v13  ;;  %v917_v35 = vld [vmem:[#allocation6 + $0x180] ss:$8 sps:$4 sm:$0xff]   ;;  %v918_v36 = vld [vmem:[#allocation6 + $0x94] ss:$8 sps:$4 sm:$0xff]   ;;  %v922_v38 = vld [vmem:[#allocation6 + $0x90] ss:$8 sps:$4 sm:$0xff]  }
  0x7a   :  { %v920_v37 = vld [vmem:[#allocation6 + $0x194] ss:$8 sps:$4 sm:$0xff]   ;;  %v923_v39 = vld [vmem:[#allocation6 + $0x190] ss:$8 sps:$4 sm:$0xff]   ;;  %v924_v40 = vld [vmem:[#allocation6 + $0xa4] ss:$8 sps:$4 sm:$0xff]  }
  0x7b   :  { %527 = vmatpush1.bf16.msra.mxu1 %v886_v14  ;;  %v926_v41 = vld [vmem:[#allocation6 + $0x1a4] ss:$8 sps:$4 sm:$0xff]   ;;  %v928_v42 = vld [vmem:[#allocation6 + $0xa0] ss:$8 sps:$4 sm:$0xff]   ;;  %v930_v44 = vld [vmem:[#allocation6 + $0xb4] ss:$8 sps:$4 sm:$0xff]  }
  0x7c   :  { %570 = vmatpush1.bf16.msra.mxu0 %v887_v15  ;;  %528 = vmatprep.subr.bf16.mxu1 %v888_v16  ;;  %v929_v43 = vld [vmem:[#allocation6 + $0x1a0] ss:$8 sps:$4 sm:$0xff]   ;;  %v932_v45 = vld [vmem:[#allocation6 + $0x1b4] ss:$8 sps:$4 sm:$0xff]   ;;  %v934_v46 = vld [vmem:[#allocation6 + $0xb0] ss:$8 sps:$4 sm:$0xff]  }
  0x7d   :  { %571 = vmatprep.subr.bf16.mxu0 %v890_v17  ;;  %v962_v47 = vld [vmem:[#allocation3 + $0x4] ss:$16 sps:$4 sm:$0xff]   ;;  %v935_v48 = vld [vmem:[#allocation6 + $0x1b0] ss:$8 sps:$4 sm:$0xff]   ;;  %v965_v51 = vld [vmem:[#allocation3 + $0xc] ss:$16 sps:$4 sm:$0xff]  }
  0x7e   :  { %v936_v49 = vld [vmem:[#allocation6 + $0xc4] ss:$8 sps:$4 sm:$0xff]   ;;  %552 = vmatprep.mubr.bf16.mxu1 %v962_v47  ;;  %595 = vmatprep.mubr.bf16.mxu0 %v965_v51  ;;  %v940_v52 = vld [vmem:[#allocation6 + $0xc0] ss:$8 sps:$4 sm:$0xff]   ;;  %v942_v54 = vld [vmem:[#allocation6 + $0xd4] ss:$8 sps:$4 sm:$0xff]  }
  0x7f   :  { %529 = vmatpush1.bf16.msra.mxu1 %v892_v18  ;;  %v938_v50 = vld [vmem:[#allocation6 + $0x1c4] ss:$8 sps:$4 sm:$0xff]   ;;  %v941_v53 = vld [vmem:[#allocation6 + $0x1c0] ss:$8 sps:$4 sm:$0xff]   ;;  %v944_v55 = vld [vmem:[#allocation6 + $0x1d4] ss:$8 sps:$4 sm:$0xff]  }
  0x80   :  { %572 = vmatpush1.bf16.msra.mxu0 %v893_v19  ;;  %530 = vmatprep.subr.bf16.mxu1 %v894_v20  ;;  %v946_v56 = vld [vmem:[#allocation6 + $0xd0] ss:$8 sps:$4 sm:$0xff]   ;;  %v948_v58 = vld [vmem:[#allocation6 + $0xe4] ss:$8 sps:$4 sm:$0xff]   ;;  %v952_v60 = vld [vmem:[#allocation6 + $0xe0] ss:$8 sps:$4 sm:$0xff]  }
  0x81   :  { %573 = vmatprep.subr.bf16.mxu0 %v896_v21  ;;  %v947_v57 = vld [vmem:[#allocation6 + $0x1d0] ss:$8 sps:$4 sm:$0xff]   ;;  %v950_v59 = vld [vmem:[#allocation6 + $0x1e4] ss:$8 sps:$4 sm:$0xff]   ;;  %v953_v61 = vld [vmem:[#allocation6 + $0x1e0] ss:$8 sps:$4 sm:$0xff]  }
  0x82   :  { %v954_v62 = vld [vmem:[#allocation6 + $0xf4] ss:$8 sps:$4 sm:$0xff]   ;;  %v958_v0 = vld [vmem:[#allocation6 + $0xf0] ss:$8 sps:$4 sm:$0xff]   ;;  %v625_v5 = vshrl.u32 %v624_v4, 7  ;;  %v646_v12 = vld [vmem:[#allocation9] sm:$0xff] }
  0x83   :  { %531 = vmatpush1.bf16.msra.mxu1 %v898_v22  ;;  %v956_v63 = vld [vmem:[#allocation6 + $0x1f4] ss:$8 sps:$4 sm:$0xff]   ;;  %v959_v1 = vld [vmem:[#allocation6 + $0x1f0] ss:$8 sps:$4 sm:$0xff]   ;;  %v621_v6 = vld [vmem:[#allocation8] sm:$0x3]  ;;  %v648_v21 = vunpack.c.l.bf16 %v646_v12 }
  0x84   :  { %574 = vmatpush1.bf16.msra.mxu0 %v899_v23  ;;  %532 = vmatprep.subr.bf16.mxu1 %v900_v24  ;;  %v960_v2 = vld [vmem:[#allocation3] ss:$16 sps:$4 sm:$0xff]   ;;  %v963_v3 = vld [vmem:[#allocation3 + $0x8] ss:$16 sps:$4 sm:$0xff]   ;;  %v622_v7 = vunpack.c.l.bf16 %v621_v6  ;;  %v1258_v8 = vsub.s32 0, %v625_v5  ;;  %v1260_v9 = vsub.s32 2, %v625_v5 }
  0x85   :  { %575 = vmatprep.subr.bf16.mxu0 %v902_v25  ;;  %v647_v17 = vld [vmem:[#allocation9 + $0x8] sm:$0xff]  ;;  %v649_v25 = vunpack.c.h.bf16 %v646_v12  ;;  %s1144_s5 = smov [#allocation14]  }
  0x86   :  { %v627_v10 = vrot.slane %v622_v7, %v1258_v8  ;;  %v631_v11 = vrot.slane %v622_v7, %v1260_v9  ;;  %s762_s22 = sshll.u32 %s1144_s5, 4  ;;  %s763_s22 = int_to_ptr.vmem [resolvable:$true] %s762_s22 }
  0x87   :  { %533 = vmatpush1.bf16.msra.mxu1 %v904_v26  ;;  %s1102_s23 = scalar_lea.vmem %s763_s22, 256  ;;  %p1107_p7 = scmp.lt.s32.totalorder %s763_s22, %s763_s22 }
  0x88   :  { %576 = vmatpush1.bf16.msra.mxu0 %v905_v27  ;;  %534 = vmatprep.subr.bf16.mxu1 %v906_v28  ;;  %v637_v13 = vrot.slane %v627_v10, %v1258_v8  ;;  %v641_v16 = vrot.slane %v631_v11, %v1258_v8  ;;  %v650_v28 = vunpack.c.l.bf16 %v647_v17  ;;  %p1103_p6 = scmp.ne.s32.totalorder %s763_s22, %s1102_s23  ;;  %p1108_p8 = scmp.lt.s32.totalorder %s1102_s23, %s1102_s23 }
  0x89   :  { %577 = vmatprep.subr.bf16.mxu0 %v908_v29 }
  0x8a   :  { %p1109_p9 = por %p1108_p8, %p1107_p7 }
  0x8b   :  { %535 = vmatpush1.bf16.msra.mxu1 %v910_v30 }
  0x8c   :  { %578 = vmatpush1.bf16.msra.mxu0 %v911_v31  ;;  %536 = vmatprep.subr.bf16.mxu1 %v912_v32  ;;  %p1110_p10 = pnand %p1109_p9, %p1103_p6 }
  0x8d   :  { %579 = vmatprep.subr.bf16.mxu0 %v914_v33  ;;  %v651_v33 = vunpack.c.h.bf16 %v647_v17 }
  0x8f   :  { %537 = vmatpush1.bf16.msra.mxu1 %v916_v34 }
  0x90   :  { %580 = vmatpush1.bf16.msra.mxu0 %v917_v35  ;;  %538 = vmatprep.subr.bf16.mxu1 %v918_v36 }
  0x91   :  { %581 = vmatprep.subr.bf16.mxu0 %v920_v37 }
  0x93   :  { %539 = vmatpush1.bf16.msra.mxu1 %v922_v38 }
  0x94   :  { %582 = vmatpush1.bf16.msra.mxu0 %v923_v39  ;;  %540 = vmatprep.subr.bf16.mxu1 %v924_v40 }
  0x95   :  { %583 = vmatprep.subr.bf16.mxu0 %v926_v41 }
  0x97   :  { %541 = vmatpush1.bf16.msra.mxu1 %v928_v42 }
  0x98   :  { %584 = vmatpush1.bf16.msra.mxu0 %v929_v43  ;;  %542 = vmatprep.subr.bf16.mxu1 %v930_v44 }
  0x99   :  { %585 = vmatprep.subr.bf16.mxu0 %v932_v45 }
  0x9b   :  { %543 = vmatpush1.bf16.msra.mxu1 %v934_v46 }
  0x9c   :  { %586 = vmatpush1.bf16.msra.mxu0 %v935_v48  ;;  %544 = vmatprep.subr.bf16.mxu1 %v936_v49 }
  0x9d   :  { %587 = vmatprep.subr.bf16.mxu0 %v938_v50 }
  0x9f   :  { %545 = vmatpush1.bf16.msra.mxu1 %v940_v52 }
  0xa0   :  { %588 = vmatpush1.bf16.msra.mxu0 %v941_v53  ;;  %546 = vmatprep.subr.bf16.mxu1 %v942_v54 }
  0xa1   :  { %589 = vmatprep.subr.bf16.mxu0 %v944_v55 }
  0xa3   :  { %547 = vmatpush1.bf16.msra.mxu1 %v946_v56 }
  0xa4   :  { %590 = vmatpush1.bf16.msra.mxu0 %v947_v57  ;;  %548 = vmatprep.subr.bf16.mxu1 %v948_v58 }
  0xa5   :  { %591 = vmatprep.subr.bf16.mxu0 %v950_v59  ;;  %v693_v59 = vld [vmem:[#allocation11] sm:$0x3] }
  0xa7   :  { %549 = vmatpush1.bf16.msra.mxu1 %v952_v60 }
  0xa8   :  { %592 = vmatpush1.bf16.msra.mxu0 %v953_v61  ;;  %550 = vmatprep.subr.bf16.mxu1 %v954_v62  ;;  %v718_v61 = vld [vmem:[#allocation12] sm:$0x3] }
  0xa9   :  { %593 = vmatprep.subr.bf16.mxu0 %v956_v63  ;;  %v694_v63 = vunpack.c.l.bf16 %v693_v59 }
  0xab   :  { %551 = vmatpush1.bf16.msra.mxu1 %v958_v0 }
  0xac   :  { %594 = vmatpush1.bf16.msra.mxu0 %v959_v1  ;;  %v719_v1 = vunpack.c.l.bf16 %v718_v61 }
  0xae   :  { %553 = vmatmul.mubr.bf16.vlgmr.msra.gmra.mrb[0].mxu1 %v960_v2  ;;  %v699_v2 = vrot.slane %v694_v63, %v1258_v8  ;;  %v724_v4 = vrot.slane %v719_v1, %v1258_v8  ;;  %v728_v5 = vrot.slane %v719_v1, %v1260_v9 }
  0xaf   :  { %596 = vmatmul.mubr.bf16.vlgmr.msra.gmra.mrb[0].mxu0 %v963_v3  ;;  %v703_v3 = vrot.slane %v694_v63, %v1260_v9 }
  0xb0   :  { %v709_v10 = vrot.slane %v699_v2, %v1258_v8 }
  0xb1   :  { %v713_v11 = vrot.slane %v703_v3, %v1258_v8 }
 0x181   :  { %v554_v14 = vpop.f32.mrb[0].mxu1 }
 0x182   :  { %v597_v15 = vpop.f32.mrb[0].mxu0  ;;  %v556_v19 = vpop.f32.mrb[1].mxu1 }
 0x183   :  { %v598_v18 = vadd.f32 %v597_v15, %v554_v14  ;;  %v599_v20 = vpop.f32.mrb[1].mxu0  ;;  %v558_v23 = vpop.f32.mrb[2].mxu1  ;;  %v734_v15 = vrot.slane %v724_v4, %v1258_v8 }
 0x184   :  { %v600_v22 = vadd.f32 %v599_v20, %v556_v19  ;;  %v601_v24 = vpop.f32.mrb[2].mxu0  ;;  %v560_v29 = vpop.f32.mrb[3].mxu1 }
 0x185   :  { %v642_v26 = vadd.f32 %v637_v13, %v598_v18  ;;  %v602_v27 = vadd.f32 %v601_v24, %v558_v23  ;;  %v603_v30 = vpop.f32.mrb[3].mxu0 }
 0x186   :  { %v643_v31 = vadd.f32 %v641_v16, %v600_v22  ;;  %v604_v32 = vadd.f32 %v603_v30, %v560_v29 }
 0x187   :  { %v644_v34 = vadd.f32 %v637_v13, %v602_v27  ;;  %v652_v35 = vadd.f32 %v648_v21, %v642_v26 }
 0x188   :  { %v645_v36 = vadd.f32 %v641_v16, %v604_v32  ;;  %v653_v37 = vadd.f32 %v649_v25, %v643_v31  ;;  %v738_v16 = vrot.slane %v728_v5, %v1258_v8 }
 0x189   :  { %v654_v38 = vadd.f32 %v650_v28, %v644_v34  ;;  %v665_v39 = vmul.f32 %v652_v35, %v652_v35 }
 0x18a   :  { %v655_v40 = vadd.f32 %v651_v33, %v645_v36  ;;  %v656_v41 = vadd.f32 %v653_v37, %v652_v35  ;;  %v666_v42 = vmul.f32 %v653_v37, %v653_v37 }
 0x18b   :  { %v667_v44 = vmul.f32 %v654_v38, %v654_v38 }
 0x18c   :  { %657 = vadd.xlane.f32.xlu0 %v656_v41  ;;  %v669_v43 = vadd.f32 %v666_v42, %v665_v39  ;;  %v668_v45 = vmul.f32 %v655_v40, %v655_v40  ;;  %v659_v46 = vadd.f32 %v655_v40, %v654_v38 }
 0x18e   :  { %670 = vadd.xlane.f32.xlu1 %v669_v43  ;;  %v672_v47 = vadd.f32 %v668_v45, %v667_v44 }
 0x190   :  { %660 = vadd.xlane.f32.xlu0 %v659_v46 }
 0x192   :  { %673 = vadd.xlane.f32.xlu1 %v672_v47 }
 0x219   :  { %v658_v48 = vpop.xlane.xlu0 %657 }
 0x21a   :  { %v663_v49 = vmul.f32 0.00390625, %v658_v48 }
 0x21b   :  { %v671_v50 = vpop.xlane.xlu1 %670 }
 0x21c   :  { %v675_v51 = vmul.f32 0.00390625, %v671_v50  ;;  %v677_v52 = vmul.f32 %v663_v49, %v663_v49  ;;  %v681_v6 = vsub.f32 %v652_v35, %v663_v49  ;;  %v682_v7 = vsub.f32 %v653_v37, %v663_v49 }
 0x21d   :  { %v661_v53 = vpop.xlane.xlu0 %660 }
 0x21e   :  { %v679_v54 = vsub.f32 %v675_v51, %v677_v52  ;;  %v664_v55 = vmul.f32 0.00390625, %v661_v53 }
 0x21f   :  { %v674_v56 = vpop.xlane.xlu1 %673 }
 0x220   :  { %v685_v57 = vadd.f32 1e-05, %v679_v54  ;;  %v676_v58 = vmul.f32 0.00390625, %v674_v56  ;;  %v678_v60 = vmul.f32 %v664_v55, %v664_v55  ;;  %v683_v19 = vsub.f32 %v654_v38, %v664_v55 }
 0x221   :  { %v684_v20 = vsub.f32 %v655_v40, %v664_v55 }
 0x222   :  { %966 = vrsqrt.f32 %v685_v57  ;;  %v680_v62 = vsub.f32 %v676_v58, %v678_v60 }
 0x224   :  { %v686_v0 = vadd.f32 1e-05, %v680_v62 }
 0x226   :  { %968 = vrsqrt.f32 %v686_v0 }
 0x22c   :  { %v967_v12 = vpop.eup %966 }
 0x22d   :  { %v689_v13 = vmul.f32 %v967_v12, %v681_v6  ;;  %v690_v14 = vmul.f32 %v967_v12, %v682_v7 }
 0x22f   :  { %v714_v17 = vmul.f32 %v709_v10, %v689_v13  ;;  %v715_v18 = vmul.f32 %v713_v11, %v690_v14 }
 0x230   :  { %v969_v21 = vpop.eup %968 }
 0x231   :  { %v739_v22 = vadd.f32 %v734_v15, %v714_v17  ;;  %v740_v9 = vadd.f32 %v738_v16, %v715_v18  ;;  %v691_v23 = vmul.f32 %v969_v21, %v683_v19  ;;  %v692_v24 = vmul.f32 %v969_v21, %v684_v20 }
 0x233   :  { %v847_v25 = vpack.c.bf16 %v740_v9, %v739_v22  ;;  %v716_v26 = vmul.f32 %v709_v10, %v691_v23  ;;  %v717_v27 = vmul.f32 %v713_v11, %v692_v24 }
 0x235   :  { %755 = vst [vmem:[#allocation14] sm:$0xff] %v847_v25  ;;  %v741_v28 = vadd.f32 %v734_v15, %v716_v26  ;;  %v742_v29 = vadd.f32 %v738_v16, %v717_v27 }
 0x237   :  { %v848_v30 = vpack.c.bf16 %v742_v29, %v741_v28 }
 0x239   :  { %756 = vst [vmem:[#allocation14 + $0x8] sm:$0xff] %v848_v30 }
 0x23a   :  { %1113 = shalt.err (!%p1110_p10)
}
 0x23b   :  { %s1114_s24 = scalar_lea.hbm %s1295_s6, 256 }
 0x23c   :  { %p1115_p11 = scmp.ne.s32.totalorder %s1295_s6, %s1114_s24  ;;  %p1118_p12 = scmp.lt.u32.totalorder %s1114_s24, %s1295_s6 }
 0x23e   :  { %p1120_p13 = pnand %p1118_p12, %p1115_p11 }
 0x240   :  { %1123 = shalt.err (!%p1120_p13)
}
 0x241   :  { %768 = dma.vmem_to_hbm [thread:$0]  %s763_s22, 256, %s1295_s6, [#allocation5], %s1135_s7, %s1135_s7, %s1136_s8  }
 0x242   :  { %1132 = dma.done.wait [#allocation5], 256  }
 0x243   :  { %1133 = vsyncadd [#allocation5], 4294967040 }
 0x244   :  { %772 = vsyncpa [#allocation4], 1 }
 0x245   :  { %773 = vsyncpa [#allocation7], 1 }
 0x246   :  { %774 = vsyncpa [#allocation10], 1 }
 0x247   :  { %775 = vsyncpa [#allocation13], 1 }
 0x248   :  { %776 = vsyncpa [#allocation5], 1 }

// kernel: seq2seq_forward.44
= control target key start
LH: loop header
LB: loop body
LE: loop exit
PB: predicated region body
PF: predicated region fallthrough
CT: control target
= control target key end

     0   :  { %s1758_s0 = inlined_call_operand.hbm [shape: bf16[2,8,256], index: 0, kind: input, shape index: {}]   ;;  %s1759_s1 = inlined_call_operand.hbm [shape: bf16[2,8,512], index: 1, kind: input, shape index: {}, may-alias: {1,2}]   ;;  %s1760_s2 = inlined_call_operand.hbm [shape: bf16[2,8,512], index: 2, kind: input, shape index: {}, may-alias: {1,2}]   ;;  %s1761_s3 = inlined_call_operand.hbm [shape: s32[2,1,8], index: 3, kind: input, shape index: {}]   ;;  %s1762_s4 = inlined_call_operand.hbm [shape: bf16[2,8,256], index: 4, kind: output, shape index: {}]  }
   0x1   :  { %1784 = sst [smem:[#allocation31_spill]] %s1759_s1 }
   0x2   :  { %1785 = sst [smem:[#allocation32_spill]] %s1761_s3 }
   0x3   :  { %1786 = sst [smem:[#allocation33_spill]] %s1762_s4 }
   0x4   :  { %9 = vsyncpa [#allocation6], 0 }
   0x5   :  { %11 = vsyncpa [#allocation6 + $0x1], 0 }
   0x6   :  { %12 = vsyncpa [#allocation9], 0 }
   0x7   :  { %14 = vsyncpa [#allocation9 + $0x1], 0 }
   0x8   :  { %15 = vsyncpa [#allocation12], 0 }
   0x9   :  { %17 = vsyncpa [#allocation12 + $0x1], 0 }
   0xa   :  { %18 = vsyncpa [#allocation7], 0 }
   0xb   :  { %20 = vsyncpa [#allocation7 + $0x1], 0  ;;  %s1288_s15 = smov 0   ;;  %s1290_s16 = smov 0  }
   0xc   :  { %s1292_s17 = smov 0   ;;  %s1294_s18 = smov 0  }
   0xd   :  { %s1296_s19 = smov 0   ;;  %s1298_s20 = smov 0  }
   0xe   :  { %s1300_s21 = smov 0   ;;  %s1302_s22 = smov 0  }
   0xf   :  { %s1304_s23 = smov 0   ;;  %s1306_s24 = smov 0  }
  0x10   :  { %s1308_s25 = smov 0   ;;  %s1310_s26 = smov 0  }
  0x11   :  { %s1312_s27 = smov 0   ;;  %s1314_s28 = smov 0  }
  0x12 LB: > { %1787 = sst [smem:[#allocation19_spill]] %s1224_s21  ;;  %s1359_s29 = sadd.s32 4294967295, %s1252_s28   ;;  %s1252_s28 = sphi %s1314_s28, %s26_s28   ;;  %s1248_s27 = sphi %s1312_s27, %s1841_s27   ;;  %s1244_s26 = sphi %s1310_s26, %s1851_s26   ;;  %s1240_s25 = sphi %s1308_s25, %s1839_s25   ;;  %s1236_s24 = sphi %s1306_s24, %s1850_s24   ;;  %s1232_s23 = sphi %s1304_s23, %s1849_s23   ;;  %s1228_s22 = sphi %s1302_s22, %s1848_s22   ;;  %s1224_s21 = sphi %s1300_s21, %s1837_s21   ;;  %s1220_s20 = sphi %s1298_s20, %s1847_s20   ;;  %s1216_s19 = sphi %s1296_s19, %s1846_s19   ;;  %s1212_s18 = sphi %s1294_s18, %s1845_s18   ;;  %s1208_s17 = sphi %s1292_s17, %s1844_s17   ;;  %s1204_s16 = sphi %s1290_s16, %s1843_s16   ;;  %s1200_s15 = sphi %s1288_s15, %s1842_s15  }
  0x13   : > { %1788 = sst [smem:[#allocation20_spill]] %s1228_s22  ;;  %s782_s30 = sadd.s32 4294967294, %s1252_s28  }
  0x14   : > { %1789 = sst [smem:[#allocation21_spill]] %s1236_s24  ;;  %s48_s5 = sadd.s32 1, %s1244_s26 }
  0x15   : > { %1790 = sst [smem:[#allocation22_spill]] %s1240_s25  ;;  %s52_s6 = sadd.s32 1, %s1248_s27 }
  0x16   : > { %1791 = sst [smem:[#allocation23_spill]] %s1248_s27  ;;  %p50_p0 = scmp.ge.s32.totalorder %s48_s5, 2 }
  0x17   : > { %s63_s7 = sadd.s32 1, %s1232_s23  ;;  %p70_p1 = scmp.ne.s32.totalorder %s1232_s23, %s1228_s22 }
  0x18   : > { %p1776_p2 = scmp.eq.s32.totalorder %s1252_s28, 0  ;;  %s1853_s5 = smov (%p50_p0, %s48_s5), 0 }
  0x19   : > { %1792 = sst [smem:[#allocation24_spill]] %s1853_s5  ;;  %s1855_s6 = smov (!%p50_p0, %s52_s6), %s1248_s27 }
  0x1a   : > { %s59_s8 = ssub.s32 %s1244_s26, %s1853_s5  ;;  %p1378_p3 = por %p1776_p2, %p70_p1 }
  0x1b   : > { %p54_p4 = scmp.ge.s32.totalorder %s1855_s6, 2  ;;  %p76_p5 = scmp.ne.s32.totalorder %s1228_s22, %s1224_s21 }
  0x1c   : > { %p1775_p6 = scmp.eq.s32.totalorder %s1359_s29, 0  ;;  %s116_s10 = sadd.s32 2, %s1244_s26 }
  0x1d   : > { %s1857_s6 = smov (%p54_p4, %s1855_s6), 0  ;;  %s117_s12 = sadd.s32 2, %s1853_s5 }
  0x1e   : > { %1794 = sst [smem:[#allocation25_spill]] %s1857_s6  ;;  %p1393_p7 = por %p1775_p6, %p76_p5 }
  0x1f   : > { %s1400_s13 = ssub.s32 %s1248_s27, %s1857_s6  ;;  %s1402_s14 = ssub.s32 %s116_s10, %s117_s12 }
  0x20   : > { %s1795_s11 = scalar_select %p1393_p7, 1, 0 }
  0x21   : > { %s60_s4 = sor.u32 %s59_s8, %s1400_s13  ;;  %p194_p9 = scmp.eq.s32.totalorder %s1359_s29, 3 }
  0x22   : > { %1796 = sst [smem:[#allocation26_spill]] %s1795_s11  ;;  %p61_p8 = scmp.eq.s32.totalorder %s60_s4, 0 }
  0x23   : > { %p200_p10 = scmp.eq.s32.totalorder %s782_s30, 3  ;;  %p1414_p11 = por %p194_p9, %p70_p1 }
  0x24   : > { %s1409_s25 = scalar_select %p61_p8, %s1232_s23, %s63_s7  }
  0x25   : > { %s1798_s11 = scalar_select %p1414_p11, 1, 0 }
  0x26   : > { %1797 = sst [smem:[#allocation27_spill]] %s1409_s25  ;;  %p1421_p12 = por %p200_p10, %p76_p5 }
  0x27   : > { %1799 = sst [smem:[#allocation28_spill]] %s1798_s11  ;;  %p1774_p13 = scmp.lt.s32.totalorder %s1252_s28, 4 }
  0x28   : > { %s1800_s6 = scalar_select %p1421_p12, 1, 0 }
  0x29   : > { %s1768_s10 = sand.u32 1, %s1232_s23   ;;  %s242_s4 = sand.u32 1, %s1252_s28  }
  0x2a   : > { %1801 = sst [smem:[#allocation29_spill]] %s1800_s6  ;;  %s1429_s8 = sshll.u32 %s1768_s10, 2 }
  0x2b   : > { %p1436_p0 = pnand %p1774_p13, %p1378_p3  ;;  %s789_s7 = sshll.u32 %s1248_s27, 2 }
  0x2c   : > { %s1442_s12 = sadd.s32 %s1244_s26, %s789_s7  ;;  %s246_s5 = scalar_lea.vmem [#allocation8], %s1429_s8 }
  0x2d   : > { %s1771_s24 = sshll.u32 %s1442_s12, 6  ;;  %s257_s25 = sshll.u32 %s246_s5, 4  ;;  %s1453_s25 = int_to_ptr.vmem [resolvable:$true] %s257_s25 }
  0x2e   : > { %s1803_s1 = sld [smem:[#allocation31_spill]]  ;;  %s1455_s21 = scalar_lea.sflag [#allocation9], %s242_s4 }
  0x2f   : > { %p975_p3 = pneg %p1436_p0 }
  0x34   : > { %s1451_s9 = scalar_lea.hbm %s1803_s1, %s1771_s24  ;;  %s978_s10 = scalar_lea.hbm %s1803_s1, 512 }
  0x35   : > { %s973_s7 = scalar_lea.hbm %s1451_s9, 64  ;;  %p979_p8 = scmp.lt.u32.totalorder %s1451_s9, %s1803_s1 }
  0x36   : > { %p974_p1 = scmp.ne.s32.totalorder %s1451_s9, %s973_s7  ;;  %p980_p9 = scmp.lt.u32.totalorder %s978_s10, %s973_s7 }
  0x37   : > { %p982_p13 = scmp.lt.u32.totalorder %s973_s7, %s1451_s9 }
  0x38   : > { %p976_p4 = pnand %p975_p3, %p974_p1  ;;  %p981_p10 = por %p980_p9, %p979_p8 }
  0x3a   : > { %p977_p5 = pneg %p976_p4  ;;  %p983_p6 = por %p982_p13, %p981_p10 }
  0x3c   : > { %p984_p2 = pnand %p983_p6, %p977_p5 }
  0x3e   : > { %987 = shalt.err (!%p984_p2)
}
  0x3f   : > { %s988_s4 = scalar_lea.vmem %s1453_s25, 64  ;;  %s1254_s5 = smov [#allocation8]  }
  0x40   : > { %p989_p1 = scmp.ne.s32.totalorder %s1453_s25, %s988_s4  ;;  %s993_s6 = sshll.u32 %s1254_s5, 4  ;;  %s994_s6 = int_to_ptr.vmem [resolvable:$false] %s993_s6 }
  0x41   : > { %s995_s24 = scalar_lea.vmem %s994_s6, 128  ;;  %p996_p11 = scmp.lt.s32.totalorder %s1453_s25, %s994_s6 }
  0x42   : > { %p991_p4 = pnand %p989_p1, %p975_p3  ;;  %p997_p8 = scmp.lt.s32.totalorder %s995_s24, %s988_s4 }
  0x44   : > { %p992_p12 = pneg %p991_p4  ;;  %p998_p9 = por %p997_p8, %p996_p11 }
  0x46   : > { %p999_p13 = pnand %p998_p9, %p992_p12 }
  0x48   : > { %1002 = shalt.err (!%p999_p13)
}
  0x49   : > { %836 = dma.hbm_to_vmem [thread:$0]  (!%p1436_p0), %s1451_s9, 64, %s1453_s25, %s1455_s21  }
  0x4a   : > { %s1804_s11 = sshll.u32 %s1442_s12, 6  ;;  %p795_p2 = scmp.ge.s32.totalorder %s1252_s28, 1 }
  0x4b   : > { %s1488_s4 = scalar_lea.hbm %s1760_s2, %s1804_s11  ;;  %p303_p6 = scmp.lt.s32.totalorder %s1252_s28, 5 }
  0x4c   : > { %s786_s6 = sshll.u32 %s1248_s27, 1  ;;  %s224_s24 = scalar_lea.vmem [#allocation5], %s1429_s8 }
  0x4d   : > { %p1492_p11 = pnand %p795_p2, %p303_p6  ;;  %s235_s1 = sshll.u32 %s224_s24, 4  ;;  %s1499_s1 = int_to_ptr.vmem [resolvable:$true] %s235_s1 }
  0x4e   : > { %s231_s22 = sadd.s32 %s1244_s26, %s786_s6  ;;  %s1807_s7 = sand.u32 1, %s1232_s23  }
  0x4f   : > { %s1805_s5 = scalar_select %p1492_p11, 1, 0 }
  0x50   : > { %s787_s3 = sshll.u32 %s231_s22, 6  ;;  %s221_s11 = scalar_lea.sflag [#allocation6], %s1807_s7 }
  0x51   : > { %1806 = sst [smem:[#allocation30_spill]] %s1805_s5  ;;  %s233_s9 = scalar_lea.hbm %s1758_s0, %s787_s3 }
  0x52   : > { %s1003_s10 = scalar_lea.hbm %s233_s9, 64  ;;  %s1008_s8 = scalar_lea.hbm %s1758_s0, 256 }
  0x53   : > { %p1004_p12 = scmp.ne.s32.totalorder %s233_s9, %s1003_s10  ;;  %p1009_p1 = scmp.lt.u32.totalorder %s233_s9, %s1758_s0 }
  0x54   : > { %p1010_p4 = scmp.lt.u32.totalorder %s1008_s8, %s1003_s10  ;;  %p1012_p9 = scmp.lt.u32.totalorder %s1003_s10, %s233_s9 }
  0x55   : > { %p1006_p5 = pnand %p1004_p12, %p975_p3 }
  0x56   : > { %p1011_p8 = por %p1010_p4, %p1009_p1 }
  0x57   : > { %p1007_p10 = pneg %p1006_p5 }
  0x58   : > { %p1013_p13 = por %p1012_p9, %p1011_p8 }
  0x5a   : > { %p1014_p2 = pnand %p1013_p13, %p1007_p10 }
  0x5c   : > { %1017 = shalt.err (!%p1014_p2)
}
  0x5d   : > { %s1018_s3 = scalar_lea.vmem %s1499_s1, 64  ;;  %s1255_s22 = smov [#allocation5]  }
  0x5e   : > { %p1019_p6 = scmp.ne.s32.totalorder %s1499_s1, %s1018_s3  ;;  %s1023_s27 = sshll.u32 %s1255_s22, 4  ;;  %s1024_s27 = int_to_ptr.vmem [resolvable:$false] %s1023_s27 }
  0x5f   : > { %s1025_s5 = scalar_lea.vmem %s1024_s27, 128  ;;  %p1026_p7 = scmp.lt.s32.totalorder %s1499_s1, %s1024_s27 }
  0x60   : > { %p1021_p12 = pnand %p1019_p6, %p975_p3  ;;  %p1027_p1 = scmp.lt.s32.totalorder %s1025_s5, %s1018_s3 }
  0x62   : > { %p1022_p5 = pneg %p1021_p12  ;;  %p1028_p4 = por %p1027_p1, %p1026_p7 }
  0x64   : > { %p1029_p8 = pnand %p1028_p4, %p1022_p5 }
  0x66   : > { %1032 = shalt.err (!%p1029_p8)
}
  0x67   : > { %833 = dma.hbm_to_vmem [thread:$0]  (!%p1436_p0), %s233_s9, 64, %s1499_s1, %s221_s11  }
  0x68   : > { %s1808_s25 = sor.u32 %s1402_s14, %s1400_s13  ;;  %s125_s12 = sadd.s32 1, %s1220_s20 }
  0x69   : > { %p123_p7 = scmp.eq.s32.totalorder %s1808_s25, 0  ;;  %p132_p3 = scmp.ne.s32.totalorder %s1220_s20, %s1216_s19 }
  0x6a   : > { %p138_p10 = scmp.ne.s32.totalorder %s1216_s19, %s1212_s18  ;;  %p1809_p9 = scmp.eq.s32.totalorder %s1252_s28, 0 }
  0x6b   : > { %s1533_s30 = scalar_select %p123_p7, %s1220_s20, %s125_s12  }
  0x6c   : > { %p134_p13 = por %p132_p3, %p1809_p9  ;;  %p1810_p2 = scmp.eq.s32.totalorder %s1359_s29, 0 }
  0x6d   : > { %s266_s10 = sand.u32 1, %s1220_s20   ;;  %s1545_s8 = scalar_lea.hbm %s1488_s4, 128 }
  0x6e   : > { %p1539_p6 = por %p138_p10, %p1810_p2  ;;  %s791_s1 = sshll.u32 %s266_s10, 2 }
  0x6f   : > { %p1812_p0 = scmp.lt.s32.totalorder %s1252_s28, 4  ;;  %s268_s18 = scalar_lea.vmem [#allocation10], %s791_s1 }
  0x70   : > { %s1811_s7 = scalar_select %p1539_p6, 1, 0 }
  0x71   : > { %p1549_p12 = pnand %p1812_p0, %p134_p13  ;;  %s280_s9 = sshll.u32 %s268_s18, 4  ;;  %s281_s9 = int_to_ptr.vmem [resolvable:$true] %s280_s9 }
  0x72   : > { %s1063_s11 = scalar_lea.hbm %s1488_s4, 192  ;;  %s1038_s3 = scalar_lea.hbm %s1760_s2, 512 }
  0x73   : > { %p1034_p5 = scmp.ne.s32.totalorder %s1545_s8, %s1063_s11  ;;  %p1035_p1 = pneg %p1549_p12 }
  0x74   : > { %p1039_p7 = scmp.lt.u32.totalorder %s1545_s8, %s1760_s2  ;;  %p1040_p3 = scmp.lt.u32.totalorder %s1038_s3, %s1063_s11 }
  0x75   : > { %p1036_p4 = pnand %p1035_p1, %p1034_p5  ;;  %p1042_p9 = scmp.lt.u32.totalorder %s1063_s11, %s1545_s8 }
  0x76   : > { %p1041_p10 = por %p1040_p3, %p1039_p7 }
  0x77   : > { %p1037_p8 = pneg %p1036_p4 }
  0x78   : > { %p1043_p13 = por %p1042_p9, %p1041_p10 }
  0x7a   : > { %p1044_p2 = pnand %p1043_p13, %p1037_p8 }
  0x7c   : > { %1047 = shalt.err (!%p1044_p2)
}
  0x7d   : > { %s1048_s4 = scalar_lea.vmem %s281_s9, 64  ;;  %s1256_s5 = smov [#allocation10]  }
  0x7e   : > { %p1049_p0 = scmp.ne.s32.totalorder %s281_s9, %s1048_s4  ;;  %s1053_s25 = sshll.u32 %s1256_s5, 4  ;;  %s1054_s25 = int_to_ptr.vmem [resolvable:$false] %s1053_s25 }
  0x7f   : > { %s1055_s12 = scalar_lea.vmem %s1054_s25, 128  ;;  %p1056_p6 = scmp.lt.s32.totalorder %s281_s9, %s1054_s25 }
  0x80   : > { %p1051_p5 = pnand %p1049_p0, %p1035_p1  ;;  %p1057_p11 = scmp.lt.s32.totalorder %s1055_s12, %s1048_s4 }
  0x82   : > { %p1052_p4 = pneg %p1051_p5  ;;  %p1058_p3 = por %p1057_p11, %p1056_p6 }
  0x84   : > { %p1059_p7 = pnand %p1058_p3, %p1052_p4 }
  0x86   : > { %1062 = shalt.err (!%p1059_p7)
}
  0x87   : > { %s1814_s10 = sld [smem:[#allocation23_spill]]  ;;  %p151_p11 = scmp.eq.s32.totalorder %s1400_s13, 0 }
  0x88   : > { %839 = dma.hbm_to_vmem [thread:$0]  (!%p1549_p12), %s1545_s8, 64, %s281_s9, %s1455_s21  }
  0x89   : > { %s153_s1 = sadd.s32 1, %s1208_s17  ;;  %p160_p6 = scmp.ne.s32.totalorder %s1208_s17, %s1204_s16 }
  0x8a   : > { %p166_p1 = scmp.ne.s32.totalorder %s1204_s16, %s1200_s15  ;;  %p1815_p8 = scmp.eq.s32.totalorder %s1252_s28, 0 }
  0x8b   : > { %s1582_s14 = scalar_select %p151_p11, %s1208_s17, %s153_s1  }
  0x8c   : > { %p162_p10 = por %p160_p6, %p1815_p8  ;;  %p1816_p9 = scmp.eq.s32.totalorder %s1359_s29, 0 }
  0x8d   : > { %s287_s11 = sand.u32 1, %s1208_s17   ;;  %s794_s6 = sshll.u32 %s1814_s10, 4 }
  0x8e   : > { %p1588_p13 = por %p166_p1, %p1816_p9  ;;  %s1818_s22 = sld [smem:[#allocation32_spill]] }
  0x8f   : > { %s290_s15 = scalar_lea.vmem [#allocation11], %s287_s11  ;;  %p1820_p12 = scmp.lt.s32.totalorder %s1252_s28, 4 }
  0x90   : > { %s298_s21 = sshll.u32 %s290_s15, 4  ;;  %s288_s8 = scalar_lea.sflag [#allocation12], %s287_s11  ;;  %s1599_s21 = int_to_ptr.vmem [resolvable:$true] %s298_s21 }
  0x91   : > { %p1603_p2 = pnand %p1820_p12, %p162_p10 }
  0x93   : > { %p1066_p5 = pneg %p1603_p2 }
  0x94   : > { %s1819_s4 = smov %s1818_s22  ;;  %s1597_s27 = scalar_lea.hbm %s1818_s22, %s794_s6 }
  0x95   : > { %s1064_s9 = scalar_lea.hbm %s1597_s27, 16  ;;  %s1069_s12 = scalar_lea.hbm %s1819_s4, 32 }
  0x96   : > { %p1065_p0 = scmp.ne.s32.totalorder %s1597_s27, %s1064_s9  ;;  %p1070_p7 = scmp.lt.u32.totalorder %s1597_s27, %s1819_s4 }
  0x97   : > { %p1071_p11 = scmp.lt.u32.totalorder %s1069_s12, %s1064_s9  ;;  %p1073_p1 = scmp.lt.u32.totalorder %s1064_s9, %s1597_s27 }
  0x98   : > { %p1067_p4 = pnand %p1066_p5, %p1065_p0 }
  0x99   : > { %p1072_p6 = por %p1071_p11, %p1070_p7 }
  0x9a   : > { %p1068_p3 = pneg %p1067_p4 }
  0x9b   : > { %p1074_p8 = por %p1073_p1, %p1072_p6 }
  0x9d   : > { %p1075_p10 = pnand %p1074_p8, %p1068_p3 }
  0x9f   : > { %1078 = shalt.err (!%p1075_p10)
}
  0xa0   : > { %s1079_s11 = scalar_lea.vmem %s1599_s21, 16  ;;  %s1257_s6 = smov [#allocation11]  }
  0xa1   : > { %p1080_p9 = scmp.ne.s32.totalorder %s1599_s21, %s1079_s11  ;;  %s1084_s24 = sshll.u32 %s1257_s6, 4  ;;  %s1085_s24 = int_to_ptr.vmem [resolvable:$false] %s1084_s24 }
  0xa2   : > { %s1086_s3 = scalar_lea.vmem %s1085_s24, 32  ;;  %p1087_p4 = scmp.lt.s32.totalorder %s1599_s21, %s1085_s24 }
  0xa3   : > { %p1082_p12 = pnand %p1080_p9, %p1066_p5  ;;  %p1088_p7 = scmp.lt.s32.totalorder %s1086_s3, %s1079_s11 }
  0xa5   : > { %p1083_p0 = pneg %p1082_p12  ;;  %p1089_p11 = por %p1088_p7, %p1087_p4 }
  0xa7   : > { %p1090_p6 = pnand %p1089_p11, %p1083_p0 }
  0xa9   : > { %1093 = shalt.err (!%p1090_p6)
}
  0xaa   : > { %842 = dma.hbm_to_vmem [thread:$0]  (!%p1603_p2), %s1597_s27, 16, %s1599_s21, %s288_s8  }
  0xab   : > { %s1822_s22 = sld [smem:[#allocation30_spill]] }
  0xb1   : > { %p1823_p3 = scmp.ne.s32.totalorder %s1822_s22, 0 }
  0xb2   : > { %s1824_s15 = sld [smem:[#allocation20_spill]] (!%p1823_p3) }
  0xb3   : > { %307 = sbr.rel (%p1823_p3) target bundleno = 1018 (0x3fa), region = 36  ;;  %s1825_s9 = sld [smem:[#allocation26_spill]] (!%p1823_p3) }
  0xb8   : > { %s1635_s5 = sand.u32 (!%p1823_p3), 1, %s1824_s15  }
  0xb9   : > { %s1638_s25 = sshll.u32 (!%p1823_p3), %s1635_s5, 2  ;;  %s310_s12 = scalar_lea.sflag (!%p1823_p3), [#allocation6], %s1635_s5 }
  0xba   : > { %s313_s10 = scalar_lea.vmem [#allocation5], %s1638_s25  ;;  %p1826_p5 = scmp.ne.s32.totalorder %s1825_s9, 0 }
  0xbc   : > { %1179 = dma.done.wait (%p1826_p5), %s310_s12, 64  }
  0xbd   : > { %1181 = vsyncadd (%p1826_p5), %s310_s12, 4294967232  ;;  %s318_s27 = sand.u32 1, %s1359_s29   ;;  %s322_s13 = scalar_lea.vmem [#allocation8], %s1638_s25 }
  0xbe   : > { %s319_s21 = scalar_lea.sflag [#allocation9], %s318_s27 }
  0xbf   : > { %1183 = dma.done.wait (%p1826_p5), %s319_s21, 64  }
  0xc0   : > { %1185 = vsyncadd (%p1826_p5), %s319_s21, 4294967232  ;;  %s329_s8 = sand.u32 1, %s1216_s19   ;;  %p1827_p2 = scmp.ne.s32.totalorder %s1811_s7, 0 }
  0xc1   : > { %s1653_s1 = sshll.u32 %s329_s8, 2 }
  0xc2   : > { %s331_s11 = scalar_lea.vmem [#allocation10], %s1653_s1 }
  0xc3   : > { %1187 = dma.done.wait (%p1827_p2), %s319_s21, 64  }
  0xc4   : > { %1189 = vsyncadd (%p1827_p2), %s319_s21, 4294967232  ;;  %s336_s29 = sand.u32 1, %s1204_s16  }
  0xc5   : > { %s337_s6 = scalar_lea.sflag [#allocation12], %s336_s29  ;;  %s339_s24 = scalar_lea.vmem [#allocation11], %s336_s29 }
  0xc6   : > { %1191 = dma.done.wait (%p1588_p13), %s337_s6, 16  }
  0xc7   : > { %1193 = vsyncadd (%p1588_p13), %s337_s6, 4294967280  ;;  %vm383_vm0 = vcmask 7168   ;;  %v1258_v0 = vmov 0.0   ;;  %vm1259_vm1 = vmmov 0   ;;  %v389_v1 = vld [vmem:[%s322_s13] sm:$0xf]  ;;  %v467_v7 = vlaneseq }
  0xc8   : > { %385 = vst.msk [vmem:[#allocation3] sm:$0xff] %vm383_vm0, %v1258_v0  ;;  %810 = vmatprep.subr.mxu0 %v1258_v0  ;;  %812 = vmatprep.mubr.msk.f32.mxu0 %vm1259_vm1, %v1258_v0  ;;  %v387_v2 = vld [vmem:[%s313_s10] sm:$0xf]  ;;  %v390_v3 = vunpack.c.l.bf16 %v389_v1  ;;  %v1260_v5 = vmov 0   ;;  %v1261_v6 = vmov -inf   ;;  %vm474_vm4 = vcmask 64512  }
  0xc9   : > { %815 = vmatprep.subr.mxu1 %v1258_v0  ;;  %817 = vmatprep.mubr.msk.f32.mxu1 %vm1259_vm1, %v1258_v0  ;;  %v388_v4 = vunpack.c.l.bf16 %v387_v2  ;;  %384 = vst.msk [vmem:[#allocation2] sm:$0xff] %vm383_vm0, %v1261_v6  ;;  %v464_v8 = vld [vmem:[%s339_s24] sm:$0x1]  ;;  %v468_v9 = vshrl.u32 %v467_v7, 7  ;;  %s1828_s7 = sld [smem:[#allocation22_spill]]  ;;  %s1829_s18 = sld [smem:[#allocation21_spill]] }
  0xca   : > { %811 = vmatpush3.xpose.msra.mxu0 %v390_v3  ;;  %965 = vset.pattern.permute.xlu0 %v1260_v5  ;;  %vm465_vm2 = vcmp.gt.s32.totalorder %v464_v8, 0  ;;  %v391_v22 = vld [vmem:[%s331_s11] sm:$0xf]  ;;  %s1830_s22 = sld [smem:[#allocation28_spill]]  ;;  %s377_s12 = scalar_lea.vmem [#allocation13], %s1638_s25 }
  0xcb   : > { %966 = vset.pattern.permute.xlu1 %v1260_v5  ;;  %v469_v10 = vsub.s32 0, %v468_v9  ;;  %v466_v11 = vsel %vm465_vm2, 1, %v1260_v5  ;;  %v392_v23 = vunpack.c.l.bf16 %v391_v22  ;;  %s613_s10 = sshll.u32 %s377_s12, 4  ;;  %s1831_s13 = sld [smem:[#allocation33_spill]]  ;;  %s1682_s10 = int_to_ptr.vmem [resolvable:$true] %s613_s10 }
  0xcc   : > { %s596_s1 = scalar_lea.sflag [#allocation7], %s1635_s5  ;;  %s1094_s11 = scalar_lea.vmem %s1682_s10, 64 }
  0xcd   : > { %813 = vmatmul.mubr.f32.vlgmr.msra.gmra.mrb[0].mxu0 %v388_v4  ;;  %v470_v12 = vrot.slane %v466_v11, %v469_v10  ;;  %816 = vmatpush3.msra.mxu1 %v392_v23  ;;  %p1095_p13 = scmp.ne.s32.totalorder %s1682_s10, %s1094_s11  ;;  %s1262_s25 = smov [#allocation13]  }
  0xce   : > { %s1098_s29 = sshll.u32 %s1262_s25, 4  ;;  %s1099_s29 = int_to_ptr.vmem [resolvable:$false] %s1098_s29 }
  0xcf   : > { %vm471_vm3 = vcmp.eq.s32.totalorder %v470_v12, 1  ;;  %v490_v31 = vld [vmem:[#allocation3] sm:$0xff]  ;;  %s802_s3 = sshll.u32 %s1828_s7, 1  ;;  %s1100_s6 = scalar_lea.vmem %s1099_s29, 128 }
  0xd0   : > { %v473_v18 = vld [vmem:[#allocation2] sm:$0xff]  ;;  %s609_s15 = sadd.s32 %s1829_s18, %s802_s3  ;;  %p1832_p1 = scmp.ne.s32.totalorder %s1830_s22, 0 }
  0xd1   : > { %s803_s9 = sshll.u32 %s609_s15, 6  ;;  %p1101_p9 = scmp.lt.s32.totalorder %s1682_s10, %s1099_s29 }
  0xd2   : > { %s1680_s8 = scalar_lea.hbm %s1831_s13, %s803_s9  ;;  %p1096_p8 = pnand %p1095_p13, %p1832_p1 }
  0xd3   : > { %p1102_p12 = scmp.lt.s32.totalorder %s1100_s6, %s1094_s11 }
  0xd4   : > { %p1097_p10 = pneg %p1096_p8 }
  0xd5   : > { %p1103_p0 = por %p1102_p12, %p1101_p9 }
  0xd7   : > { %p1104_p4 = pnand %p1103_p0, %p1097_p10 }
 0x1a0   : > { %v459_v13 = vpop.f32.mrb[0].mxu0 }
 0x1a1   : > { %v463_v14 = vmul.f32 0.088388346, %v459_v13  ;;  %v814_v15 = vpop.f32.mrb[1].mxu0 }
 0x1a3   : > { %v472_v16 = vsel %vm471_vm3, %v463_v14, -1e+10 }
 0x1a4   : > { %v475_v17 = vsel %vm474_vm4, %v472_v16, -inf }
 0x1a5   : > { %476 = vmax.xlane.f32.xlu0 %v475_v17 }
 0x232   : > { %v477_v19 = vpop.xlane.xlu0 %476 }
 0x233   : > { %v478_v20 = vmax.f32 %v473_v18, %v477_v19 }
 0x235   : > { %v479_v21 = vsub.f32 %v473_v18, %v478_v20  ;;  %580 = vst.msk [vmem:[#allocation2] sm:$0xff] %vm383_vm0, %v478_v20  ;;  %484 = vperm.xlu0 %965, %v478_v20  }
 0x237   : > { %v480_v29 = vmul.f32 1.442695, %v479_v21 }
 0x2b4   : > { %v485_v24 = vpop.permute.xlu0 %484 }
 0x2b5   : > { %v487_v25 = vsub.f32 %v472_v16, %v485_v24 }
 0x2b7   : > { %v488_v26 = vmul.f32 1.442695, %v487_v25 }
 0x2b9   : > { %967 = vpow2.f32 %v488_v26 }
 0x2ba   : > { %969 = vpow2.f32 %v480_v29 }
 0x2c3   : > { %v968_v27 = vpop.eup %967 }
 0x2c4   : > { %818 = vmatmul.mubr.msk.f32.vlgmr.msra.gmra.mrb[0].mxu1 %vm474_vm4, %v968_v27  ;;  %v492_v28 = vsel %vm474_vm4, %v968_v27, 0.0  ;;  %v970_v30 = vpop.eup %969 }
 0x2c5   : > { %493 = vadd.xlane.f32.xlu1 %v492_v28  ;;  %v491_v32 = vmul.f32 %v970_v30, %v490_v31 }
 0x2d6   : > { %501 = vperm.xlu1 %966, %v970_v30  }
 0x352   : > { %v494_v33 = vpop.xlane.xlu1 %493 }
 0x353   : > { %v495_v34 = vadd.f32 %v494_v33, %v491_v32 }
 0x355   : > { %497 = vst.msk [vmem:[#allocation3] sm:$0xff] %vm383_vm0, %v495_v34 }
 0x356   : > { %v502_v39 = vpop.permute.xlu1 %501 }
 0x357   : > { %v504_v40 = vmul.f32 0.0, %v502_v39 }
 0x35c   : > { %v585_v35 = vld [vmem:[#allocation3] sm:$0xff] }
 0x35d   : > { %971 = vrcp.f32 %v585_v35 }
 0x367   : > { %v972_v36 = vpop.eup %971 }
 0x368   : > { %589 = vperm.xlu1 %966, %v972_v36  }
 0x397   : > { %v574_v37 = vpop.f32.mrb[0].mxu1 }
 0x398   : > { %v819_v38 = vpop.f32.mrb[1].mxu1  ;;  %v578_v41 = vadd.f32 %v574_v37, %v504_v40 }
 0x3e7   : > { %v590_v42 = vpop.permute.xlu1 %589 }
 0x3e8   : > { %v592_v43 = vmul.f32 %v590_v42, %v578_v41 }
 0x3ea   : > { %v593_v44 = vpack.c.bf16 %v592_v43, %v592_v43 }
 0x3ec   : > { %594 = vst [vmem:[%s377_s12] sm:$0xf] %v593_v44 }
 0x3ed   : > { %1107 = shalt.err (!%p1104_p4)
}
 0x3ee   : > { %s1108_s5 = scalar_lea.hbm %s1680_s8, 64  ;;  %s1112_s18 = scalar_lea.hbm %s1831_s13, 256 }
 0x3ef   : > { %p1109_p7 = scmp.ne.s32.totalorder %s1680_s8, %s1108_s5  ;;  %p1113_p3 = scmp.lt.u32.totalorder %s1680_s8, %s1831_s13 }
 0x3f0   : > { %p1114_p5 = scmp.lt.u32.totalorder %s1112_s18, %s1108_s5  ;;  %p1116_p13 = scmp.lt.u32.totalorder %s1108_s5, %s1680_s8 }
 0x3f1   : > { %p1110_p11 = pnand %p1109_p7, %p1832_p1 }
 0x3f2   : > { %p1115_p2 = por %p1114_p5, %p1113_p3 }
 0x3f3   : > { %p1111_p6 = pneg %p1110_p11 }
 0x3f4   : > { %p1117_p8 = por %p1116_p13, %p1115_p2 }
 0x3f6   : > { %p1118_p10 = pnand %p1117_p8, %p1111_p6 }
 0x3f8   : > { %1121 = shalt.err (!%p1118_p10)
}
 0x3f9   : > { %828 = dma.vmem_to_hbm [thread:$0]  (%p1832_p1), %s1682_s10, 64, %s1680_s8, %s596_s1  }
 0x3fa PF: > { %s1833_s9 = sld [smem:[#allocation19_spill]]  ;;  %s1834_s12 = sld [smem:[#allocation29_spill]] }
 0x3fb   : > { %p848_p9 = scmp.ge.s32.totalorder %s1252_s28, 2 }
 0x400   : > { %s625_s27 = sand.u32 1, %s1833_s9   ;;  %p1835_p12 = scmp.ne.s32.totalorder %s1834_s12, 0 }
 0x401   : > { %s626_s21 = scalar_lea.sflag [#allocation7], %s625_s27 }
 0x402   : > { %p844_p0 = pnand %p848_p9, %p1835_p12 }
 0x404   : > { %1195 = dma.done.wait (!%p844_p0), %s626_s21, 64  }
 0x405   : > { %1197 = vsyncadd (!%p844_p0), %s626_s21, 4294967232  ;;  %s26_s28 = sadd.s32 1, %s1252_s28   ;;  %s1837_s21 = sld [smem:[#allocation20_spill]] }
 0x406   : > { %p1711_p4 = scmp.ge.s32.totalorder %s26_s28, 6   ;;  %s1838_s10 = sld [smem:[#allocation27_spill]] }
 0x407   : > { %s1839_s25 = sld [smem:[#allocation23_spill]]  ;;  %s1840_s8 = sld [smem:[#allocation24_spill]] }
 0x408   : > { %s1841_s27 = sld [smem:[#allocation25_spill]]  ;;  %s1842_s15 = smov %s1204_s16 }
 0x409   : > { %s1843_s16 = smov %s1208_s17  ;;  %s1844_s17 = smov %s1582_s14 }
 0x40a   : > { %s1845_s18 = smov %s1216_s19  ;;  %s1846_s19 = smov %s1220_s20 }
 0x40b   : > { %s1847_s20 = smov %s1533_s30  ;;  %s1848_s22 = smov %s1232_s23 }
 0x40c   : > { %s1849_s23 = smov %s1838_s10  ;;  %s1850_s24 = smov %s1244_s26 }
 0x40d   : > { %s1851_s26 = smov %s1840_s8  ;;  %25 = sbr.rel (!%p1711_p4) target bundleno = 18 (0x12), region = 126 }
 0x414   :  { %631 = vsyncpa [#allocation6], 1 }
 0x415   :  { %633 = vsyncpa [#allocation6 + $0x1], 1 }
 0x416   :  { %634 = vsyncpa [#allocation9], 1 }
 0x417   :  { %636 = vsyncpa [#allocation9 + $0x1], 1 }
 0x418   :  { %637 = vsyncpa [#allocation12], 1 }
 0x419   :  { %639 = vsyncpa [#allocation12 + $0x1], 1 }
 0x41a   :  { %640 = vsyncpa [#allocation7], 1 }
 0x41b   :  { %642 = vsyncpa [#allocation7 + $0x1], 1 }

// kernel: seq2seq_forward.53
= control target key start
LH: loop header
LB: loop body
LE: loop exit
PB: predicated region body
PF: predicated region fallthrough
CT: control target
= control target key end

     0   :  { %s1949_s0 = inlined_call_operand.hbm [shape: bf16[2,8,256], index: 0, kind: input, shape index: {}]   ;;  %s1950_s1 = inlined_call_operand.hbm [shape: bf16[2,8,512], index: 1, kind: input, shape index: {}, may-alias: {1,2}]   ;;  %s1951_s2 = inlined_call_operand.hbm [shape: bf16[2,8,512], index: 2, kind: input, shape index: {}, may-alias: {1,2}]   ;;  %s1952_s3 = inlined_call_operand.hbm [shape: s32[2,1,8], index: 3, kind: input, shape index: {}]   ;;  %s1953_s4 = inlined_call_operand.hbm [shape: bf16[2,8,256], index: 4, kind: output, shape index: {0}]   ;;  %s1954_s5 = inlined_call_operand.hbm [shape: f32[2,2,8,8], index: 5, kind: output, shape index: {1}]  }
   0x1   :  { %1978 = sst [smem:[#allocation34_spill]] %s1950_s1 }
   0x2   :  { %1979 = sst [smem:[#allocation35_spill]] %s1952_s3 }
   0x3   :  { %1980 = sst [smem:[#allocation36_spill]] %s1953_s4 }
   0x4   :  { %1981 = sst [smem:[#allocation37_spill]] %s1954_s5 }
   0x5   :  { %11 = vsyncpa [#allocation6], 0 }
   0x6   :  { %13 = vsyncpa [#allocation6 + $0x1], 0 }
   0x7   :  { %14 = vsyncpa [#allocation9], 0 }
   0x8   :  { %16 = vsyncpa [#allocation9 + $0x1], 0 }
   0x9   :  { %17 = vsyncpa [#allocation12], 0 }
   0xa   :  { %19 = vsyncpa [#allocation12 + $0x1], 0 }
   0xb   :  { %20 = vsyncpa [#allocation7], 0 }
   0xc   :  { %22 = vsyncpa [#allocation7 + $0x1], 0 }
   0xd   :  { %23 = vsyncpa [#allocation15], 0 }
   0xe   :  { %25 = vsyncpa [#allocation15 + $0x1], 0  ;;  %s1444_s18 = smov 0   ;;  %s1446_s19 = smov 0  }
   0xf   :  { %s1448_s20 = smov 0   ;;  %s1450_s21 = smov 0  }
  0x10   :  { %s1452_s22 = smov 0   ;;  %s1454_s23 = smov 0  }
  0x11   :  { %s1456_s24 = smov 0   ;;  %s1458_s25 = smov 0  }
  0x12   :  { %s1460_s26 = smov 0   ;;  %s1462_s27 = smov 0  }
  0x13   :  { %s1464_s28 = smov 0   ;;  %s1466_s29 = smov 0  }
  0x14   :  { %s1468_s30 = smov 0   ;;  %s1470_s6 = smov 0  }
  0x15 LB: > { %1982 = sst [smem:[#allocation22_spill]] %s1374_s24  ;;  %s1515_s7 = sadd.s32 4294967295, %s1402_s6   ;;  %s1402_s6 = sphi %s1470_s6, %s31_s6   ;;  %s1398_s30 = sphi %s1468_s30, %s2052_s30   ;;  %s1394_s29 = sphi %s1466_s29, %s2051_s29   ;;  %s1390_s28 = sphi %s1464_s28, %s2037_s28   ;;  %s1386_s27 = sphi %s1462_s27, %s2050_s27   ;;  %s1382_s26 = sphi %s1460_s26, %s2049_s26   ;;  %s1378_s25 = sphi %s1458_s25, %s2048_s25   ;;  %s1374_s24 = sphi %s1456_s24, %s2047_s24   ;;  %s1370_s23 = sphi %s1454_s23, %s2046_s23   ;;  %s1366_s22 = sphi %s1452_s22, %s2045_s22   ;;  %s1362_s21 = sphi %s1450_s21, %s2044_s21   ;;  %s1358_s20 = sphi %s1448_s20, %s2043_s20   ;;  %s1354_s19 = sphi %s1446_s19, %s2042_s19   ;;  %s1350_s18 = sphi %s1444_s18, %s2041_s18  }
  0x16   : > { %1983 = sst [smem:[#allocation23_spill]] %s1378_s25  ;;  %s889_s8 = sadd.s32 4294967294, %s1402_s6  }
  0x17   : > { %1984 = sst [smem:[#allocation24_spill]] %s1386_s27  ;;  %s53_s9 = sadd.s32 1, %s1394_s29 }
  0x18   : > { %1985 = sst [smem:[#allocation25_spill]] %s1390_s28  ;;  %s57_s10 = sadd.s32 1, %s1398_s30 }
  0x19   : > { %1986 = sst [smem:[#allocation26_spill]] %s1398_s30  ;;  %p55_p0 = scmp.ge.s32.totalorder %s53_s9, 2 }
  0x1a   : > { %s68_s11 = sadd.s32 1, %s1382_s26  ;;  %p75_p1 = scmp.ne.s32.totalorder %s1382_s26, %s1378_s25 }
  0x1b   : > { %p1969_p2 = scmp.eq.s32.totalorder %s1402_s6, 0  ;;  %s2054_s9 = smov (%p55_p0, %s53_s9), 0 }
  0x1c   : > { %1987 = sst [smem:[#allocation27_spill]] %s2054_s9  ;;  %s2056_s10 = smov (!%p55_p0, %s57_s10), %s1398_s30 }
  0x1d   : > { %s64_s12 = ssub.s32 %s1394_s29, %s2054_s9  ;;  %p1534_p3 = por %p1969_p2, %p75_p1 }
  0x1e   : > { %p59_p4 = scmp.ge.s32.totalorder %s2056_s10, 2  ;;  %p81_p5 = scmp.ne.s32.totalorder %s1378_s25, %s1374_s24 }
  0x1f   : > { %p1968_p6 = scmp.eq.s32.totalorder %s1515_s7, 0  ;;  %s121_s14 = sadd.s32 2, %s1394_s29 }
  0x20   : > { %s2058_s10 = smov (%p59_p4, %s2056_s10), 0  ;;  %s122_s16 = sadd.s32 2, %s2054_s9 }
  0x21   : > { %1989 = sst [smem:[#allocation28_spill]] %s2058_s10  ;;  %p1549_p7 = por %p1968_p6, %p81_p5 }
  0x22   : > { %s1556_s17 = ssub.s32 %s1398_s30, %s2058_s10  ;;  %s1558_s4 = ssub.s32 %s121_s14, %s122_s16 }
  0x23   : > { %s1990_s15 = scalar_select %p1549_p7, 1, 0 }
  0x24   : > { %s65_s5 = sor.u32 %s64_s12, %s1556_s17  ;;  %p199_p9 = scmp.eq.s32.totalorder %s1515_s7, 3 }
  0x25   : > { %1991 = sst [smem:[#allocation29_spill]] %s1990_s15  ;;  %p66_p8 = scmp.eq.s32.totalorder %s65_s5, 0 }
  0x26   : > { %p205_p10 = scmp.eq.s32.totalorder %s889_s8, 3  ;;  %p1570_p11 = por %p199_p9, %p75_p1 }
  0x27   : > { %s1565_s28 = scalar_select %p66_p8, %s1382_s26, %s68_s11  }
  0x28   : > { %s1993_s15 = scalar_select %p1570_p11, 1, 0 }
  0x29   : > { %1992 = sst [smem:[#allocation30_spill]] %s1565_s28  ;;  %p1577_p12 = por %p205_p10, %p81_p5 }
  0x2a   : > { %1994 = sst [smem:[#allocation31_spill]] %s1993_s15  ;;  %p1967_p13 = scmp.lt.s32.totalorder %s1402_s6, 4 }
  0x2b   : > { %s1995_s10 = scalar_select %p1577_p12, 1, 0 }
  0x2c   : > { %s1961_s14 = sand.u32 1, %s1382_s26   ;;  %s277_s5 = sand.u32 1, %s1402_s6  }
  0x2d   : > { %1996 = sst [smem:[#allocation32_spill]] %s1995_s10  ;;  %s1585_s12 = sshll.u32 %s1961_s14, 2 }
  0x2e   : > { %p1592_p0 = pnand %p1967_p13, %p1534_p3  ;;  %s896_s11 = sshll.u32 %s1398_s30, 2 }
  0x2f   : > { %s1598_s16 = sadd.s32 %s1394_s29, %s896_s11  ;;  %s281_s9 = scalar_lea.vmem [#allocation8], %s1585_s12 }
  0x30   : > { %s1964_s27 = sshll.u32 %s1598_s16, 6  ;;  %s292_s28 = sshll.u32 %s281_s9, 4  ;;  %s1609_s28 = int_to_ptr.vmem [resolvable:$true] %s292_s28 }
  0x31   : > { %s1998_s1 = sld [smem:[#allocation34_spill]]  ;;  %s1611_s24 = scalar_lea.sflag [#allocation9], %s277_s5 }
  0x32   : > { %p1093_p3 = pneg %p1592_p0 }
  0x37   : > { %s1607_s13 = scalar_lea.hbm %s1998_s1, %s1964_s27  ;;  %s1096_s14 = scalar_lea.hbm %s1998_s1, 512 }
  0x38   : > { %s1091_s11 = scalar_lea.hbm %s1607_s13, 64  ;;  %p1097_p8 = scmp.lt.u32.totalorder %s1607_s13, %s1998_s1 }
  0x39   : > { %p1092_p1 = scmp.ne.s32.totalorder %s1607_s13, %s1091_s11  ;;  %p1098_p9 = scmp.lt.u32.totalorder %s1096_s14, %s1091_s11 }
  0x3a   : > { %p1100_p13 = scmp.lt.u32.totalorder %s1091_s11, %s1607_s13 }
  0x3b   : > { %p1094_p4 = pnand %p1093_p3, %p1092_p1  ;;  %p1099_p10 = por %p1098_p9, %p1097_p8 }
  0x3d   : > { %p1095_p5 = pneg %p1094_p4  ;;  %p1101_p6 = por %p1100_p13, %p1099_p10 }
  0x3f   : > { %p1102_p2 = pnand %p1101_p6, %p1095_p5 }
  0x41   : > { %1105 = shalt.err (!%p1102_p2)
}
  0x42   : > { %s1106_s5 = scalar_lea.vmem %s1609_s28, 64  ;;  %s1404_s9 = smov [#allocation8]  }
  0x43   : > { %p1107_p1 = scmp.ne.s32.totalorder %s1609_s28, %s1106_s5  ;;  %s1111_s10 = sshll.u32 %s1404_s9, 4  ;;  %s1112_s10 = int_to_ptr.vmem [resolvable:$false] %s1111_s10 }
  0x44   : > { %s1113_s27 = scalar_lea.vmem %s1112_s10, 128  ;;  %p1114_p11 = scmp.lt.s32.totalorder %s1609_s28, %s1112_s10 }
  0x45   : > { %p1109_p4 = pnand %p1107_p1, %p1093_p3  ;;  %p1115_p8 = scmp.lt.s32.totalorder %s1113_s27, %s1106_s5 }
  0x47   : > { %p1110_p12 = pneg %p1109_p4  ;;  %p1116_p9 = por %p1115_p8, %p1114_p11 }
  0x49   : > { %p1117_p13 = pnand %p1116_p9, %p1110_p12 }
  0x4b   : > { %1120 = shalt.err (!%p1117_p13)
}
  0x4c   : > { %949 = dma.hbm_to_vmem [thread:$0]  (!%p1592_p0), %s1607_s13, 64, %s1609_s28, %s1611_s24  }
  0x4d   : > { %s1999_s15 = sshll.u32 %s1598_s16, 6  ;;  %p902_p2 = scmp.ge.s32.totalorder %s1402_s6, 1 }
  0x4e   : > { %s1644_s5 = scalar_lea.hbm %s1951_s2, %s1999_s15  ;;  %p338_p6 = scmp.lt.s32.totalorder %s1402_s6, 5 }
  0x4f   : > { %s893_s10 = sshll.u32 %s1398_s30, 1  ;;  %s259_s27 = scalar_lea.vmem [#allocation5], %s1585_s12 }
  0x50   : > { %p1648_p11 = pnand %p902_p2, %p338_p6  ;;  %s270_s1 = sshll.u32 %s259_s27, 4  ;;  %s1655_s1 = int_to_ptr.vmem [resolvable:$true] %s270_s1 }
  0x51   : > { %s266_s25 = sadd.s32 %s1394_s29, %s893_s10  ;;  %s2002_s11 = sand.u32 1, %s1382_s26  }
  0x52   : > { %s2000_s9 = scalar_select %p1648_p11, 1, 0 }
  0x53   : > { %s894_s3 = sshll.u32 %s266_s25, 6  ;;  %s256_s15 = scalar_lea.sflag [#allocation6], %s2002_s11 }
  0x54   : > { %2001 = sst [smem:[#allocation33_spill]] %s2000_s9  ;;  %s268_s13 = scalar_lea.hbm %s1949_s0, %s894_s3 }
  0x55   : > { %s1121_s14 = scalar_lea.hbm %s268_s13, 64  ;;  %s1126_s12 = scalar_lea.hbm %s1949_s0, 256 }
  0x56   : > { %p1122_p12 = scmp.ne.s32.totalorder %s268_s13, %s1121_s14  ;;  %p1127_p1 = scmp.lt.u32.totalorder %s268_s13, %s1949_s0 }
  0x57   : > { %p1128_p4 = scmp.lt.u32.totalorder %s1126_s12, %s1121_s14  ;;  %p1130_p9 = scmp.lt.u32.totalorder %s1121_s14, %s268_s13 }
  0x58   : > { %p1124_p5 = pnand %p1122_p12, %p1093_p3 }
  0x59   : > { %p1129_p8 = por %p1128_p4, %p1127_p1 }
  0x5a   : > { %p1125_p10 = pneg %p1124_p5 }
  0x5b   : > { %p1131_p13 = por %p1130_p9, %p1129_p8 }
  0x5d   : > { %p1132_p2 = pnand %p1131_p13, %p1125_p10 }
  0x5f   : > { %1135 = shalt.err (!%p1132_p2)
}
  0x60   : > { %s1136_s3 = scalar_lea.vmem %s1655_s1, 64  ;;  %s1405_s25 = smov [#allocation5]  }
  0x61   : > { %p1137_p6 = scmp.ne.s32.totalorder %s1655_s1, %s1136_s3  ;;  %s1141_s30 = sshll.u32 %s1405_s25, 4  ;;  %s1142_s30 = int_to_ptr.vmem [resolvable:$false] %s1141_s30 }
  0x62   : > { %s1143_s9 = scalar_lea.vmem %s1142_s30, 128  ;;  %p1144_p7 = scmp.lt.s32.totalorder %s1655_s1, %s1142_s30 }
  0x63   : > { %p1139_p12 = pnand %p1137_p6, %p1093_p3  ;;  %p1145_p1 = scmp.lt.s32.totalorder %s1143_s9, %s1136_s3 }
  0x65   : > { %p1140_p5 = pneg %p1139_p12  ;;  %p1146_p4 = por %p1145_p1, %p1144_p7 }
  0x67   : > { %p1147_p8 = pnand %p1146_p4, %p1140_p5 }
  0x69   : > { %1150 = shalt.err (!%p1147_p8)
}
  0x6a   : > { %946 = dma.hbm_to_vmem [thread:$0]  (!%p1592_p0), %s268_s13, 64, %s1655_s1, %s256_s15  }
  0x6b   : > { %s2003_s28 = sor.u32 %s1558_s4, %s1556_s17  ;;  %s130_s16 = sadd.s32 1, %s1370_s23 }
  0x6c   : > { %p128_p7 = scmp.eq.s32.totalorder %s2003_s28, 0  ;;  %p137_p3 = scmp.ne.s32.totalorder %s1370_s23, %s1366_s22 }
  0x6d   : > { %p143_p10 = scmp.ne.s32.totalorder %s1366_s22, %s1362_s21  ;;  %p2004_p9 = scmp.eq.s32.totalorder %s1402_s6, 0 }
  0x6e   : > { %s1689_s8 = scalar_select %p128_p7, %s1370_s23, %s130_s16  }
  0x6f   : > { %p139_p13 = por %p137_p3, %p2004_p9  ;;  %p2005_p2 = scmp.eq.s32.totalorder %s1515_s7, 0 }
  0x70   : > { %s301_s14 = sand.u32 1, %s1370_s23   ;;  %s1701_s12 = scalar_lea.hbm %s1644_s5, 128 }
  0x71   : > { %p1695_p6 = por %p143_p10, %p2005_p2  ;;  %s898_s1 = sshll.u32 %s301_s14, 2 }
  0x72   : > { %p2007_p0 = scmp.lt.s32.totalorder %s1402_s6, 4  ;;  %s303_s21 = scalar_lea.vmem [#allocation10], %s898_s1 }
  0x73   : > { %s2006_s11 = scalar_select %p1695_p6, 1, 0 }
  0x74   : > { %p1705_p12 = pnand %p2007_p0, %p139_p13  ;;  %s315_s13 = sshll.u32 %s303_s21, 4  ;;  %s316_s13 = int_to_ptr.vmem [resolvable:$true] %s315_s13 }
  0x75   : > { %s1181_s15 = scalar_lea.hbm %s1644_s5, 192  ;;  %s1156_s3 = scalar_lea.hbm %s1951_s2, 512 }
  0x76   : > { %p1152_p5 = scmp.ne.s32.totalorder %s1701_s12, %s1181_s15  ;;  %p1153_p1 = pneg %p1705_p12 }
  0x77   : > { %p1157_p7 = scmp.lt.u32.totalorder %s1701_s12, %s1951_s2  ;;  %p1158_p3 = scmp.lt.u32.totalorder %s1156_s3, %s1181_s15 }
  0x78   : > { %p1154_p4 = pnand %p1153_p1, %p1152_p5  ;;  %p1160_p9 = scmp.lt.u32.totalorder %s1181_s15, %s1701_s12 }
  0x79   : > { %p1159_p10 = por %p1158_p3, %p1157_p7 }
  0x7a   : > { %p1155_p8 = pneg %p1154_p4 }
  0x7b   : > { %p1161_p13 = por %p1160_p9, %p1159_p10 }
  0x7d   : > { %p1162_p2 = pnand %p1161_p13, %p1155_p8 }
  0x7f   : > { %1165 = shalt.err (!%p1162_p2)
}
  0x80   : > { %s1166_s5 = scalar_lea.vmem %s316_s13, 64  ;;  %s1406_s9 = smov [#allocation10]  }
  0x81   : > { %p1167_p0 = scmp.ne.s32.totalorder %s316_s13, %s1166_s5  ;;  %s1171_s28 = sshll.u32 %s1406_s9, 4  ;;  %s1172_s28 = int_to_ptr.vmem [resolvable:$false] %s1171_s28 }
  0x82   : > { %s1173_s16 = scalar_lea.vmem %s1172_s28, 128  ;;  %p1174_p6 = scmp.lt.s32.totalorder %s316_s13, %s1172_s28 }
  0x83   : > { %p1169_p5 = pnand %p1167_p0, %p1153_p1  ;;  %p1175_p11 = scmp.lt.s32.totalorder %s1173_s16, %s1166_s5 }
  0x85   : > { %p1170_p4 = pneg %p1169_p5  ;;  %p1176_p3 = por %p1175_p11, %p1174_p6 }
  0x87   : > { %p1177_p7 = pnand %p1176_p3, %p1170_p4 }
  0x89   : > { %1180 = shalt.err (!%p1177_p7)
}
  0x8a   : > { %s2009_s14 = sld [smem:[#allocation26_spill]]  ;;  %p156_p11 = scmp.eq.s32.totalorder %s1556_s17, 0 }
  0x8b   : > { %952 = dma.hbm_to_vmem [thread:$0]  (!%p1705_p12), %s1701_s12, 64, %s316_s13, %s1611_s24  }
  0x8c   : > { %s158_s1 = sadd.s32 1, %s1358_s20  ;;  %p165_p6 = scmp.ne.s32.totalorder %s1358_s20, %s1354_s19 }
  0x8d   : > { %p171_p1 = scmp.ne.s32.totalorder %s1354_s19, %s1350_s18  ;;  %p2010_p8 = scmp.eq.s32.totalorder %s1402_s6, 0 }
  0x8e   : > { %s1738_s4 = scalar_select %p156_p11, %s1358_s20, %s158_s1  }
  0x8f   : > { %p167_p10 = por %p165_p6, %p2010_p8  ;;  %p2011_p9 = scmp.eq.s32.totalorder %s1515_s7, 0 }
  0x90   : > { %s322_s15 = sand.u32 1, %s1358_s20   ;;  %s901_s10 = sshll.u32 %s2009_s14, 4 }
  0x91   : > { %p1744_p13 = por %p171_p1, %p2011_p9  ;;  %s2013_s25 = sld [smem:[#allocation35_spill]] }
  0x92   : > { %s325_s18 = scalar_lea.vmem [#allocation11], %s322_s15  ;;  %p2015_p12 = scmp.lt.s32.totalorder %s1402_s6, 4 }
  0x93   : > { %s333_s24 = sshll.u32 %s325_s18, 4  ;;  %s323_s12 = scalar_lea.sflag [#allocation12], %s322_s15  ;;  %s1755_s24 = int_to_ptr.vmem [resolvable:$true] %s333_s24 }
  0x94   : > { %p1759_p2 = pnand %p2015_p12, %p167_p10 }
  0x96   : > { %p1184_p5 = pneg %p1759_p2 }
  0x97   : > { %s2014_s5 = smov %s2013_s25  ;;  %s1753_s30 = scalar_lea.hbm %s2013_s25, %s901_s10 }
  0x98   : > { %s1182_s13 = scalar_lea.hbm %s1753_s30, 16  ;;  %s1187_s16 = scalar_lea.hbm %s2014_s5, 32 }
  0x99   : > { %p1183_p0 = scmp.ne.s32.totalorder %s1753_s30, %s1182_s13  ;;  %p1188_p7 = scmp.lt.u32.totalorder %s1753_s30, %s2014_s5 }
  0x9a   : > { %p1189_p11 = scmp.lt.u32.totalorder %s1187_s16, %s1182_s13  ;;  %p1191_p1 = scmp.lt.u32.totalorder %s1182_s13, %s1753_s30 }
  0x9b   : > { %p1185_p4 = pnand %p1184_p5, %p1183_p0 }
  0x9c   : > { %p1190_p6 = por %p1189_p11, %p1188_p7 }
  0x9d   : > { %p1186_p3 = pneg %p1185_p4 }
  0x9e   : > { %p1192_p8 = por %p1191_p1, %p1190_p6 }
  0xa0   : > { %p1193_p10 = pnand %p1192_p8, %p1186_p3 }
  0xa2   : > { %1196 = shalt.err (!%p1193_p10)
}
  0xa3   : > { %s1197_s15 = scalar_lea.vmem %s1755_s24, 16  ;;  %s1407_s10 = smov [#allocation11]  }
  0xa4   : > { %p1198_p9 = scmp.ne.s32.totalorder %s1755_s24, %s1197_s15  ;;  %s1202_s27 = sshll.u32 %s1407_s10, 4  ;;  %s1203_s27 = int_to_ptr.vmem [resolvable:$false] %s1202_s27 }
  0xa5   : > { %s1204_s3 = scalar_lea.vmem %s1203_s27, 32  ;;  %p1205_p4 = scmp.lt.s32.totalorder %s1755_s24, %s1203_s27 }
  0xa6   : > { %p1200_p12 = pnand %p1198_p9, %p1184_p5  ;;  %p1206_p7 = scmp.lt.s32.totalorder %s1204_s3, %s1197_s15 }
  0xa8   : > { %p1201_p0 = pneg %p1200_p12  ;;  %p1207_p11 = por %p1206_p7, %p1205_p4 }
  0xaa   : > { %p1208_p6 = pnand %p1207_p11, %p1201_p0 }
  0xac   : > { %1211 = shalt.err (!%p1208_p6)
}
  0xad   : > { %955 = dma.hbm_to_vmem [thread:$0]  (!%p1759_p2), %s1753_s30, 16, %s1755_s24, %s323_s12  }
  0xae   : > { %s2017_s25 = sld [smem:[#allocation33_spill]] }
  0xb4   : > { %p2018_p3 = scmp.ne.s32.totalorder %s2017_s25, 0 }
  0xb5   : > { %s2019_s18 = sld [smem:[#allocation23_spill]] (!%p2018_p3) }
  0xb6   : > { %342 = sbr.rel (%p2018_p3) target bundleno = 1042 (0x412), region = 36  ;;  %s2020_s13 = sld [smem:[#allocation29_spill]] (!%p2018_p3) }
  0xbb   : > { %s1791_s9 = sand.u32 (!%p2018_p3), 1, %s2019_s18  }
  0xbc   : > { %s1794_s28 = sshll.u32 (!%p2018_p3), %s1791_s9, 2  ;;  %s345_s16 = scalar_lea.sflag (!%p2018_p3), [#allocation6], %s1791_s9 }
  0xbd   : > { %s348_s14 = scalar_lea.vmem [#allocation5], %s1794_s28  ;;  %p2021_p5 = scmp.ne.s32.totalorder %s2020_s13, 0 }
  0xbf   : > { %1325 = dma.done.wait (%p2021_p5), %s345_s16, 64  }
  0xc0   : > { %1327 = vsyncadd (%p2021_p5), %s345_s16, 4294967232  ;;  %s353_s30 = sand.u32 1, %s1515_s7   ;;  %s357_s17 = scalar_lea.vmem [#allocation8], %s1794_s28 }
  0xc1   : > { %s354_s24 = scalar_lea.sflag [#allocation9], %s353_s30 }
  0xc2   : > { %1329 = dma.done.wait (%p2021_p5), %s354_s24, 64  }
  0xc3   : > { %1331 = vsyncadd (%p2021_p5), %s354_s24, 4294967232  ;;  %s364_s12 = sand.u32 1, %s1366_s22   ;;  %p2022_p2 = scmp.ne.s32.totalorder %s2006_s11, 0 }
  0xc4   : > { %s1809_s1 = sshll.u32 %s364_s12, 2 }
  0xc5   : > { %s366_s15 = scalar_lea.vmem [#allocation10], %s1809_s1 }
  0xc6   : > { %1333 = dma.done.wait (%p2022_p2), %s354_s24, 64  }
  0xc7   : > { %1335 = vsyncadd (%p2022_p2), %s354_s24, 4294967232  ;;  %s371_s7 = sand.u32 1, %s1354_s19  }
  0xc8   : > { %s372_s10 = scalar_lea.sflag [#allocation12], %s371_s7  ;;  %s374_s27 = scalar_lea.vmem [#allocation11], %s371_s7 }
  0xc9   : > { %1337 = dma.done.wait (%p1744_p13), %s372_s10, 16  }
  0xca   : > { %1339 = vsyncadd (%p1744_p13), %s372_s10, 4294967280  ;;  %vm425_vm0 = vcmask 7168   ;;  %v1408_v0 = vmov 0.0   ;;  %vm1409_vm1 = vmmov 0   ;;  %v431_v1 = vld [vmem:[%s357_s17] sm:$0xf]  ;;  %v509_v7 = vlaneseq }
  0xcb   : > { %427 = vst.msk [vmem:[#allocation3] sm:$0xff] %vm425_vm0, %v1408_v0  ;;  %921 = vmatprep.subr.mxu0 %v1408_v0  ;;  %923 = vmatprep.mubr.msk.f32.mxu0 %vm1409_vm1, %v1408_v0  ;;  %v429_v2 = vld [vmem:[%s348_s14] sm:$0xf]  ;;  %v432_v3 = vunpack.c.l.bf16 %v431_v1  ;;  %v1410_v5 = vmov 0   ;;  %v1411_v6 = vmov -inf   ;;  %vm516_vm4 = vcmask 64512  }
  0xcc   : > { %926 = vmatprep.subr.mxu1 %v1408_v0  ;;  %928 = vmatprep.mubr.msk.f32.mxu1 %vm1409_vm1, %v1408_v0  ;;  %v430_v4 = vunpack.c.l.bf16 %v429_v2  ;;  %426 = vst.msk [vmem:[#allocation2] sm:$0xff] %vm425_vm0, %v1411_v6  ;;  %v506_v8 = vld [vmem:[%s374_s27] sm:$0x1]  ;;  %v510_v9 = vshrl.u32 %v509_v7, 7  ;;  %s2023_s11 = sld [smem:[#allocation25_spill]]  ;;  %s2024_s21 = sld [smem:[#allocation24_spill]] }
  0xcd   : > { %922 = vmatpush3.xpose.msra.mxu0 %v432_v3  ;;  %1081 = vset.pattern.permute.xlu0 %v1410_v5  ;;  %vm507_vm2 = vcmp.gt.s32.totalorder %v506_v8, 0  ;;  %v433_v22 = vld [vmem:[%s366_s15] sm:$0xf]  ;;  %s907_s25 = sshll.u32 %s1791_s9, 3  ;;  %s2025_s24 = sld [smem:[#allocation31_spill]] }
  0xce   : > { %1082 = vset.pattern.permute.xlu1 %v1410_v5  ;;  %v511_v10 = vsub.s32 0, %v510_v9  ;;  %v508_v11 = vsel %vm507_vm2, 1, %v1410_v5  ;;  %v434_v23 = vunpack.c.l.bf16 %v433_v22  ;;  %s419_s16 = scalar_lea.vmem [#allocation14], %s907_s25  ;;  %s1977_s17 = scalar_lea.vmem [#allocation13], %s1794_s28 }
  0xcf   : > { %s685_s14 = sshll.u32 %s419_s16, 4  ;;  %s669_s12 = sshll.u32 %s1977_s17, 4  ;;  %s1841_s14 = int_to_ptr.vmem [resolvable:$true] %s685_s14  ;;  %s1848_s12 = int_to_ptr.vmem [resolvable:$true] %s669_s12 }
  0xd0   : > { %924 = vmatmul.mubr.f32.vlgmr.msra.gmra.mrb[0].mxu0 %v430_v4  ;;  %v512_v12 = vrot.slane %v508_v11, %v511_v10  ;;  %927 = vmatpush3.msra.mxu1 %v434_v23  ;;  %s2026_s7 = sld [smem:[#allocation37_spill]]  ;;  %s1212_s17 = scalar_lea.vmem %s1841_s14, 128 }
  0xd1   : > { %p1213_p13 = scmp.ne.s32.totalorder %s1841_s14, %s1212_s17 }
  0xd2   : > { %vm513_vm3 = vcmp.eq.s32.totalorder %v512_v12, 1  ;;  %v532_v31 = vld [vmem:[#allocation3] sm:$0xff]  ;;  %s911_s3 = sshll.u32 %s2023_s11, 1 }
  0xd3   : > { %v515_v18 = vld [vmem:[#allocation2] sm:$0xff]  ;;  %s665_s18 = sadd.s32 %s2024_s21, %s911_s3  ;;  %s2027_s21 = sld [smem:[#allocation36_spill]] }
  0xd4   : > { %s914_s13 = sshll.u32 %s665_s18, 7  ;;  %s912_s30 = sshll.u32 %s665_s18, 6 }
  0xd5   : > { %s652_s18 = scalar_lea.sflag [#allocation15], %s1791_s9  ;;  %p2029_p1 = scmp.ne.s32.totalorder %s2025_s24, 0 }
  0xd6   : > { %s1839_s10 = scalar_lea.hbm %s2026_s7, %s914_s13  ;;  %s1412_s13 = smov [#allocation14]  }
  0xd7   : > { %p1214_p8 = pnand %p1213_p13, %p2029_p1  ;;  %s1216_s1 = sshll.u32 %s1412_s13, 4  ;;  %s1217_s1 = int_to_ptr.vmem [resolvable:$false] %s1216_s1 }
  0xd8   : > { %s1218_s15 = scalar_lea.vmem %s1217_s1, 256  ;;  %p1219_p9 = scmp.lt.s32.totalorder %s1841_s14, %s1217_s1 }
  0xd9   : > { %s2028_s3 = smov %s2027_s21  ;;  %s1846_s25 = scalar_lea.hbm %s2027_s21, %s912_s30 }
  0xda   : > { %p1215_p10 = pneg %p1214_p8  ;;  %p1220_p12 = scmp.lt.s32.totalorder %s1218_s15, %s1212_s17 }
  0xdc   : > { %p1221_p0 = por %p1220_p12, %p1219_p9 }
  0xde   : > { %p1222_p4 = pnand %p1221_p0, %p1215_p10 }
 0x1a3   : > { %v501_v13 = vpop.f32.mrb[0].mxu0 }
 0x1a4   : > { %v505_v14 = vmul.f32 0.088388346, %v501_v13  ;;  %v925_v15 = vpop.f32.mrb[1].mxu0 }
 0x1a6   : > { %v514_v16 = vsel %vm513_vm3, %v505_v14, -1e+10 }
 0x1a7   : > { %v517_v17 = vsel %vm516_vm4, %v514_v16, -inf }
 0x1a8   : > { %518 = vmax.xlane.f32.xlu0 %v517_v17 }
 0x235   : > { %v519_v19 = vpop.xlane.xlu0 %518 }
 0x236   : > { %v520_v20 = vmax.f32 %v515_v18, %v519_v19 }
 0x238   : > { %v521_v21 = vsub.f32 %v515_v18, %v520_v20  ;;  %622 = vst.msk [vmem:[#allocation2] sm:$0xff] %vm425_vm0, %v520_v20  ;;  %526 = vperm.xlu0 %1081, %v520_v20  }
 0x23a   : > { %v522_v29 = vmul.f32 1.442695, %v521_v21 }
 0x2b7   : > { %v527_v24 = vpop.permute.xlu0 %526 }
 0x2b8   : > { %v529_v25 = vsub.f32 %v514_v16, %v527_v24 }
 0x2ba   : > { %v530_v26 = vmul.f32 1.442695, %v529_v25 }
 0x2bc   : > { %1083 = vpow2.f32 %v530_v26 }
 0x2bd   : > { %1085 = vpow2.f32 %v522_v29 }
 0x2c6   : > { %v1084_v27 = vpop.eup %1083 }
 0x2c7   : > { %929 = vmatmul.mubr.msk.f32.vlgmr.msra.gmra.mrb[0].mxu1 %vm516_vm4, %v1084_v27  ;;  %v534_v28 = vsel %vm516_vm4, %v1084_v27, 0.0  ;;  %v1086_v30 = vpop.eup %1085 }
 0x2c8   : > { %535 = vadd.xlane.f32.xlu1 %v534_v28  ;;  %v533_v32 = vmul.f32 %v1086_v30, %v532_v31 }
 0x355   : > { %v536_v33 = vpop.xlane.xlu1 %535 }
 0x356   : > { %v537_v34 = vadd.f32 %v536_v33, %v533_v32 }
 0x358   : > { %539 = vst.msk [vmem:[#allocation3] sm:$0xff] %vm425_vm0, %v537_v34 }
 0x35f   : > { %v637_v35 = vld [vmem:[#allocation3] sm:$0xff] }
 0x360   : > { %640 = vperm.xlu1 %1082, %v637_v35   ;;  %1087 = vrcp.f32 %v637_v35 }
 0x364   : > { %543 = vperm.xlu1 %1082, %v1086_v30  }
 0x36a   : > { %v1088_v36 = vpop.eup %1087 }
 0x36b   : > { %631 = vperm.xlu1 %1082, %v1088_v36  }
 0x39a   : > { %v616_v37 = vpop.f32.mrb[0].mxu1 }
 0x39b   : > { %v930_v38 = vpop.f32.mrb[1].mxu1 }
 0x3df   : > { %v641_v39 = vpop.permute.xlu1 %640 }
 0x3e0   : > { %1089 = vrcp.f32 %v641_v39 }
 0x3e3   : > { %v544_v40 = vpop.permute.xlu1 %543 }
 0x3e4   : > { %v546_v41 = vmul.f32 0.0, %v544_v40 }
 0x3e6   : > { %v620_v42 = vadd.f32 %v616_v37, %v546_v41 }
 0x3ea   : > { %v1090_v43 = vpop.eup %1089  ;;  %v632_v44 = vpop.permute.xlu1 %631 }
 0x3eb   : > { %v644_v45 = vmul.f32 %v1090_v43, %v1084_v27  ;;  %v634_v46 = vmul.f32 %v632_v44, %v620_v42 }
 0x3ed   : > { %v635_v47 = vpack.c.bf16 %v634_v46, %v634_v46  ;;  %645 = vst.msk [vmem:[%s419_s16] sm:$0xff] %vm516_vm4, %v644_v45 }
 0x3ee   : > { %1225 = shalt.err (!%p1222_p4)
}
 0x3ef   : > { %s1226_s16 = scalar_lea.hbm %s1839_s10, 128  ;;  %s1230_s11 = scalar_lea.hbm %s2026_s7, 512 }
 0x3f0   : > { %p1227_p7 = scmp.ne.s32.totalorder %s1839_s10, %s1226_s16  ;;  %p1231_p3 = scmp.lt.u32.totalorder %s1839_s10, %s2026_s7 }
 0x3f1   : > { %p1232_p5 = scmp.lt.u32.totalorder %s1230_s11, %s1226_s16  ;;  %p1234_p13 = scmp.lt.u32.totalorder %s1226_s16, %s1839_s10 }
 0x3f2   : > { %p1228_p11 = pnand %p1227_p7, %p2029_p1 }
 0x3f3   : > { %p1233_p2 = por %p1232_p5, %p1231_p3 }
 0x3f4   : > { %p1229_p6 = pneg %p1228_p11 }
 0x3f5   : > { %p1235_p8 = por %p1234_p13, %p1233_p2 }
 0x3f7   : > { %p1236_p10 = pnand %p1235_p8, %p1229_p6 }
 0x3f9   : > { %1239 = shalt.err (!%p1236_p10)
}
 0x3fa   : > { %940 = dma.vmem_to_hbm [thread:$0]  (%p2029_p1), %s1841_s14, 128, %s1839_s10, %s652_s18  }
 0x3fb   : > { %s2030_s17 = scalar_lea.vmem [#allocation13], %s1794_s28  ;;  %s647_s1 = scalar_lea.sflag [#allocation7], %s1791_s9 }
 0x3fc   : > { %636 = vst [vmem:[%s2030_s17] sm:$0xf] %v635_v47  ;;  %s1240_s15 = scalar_lea.vmem %s1848_s12, 64  ;;  %s1413_s16 = smov [#allocation13]  }
 0x3fd   : > { %p1241_p9 = scmp.ne.s32.totalorder %s1848_s12, %s1240_s15  ;;  %s1244_s30 = sshll.u32 %s1413_s16, 4  ;;  %s1245_s30 = int_to_ptr.vmem [resolvable:$false] %s1244_s30 }
 0x3fe   : > { %s1246_s27 = scalar_lea.vmem %s1245_s30, 128  ;;  %p1247_p4 = scmp.lt.s32.totalorder %s1848_s12, %s1245_s30 }
 0x3ff   : > { %p1242_p12 = pnand %p1241_p9, %p2029_p1  ;;  %p1248_p7 = scmp.lt.s32.totalorder %s1246_s27, %s1240_s15 }
 0x401   : > { %p1243_p0 = pneg %p1242_p12  ;;  %p1249_p11 = por %p1248_p7, %p1247_p4 }
 0x403   : > { %p1250_p6 = pnand %p1249_p11, %p1243_p0 }
 0x405   : > { %1253 = shalt.err (!%p1250_p6)
}
 0x406   : > { %s1254_s9 = scalar_lea.hbm %s1846_s25, 64  ;;  %s1258_s10 = scalar_lea.hbm %s2028_s3, 256 }
 0x407   : > { %p1255_p3 = scmp.ne.s32.totalorder %s1846_s25, %s1254_s9  ;;  %p1259_p13 = scmp.lt.u32.totalorder %s1846_s25, %s2028_s3 }
 0x408   : > { %p1260_p8 = scmp.lt.u32.totalorder %s1258_s10, %s1254_s9  ;;  %p1262_p9 = scmp.lt.u32.totalorder %s1254_s9, %s1846_s25 }
 0x409   : > { %p1256_p5 = pnand %p1255_p3, %p2029_p1 }
 0x40a   : > { %p1261_p10 = por %p1260_p8, %p1259_p13 }
 0x40b   : > { %p1257_p2 = pneg %p1256_p5 }
 0x40c   : > { %p1263_p12 = por %p1262_p9, %p1261_p10 }
 0x40e   : > { %p1264_p0 = pnand %p1263_p12, %p1257_p2 }
 0x410   : > { %1267 = shalt.err (!%p1264_p0)
}
 0x411   : > { %939 = dma.vmem_to_hbm [thread:$0]  (%p2029_p1), %s1848_s12, 64, %s1846_s25, %s647_s1  }
 0x412 PF: > { %s2031_s21 = sld [smem:[#allocation22_spill]]  ;;  %s2032_s13 = sld [smem:[#allocation32_spill]] }
 0x413   : > { %p964_p4 = scmp.ge.s32.totalorder %s1402_s6, 2 }
 0x418   : > { %s697_s17 = sand.u32 1, %s2031_s21   ;;  %p2033_p7 = scmp.ne.s32.totalorder %s2032_s13, 0 }
 0x419   : > { %s698_s15 = scalar_lea.sflag [#allocation7], %s697_s17 }
 0x41a   : > { %p957_p11 = pnand %p964_p4, %p2033_p7 }
 0x41c   : > { %1341 = dma.done.wait (!%p957_p11), %s698_s15, 64  }
 0x41d   : > { %1343 = vsyncadd (!%p957_p11), %s698_s15, 4294967232  ;;  %s707_s16 = scalar_lea.sflag [#allocation15], %s697_s17 }
 0x41e   : > { %1345 = dma.done.wait (!%p957_p11), %s707_s16, 128  }
 0x41f   : > { %1347 = vsyncadd (!%p957_p11), %s707_s16, 4294967168  ;;  %s31_s6 = sadd.s32 1, %s1402_s6   ;;  %s2035_s12 = sld [smem:[#allocation23_spill]] }
 0x420   : > { %p1902_p6 = scmp.ge.s32.totalorder %s31_s6, 6   ;;  %s2036_s1 = sld [smem:[#allocation30_spill]] }
 0x421   : > { %s2037_s28 = sld [smem:[#allocation26_spill]]  ;;  %s2038_s30 = sld [smem:[#allocation27_spill]] }
 0x422   : > { %s2039_s9 = sld [smem:[#allocation28_spill]]  ;;  %s2041_s18 = smov %s1354_s19 }
 0x423   : > { %s2042_s19 = smov %s1358_s20  ;;  %s2043_s20 = smov %s1738_s4 }
 0x424   : > { %s2044_s21 = smov %s1366_s22  ;;  %s2045_s22 = smov %s1370_s23 }
 0x425   : > { %s2046_s23 = smov %s1689_s8  ;;  %s2047_s24 = smov %s2035_s12 }
 0x426   : > { %s2048_s25 = smov %s1382_s26  ;;  %s2049_s26 = smov %s2036_s1 }
 0x427   : > { %s2050_s27 = smov %s1394_s29  ;;  %s2051_s29 = smov %s2038_s30 }
 0x428   : > { %s2052_s30 = smov %s2039_s9  ;;  %30 = sbr.rel (!%p1902_p6) target bundleno = 21 (0x15), region = 143 }
 0x42f   :  { %712 = vsyncpa [#allocation6], 1 }
 0x430   :  { %714 = vsyncpa [#allocation6 + $0x1], 1 }
 0x431   :  { %715 = vsyncpa [#allocation9], 1 }
 0x432   :  { %717 = vsyncpa [#allocation9 + $0x1], 1 }
 0x433   :  { %718 = vsyncpa [#allocation12], 1 }
 0x434   :  { %720 = vsyncpa [#allocation12 + $0x1], 1 }
 0x435   :  { %721 = vsyncpa [#allocation7], 1 }
 0x436   :  { %723 = vsyncpa [#allocation7 + $0x1], 1 }
 0x437   :  { %724 = vsyncpa [#allocation15], 1 }
 0x438   :  { %726 = vsyncpa [#allocation15 + $0x1], 1 }

// kernel: seq2seq_forward.57
= control target key start
LH: loop header
LB: loop body
LE: loop exit
PB: predicated region body
PF: predicated region fallthrough
CT: control target
= control target key end

     0   :  { %8 = vsyncpa [#allocation4], 0  ;;  %s645_s0 = inlined_call_operand.hbm [shape: bf16[16,256], index: 0, kind: input, shape index: {}]   ;;  %s646_s1 = inlined_call_operand.hbm [shape: bf16[256,256], index: 1, kind: input, shape index: {}]   ;;  %s647_s2 = inlined_call_operand.hbm [shape: bf16[1,256], index: 2, kind: input, shape index: {}]   ;;  %s648_s3 = inlined_call_operand.hbm [shape: f32[16,256], index: 3, kind: output, shape index: {}]  }
   0x1   :  { %9 = vsyncpa [#allocation7], 0 }
   0x2   :  { %10 = vsyncpa [#allocation5], 0  ;;  %s562_s12 = smov [#allocation6]   ;;  %s563_s14 = smov [#allocation3]  }
   0x3   :  { %s28_s13 = sshll.u32 %s562_s12, 4  ;;  %s16_s15 = sshll.u32 %s563_s14, 4  ;;  %s29_s13 = int_to_ptr.vmem [resolvable:$true] %s28_s13  ;;  %s590_s15 = int_to_ptr.vmem [resolvable:$true] %s16_s15 }
   0x4   :  { %s468_s18 = scalar_lea.hbm %s646_s1, 4096 }
   0x5   :  { %p469_p0 = scmp.ne.s32.totalorder %s646_s1, %s468_s18  ;;  %p472_p1 = scmp.lt.u32.totalorder %s468_s18, %s646_s1 }
   0x7   :  { %p474_p2 = pnand %p472_p1, %p469_p0 }
   0x9   :  { %477 = shalt.err (!%p474_p2)
}
   0xa   :  { %s478_s23 = scalar_lea.vmem %s29_s13, 4096  ;;  %p483_p4 = scmp.lt.s32.totalorder %s29_s13, %s29_s13 }
   0xb   :  { %p479_p3 = scmp.ne.s32.totalorder %s29_s13, %s478_s23  ;;  %p484_p5 = scmp.lt.s32.totalorder %s478_s23, %s478_s23 }
   0xd   :  { %p485_p6 = por %p484_p5, %p483_p4 }
   0xf   :  { %p486_p7 = pnand %p485_p6, %p479_p3 }
  0x11   :  { %489 = shalt.err (!%p486_p7)
}
  0x12   :  { %s564_s24 = smov 128   ;;  %s565_s25 = smov 8  }
  0x13   :  { %34 = dma.hbm_to_vmem [thread:$0]  %s646_s1, 4096, %s29_s13, [#allocation7], %s564_s24, %s564_s24, %s565_s25  }
  0x14   :  { %s490_s30 = scalar_lea.hbm %s645_s0, 256 }
  0x15   :  { %p491_p8 = scmp.ne.s32.totalorder %s645_s0, %s490_s30  ;;  %p494_p9 = scmp.lt.u32.totalorder %s490_s30, %s645_s0 }
  0x17   :  { %p496_p10 = pnand %p494_p9, %p491_p8 }
  0x19   :  { %499 = shalt.err (!%p496_p10)
}
  0x1a   :  { %s500_s8 = scalar_lea.vmem %s590_s15, 256  ;;  %p505_p12 = scmp.lt.s32.totalorder %s590_s15, %s590_s15 }
  0x1b   :  { %p501_p11 = scmp.ne.s32.totalorder %s590_s15, %s500_s8  ;;  %p506_p13 = scmp.lt.s32.totalorder %s500_s8, %s500_s8 }
  0x1d   :  { %p507_p0 = por %p506_p13, %p505_p12 }
  0x1f   :  { %p508_p1 = pnand %p507_p0, %p501_p11 }
  0x21   :  { %511 = shalt.err (!%p508_p1)
}
  0x22   :  { %22 = dma.hbm_to_vmem [thread:$0]  %s645_s0, 256, %s590_s15, [#allocation4], %s564_s24, %s564_s24, %s565_s25  }
  0x23   :  { %s566_s10 = smov [#allocation8]   ;;  %s512_s14 = scalar_lea.hbm %s647_s2, 32 }
  0x24   :  { %s41_s11 = sshll.u32 %s566_s10, 4  ;;  %p513_p2 = scmp.ne.s32.totalorder %s647_s2, %s512_s14  ;;  %s42_s11 = int_to_ptr.vmem [resolvable:$true] %s41_s11 }
  0x25   :  { %p516_p3 = scmp.lt.u32.totalorder %s512_s14, %s647_s2 }
  0x27   :  { %p518_p4 = pnand %p516_p3, %p513_p2 }
  0x29   :  { %521 = shalt.err (!%p518_p4)
}
  0x2a   :  { %s522_s20 = scalar_lea.vmem %s42_s11, 32  ;;  %p527_p6 = scmp.lt.s32.totalorder %s42_s11, %s42_s11 }
  0x2b   :  { %p523_p5 = scmp.ne.s32.totalorder %s42_s11, %s522_s20  ;;  %p528_p7 = scmp.lt.s32.totalorder %s522_s20, %s522_s20 }
  0x2d   :  { %p529_p8 = por %p528_p7, %p527_p6 }
  0x2f   :  { %p530_p9 = pnand %p529_p8, %p523_p5 }
  0x31   :  { %533 = shalt.err (!%p530_p9)
}
  0x32   :  { %44 = dma.hbm_to_vmem [thread:$0]  %s647_s2, 32, %s42_s11, [#allocation7]  }
  0x33   :  { %556 = dma.done.wait [#allocation4], 256  }
  0x34   :  { %557 = vsyncadd [#allocation4], 4294967040 }
  0x35   :  { %558 = dma.done.wait [#allocation7], 4128  }
  0x36   :  { %559 = vsyncadd [#allocation7], 4294963168  ;;  %v417_v0 = vld [vmem:[#allocation6 + $0x4] ss:$8 sps:$4 sm:$0xff]   ;;  %v419_v1 = vld [vmem:[#allocation6] ss:$8 sps:$4 sm:$0xff]   ;;  %v331_v34 = vlaneseq }
  0x37   :  { %270 = vmatprep.subr.bf16.mxu0 %v417_v0  ;;  %v420_v2 = vld [vmem:[#allocation6 + $0x14] ss:$8 sps:$4 sm:$0xff]   ;;  %v422_v3 = vld [vmem:[#allocation6 + $0x10] ss:$8 sps:$4 sm:$0xff]   ;;  %v423_v4 = vld [vmem:[#allocation6 + $0x24] ss:$8 sps:$4 sm:$0xff]  }
  0x38   :  { %271 = vmatpush1.bf16.msra.mxu0 %v419_v1  ;;  %v425_v5 = vld [vmem:[#allocation6 + $0x20] ss:$8 sps:$4 sm:$0xff]   ;;  %v426_v6 = vld [vmem:[#allocation6 + $0x34] ss:$8 sps:$4 sm:$0xff]   ;;  %v428_v7 = vld [vmem:[#allocation6 + $0x30] ss:$8 sps:$4 sm:$0xff]  }
  0x39   :  { %272 = vmatprep.subr.bf16.mxu0 %v420_v2  ;;  %v429_v8 = vld [vmem:[#allocation6 + $0x44] ss:$8 sps:$4 sm:$0xff]   ;;  %v431_v9 = vld [vmem:[#allocation6 + $0x40] ss:$8 sps:$4 sm:$0xff]   ;;  %v432_v10 = vld [vmem:[#allocation6 + $0x54] ss:$8 sps:$4 sm:$0xff]  }
  0x3a   :  { %v434_v11 = vld [vmem:[#allocation6 + $0x50] ss:$8 sps:$4 sm:$0xff]   ;;  %v435_v12 = vld [vmem:[#allocation6 + $0x64] ss:$8 sps:$4 sm:$0xff]   ;;  %v467_v13 = vld [vmem:[#allocation3 + $0x4] ss:$8 sps:$4 sm:$0xff]  }
  0x3b   :  { %v437_v14 = vld [vmem:[#allocation6 + $0x60] ss:$8 sps:$4 sm:$0xff]   ;;  %v438_v15 = vld [vmem:[#allocation6 + $0x74] ss:$8 sps:$4 sm:$0xff]   ;;  %302 = vmatprep.mubr.bf16.mxu0 %v467_v13  ;;  %v440_v16 = vld [vmem:[#allocation6 + $0x70] ss:$8 sps:$4 sm:$0xff]  }
  0x3c   :  { %273 = vmatpush1.bf16.msra.mxu0 %v422_v3  ;;  %v441_v17 = vld [vmem:[#allocation6 + $0x84] ss:$8 sps:$4 sm:$0xff]   ;;  %v443_v18 = vld [vmem:[#allocation6 + $0x80] ss:$8 sps:$4 sm:$0xff]   ;;  %v444_v19 = vld [vmem:[#allocation6 + $0x94] ss:$8 sps:$4 sm:$0xff]  }
  0x3d   :  { %274 = vmatprep.subr.bf16.mxu0 %v423_v4  ;;  %v446_v20 = vld [vmem:[#allocation6 + $0x90] ss:$8 sps:$4 sm:$0xff]   ;;  %v447_v21 = vld [vmem:[#allocation6 + $0xa4] ss:$8 sps:$4 sm:$0xff]   ;;  %v449_v22 = vld [vmem:[#allocation6 + $0xa0] ss:$8 sps:$4 sm:$0xff]  }
  0x3e   :  { %v450_v23 = vld [vmem:[#allocation6 + $0xb4] ss:$8 sps:$4 sm:$0xff]   ;;  %v452_v24 = vld [vmem:[#allocation6 + $0xb0] ss:$8 sps:$4 sm:$0xff]   ;;  %v453_v25 = vld [vmem:[#allocation6 + $0xc4] ss:$8 sps:$4 sm:$0xff]  }
  0x3f   :  { %v455_v26 = vld [vmem:[#allocation6 + $0xc0] ss:$8 sps:$4 sm:$0xff]   ;;  %v456_v27 = vld [vmem:[#allocation6 + $0xd4] ss:$8 sps:$4 sm:$0xff]   ;;  %v458_v28 = vld [vmem:[#allocation6 + $0xd0] ss:$8 sps:$4 sm:$0xff]  }
  0x40   :  { %275 = vmatpush1.bf16.msra.mxu0 %v425_v5  ;;  %v459_v29 = vld [vmem:[#allocation6 + $0xe4] ss:$8 sps:$4 sm:$0xff]   ;;  %v461_v30 = vld [vmem:[#allocation6 + $0xe0] ss:$8 sps:$4 sm:$0xff]   ;;  %v462_v31 = vld [vmem:[#allocation6 + $0xf4] ss:$8 sps:$4 sm:$0xff]  }
  0x41   :  { %276 = vmatprep.subr.bf16.mxu0 %v426_v6  ;;  %v464_v32 = vld [vmem:[#allocation6 + $0xf0] ss:$8 sps:$4 sm:$0xff]   ;;  %v332_v35 = vshrl.u32 %v331_v34, 7  ;;  %v328_v36 = vld [vmem:[#allocation8] sm:$0x3]  ;;  %s567_s2 = smov [#allocation9]  }
  0x42   :  { %v465_v33 = vld [vmem:[#allocation3] ss:$8 sps:$4 sm:$0xff]   ;;  %v329_v37 = vunpack.c.l.bf16 %v328_v36  ;;  %s362_s21 = sshll.u32 %s567_s2, 4  ;;  %s363_s21 = int_to_ptr.vmem [resolvable:$true] %s362_s21 }
  0x43   :  { %v333_v38 = vsub.s32 0, %v332_v35  ;;  %v337_v39 = vsub.s32 2, %v332_v35  ;;  %s534_s22 = scalar_lea.vmem %s363_s21, 512  ;;  %p539_p11 = scmp.lt.s32.totalorder %s363_s21, %s363_s21 }
  0x44   :  { %277 = vmatpush1.bf16.msra.mxu0 %v428_v7  ;;  %p535_p10 = scmp.ne.s32.totalorder %s363_s21, %s534_s22  ;;  %p540_p12 = scmp.lt.s32.totalorder %s534_s22, %s534_s22 }
  0x45   :  { %278 = vmatprep.subr.bf16.mxu0 %v429_v8  ;;  %v334_v40 = vrot.slane %v329_v37, %v333_v38  ;;  %v338_v41 = vrot.slane %v329_v37, %v337_v39 }
  0x46   :  { %p541_p13 = por %p540_p12, %p539_p11 }
  0x47   :  { %v344_v42 = vrot.slane %v334_v40, %v333_v38  ;;  %v348_v43 = vrot.slane %v338_v41, %v333_v38 }
  0x48   :  { %279 = vmatpush1.bf16.msra.mxu0 %v431_v9  ;;  %p542_p0 = pnand %p541_p13, %p535_p10 }
  0x49   :  { %280 = vmatprep.subr.bf16.mxu0 %v432_v10 }
  0x4c   :  { %281 = vmatpush1.bf16.msra.mxu0 %v434_v11 }
  0x4d   :  { %282 = vmatprep.subr.bf16.mxu0 %v435_v12 }
  0x50   :  { %283 = vmatpush1.bf16.msra.mxu0 %v437_v14 }
  0x51   :  { %284 = vmatprep.subr.bf16.mxu0 %v438_v15 }
  0x54   :  { %285 = vmatpush1.bf16.msra.mxu0 %v440_v16 }
  0x55   :  { %286 = vmatprep.subr.bf16.mxu0 %v441_v17 }
  0x58   :  { %287 = vmatpush1.bf16.msra.mxu0 %v443_v18 }
  0x59   :  { %288 = vmatprep.subr.bf16.mxu0 %v444_v19 }
  0x5c   :  { %289 = vmatpush1.bf16.msra.mxu0 %v446_v20 }
  0x5d   :  { %290 = vmatprep.subr.bf16.mxu0 %v447_v21 }
  0x60   :  { %291 = vmatpush1.bf16.msra.mxu0 %v449_v22 }
  0x61   :  { %292 = vmatprep.subr.bf16.mxu0 %v450_v23 }
  0x64   :  { %293 = vmatpush1.bf16.msra.mxu0 %v452_v24 }
  0x65   :  { %294 = vmatprep.subr.bf16.mxu0 %v453_v25 }
  0x68   :  { %295 = vmatpush1.bf16.msra.mxu0 %v455_v26 }
  0x69   :  { %296 = vmatprep.subr.bf16.mxu0 %v456_v27 }
  0x6c   :  { %297 = vmatpush1.bf16.msra.mxu0 %v458_v28 }
  0x6d   :  { %298 = vmatprep.subr.bf16.mxu0 %v459_v29 }
  0x70   :  { %299 = vmatpush1.bf16.msra.mxu0 %v461_v30 }
  0x71   :  { %300 = vmatprep.subr.bf16.mxu0 %v462_v31 }
  0x74   :  { %301 = vmatpush1.bf16.msra.mxu0 %v464_v32 }
  0x77   :  { %303 = vmatmul.mubr.bf16.vlgmr.msra.gmra.mrb[0].mxu0 %v465_v33 }
 0x14a   :  { %v304_v44 = vpop.f32.mrb[0].mxu0 }
 0x14b   :  { %v349_v45 = vadd.f32 %v344_v42, %v304_v44  ;;  %v306_v46 = vpop.f32.mrb[1].mxu0 }
 0x14c   :  { %v350_v47 = vadd.f32 %v348_v43, %v306_v46  ;;  %v308_v48 = vpop.f32.mrb[2].mxu0 }
 0x14d   :  { %353 = vst [vmem:[#allocation9] sm:$0xff] %v349_v45  ;;  %v351_v49 = vadd.f32 %v344_v42, %v308_v48  ;;  %v310_v50 = vpop.f32.mrb[3].mxu0 }
 0x14e   :  { %354 = vst [vmem:[#allocation9 + $0x8] sm:$0xff] %v350_v47  ;;  %v352_v51 = vadd.f32 %v348_v43, %v310_v50 }
 0x14f   :  { %355 = vst [vmem:[#allocation9 + $0x10] sm:$0xff] %v351_v49 }
 0x150   :  { %356 = vst [vmem:[#allocation9 + $0x18] sm:$0xff] %v352_v51 }
 0x151   :  { %545 = shalt.err (!%p542_p0)
}
 0x152   :  { %s546_s25 = scalar_lea.hbm %s648_s3, 512 }
 0x153   :  { %p547_p1 = scmp.ne.s32.totalorder %s648_s3, %s546_s25  ;;  %p550_p2 = scmp.lt.u32.totalorder %s546_s25, %s648_s3 }
 0x155   :  { %p552_p3 = pnand %p550_p2, %p547_p1 }
 0x157   :  { %555 = shalt.err (!%p552_p3)
}
 0x158   :  { %s568_s30 = smov 256   ;;  %s569_s4 = smov 16  }
 0x159   :  { %368 = dma.vmem_to_hbm [thread:$0]  %s363_s21, 512, %s648_s3, [#allocation5], %s568_s30, %s568_s30, %s569_s4  }
 0x15a   :  { %560 = dma.done.wait [#allocation5], 512  }
 0x15b   :  { %561 = vsyncadd [#allocation5], 4294966784 }
 0x15c   :  { %372 = vsyncpa [#allocation4], 1 }
 0x15d   :  { %373 = vsyncpa [#allocation7], 1 }
 0x15e   :  { %374 = vsyncpa [#allocation5], 1 }

</bundles_post_ra>
